<compile_context>
chip_gen: v5e
topology: v5e:2x2
jax: 0.10.0
libtpu: 0.0.40
codegen_flags: <defaults>
</compile_context>

<pallas_src>
import math

import jax
import jax.numpy as jnp
from jax.experimental import pallas as pl
from jax.experimental.pallas import tpu as pltpu

# ----------------------------- model dimensions ------------------------------
EMB = 32             # args.embedding_size
HEADS = 8
HEAD_DIM = EMB // HEADS
SCALE = 1.0 / math.sqrt(HEAD_DIM)
FF_HIDDEN = 4 * EMB  # feed_forward_hidden
NL_LEN = 16          # args.NlLen
WO_LEN = 8           # args.WoLen
CHAR_VOC = 40        # args.Vocsize
NL_VOC = 60          # args.Nl_Vocsize
N_BLOCKS = 5
BATCH = 2

BS = BATCH * NL_LEN              # folded-batch activation rows      (32)
COLS = BATCH * HEADS * NL_LEN    # attention lanes: (batch, head, key) (256)


# --------------------------- in-kernel math helpers ---------------------------
def _layernorm(x, g, b):
    mu = jnp.mean(x, axis=-1, keepdims=True)
    var = jnp.mean((x - mu) ** 2, axis=-1, keepdims=True)
    # TODO(synk): TreeGen's custom LayerNorm eps unknown; BERT-pytorch uses 1e-6.
    return (x - mu) * jax.lax.rsqrt(var + 1e-6) * g + b


def _gelu(x):
    # TODO(synk): tanh-approx GELU (BERT-pytorch style); exact erf differs ~1e-3.
    c = math.sqrt(2.0 / math.pi)
    return 0.5 * x * (1.0 + jnp.tanh(c * (x + 0.044715 * x * x * x)))


# ------------------------------ fused encoder kernel --------------------------
def _encoder_kernel(tok_ref, char_ref,
                    tok_emb_ref, char_comb_ref, conv_b_ref,
                    char_expand_ref, char_iota_ref,
                    p_mat_ref, p_mat_t_ref, kmask_ref, vmask_ref, cross_ref,
                    gsum_ref, gsumt_ref,
                    ln1g_ref, ln1b_ref, wqkv_ref, bqkv_ref, wo_ref, bo_ref,
                    ln2g_ref, ln2b_ref, ffw1_ref, ffb1_ref, ffw2_ref, ffb2_ref,
                    o_ref):
    tok_ids = tok_ref[...]                                        # (BS, 1) int32

    # ---- token-embedding gather fused as one-hot @ table (MXU) -----------------
    tok_iota = jax.lax.broadcasted_iota(jnp.int32, (BS, NL_VOC), 1)
    tok_onehot = (tok_ids == tok_iota).astype(jnp.float32)        # (BS, NL_VOC)
    x = jnp.dot(tok_onehot, tok_emb_ref[...],
                preferred_element_type=jnp.float32)               # (BS, E)

    # ---- char-embedding gather + Conv2d(E,E,(1,W)) fused into ONE matmul --------
    # char_comb already holds char_emb @ conv-weight per kernel position w.
    char_f = char_ref[...].astype(jnp.float32)                    # (BS, W)
    char_cols = jnp.dot(char_f, char_expand_ref[...],
                        preferred_element_type=jnp.float32)       # (BS, W*VOC): id per col
    char_onehot = (char_cols == char_iota_ref[...]).astype(jnp.float32)
    char_em = (jnp.dot(char_onehot, char_comb_ref[...],
                       preferred_element_type=jnp.float32)
               + conv_b_ref[...])                                 # (BS, E)

    # ---- additive attention bias (key padding + cross-batch block mask) --------
    # Hoisted: computed once, reused by all 5 blocks.
    pad_col = (tok_ids <= 0).astype(jnp.float32) * (-1e9)         # (BS, 1)
    keyneg = jnp.dot(jnp.transpose(pad_col), p_mat_ref[...],
                     preferred_element_type=jnp.float32)          # (1, COLS)
    att_bias = cross_ref[...] + keyneg                            # (BS, COLS)

    p_mat = p_mat_ref[...]
    p_mat_t = p_mat_t_ref[...]
    kmask = kmask_ref[...]
    vmask = vmask_ref[...]
    gsum = gsum_ref[...]
    gsumt = gsumt_ref[...]

    for blk in range(N_BLOCKS):
        # --- SublayerConnection 1: x + MHA(LN(x)) --------------------------------
        h = _layernorm(x, ln1g_ref[blk], ln1b_ref[blk])
        qkv = (jnp.dot(h, wqkv_ref[blk], preferred_element_type=jnp.float32)
               + bqkv_ref[blk])                                   # (BS, 3E) fused QKV
        q = qkv[:, :EMB]                  # 1/sqrt(head_dim) pre-folded into Wq/bq
        k = qkv[:, EMB:2 * EMB]
        v = qkv[:, 2 * EMB:]

        # Heads packed along the lane axis (block-diagonal over batch):
        #   K_stack (E, COLS), V_stack (COLS, E); head masks are precomputed 0/1.
        k_stack = jnp.dot(jnp.transpose(k), p_mat,
                          preferred_element_type=jnp.float32) * kmask
        v_stack = jnp.dot(p_mat_t, v,
                          preferred_element_type=jnp.float32) * vmask

        s = jnp.dot(q, k_stack, preferred_element_type=jnp.float32) + att_bias
        s = s - jnp.max(s, axis=-1, keepdims=True)   # shift-invariant stabilization
        e = jnp.exp(s)                                # masked lanes -> exp(-1e9)=0
        denom = jnp.dot(e, gsum, preferred_element_type=jnp.float32)    # (BS, H)
        denom_l = jnp.dot(denom, gsumt, preferred_element_type=jnp.float32)
        p = e * pl.reciprocal(denom_l, approx=True)   # divide on the EUP slot
        ctx = jnp.dot(p, v_stack, preferred_element_type=jnp.float32)   # (BS, E)

        x = x + (jnp.dot(ctx, wo_ref[blk], preferred_element_type=jnp.float32)
                 + bo_ref[blk])
        # TODO(synk): TransformerBlock source not given; char embedding fused additively.
        x = x + char_em

        # --- SublayerConnection 2: x + FFN(LN(x)) --------------------------------
        h = _layernorm(x, ln2g_ref[blk], ln2b_ref[blk])
        ffh = _gelu(jnp.dot(h, ffw1_ref[blk], preferred_element_type=jnp.float32)
                    + ffb1_ref[blk])
        x = x + (jnp.dot(ffh, ffw2_ref[blk], preferred_element_type=jnp.float32)
                 + ffb2_ref[blk])

    # ---- lane-dense output: (B, S*E) slab -> unmasked full-lane stores ----------
    # Built with static row slices + lane concats (layout plumbing only).
    rows = []
    for b in range(BATCH):
        pieces = [x[b * NL_LEN + s: b * NL_LEN + s + 1, :] for s in range(NL_LEN)]
        rows.append(jnp.concatenate(pieces, axis=1))              # (1, S*E)
    o_ref[...] = jnp.concatenate(rows, axis=0)                    # (B, S*E)


_CONST_KEYS = ("tok_emb", "char_comb", "conv_b", "char_expand", "char_iota",
               "p_mat", "p_mat_t", "kmask", "vmask", "cross", "gsum", "gsumt",
               "ln1_g", "ln1_b", "wqkv", "bqkv", "wo", "bo",
               "ln2_g", "ln2_b", "ff_w1", "ff_b1", "ff_w2", "ff_b2")


# ------------------------- kernel-ready constant prep --------------------------
def prepare_consts(params):
    """Precompute weight fusions + static index matrices (done once, outside jit)."""
    f32 = jnp.float32

    # char table pre-multiplied by conv weights per kernel position:
    # char_comb[w*VOC + c, o] = sum_i char_emb[c, i] * conv_w2[w*E + i, o]
    w2 = params["conv_w2"].reshape(WO_LEN, EMB, EMB)
    char_comb = jnp.einsum("ci,wio->wco", params["char_emb"], w2).reshape(
        WO_LEN * CHAR_VOC, EMB).astype(f32)

    # expands (BS, W) char ids to (BS, W*VOC): id replicated over its w-group
    wi = jax.lax.broadcasted_iota(jnp.int32, (WO_LEN, WO_LEN * CHAR_VOC), 0)
    ci = jax.lax.broadcasted_iota(jnp.int32, (WO_LEN, WO_LEN * CHAR_VOC), 1)
    char_expand = (wi == ci // CHAR_VOC).astype(f32)
    char_iota = (jax.lax.broadcasted_iota(
        jnp.int32, (1, WO_LEN * CHAR_VOC), 1) % CHAR_VOC).astype(f32)

    # lane packing: col = b*(H*S) + h*S + j  <->  key row = b*S + j, head h
    r = jax.lax.broadcasted_iota(jnp.int32, (BS, COLS), 0)
    c = jax.lax.broadcasted_iota(jnp.int32, (BS, COLS), 1)
    rb, rj = r // NL_LEN, r % NL_LEN
    cb, cj = c // (HEADS * NL_LEN), c % NL_LEN
    p_mat = ((rb == cb) & (rj == cj)).astype(f32)        # (BS, COLS) scatter/tile
    cross = jnp.where(rb == cb, 0.0, -1e9).astype(f32)   # block-diagonal batch mask

    e_i = jax.lax.broadcasted_iota(jnp.int32, (EMB, COLS), 0)
    c_i = jax.lax.broadcasted_iota(jnp.int32, (EMB, COLS), 1)
    kmask = (e_i // HEAD_DIM == (c_i % (HEADS * NL_LEN)) // NL_LEN).astype(f32)

    g_c = jax.lax.broadcasted_iota(jnp.int32, (COLS, HEADS), 0)
    g_h = jax.lax.broadcasted_iota(jnp.int32, (COLS, HEADS), 1)
    gsum = ((g_c % (HEADS * NL_LEN)) // NL_LEN == g_h).astype(f32)

    # fold 1/sqrt(head_dim) into the Q columns of the fused QKV projection
    q_scale = jnp.concatenate([jnp.full((EMB,), SCALE, f32),
                               jnp.ones((2 * EMB,), f32)])

    return {
        "tok_emb": params["tok_emb"].astype(f32),
        "char_comb": char_comb,
        "conv_b": params["conv_b"].astype(f32),
        "char_expand": char_expand,
        "char_iota": char_iota,
        "p_mat": p_mat,
        "p_mat_t": p_mat.T,
        "kmask": kmask,
        "vmask": kmask.T,
        "cross": cross,
        "gsum": gsum,
        "gsumt": gsum.T,
        "ln1_g": params["ln1_g"], "ln1_b": params["ln1_b"],
        "wqkv": params["wqkv"] * q_scale,
        "bqkv": params["bqkv"] * q_scale,
        "wo": params["wo"], "bo": params["bo"],
        "ln2_g": params["ln2_g"], "ln2_b": params["ln2_b"],
        "ff_w1": params["ff_w1"], "ff_b1": params["ff_b1"],
        "ff_w2": params["ff_w2"], "ff_b2": params["ff_b2"],
    }


# ----------------------------------- forward -----------------------------------
@jax.jit
def nl_encoder_forward(consts, input_nl, input_nlchar):
    B, S = input_nl.shape
    nlmask = input_nl > 0
    # metadata-only reshapes of the raw int ids; all gathers happen inside the kernel
    tok_ids = input_nl.reshape(B * S, 1).astype(jnp.int32)
    char_ids = input_nlchar.reshape(B * S, WO_LEN).astype(jnp.int32)
    weights = [consts[k] for k in _CONST_KEYS]
    n_in = 2 + len(weights)
    out = pl.pallas_call(
        _encoder_kernel,
        out_shape=jax.ShapeDtypeStruct((B, S * EMB), jnp.float32),
        in_specs=[pl.BlockSpec(memory_space=pltpu.MemorySpace.VMEM)
                  for _ in range(n_in)],
        out_specs=pl.BlockSpec(memory_space=pltpu.MemorySpace.VMEM),
    )(tok_ids, char_ids, *weights)
    return out.reshape(B, S, EMB), nlmask


# ------------------------------ param init ------------------------------------
def init_params(key):
    def nrm(k, shape, scale=0.02):
        return scale * jax.random.normal(k, shape, dtype=jnp.float32)

    ks = jax.random.split(key, 8)

    # Conv2d weight (O, I, 1, W) -> (W*E_in, E_out), done once.
    conv_w = nrm(ks[2], (EMB, EMB, 1, WO_LEN))
    conv_w2 = jnp.transpose(conv_w[:, :, 0, :], (2, 1, 0)).reshape(WO_LEN * EMB, EMB)

    zeros = lambda s: jnp.zeros(s, jnp.float32)
    ones = lambda s: jnp.ones(s, jnp.float32)

    return {
        "char_emb": nrm(ks[0], (CHAR_VOC, EMB)),
        "tok_emb": nrm(ks[1], (NL_VOC, EMB)),
        "conv_w2": conv_w2,
        "conv_b": zeros((1, EMB)),
        "ln1_g": ones((N_BLOCKS, 1, EMB)), "ln1_b": zeros((N_BLOCKS, 1, EMB)),
        "wqkv": nrm(ks[3], (N_BLOCKS, EMB, 3 * EMB)),
        "bqkv": zeros((N_BLOCKS, 1, 3 * EMB)),
        "wo": nrm(ks[4], (N_BLOCKS, EMB, EMB)), "bo": zeros((N_BLOCKS, 1, EMB)),
        "ln2_g": ones((N_BLOCKS, 1, EMB)), "ln2_b": zeros((N_BLOCKS, 1, EMB)),
        "ff_w1": nrm(ks[5], (N_BLOCKS, EMB, FF_HIDDEN)),
        "ff_b1": zeros((N_BLOCKS, 1, FF_HIDDEN)),
        "ff_w2": nrm(ks[6], (N_BLOCKS, FF_HIDDEN, EMB)),
        "ff_b2": zeros((N_BLOCKS, 1, EMB)),
    }


# -------------------------- pure-JAX reference (check) -------------------------
def _reference_forward(params, input_nl, input_nlchar):
    B, S = input_nl.shape
    W = input_nlchar.shape[2]
    nlmask = input_nl > 0
    with jax.default_matmul_precision("highest"):
        char = jnp.take(params["char_emb"], input_nlchar, axis=0).reshape(B, S, W * EMB)
        char_em = char @ params["conv_w2"] + params["conv_b"]
        x = jnp.take(params["tok_emb"], input_nl, axis=0)
        neg = (1.0 - nlmask.astype(jnp.float32)) * (-1e9)

        def ln(v, g, b):
            mu = v.mean(-1, keepdims=True)
            var = ((v - mu) ** 2).mean(-1, keepdims=True)
            return (v - mu) * jax.lax.rsqrt(var + 1e-6) * g + b

        for i in range(N_BLOCKS):
            h = ln(x, params["ln1_g"][i], params["ln1_b"][i])
            qkv = h @ params["wqkv"][i] + params["bqkv"][i]
            q, k, v = jnp.split(qkv, 3, axis=-1)
            q = q.reshape(B, S, HEADS, HEAD_DIM)
            k = k.reshape(B, S, HEADS, HEAD_DIM)
            v = v.reshape(B, S, HEADS, HEAD_DIM)
            s = jnp.einsum("bqhd,bkhd->bhqk", q, k) * SCALE + neg[:, None, None, :]
            s = s - s.max(-1, keepdims=True)
            p = jnp.exp(s)
            p = p / p.sum(-1, keepdims=True)
            ctx = jnp.einsum("bhqk,bkhd->bqhd", p, v).reshape(B, S, EMB)
            x = x + ctx @ params["wo"][i] + params["bo"][i]
            x = x + char_em
            h = ln(x, params["ln2_g"][i], params["ln2_b"][i])
            x = x + _gelu(h @ params["ff_w1"][i] + params["ff_b1"][i]) @ params["ff_w2"][i] \
                  + params["ff_b2"][i]
    return x, nlmask


# --------------------------------- main ---------------------------------------
if __name__ == "__main__":
    key = jax.random.PRNGKey(0)
    kp, k1, k2 = jax.random.split(key, 3)

    params = init_params(kp)
    consts = prepare_consts(params)

    input_nl = jax.random.randint(k1, (BATCH, NL_LEN), 0, NL_VOC, dtype=jnp.int32)
    input_nl = input_nl.at[:, 0].set(1)  # guarantee at least one unmasked token
    input_nlchar = jax.random.randint(
        k2, (BATCH, NL_LEN, WO_LEN), 0, CHAR_VOC, dtype=jnp.int32)

    x_out, nlmask = nl_encoder_forward(consts, input_nl, input_nlchar)
    jax.block_until_ready(x_out)
    jax.block_until_ready(nlmask)

    assert x_out.shape == (BATCH, NL_LEN, EMB)
    assert nlmask.shape == (BATCH, NL_LEN) and nlmask.dtype == jnp.bool_
    assert bool(jnp.all(jnp.isfinite(x_out)))

    x_ref, _ = _reference_forward(params, input_nl, input_nlchar)
    # tolerance accounts for the approx-reciprocal softmax denominator (EUP vrcp)
    assert bool(jnp.allclose(x_out, x_ref, rtol=2e-3, atol=2e-3)), \
        float(jnp.max(jnp.abs(x_out - x_ref)))

    print("KERNEL_OK")
</pallas_src>

<mosaic_0001>
module attributes {stable_mosaic.version = 11 : i64} {
  func.func @_encoder_kernel(%arg0: memref<32x1xi32, #tpu.memory_space<vmem>>, %arg1: memref<32x8xi32, #tpu.memory_space<vmem>>, %arg2: memref<60x32xf32, #tpu.memory_space<vmem>>, %arg3: memref<320x32xf32, #tpu.memory_space<vmem>>, %arg4: memref<1x32xf32, #tpu.memory_space<vmem>>, %arg5: memref<8x320xf32, #tpu.memory_space<vmem>>, %arg6: memref<1x320xf32, #tpu.memory_space<vmem>>, %arg7: memref<32x256xf32, #tpu.memory_space<vmem>>, %arg8: memref<256x32xf32, #tpu.memory_space<vmem>>, %arg9: memref<32x256xf32, #tpu.memory_space<vmem>>, %arg10: memref<256x32xf32, #tpu.memory_space<vmem>>, %arg11: memref<32x256xf32, #tpu.memory_space<vmem>>, %arg12: memref<256x8xf32, #tpu.memory_space<vmem>>, %arg13: memref<8x256xf32, #tpu.memory_space<vmem>>, %arg14: memref<5x1x32xf32, #tpu.memory_space<vmem>>, %arg15: memref<5x1x32xf32, #tpu.memory_space<vmem>>, %arg16: memref<5x32x96xf32, #tpu.memory_space<vmem>>, %arg17: memref<5x1x96xf32, #tpu.memory_space<vmem>>, %arg18: memref<5x32x32xf32, #tpu.memory_space<vmem>>, %arg19: memref<5x1x32xf32, #tpu.memory_space<vmem>>, %arg20: memref<5x1x32xf32, #tpu.memory_space<vmem>>, %arg21: memref<5x1x32xf32, #tpu.memory_space<vmem>>, %arg22: memref<5x32x128xf32, #tpu.memory_space<vmem>>, %arg23: memref<5x1x128xf32, #tpu.memory_space<vmem>>, %arg24: memref<5x128x32xf32, #tpu.memory_space<vmem>>, %arg25: memref<5x1x32xf32, #tpu.memory_space<vmem>>, %arg26: memref<2x512xf32, #tpu.memory_space<vmem>>) attributes {dimension_semantics = [], scalar_prefetch = 0 : i64, scratch_operands = 0 : i64, tpu.core_type = #tpu.core_type<tc>} {
    %c0 = arith.constant 0 : index
    %c0_0 = arith.constant 0 : index
    %0 = vector.load %arg0[%c0, %c0_0] : memref<32x1xi32, #tpu.memory_space<vmem>>, vector<32x1xi32>
    %1 = tpu.iota {dimensions = array<i32: 1>} : vector<32x60xi32>
    %2 = vector.broadcast %0 : vector<32x1xi32> to vector<32x60xi32>
    %3 = arith.cmpi eq, %2, %1 : vector<32x60xi32>
    %4 = arith.extui %3 : vector<32x60xi1> to vector<32x60xi32>
    %5 = arith.sitofp %4 : vector<32x60xi32> to vector<32x60xf32>
    %c0_1 = arith.constant 0 : index
    %c0_2 = arith.constant 0 : index
    %6 = vector.load %arg2[%c0_1, %c0_2] : memref<60x32xf32, #tpu.memory_space<vmem>>, vector<60x32xf32>
    %cst = arith.constant dense<0.000000e+00> : vector<32x32xf32>
    %7 = tpu.matmul %5, %6, %cst {dimension_numbers = #tpu.dot_dimension_numbers<[1], [0], [0], [1], [0, 0, 1, 1], [], []>} : vector<32x60xf32>, vector<60x32xf32>, vector<32x32xf32> -> vector<32x32xf32>
    %c0_3 = arith.constant 0 : index
    %c0_4 = arith.constant 0 : index
    %8 = vector.load %arg1[%c0_3, %c0_4] : memref<32x8xi32, #tpu.memory_space<vmem>>, vector<32x8xi32>
    %9 = arith.sitofp %8 : vector<32x8xi32> to vector<32x8xf32>
    %c0_5 = arith.constant 0 : index
    %c0_6 = arith.constant 0 : index
    %10 = vector.load %arg5[%c0_5, %c0_6] : memref<8x320xf32, #tpu.memory_space<vmem>>, vector<8x320xf32>
    %cst_7 = arith.constant dense<0.000000e+00> : vector<32x320xf32>
    %11 = tpu.matmul %9, %10, %cst_7 {dimension_numbers = #tpu.dot_dimension_numbers<[1], [0], [0], [1], [0, 0, 1, 1], [], []>} : vector<32x8xf32>, vector<8x320xf32>, vector<32x320xf32> -> vector<32x320xf32>
    %c0_8 = arith.constant 0 : index
    %c0_9 = arith.constant 0 : index
    %12 = vector.load %arg6[%c0_8, %c0_9] : memref<1x320xf32, #tpu.memory_space<vmem>>, vector<1x320xf32>
    %13 = vector.broadcast %12 : vector<1x320xf32> to vector<32x320xf32>
    %14 = arith.cmpf oeq, %11, %13 : vector<32x320xf32>
    %15 = arith.extui %14 : vector<32x320xi1> to vector<32x320xi32>
    %16 = arith.sitofp %15 : vector<32x320xi32> to vector<32x320xf32>
    %c0_10 = arith.constant 0 : index
    %c0_11 = arith.constant 0 : index
    %17 = vector.load %arg3[%c0_10, %c0_11] : memref<320x32xf32, #tpu.memory_space<vmem>>, vector<320x32xf32>
    %cst_12 = arith.constant dense<0.000000e+00> : vector<32x32xf32>
    %18 = tpu.matmul %16, %17, %cst_12 {dimension_numbers = #tpu.dot_dimension_numbers<[1], [0], [0], [1], [0, 0, 1, 1], [], []>} : vector<32x320xf32>, vector<320x32xf32>, vector<32x32xf32> -> vector<32x32xf32>
    %c0_13 = arith.constant 0 : index
    %c0_14 = arith.constant 0 : index
    %19 = vector.load %arg4[%c0_13, %c0_14] : memref<1x32xf32, #tpu.memory_space<vmem>>, vector<1x32xf32>
    %20 = vector.broadcast %19 : vector<1x32xf32> to vector<32x32xf32>
    %21 = arith.addf %18, %20 : vector<32x32xf32>
    %c0_i32 = arith.constant 0 : i32
    %22 = vector.broadcast %c0_i32 : i32 to vector<32x1xi32>
    %23 = arith.cmpi sle, %0, %22 : vector<32x1xi32>
    %24 = arith.extui %23 : vector<32x1xi1> to vector<32x1xi32>
    %25 = arith.sitofp %24 : vector<32x1xi32> to vector<32x1xf32>
    %cst_15 = arith.constant -1.000000e+09 : f32
    %26 = vector.broadcast %cst_15 : f32 to vector<32x1xf32>
    %27 = arith.mulf %25, %26 : vector<32x1xf32>
    %28 = tpu.transpose %27, [1, 0] : vector<32x1xf32> -> vector<1x32xf32>
    %c0_16 = arith.constant 0 : index
    %c0_17 = arith.constant 0 : index
    %29 = vector.load %arg7[%c0_16, %c0_17] : memref<32x256xf32, #tpu.memory_space<vmem>>, vector<32x256xf32>
    %cst_18 = arith.constant dense<0.000000e+00> : vector<1x256xf32>
    %30 = tpu.matmul %28, %29, %cst_18 {dimension_numbers = #tpu.dot_dimension_numbers<[1], [0], [0], [1], [0, 0, 1, 1], [], []>} : vector<1x32xf32>, vector<32x256xf32>, vector<1x256xf32> -> vector<1x256xf32>
    %c0_19 = arith.constant 0 : index
    %c0_20 = arith.constant 0 : index
    %31 = vector.load %arg11[%c0_19, %c0_20] : memref<32x256xf32, #tpu.memory_space<vmem>>, vector<32x256xf32>
    %32 = vector.broadcast %30 : vector<1x256xf32> to vector<32x256xf32>
    %33 = arith.addf %31, %32 : vector<32x256xf32>
    %c0_21 = arith.constant 0 : index
    %c0_22 = arith.constant 0 : index
    %34 = vector.load %arg7[%c0_21, %c0_22] : memref<32x256xf32, #tpu.memory_space<vmem>>, vector<32x256xf32>
    %c0_23 = arith.constant 0 : index
    %c0_24 = arith.constant 0 : index
    %35 = vector.load %arg8[%c0_23, %c0_24] : memref<256x32xf32, #tpu.memory_space<vmem>>, vector<256x32xf32>
    %c0_25 = arith.constant 0 : index
    %c0_26 = arith.constant 0 : index
    %36 = vector.load %arg9[%c0_25, %c0_26] : memref<32x256xf32, #tpu.memory_space<vmem>>, vector<32x256xf32>
    %c0_27 = arith.constant 0 : index
    %c0_28 = arith.constant 0 : index
    %37 = vector.load %arg10[%c0_27, %c0_28] : memref<256x32xf32, #tpu.memory_space<vmem>>, vector<256x32xf32>
    %c0_29 = arith.constant 0 : index
    %c0_30 = arith.constant 0 : index
    %38 = vector.load %arg12[%c0_29, %c0_30] : memref<256x8xf32, #tpu.memory_space<vmem>>, vector<256x8xf32>
    %c0_31 = arith.constant 0 : index
    %c0_32 = arith.constant 0 : index
    %39 = vector.load %arg13[%c0_31, %c0_32] : memref<8x256xf32, #tpu.memory_space<vmem>>, vector<8x256xf32>
    %c0_33 = arith.constant 0 : index
    %c0_34 = arith.constant 0 : index
    %c0_35 = arith.constant 0 : index
    %40 = vector.load %arg14[%c0_33, %c0_34, %c0_35] : memref<5x1x32xf32, #tpu.memory_space<vmem>>, vector<1x1x32xf32>
    %41 = vector.shape_cast %40 : vector<1x1x32xf32> to vector<1x32xf32>
    %c0_36 = arith.constant 0 : index
    %c0_37 = arith.constant 0 : index
    %c0_38 = arith.constant 0 : index
    %42 = vector.load %arg15[%c0_36, %c0_37, %c0_38] : memref<5x1x32xf32, #tpu.memory_space<vmem>>, vector<1x1x32xf32>
    %43 = vector.shape_cast %42 : vector<1x1x32xf32> to vector<1x32xf32>
    %cst_39 = arith.constant dense<0.000000e+00> : vector<32xf32>
    %44 = vector.multi_reduction <add>, %7, %cst_39 [1] : vector<32x32xf32> to vector<32xf32>
    %45 = vector.shape_cast %44 : vector<32xf32> to vector<32x1xf32>
    %cst_40 = arith.constant 3.200000e+01 : f32
    %46 = vector.broadcast %cst_40 : f32 to vector<32x1xf32>
    %47 = arith.divf %45, %46 : vector<32x1xf32>
    %48 = vector.broadcast %47 : vector<32x1xf32> to vector<32x32xf32>
    %49 = arith.subf %7, %48 : vector<32x32xf32>
    %50 = arith.mulf %49, %49 : vector<32x32xf32>
    %cst_41 = arith.constant dense<0.000000e+00> : vector<32xf32>
    %51 = vector.multi_reduction <add>, %50, %cst_41 [1] : vector<32x32xf32> to vector<32xf32>
    %52 = vector.shape_cast %51 : vector<32xf32> to vector<32x1xf32>
    %cst_42 = arith.constant 3.200000e+01 : f32
    %53 = vector.broadcast %cst_42 : f32 to vector<32x1xf32>
    %54 = arith.divf %52, %53 : vector<32x1xf32>
    %55 = vector.broadcast %47 : vector<32x1xf32> to vector<32x32xf32>
    %56 = arith.subf %7, %55 : vector<32x32xf32>
    %cst_43 = arith.constant 9.99999997E-7 : f32
    %57 = vector.broadcast %cst_43 : f32 to vector<32x1xf32>
    %58 = arith.addf %54, %57 : vector<32x1xf32>
    %59 = math.rsqrt %58 : vector<32x1xf32>
    %60 = vector.broadcast %59 : vector<32x1xf32> to vector<32x32xf32>
    %61 = arith.mulf %56, %60 : vector<32x32xf32>
    %62 = vector.broadcast %41 : vector<1x32xf32> to vector<32x32xf32>
    %63 = arith.mulf %61, %62 : vector<32x32xf32>
    %64 = vector.broadcast %43 : vector<1x32xf32> to vector<32x32xf32>
    %65 = arith.addf %63, %64 : vector<32x32xf32>
    %c0_44 = arith.constant 0 : index
    %c0_45 = arith.constant 0 : index
    %c0_46 = arith.constant 0 : index
    %66 = vector.load %arg16[%c0_44, %c0_45, %c0_46] : memref<5x32x96xf32, #tpu.memory_space<vmem>>, vector<1x32x96xf32>
    %67 = vector.shape_cast %66 : vector<1x32x96xf32> to vector<32x96xf32>
    %cst_47 = arith.constant dense<0.000000e+00> : vector<32x96xf32>
    %68 = tpu.matmul %65, %67, %cst_47 {dimension_numbers = #tpu.dot_dimension_numbers<[1], [0], [0], [1], [0, 0, 1, 1], [], []>} : vector<32x32xf32>, vector<32x96xf32>, vector<32x96xf32> -> vector<32x96xf32>
    %c0_48 = arith.constant 0 : index
    %c0_49 = arith.constant 0 : index
    %c0_50 = arith.constant 0 : index
    %69 = vector.load %arg17[%c0_48, %c0_49, %c0_50] : memref<5x1x96xf32, #tpu.memory_space<vmem>>, vector<1x1x96xf32>
    %70 = vector.shape_cast %69 : vector<1x1x96xf32> to vector<1x96xf32>
    %71 = vector.broadcast %70 : vector<1x96xf32> to vector<32x96xf32>
    %72 = arith.addf %68, %71 : vector<32x96xf32>
    %73 = vector.extract_strided_slice %72 {offsets = [0, 0], sizes = [32, 32], strides = [1, 1]} : vector<32x96xf32> to vector<32x32xf32>
    %74 = vector.extract_strided_slice %72 {offsets = [0, 32], sizes = [32, 32], strides = [1, 1]} : vector<32x96xf32> to vector<32x32xf32>
    %75 = vector.extract_strided_slice %72 {offsets = [0, 64], sizes = [32, 32], strides = [1, 1]} : vector<32x96xf32> to vector<32x32xf32>
    %76 = tpu.transpose %74, [1, 0] : vector<32x32xf32> -> vector<32x32xf32>
    %cst_51 = arith.constant dense<0.000000e+00> : vector<32x256xf32>
    %77 = tpu.matmul %76, %34, %cst_51 {dimension_numbers = #tpu.dot_dimension_numbers<[1], [0], [0], [1], [0, 0, 1, 1], [], []>} : vector<32x32xf32>, vector<32x256xf32>, vector<32x256xf32> -> vector<32x256xf32>
    %78 = arith.mulf %77, %36 : vector<32x256xf32>
    %cst_52 = arith.constant dense<0.000000e+00> : vector<256x32xf32>
    %79 = tpu.matmul %35, %75, %cst_52 {dimension_numbers = #tpu.dot_dimension_numbers<[1], [0], [0], [1], [0, 0, 1, 1], [], []>} : vector<256x32xf32>, vector<32x32xf32>, vector<256x32xf32> -> vector<256x32xf32>
    %80 = arith.mulf %79, %37 : vector<256x32xf32>
    %cst_53 = arith.constant dense<0.000000e+00> : vector<32x256xf32>
    %81 = tpu.matmul %73, %78, %cst_53 {dimension_numbers = #tpu.dot_dimension_numbers<[1], [0], [0], [1], [0, 0, 1, 1], [], []>} : vector<32x32xf32>, vector<32x256xf32>, vector<32x256xf32> -> vector<32x256xf32>
    %82 = arith.addf %81, %33 : vector<32x256xf32>
    %cst_54 = arith.constant dense<0xFF800000> : vector<32xf32>
    %83 = vector.multi_reduction <maximumf>, %82, %cst_54 [1] : vector<32x256xf32> to vector<32xf32>
    %84 = vector.shape_cast %83 : vector<32xf32> to vector<32x1xf32>
    %85 = vector.broadcast %84 : vector<32x1xf32> to vector<32x256xf32>
    %86 = arith.subf %82, %85 : vector<32x256xf32>
    %87 = math.exp %86 : vector<32x256xf32>
    %cst_55 = arith.constant dense<0.000000e+00> : vector<32x8xf32>
    %88 = tpu.matmul %87, %38, %cst_55 {dimension_numbers = #tpu.dot_dimension_numbers<[1], [0], [0], [1], [0, 0, 1, 1], [], []>} : vector<32x256xf32>, vector<256x8xf32>, vector<32x8xf32> -> vector<32x8xf32>
    %cst_56 = arith.constant dense<0.000000e+00> : vector<32x256xf32>
    %89 = tpu.matmul %88, %39, %cst_56 {dimension_numbers = #tpu.dot_dimension_numbers<[1], [0], [0], [1], [0, 0, 1, 1], [], []>} : vector<32x8xf32>, vector<8x256xf32>, vector<32x256xf32> -> vector<32x256xf32>
    %90 = tpu.reciprocal %89 {approx = true} : vector<32x256xf32> -> vector<32x256xf32>
    %91 = arith.mulf %87, %90 : vector<32x256xf32>
    %cst_57 = arith.constant dense<0.000000e+00> : vector<32x32xf32>
    %92 = tpu.matmul %91, %80, %cst_57 {dimension_numbers = #tpu.dot_dimension_numbers<[1], [0], [0], [1], [0, 0, 1, 1], [], []>} : vector<32x256xf32>, vector<256x32xf32>, vector<32x32xf32> -> vector<32x32xf32>
    %c0_58 = arith.constant 0 : index
    %c0_59 = arith.constant 0 : index
    %c0_60 = arith.constant 0 : index
    %93 = vector.load %arg18[%c0_58, %c0_59, %c0_60] : memref<5x32x32xf32, #tpu.memory_space<vmem>>, vector<1x32x32xf32>
    %94 = vector.shape_cast %93 : vector<1x32x32xf32> to vector<32x32xf32>
    %cst_61 = arith.constant dense<0.000000e+00> : vector<32x32xf32>
    %95 = tpu.matmul %92, %94, %cst_61 {dimension_numbers = #tpu.dot_dimension_numbers<[1], [0], [0], [1], [0, 0, 1, 1], [], []>} : vector<32x32xf32>, vector<32x32xf32>, vector<32x32xf32> -> vector<32x32xf32>
    %c0_62 = arith.constant 0 : index
    %c0_63 = arith.constant 0 : index
    %c0_64 = arith.constant 0 : index
    %96 = vector.load %arg19[%c0_62, %c0_63, %c0_64] : memref<5x1x32xf32, #tpu.memory_space<vmem>>, vector<1x1x32xf32>
    %97 = vector.shape_cast %96 : vector<1x1x32xf32> to vector<1x32xf32>
    %98 = vector.broadcast %97 : vector<1x32xf32> to vector<32x32xf32>
    %99 = arith.addf %95, %98 : vector<32x32xf32>
    %100 = arith.addf %7, %99 : vector<32x32xf32>
    %101 = arith.addf %100, %21 : vector<32x32xf32>
    %c0_65 = arith.constant 0 : index
    %c0_66 = arith.constant 0 : index
    %c0_67 = arith.constant 0 : index
    %102 = vector.load %arg20[%c0_65, %c0_66, %c0_67] : memref<5x1x32xf32, #tpu.memory_space<vmem>>, vector<1x1x32xf32>
    %103 = vector.shape_cast %102 : vector<1x1x32xf32> to vector<1x32xf32>
    %c0_68 = arith.constant 0 : index
    %c0_69 = arith.constant 0 : index
    %c0_70 = arith.constant 0 : index
    %104 = vector.load %arg21[%c0_68, %c0_69, %c0_70] : memref<5x1x32xf32, #tpu.memory_space<vmem>>, vector<1x1x32xf32>
    %105 = vector.shape_cast %104 : vector<1x1x32xf32> to vector<1x32xf32>
    %cst_71 = arith.constant dense<0.000000e+00> : vector<32xf32>
    %106 = vector.multi_reduction <add>, %101, %cst_71 [1] : vector<32x32xf32> to vector<32xf32>
    %107 = vector.shape_cast %106 : vector<32xf32> to vector<32x1xf32>
    %cst_72 = arith.constant 3.200000e+01 : f32
    %108 = vector.broadcast %cst_72 : f32 to vector<32x1xf32>
    %109 = arith.divf %107, %108 : vector<32x1xf32>
    %110 = vector.broadcast %109 : vector<32x1xf32> to vector<32x32xf32>
    %111 = arith.subf %101, %110 : vector<32x32xf32>
    %112 = arith.mulf %111, %111 : vector<32x32xf32>
    %cst_73 = arith.constant dense<0.000000e+00> : vector<32xf32>
    %113 = vector.multi_reduction <add>, %112, %cst_73 [1] : vector<32x32xf32> to vector<32xf32>
    %114 = vector.shape_cast %113 : vector<32xf32> to vector<32x1xf32>
    %cst_74 = arith.constant 3.200000e+01 : f32
    %115 = vector.broadcast %cst_74 : f32 to vector<32x1xf32>
    %116 = arith.divf %114, %115 : vector<32x1xf32>
    %117 = vector.broadcast %109 : vector<32x1xf32> to vector<32x32xf32>
    %118 = arith.subf %101, %117 : vector<32x32xf32>
    %cst_75 = arith.constant 9.99999997E-7 : f32
    %119 = vector.broadcast %cst_75 : f32 to vector<32x1xf32>
    %120 = arith.addf %116, %119 : vector<32x1xf32>
    %121 = math.rsqrt %120 : vector<32x1xf32>
    %122 = vector.broadcast %121 : vector<32x1xf32> to vector<32x32xf32>
    %123 = arith.mulf %118, %122 : vector<32x32xf32>
    %124 = vector.broadcast %103 : vector<1x32xf32> to vector<32x32xf32>
    %125 = arith.mulf %123, %124 : vector<32x32xf32>
    %126 = vector.broadcast %105 : vector<1x32xf32> to vector<32x32xf32>
    %127 = arith.addf %125, %126 : vector<32x32xf32>
    %c0_76 = arith.constant 0 : index
    %c0_77 = arith.constant 0 : index
    %c0_78 = arith.constant 0 : index
    %128 = vector.load %arg22[%c0_76, %c0_77, %c0_78] : memref<5x32x128xf32, #tpu.memory_space<vmem>>, vector<1x32x128xf32>
    %129 = vector.shape_cast %128 : vector<1x32x128xf32> to vector<32x128xf32>
    %cst_79 = arith.constant dense<0.000000e+00> : vector<32x128xf32>
    %130 = tpu.matmul %127, %129, %cst_79 {dimension_numbers = #tpu.dot_dimension_numbers<[1], [0], [0], [1], [0, 0, 1, 1], [], []>} : vector<32x32xf32>, vector<32x128xf32>, vector<32x128xf32> -> vector<32x128xf32>
    %c0_80 = arith.constant 0 : index
    %c0_81 = arith.constant 0 : index
    %c0_82 = arith.constant 0 : index
    %131 = vector.load %arg23[%c0_80, %c0_81, %c0_82] : memref<5x1x128xf32, #tpu.memory_space<vmem>>, vector<1x1x128xf32>
    %132 = vector.shape_cast %131 : vector<1x1x128xf32> to vector<1x128xf32>
    %133 = vector.broadcast %132 : vector<1x128xf32> to vector<32x128xf32>
    %134 = arith.addf %130, %133 : vector<32x128xf32>
    %cst_83 = arith.constant 5.000000e-01 : f32
    %135 = vector.broadcast %cst_83 : f32 to vector<32x128xf32>
    %136 = arith.mulf %135, %134 : vector<32x128xf32>
    %cst_84 = arith.constant 4.471500e-02 : f32
    %137 = vector.broadcast %cst_84 : f32 to vector<32x128xf32>
    %138 = arith.mulf %137, %134 : vector<32x128xf32>
    %139 = arith.mulf %138, %134 : vector<32x128xf32>
    %140 = arith.mulf %139, %134 : vector<32x128xf32>
    %141 = arith.addf %134, %140 : vector<32x128xf32>
    %cst_85 = arith.constant 0.797884583 : f32
    %142 = vector.broadcast %cst_85 : f32 to vector<32x128xf32>
    %143 = arith.mulf %142, %141 : vector<32x128xf32>
    %144 = math.tanh %143 : vector<32x128xf32>
    %cst_86 = arith.constant 1.000000e+00 : f32
    %145 = vector.broadcast %cst_86 : f32 to vector<32x128xf32>
    %146 = arith.addf %145, %144 : vector<32x128xf32>
    %147 = arith.mulf %136, %146 : vector<32x128xf32>
    %c0_87 = arith.constant 0 : index
    %c0_88 = arith.constant 0 : index
    %c0_89 = arith.constant 0 : index
    %148 = vector.load %arg24[%c0_87, %c0_88, %c0_89] : memref<5x128x32xf32, #tpu.memory_space<vmem>>, vector<1x128x32xf32>
    %149 = vector.shape_cast %148 : vector<1x128x32xf32> to vector<128x32xf32>
    %cst_90 = arith.constant dense<0.000000e+00> : vector<32x32xf32>
    %150 = tpu.matmul %147, %149, %cst_90 {dimension_numbers = #tpu.dot_dimension_numbers<[1], [0], [0], [1], [0, 0, 1, 1], [], []>} : vector<32x128xf32>, vector<128x32xf32>, vector<32x32xf32> -> vector<32x32xf32>
    %c0_91 = arith.constant 0 : index
    %c0_92 = arith.constant 0 : index
    %c0_93 = arith.constant 0 : index
    %151 = vector.load %arg25[%c0_91, %c0_92, %c0_93] : memref<5x1x32xf32, #tpu.memory_space<vmem>>, vector<1x1x32xf32>
    %152 = vector.shape_cast %151 : vector<1x1x32xf32> to vector<1x32xf32>
    %153 = vector.broadcast %152 : vector<1x32xf32> to vector<32x32xf32>
    %154 = arith.addf %150, %153 : vector<32x32xf32>
    %155 = arith.addf %101, %154 : vector<32x32xf32>
    %c1 = arith.constant 1 : index
    %c0_94 = arith.constant 0 : index
    %c0_95 = arith.constant 0 : index
    %156 = vector.load %arg14[%c1, %c0_94, %c0_95] : memref<5x1x32xf32, #tpu.memory_space<vmem>>, vector<1x1x32xf32>
    %157 = vector.shape_cast %156 : vector<1x1x32xf32> to vector<1x32xf32>
    %c1_96 = arith.constant 1 : index
    %c0_97 = arith.constant 0 : index
    %c0_98 = arith.constant 0 : index
    %158 = vector.load %arg15[%c1_96, %c0_97, %c0_98] : memref<5x1x32xf32, #tpu.memory_space<vmem>>, vector<1x1x32xf32>
    %159 = vector.shape_cast %158 : vector<1x1x32xf32> to vector<1x32xf32>
    %cst_99 = arith.constant dense<0.000000e+00> : vector<32xf32>
    %160 = vector.multi_reduction <add>, %155, %cst_99 [1] : vector<32x32xf32> to vector<32xf32>
    %161 = vector.shape_cast %160 : vector<32xf32> to vector<32x1xf32>
    %cst_100 = arith.constant 3.200000e+01 : f32
    %162 = vector.broadcast %cst_100 : f32 to vector<32x1xf32>
    %163 = arith.divf %161, %162 : vector<32x1xf32>
    %164 = vector.broadcast %163 : vector<32x1xf32> to vector<32x32xf32>
    %165 = arith.subf %155, %164 : vector<32x32xf32>
    %166 = arith.mulf %165, %165 : vector<32x32xf32>
    %cst_101 = arith.constant dense<0.000000e+00> : vector<32xf32>
    %167 = vector.multi_reduction <add>, %166, %cst_101 [1] : vector<32x32xf32> to vector<32xf32>
    %168 = vector.shape_cast %167 : vector<32xf32> to vector<32x1xf32>
    %cst_102 = arith.constant 3.200000e+01 : f32
    %169 = vector.broadcast %cst_102 : f32 to vector<32x1xf32>
    %170 = arith.divf %168, %169 : vector<32x1xf32>
    %171 = vector.broadcast %163 : vector<32x1xf32> to vector<32x32xf32>
    %172 = arith.subf %155, %171 : vector<32x32xf32>
    %cst_103 = arith.constant 9.99999997E-7 : f32
    %173 = vector.broadcast %cst_103 : f32 to vector<32x1xf32>
    %174 = arith.addf %170, %173 : vector<32x1xf32>
    %175 = math.rsqrt %174 : vector<32x1xf32>
    %176 = vector.broadcast %175 : vector<32x1xf32> to vector<32x32xf32>
    %177 = arith.mulf %172, %176 : vector<32x32xf32>
    %178 = vector.broadcast %157 : vector<1x32xf32> to vector<32x32xf32>
    %179 = arith.mulf %177, %178 : vector<32x32xf32>
    %180 = vector.broadcast %159 : vector<1x32xf32> to vector<32x32xf32>
    %181 = arith.addf %179, %180 : vector<32x32xf32>
    %c1_104 = arith.constant 1 : index
    %c0_105 = arith.constant 0 : index
    %c0_106 = arith.constant 0 : index
    %182 = vector.load %arg16[%c1_104, %c0_105, %c0_106] : memref<5x32x96xf32, #tpu.memory_space<vmem>>, vector<1x32x96xf32>
    %183 = vector.shape_cast %182 : vector<1x32x96xf32> to vector<32x96xf32>
    %cst_107 = arith.constant dense<0.000000e+00> : vector<32x96xf32>
    %184 = tpu.matmul %181, %183, %cst_107 {dimension_numbers = #tpu.dot_dimension_numbers<[1], [0], [0], [1], [0, 0, 1, 1], [], []>} : vector<32x32xf32>, vector<32x96xf32>, vector<32x96xf32> -> vector<32x96xf32>
    %c1_108 = arith.constant 1 : index
    %c0_109 = arith.constant 0 : index
    %c0_110 = arith.constant 0 : index
    %185 = vector.load %arg17[%c1_108, %c0_109, %c0_110] : memref<5x1x96xf32, #tpu.memory_space<vmem>>, vector<1x1x96xf32>
    %186 = vector.shape_cast %185 : vector<1x1x96xf32> to vector<1x96xf32>
    %187 = vector.broadcast %186 : vector<1x96xf32> to vector<32x96xf32>
    %188 = arith.addf %184, %187 : vector<32x96xf32>
    %189 = vector.extract_strided_slice %188 {offsets = [0, 0], sizes = [32, 32], strides = [1, 1]} : vector<32x96xf32> to vector<32x32xf32>
    %190 = vector.extract_strided_slice %188 {offsets = [0, 32], sizes = [32, 32], strides = [1, 1]} : vector<32x96xf32> to vector<32x32xf32>
    %191 = vector.extract_strided_slice %188 {offsets = [0, 64], sizes = [32, 32], strides = [1, 1]} : vector<32x96xf32> to vector<32x32xf32>
    %192 = tpu.transpose %190, [1, 0] : vector<32x32xf32> -> vector<32x32xf32>
    %cst_111 = arith.constant dense<0.000000e+00> : vector<32x256xf32>
    %193 = tpu.matmul %192, %34, %cst_111 {dimension_numbers = #tpu.dot_dimension_numbers<[1], [0], [0], [1], [0, 0, 1, 1], [], []>} : vector<32x32xf32>, vector<32x256xf32>, vector<32x256xf32> -> vector<32x256xf32>
    %194 = arith.mulf %193, %36 : vector<32x256xf32>
    %cst_112 = arith.constant dense<0.000000e+00> : vector<256x32xf32>
    %195 = tpu.matmul %35, %191, %cst_112 {dimension_numbers = #tpu.dot_dimension_numbers<[1], [0], [0], [1], [0, 0, 1, 1], [], []>} : vector<256x32xf32>, vector<32x32xf32>, vector<256x32xf32> -> vector<256x32xf32>
    %196 = arith.mulf %195, %37 : vector<256x32xf32>
    %cst_113 = arith.constant dense<0.000000e+00> : vector<32x256xf32>
    %197 = tpu.matmul %189, %194, %cst_113 {dimension_numbers = #tpu.dot_dimension_numbers<[1], [0], [0], [1], [0, 0, 1, 1], [], []>} : vector<32x32xf32>, vector<32x256xf32>, vector<32x256xf32> -> vector<32x256xf32>
    %198 = arith.addf %197, %33 : vector<32x256xf32>
    %cst_114 = arith.constant dense<0xFF800000> : vector<32xf32>
    %199 = vector.multi_reduction <maximumf>, %198, %cst_114 [1] : vector<32x256xf32> to vector<32xf32>
    %200 = vector.shape_cast %199 : vector<32xf32> to vector<32x1xf32>
    %201 = vector.broadcast %200 : vector<32x1xf32> to vector<32x256xf32>
    %202 = arith.subf %198, %201 : vector<32x256xf32>
    %203 = math.exp %202 : vector<32x256xf32>
    %cst_115 = arith.constant dense<0.000000e+00> : vector<32x8xf32>
    %204 = tpu.matmul %203, %38, %cst_115 {dimension_numbers = #tpu.dot_dimension_numbers<[1], [0], [0], [1], [0, 0, 1, 1], [], []>} : vector<32x256xf32>, vector<256x8xf32>, vector<32x8xf32> -> vector<32x8xf32>
    %cst_116 = arith.constant dense<0.000000e+00> : vector<32x256xf32>
    %205 = tpu.matmul %204, %39, %cst_116 {dimension_numbers = #tpu.dot_dimension_numbers<[1], [0], [0], [1], [0, 0, 1, 1], [], []>} : vector<32x8xf32>, vector<8x256xf32>, vector<32x256xf32> -> vector<32x256xf32>
    %206 = tpu.reciprocal %205 {approx = true} : vector<32x256xf32> -> vector<32x256xf32>
    %207 = arith.mulf %203, %206 : vector<32x256xf32>
    %cst_117 = arith.constant dense<0.000000e+00> : vector<32x32xf32>
    %208 = tpu.matmul %207, %196, %cst_117 {dimension_numbers = #tpu.dot_dimension_numbers<[1], [0], [0], [1], [0, 0, 1, 1], [], []>} : vector<32x256xf32>, vector<256x32xf32>, vector<32x32xf32> -> vector<32x32xf32>
    %c1_118 = arith.constant 1 : index
    %c0_119 = arith.constant 0 : index
    %c0_120 = arith.constant 0 : index
    %209 = vector.load %arg18[%c1_118, %c0_119, %c0_120] : memref<5x32x32xf32, #tpu.memory_space<vmem>>, vector<1x32x32xf32>
    %210 = vector.shape_cast %209 : vector<1x32x32xf32> to vector<32x32xf32>
    %cst_121 = arith.constant dense<0.000000e+00> : vector<32x32xf32>
    %211 = tpu.matmul %208, %210, %cst_121 {dimension_numbers = #tpu.dot_dimension_numbers<[1], [0], [0], [1], [0, 0, 1, 1], [], []>} : vector<32x32xf32>, vector<32x32xf32>, vector<32x32xf32> -> vector<32x32xf32>
    %c1_122 = arith.constant 1 : index
    %c0_123 = arith.constant 0 : index
    %c0_124 = arith.constant 0 : index
    %212 = vector.load %arg19[%c1_122, %c0_123, %c0_124] : memref<5x1x32xf32, #tpu.memory_space<vmem>>, vector<1x1x32xf32>
    %213 = vector.shape_cast %212 : vector<1x1x32xf32> to vector<1x32xf32>
    %214 = vector.broadcast %213 : vector<1x32xf32> to vector<32x32xf32>
    %215 = arith.addf %211, %214 : vector<32x32xf32>
    %216 = arith.addf %155, %215 : vector<32x32xf32>
    %217 = arith.addf %216, %21 : vector<32x32xf32>
    %c1_125 = arith.constant 1 : index
    %c0_126 = arith.constant 0 : index
    %c0_127 = arith.constant 0 : index
    %218 = vector.load %arg20[%c1_125, %c0_126, %c0_127] : memref<5x1x32xf32, #tpu.memory_space<vmem>>, vector<1x1x32xf32>
    %219 = vector.shape_cast %218 : vector<1x1x32xf32> to vector<1x32xf32>
    %c1_128 = arith.constant 1 : index
    %c0_129 = arith.constant 0 : index
    %c0_130 = arith.constant 0 : index
    %220 = vector.load %arg21[%c1_128, %c0_129, %c0_130] : memref<5x1x32xf32, #tpu.memory_space<vmem>>, vector<1x1x32xf32>
    %221 = vector.shape_cast %220 : vector<1x1x32xf32> to vector<1x32xf32>
    %cst_131 = arith.constant dense<0.000000e+00> : vector<32xf32>
    %222 = vector.multi_reduction <add>, %217, %cst_131 [1] : vector<32x32xf32> to vector<32xf32>
    %223 = vector.shape_cast %222 : vector<32xf32> to vector<32x1xf32>
    %cst_132 = arith.constant 3.200000e+01 : f32
    %224 = vector.broadcast %cst_132 : f32 to vector<32x1xf32>
    %225 = arith.divf %223, %224 : vector<32x1xf32>
    %226 = vector.broadcast %225 : vector<32x1xf32> to vector<32x32xf32>
    %227 = arith.subf %217, %226 : vector<32x32xf32>
    %228 = arith.mulf %227, %227 : vector<32x32xf32>
    %cst_133 = arith.constant dense<0.000000e+00> : vector<32xf32>
    %229 = vector.multi_reduction <add>, %228, %cst_133 [1] : vector<32x32xf32> to vector<32xf32>
    %230 = vector.shape_cast %229 : vector<32xf32> to vector<32x1xf32>
    %cst_134 = arith.constant 3.200000e+01 : f32
    %231 = vector.broadcast %cst_134 : f32 to vector<32x1xf32>
    %232 = arith.divf %230, %231 : vector<32x1xf32>
    %233 = vector.broadcast %225 : vector<32x1xf32> to vector<32x32xf32>
    %234 = arith.subf %217, %233 : vector<32x32xf32>
    %cst_135 = arith.constant 9.99999997E-7 : f32
    %235 = vector.broadcast %cst_135 : f32 to vector<32x1xf32>
    %236 = arith.addf %232, %235 : vector<32x1xf32>
    %237 = math.rsqrt %236 : vector<32x1xf32>
    %238 = vector.broadcast %237 : vector<32x1xf32> to vector<32x32xf32>
    %239 = arith.mulf %234, %238 : vector<32x32xf32>
    %240 = vector.broadcast %219 : vector<1x32xf32> to vector<32x32xf32>
    %241 = arith.mulf %239, %240 : vector<32x32xf32>
    %242 = vector.broadcast %221 : vector<1x32xf32> to vector<32x32xf32>
    %243 = arith.addf %241, %242 : vector<32x32xf32>
    %c1_136 = arith.constant 1 : index
    %c0_137 = arith.constant 0 : index
    %c0_138 = arith.constant 0 : index
    %244 = vector.load %arg22[%c1_136, %c0_137, %c0_138] : memref<5x32x128xf32, #tpu.memory_space<vmem>>, vector<1x32x128xf32>
    %245 = vector.shape_cast %244 : vector<1x32x128xf32> to vector<32x128xf32>
    %cst_139 = arith.constant dense<0.000000e+00> : vector<32x128xf32>
    %246 = tpu.matmul %243, %245, %cst_139 {dimension_numbers = #tpu.dot_dimension_numbers<[1], [0], [0], [1], [0, 0, 1, 1], [], []>} : vector<32x32xf32>, vector<32x128xf32>, vector<32x128xf32> -> vector<32x128xf32>
    %c1_140 = arith.constant 1 : index
    %c0_141 = arith.constant 0 : index
    %c0_142 = arith.constant 0 : index
    %247 = vector.load %arg23[%c1_140, %c0_141, %c0_142] : memref<5x1x128xf32, #tpu.memory_space<vmem>>, vector<1x1x128xf32>
    %248 = vector.shape_cast %247 : vector<1x1x128xf32> to vector<1x128xf32>
    %249 = vector.broadcast %248 : vector<1x128xf32> to vector<32x128xf32>
    %250 = arith.addf %246, %249 : vector<32x128xf32>
    %cst_143 = arith.constant 5.000000e-01 : f32
    %251 = vector.broadcast %cst_143 : f32 to vector<32x128xf32>
    %252 = arith.mulf %251, %250 : vector<32x128xf32>
    %cst_144 = arith.constant 4.471500e-02 : f32
    %253 = vector.broadcast %cst_144 : f32 to vector<32x128xf32>
    %254 = arith.mulf %253, %250 : vector<32x128xf32>
    %255 = arith.mulf %254, %250 : vector<32x128xf32>
    %256 = arith.mulf %255, %250 : vector<32x128xf32>
    %257 = arith.addf %250, %256 : vector<32x128xf32>
    %cst_145 = arith.constant 0.797884583 : f32
    %258 = vector.broadcast %cst_145 : f32 to vector<32x128xf32>
    %259 = arith.mulf %258, %257 : vector<32x128xf32>
    %260 = math.tanh %259 : vector<32x128xf32>
    %cst_146 = arith.constant 1.000000e+00 : f32
    %261 = vector.broadcast %cst_146 : f32 to vector<32x128xf32>
    %262 = arith.addf %261, %260 : vector<32x128xf32>
    %263 = arith.mulf %252, %262 : vector<32x128xf32>
    %c1_147 = arith.constant 1 : index
    %c0_148 = arith.constant 0 : index
    %c0_149 = arith.constant 0 : index
    %264 = vector.load %arg24[%c1_147, %c0_148, %c0_149] : memref<5x128x32xf32, #tpu.memory_space<vmem>>, vector<1x128x32xf32>
    %265 = vector.shape_cast %264 : vector<1x128x32xf32> to vector<128x32xf32>
    %cst_150 = arith.constant dense<0.000000e+00> : vector<32x32xf32>
    %266 = tpu.matmul %263, %265, %cst_150 {dimension_numbers = #tpu.dot_dimension_numbers<[1], [0], [0], [1], [0, 0, 1, 1], [], []>} : vector<32x128xf32>, vector<128x32xf32>, vector<32x32xf32> -> vector<32x32xf32>
    %c1_151 = arith.constant 1 : index
    %c0_152 = arith.constant 0 : index
    %c0_153 = arith.constant 0 : index
    %267 = vector.load %arg25[%c1_151, %c0_152, %c0_153] : memref<5x1x32xf32, #tpu.memory_space<vmem>>, vector<1x1x32xf32>
    %268 = vector.shape_cast %267 : vector<1x1x32xf32> to vector<1x32xf32>
    %269 = vector.broadcast %268 : vector<1x32xf32> to vector<32x32xf32>
    %270 = arith.addf %266, %269 : vector<32x32xf32>
    %271 = arith.addf %217, %270 : vector<32x32xf32>
    %c2 = arith.constant 2 : index
    %c0_154 = arith.constant 0 : index
    %c0_155 = arith.constant 0 : index
    %272 = vector.load %arg14[%c2, %c0_154, %c0_155] : memref<5x1x32xf32, #tpu.memory_space<vmem>>, vector<1x1x32xf32>
    %273 = vector.shape_cast %272 : vector<1x1x32xf32> to vector<1x32xf32>
    %c2_156 = arith.constant 2 : index
    %c0_157 = arith.constant 0 : index
    %c0_158 = arith.constant 0 : index
    %274 = vector.load %arg15[%c2_156, %c0_157, %c0_158] : memref<5x1x32xf32, #tpu.memory_space<vmem>>, vector<1x1x32xf32>
    %275 = vector.shape_cast %274 : vector<1x1x32xf32> to vector<1x32xf32>
    %cst_159 = arith.constant dense<0.000000e+00> : vector<32xf32>
    %276 = vector.multi_reduction <add>, %271, %cst_159 [1] : vector<32x32xf32> to vector<32xf32>
    %277 = vector.shape_cast %276 : vector<32xf32> to vector<32x1xf32>
    %cst_160 = arith.constant 3.200000e+01 : f32
    %278 = vector.broadcast %cst_160 : f32 to vector<32x1xf32>
    %279 = arith.divf %277, %278 : vector<32x1xf32>
    %280 = vector.broadcast %279 : vector<32x1xf32> to vector<32x32xf32>
    %281 = arith.subf %271, %280 : vector<32x32xf32>
    %282 = arith.mulf %281, %281 : vector<32x32xf32>
    %cst_161 = arith.constant dense<0.000000e+00> : vector<32xf32>
    %283 = vector.multi_reduction <add>, %282, %cst_161 [1] : vector<32x32xf32> to vector<32xf32>
    %284 = vector.shape_cast %283 : vector<32xf32> to vector<32x1xf32>
    %cst_162 = arith.constant 3.200000e+01 : f32
    %285 = vector.broadcast %cst_162 : f32 to vector<32x1xf32>
    %286 = arith.divf %284, %285 : vector<32x1xf32>
    %287 = vector.broadcast %279 : vector<32x1xf32> to vector<32x32xf32>
    %288 = arith.subf %271, %287 : vector<32x32xf32>
    %cst_163 = arith.constant 9.99999997E-7 : f32
    %289 = vector.broadcast %cst_163 : f32 to vector<32x1xf32>
    %290 = arith.addf %286, %289 : vector<32x1xf32>
    %291 = math.rsqrt %290 : vector<32x1xf32>
    %292 = vector.broadcast %291 : vector<32x1xf32> to vector<32x32xf32>
    %293 = arith.mulf %288, %292 : vector<32x32xf32>
    %294 = vector.broadcast %273 : vector<1x32xf32> to vector<32x32xf32>
    %295 = arith.mulf %293, %294 : vector<32x32xf32>
    %296 = vector.broadcast %275 : vector<1x32xf32> to vector<32x32xf32>
    %297 = arith.addf %295, %296 : vector<32x32xf32>
    %c2_164 = arith.constant 2 : index
    %c0_165 = arith.constant 0 : index
    %c0_166 = arith.constant 0 : index
    %298 = vector.load %arg16[%c2_164, %c0_165, %c0_166] : memref<5x32x96xf32, #tpu.memory_space<vmem>>, vector<1x32x96xf32>
    %299 = vector.shape_cast %298 : vector<1x32x96xf32> to vector<32x96xf32>
    %cst_167 = arith.constant dense<0.000000e+00> : vector<32x96xf32>
    %300 = tpu.matmul %297, %299, %cst_167 {dimension_numbers = #tpu.dot_dimension_numbers<[1], [0], [0], [1], [0, 0, 1, 1], [], []>} : vector<32x32xf32>, vector<32x96xf32>, vector<32x96xf32> -> vector<32x96xf32>
    %c2_168 = arith.constant 2 : index
    %c0_169 = arith.constant 0 : index
    %c0_170 = arith.constant 0 : index
    %301 = vector.load %arg17[%c2_168, %c0_169, %c0_170] : memref<5x1x96xf32, #tpu.memory_space<vmem>>, vector<1x1x96xf32>
    %302 = vector.shape_cast %301 : vector<1x1x96xf32> to vector<1x96xf32>
    %303 = vector.broadcast %302 : vector<1x96xf32> to vector<32x96xf32>
    %304 = arith.addf %300, %303 : vector<32x96xf32>
    %305 = vector.extract_strided_slice %304 {offsets = [0, 0], sizes = [32, 32], strides = [1, 1]} : vector<32x96xf32> to vector<32x32xf32>
    %306 = vector.extract_strided_slice %304 {offsets = [0, 32], sizes = [32, 32], strides = [1, 1]} : vector<32x96xf32> to vector<32x32xf32>
    %307 = vector.extract_strided_slice %304 {offsets = [0, 64], sizes = [32, 32], strides = [1, 1]} : vector<32x96xf32> to vector<32x32xf32>
    %308 = tpu.transpose %306, [1, 0] : vector<32x32xf32> -> vector<32x32xf32>
    %cst_171 = arith.constant dense<0.000000e+00> : vector<32x256xf32>
    %309 = tpu.matmul %308, %34, %cst_171 {dimension_numbers = #tpu.dot_dimension_numbers<[1], [0], [0], [1], [0, 0, 1, 1], [], []>} : vector<32x32xf32>, vector<32x256xf32>, vector<32x256xf32> -> vector<32x256xf32>
    %310 = arith.mulf %309, %36 : vector<32x256xf32>
    %cst_172 = arith.constant dense<0.000000e+00> : vector<256x32xf32>
    %311 = tpu.matmul %35, %307, %cst_172 {dimension_numbers = #tpu.dot_dimension_numbers<[1], [0], [0], [1], [0, 0, 1, 1], [], []>} : vector<256x32xf32>, vector<32x32xf32>, vector<256x32xf32> -> vector<256x32xf32>
    %312 = arith.mulf %311, %37 : vector<256x32xf32>
    %cst_173 = arith.constant dense<0.000000e+00> : vector<32x256xf32>
    %313 = tpu.matmul %305, %310, %cst_173 {dimension_numbers = #tpu.dot_dimension_numbers<[1], [0], [0], [1], [0, 0, 1, 1], [], []>} : vector<32x32xf32>, vector<32x256xf32>, vector<32x256xf32> -> vector<32x256xf32>
    %314 = arith.addf %313, %33 : vector<32x256xf32>
    %cst_174 = arith.constant dense<0xFF800000> : vector<32xf32>
    %315 = vector.multi_reduction <maximumf>, %314, %cst_174 [1] : vector<32x256xf32> to vector<32xf32>
    %316 = vector.shape_cast %315 : vector<32xf32> to vector<32x1xf32>
    %317 = vector.broadcast %316 : vector<32x1xf32> to vector<32x256xf32>
    %318 = arith.subf %314, %317 : vector<32x256xf32>
    %319 = math.exp %318 : vector<32x256xf32>
    %cst_175 = arith.constant dense<0.000000e+00> : vector<32x8xf32>
    %320 = tpu.matmul %319, %38, %cst_175 {dimension_numbers = #tpu.dot_dimension_numbers<[1], [0], [0], [1], [0, 0, 1, 1], [], []>} : vector<32x256xf32>, vector<256x8xf32>, vector<32x8xf32> -> vector<32x8xf32>
    %cst_176 = arith.constant dense<0.000000e+00> : vector<32x256xf32>
    %321 = tpu.matmul %320, %39, %cst_176 {dimension_numbers = #tpu.dot_dimension_numbers<[1], [0], [0], [1], [0, 0, 1, 1], [], []>} : vector<32x8xf32>, vector<8x256xf32>, vector<32x256xf32> -> vector<32x256xf32>
    %322 = tpu.reciprocal %321 {approx = true} : vector<32x256xf32> -> vector<32x256xf32>
    %323 = arith.mulf %319, %322 : vector<32x256xf32>
    %cst_177 = arith.constant dense<0.000000e+00> : vector<32x32xf32>
    %324 = tpu.matmul %323, %312, %cst_177 {dimension_numbers = #tpu.dot_dimension_numbers<[1], [0], [0], [1], [0, 0, 1, 1], [], []>} : vector<32x256xf32>, vector<256x32xf32>, vector<32x32xf32> -> vector<32x32xf32>
    %c2_178 = arith.constant 2 : index
    %c0_179 = arith.constant 0 : index
    %c0_180 = arith.constant 0 : index
    %325 = vector.load %arg18[%c2_178, %c0_179, %c0_180] : memref<5x32x32xf32, #tpu.memory_space<vmem>>, vector<1x32x32xf32>
    %326 = vector.shape_cast %325 : vector<1x32x32xf32> to vector<32x32xf32>
    %cst_181 = arith.constant dense<0.000000e+00> : vector<32x32xf32>
    %327 = tpu.matmul %324, %326, %cst_181 {dimension_numbers = #tpu.dot_dimension_numbers<[1], [0], [0], [1], [0, 0, 1, 1], [], []>} : vector<32x32xf32>, vector<32x32xf32>, vector<32x32xf32> -> vector<32x32xf32>
    %c2_182 = arith.constant 2 : index
    %c0_183 = arith.constant 0 : index
    %c0_184 = arith.constant 0 : index
    %328 = vector.load %arg19[%c2_182, %c0_183, %c0_184] : memref<5x1x32xf32, #tpu.memory_space<vmem>>, vector<1x1x32xf32>
    %329 = vector.shape_cast %328 : vector<1x1x32xf32> to vector<1x32xf32>
    %330 = vector.broadcast %329 : vector<1x32xf32> to vector<32x32xf32>
    %331 = arith.addf %327, %330 : vector<32x32xf32>
    %332 = arith.addf %271, %331 : vector<32x32xf32>
    %333 = arith.addf %332, %21 : vector<32x32xf32>
    %c2_185 = arith.constant 2 : index
    %c0_186 = arith.constant 0 : index
    %c0_187 = arith.constant 0 : index
    %334 = vector.load %arg20[%c2_185, %c0_186, %c0_187] : memref<5x1x32xf32, #tpu.memory_space<vmem>>, vector<1x1x32xf32>
    %335 = vector.shape_cast %334 : vector<1x1x32xf32> to vector<1x32xf32>
    %c2_188 = arith.constant 2 : index
    %c0_189 = arith.constant 0 : index
    %c0_190 = arith.constant 0 : index
    %336 = vector.load %arg21[%c2_188, %c0_189, %c0_190] : memref<5x1x32xf32, #tpu.memory_space<vmem>>, vector<1x1x32xf32>
    %337 = vector.shape_cast %336 : vector<1x1x32xf32> to vector<1x32xf32>
    %cst_191 = arith.constant dense<0.000000e+00> : vector<32xf32>
    %338 = vector.multi_reduction <add>, %333, %cst_191 [1] : vector<32x32xf32> to vector<32xf32>
    %339 = vector.shape_cast %338 : vector<32xf32> to vector<32x1xf32>
    %cst_192 = arith.constant 3.200000e+01 : f32
    %340 = vector.broadcast %cst_192 : f32 to vector<32x1xf32>
    %341 = arith.divf %339, %340 : vector<32x1xf32>
    %342 = vector.broadcast %341 : vector<32x1xf32> to vector<32x32xf32>
    %343 = arith.subf %333, %342 : vector<32x32xf32>
    %344 = arith.mulf %343, %343 : vector<32x32xf32>
    %cst_193 = arith.constant dense<0.000000e+00> : vector<32xf32>
    %345 = vector.multi_reduction <add>, %344, %cst_193 [1] : vector<32x32xf32> to vector<32xf32>
    %346 = vector.shape_cast %345 : vector<32xf32> to vector<32x1xf32>
    %cst_194 = arith.constant 3.200000e+01 : f32
    %347 = vector.broadcast %cst_194 : f32 to vector<32x1xf32>
    %348 = arith.divf %346, %347 : vector<32x1xf32>
    %349 = vector.broadcast %341 : vector<32x1xf32> to vector<32x32xf32>
    %350 = arith.subf %333, %349 : vector<32x32xf32>
    %cst_195 = arith.constant 9.99999997E-7 : f32
    %351 = vector.broadcast %cst_195 : f32 to vector<32x1xf32>
    %352 = arith.addf %348, %351 : vector<32x1xf32>
    %353 = math.rsqrt %352 : vector<32x1xf32>
    %354 = vector.broadcast %353 : vector<32x1xf32> to vector<32x32xf32>
    %355 = arith.mulf %350, %354 : vector<32x32xf32>
    %356 = vector.broadcast %335 : vector<1x32xf32> to vector<32x32xf32>
    %357 = arith.mulf %355, %356 : vector<32x32xf32>
    %358 = vector.broadcast %337 : vector<1x32xf32> to vector<32x32xf32>
    %359 = arith.addf %357, %358 : vector<32x32xf32>
    %c2_196 = arith.constant 2 : index
    %c0_197 = arith.constant 0 : index
    %c0_198 = arith.constant 0 : index
    %360 = vector.load %arg22[%c2_196, %c0_197, %c0_198] : memref<5x32x128xf32, #tpu.memory_space<vmem>>, vector<1x32x128xf32>
    %361 = vector.shape_cast %360 : vector<1x32x128xf32> to vector<32x128xf32>
    %cst_199 = arith.constant dense<0.000000e+00> : vector<32x128xf32>
    %362 = tpu.matmul %359, %361, %cst_199 {dimension_numbers = #tpu.dot_dimension_numbers<[1], [0], [0], [1], [0, 0, 1, 1], [], []>} : vector<32x32xf32>, vector<32x128xf32>, vector<32x128xf32> -> vector<32x128xf32>
    %c2_200 = arith.constant 2 : index
    %c0_201 = arith.constant 0 : index
    %c0_202 = arith.constant 0 : index
    %363 = vector.load %arg23[%c2_200, %c0_201, %c0_202] : memref<5x1x128xf32, #tpu.memory_space<vmem>>, vector<1x1x128xf32>
    %364 = vector.shape_cast %363 : vector<1x1x128xf32> to vector<1x128xf32>
    %365 = vector.broadcast %364 : vector<1x128xf32> to vector<32x128xf32>
    %366 = arith.addf %362, %365 : vector<32x128xf32>
    %cst_203 = arith.constant 5.000000e-01 : f32
    %367 = vector.broadcast %cst_203 : f32 to vector<32x128xf32>
    %368 = arith.mulf %367, %366 : vector<32x128xf32>
    %cst_204 = arith.constant 4.471500e-02 : f32
    %369 = vector.broadcast %cst_204 : f32 to vector<32x128xf32>
    %370 = arith.mulf %369, %366 : vector<32x128xf32>
    %371 = arith.mulf %370, %366 : vector<32x128xf32>
    %372 = arith.mulf %371, %366 : vector<32x128xf32>
    %373 = arith.addf %366, %372 : vector<32x128xf32>
    %cst_205 = arith.constant 0.797884583 : f32
    %374 = vector.broadcast %cst_205 : f32 to vector<32x128xf32>
    %375 = arith.mulf %374, %373 : vector<32x128xf32>
    %376 = math.tanh %375 : vector<32x128xf32>
    %cst_206 = arith.constant 1.000000e+00 : f32
    %377 = vector.broadcast %cst_206 : f32 to vector<32x128xf32>
    %378 = arith.addf %377, %376 : vector<32x128xf32>
    %379 = arith.mulf %368, %378 : vector<32x128xf32>
    %c2_207 = arith.constant 2 : index
    %c0_208 = arith.constant 0 : index
    %c0_209 = arith.constant 0 : index
    %380 = vector.load %arg24[%c2_207, %c0_208, %c0_209] : memref<5x128x32xf32, #tpu.memory_space<vmem>>, vector<1x128x32xf32>
    %381 = vector.shape_cast %380 : vector<1x128x32xf32> to vector<128x32xf32>
    %cst_210 = arith.constant dense<0.000000e+00> : vector<32x32xf32>
    %382 = tpu.matmul %379, %381, %cst_210 {dimension_numbers = #tpu.dot_dimension_numbers<[1], [0], [0], [1], [0, 0, 1, 1], [], []>} : vector<32x128xf32>, vector<128x32xf32>, vector<32x32xf32> -> vector<32x32xf32>
    %c2_211 = arith.constant 2 : index
    %c0_212 = arith.constant 0 : index
    %c0_213 = arith.constant 0 : index
    %383 = vector.load %arg25[%c2_211, %c0_212, %c0_213] : memref<5x1x32xf32, #tpu.memory_space<vmem>>, vector<1x1x32xf32>
    %384 = vector.shape_cast %383 : vector<1x1x32xf32> to vector<1x32xf32>
    %385 = vector.broadcast %384 : vector<1x32xf32> to vector<32x32xf32>
    %386 = arith.addf %382, %385 : vector<32x32xf32>
    %387 = arith.addf %333, %386 : vector<32x32xf32>
    %c3 = arith.constant 3 : index
    %c0_214 = arith.constant 0 : index
    %c0_215 = arith.constant 0 : index
    %388 = vector.load %arg14[%c3, %c0_214, %c0_215] : memref<5x1x32xf32, #tpu.memory_space<vmem>>, vector<1x1x32xf32>
    %389 = vector.shape_cast %388 : vector<1x1x32xf32> to vector<1x32xf32>
    %c3_216 = arith.constant 3 : index
    %c0_217 = arith.constant 0 : index
    %c0_218 = arith.constant 0 : index
    %390 = vector.load %arg15[%c3_216, %c0_217, %c0_218] : memref<5x1x32xf32, #tpu.memory_space<vmem>>, vector<1x1x32xf32>
    %391 = vector.shape_cast %390 : vector<1x1x32xf32> to vector<1x32xf32>
    %cst_219 = arith.constant dense<0.000000e+00> : vector<32xf32>
    %392 = vector.multi_reduction <add>, %387, %cst_219 [1] : vector<32x32xf32> to vector<32xf32>
    %393 = vector.shape_cast %392 : vector<32xf32> to vector<32x1xf32>
    %cst_220 = arith.constant 3.200000e+01 : f32
    %394 = vector.broadcast %cst_220 : f32 to vector<32x1xf32>
    %395 = arith.divf %393, %394 : vector<32x1xf32>
    %396 = vector.broadcast %395 : vector<32x1xf32> to vector<32x32xf32>
    %397 = arith.subf %387, %396 : vector<32x32xf32>
    %398 = arith.mulf %397, %397 : vector<32x32xf32>
    %cst_221 = arith.constant dense<0.000000e+00> : vector<32xf32>
    %399 = vector.multi_reduction <add>, %398, %cst_221 [1] : vector<32x32xf32> to vector<32xf32>
    %400 = vector.shape_cast %399 : vector<32xf32> to vector<32x1xf32>
    %cst_222 = arith.constant 3.200000e+01 : f32
    %401 = vector.broadcast %cst_222 : f32 to vector<32x1xf32>
    %402 = arith.divf %400, %401 : vector<32x1xf32>
    %403 = vector.broadcast %395 : vector<32x1xf32> to vector<32x32xf32>
    %404 = arith.subf %387, %403 : vector<32x32xf32>
    %cst_223 = arith.constant 9.99999997E-7 : f32
    %405 = vector.broadcast %cst_223 : f32 to vector<32x1xf32>
    %406 = arith.addf %402, %405 : vector<32x1xf32>
    %407 = math.rsqrt %406 : vector<32x1xf32>
    %408 = vector.broadcast %407 : vector<32x1xf32> to vector<32x32xf32>
    %409 = arith.mulf %404, %408 : vector<32x32xf32>
    %410 = vector.broadcast %389 : vector<1x32xf32> to vector<32x32xf32>
    %411 = arith.mulf %409, %410 : vector<32x32xf32>
    %412 = vector.broadcast %391 : vector<1x32xf32> to vector<32x32xf32>
    %413 = arith.addf %411, %412 : vector<32x32xf32>
    %c3_224 = arith.constant 3 : index
    %c0_225 = arith.constant 0 : index
    %c0_226 = arith.constant 0 : index
    %414 = vector.load %arg16[%c3_224, %c0_225, %c0_226] : memref<5x32x96xf32, #tpu.memory_space<vmem>>, vector<1x32x96xf32>
    %415 = vector.shape_cast %414 : vector<1x32x96xf32> to vector<32x96xf32>
    %cst_227 = arith.constant dense<0.000000e+00> : vector<32x96xf32>
    %416 = tpu.matmul %413, %415, %cst_227 {dimension_numbers = #tpu.dot_dimension_numbers<[1], [0], [0], [1], [0, 0, 1, 1], [], []>} : vector<32x32xf32>, vector<32x96xf32>, vector<32x96xf32> -> vector<32x96xf32>
    %c3_228 = arith.constant 3 : index
    %c0_229 = arith.constant 0 : index
    %c0_230 = arith.constant 0 : index
    %417 = vector.load %arg17[%c3_228, %c0_229, %c0_230] : memref<5x1x96xf32, #tpu.memory_space<vmem>>, vector<1x1x96xf32>
    %418 = vector.shape_cast %417 : vector<1x1x96xf32> to vector<1x96xf32>
    %419 = vector.broadcast %418 : vector<1x96xf32> to vector<32x96xf32>
    %420 = arith.addf %416, %419 : vector<32x96xf32>
    %421 = vector.extract_strided_slice %420 {offsets = [0, 0], sizes = [32, 32], strides = [1, 1]} : vector<32x96xf32> to vector<32x32xf32>
    %422 = vector.extract_strided_slice %420 {offsets = [0, 32], sizes = [32, 32], strides = [1, 1]} : vector<32x96xf32> to vector<32x32xf32>
    %423 = vector.extract_strided_slice %420 {offsets = [0, 64], sizes = [32, 32], strides = [1, 1]} : vector<32x96xf32> to vector<32x32xf32>
    %424 = tpu.transpose %422, [1, 0] : vector<32x32xf32> -> vector<32x32xf32>
    %cst_231 = arith.constant dense<0.000000e+00> : vector<32x256xf32>
    %425 = tpu.matmul %424, %34, %cst_231 {dimension_numbers = #tpu.dot_dimension_numbers<[1], [0], [0], [1], [0, 0, 1, 1], [], []>} : vector<32x32xf32>, vector<32x256xf32>, vector<32x256xf32> -> vector<32x256xf32>
    %426 = arith.mulf %425, %36 : vector<32x256xf32>
    %cst_232 = arith.constant dense<0.000000e+00> : vector<256x32xf32>
    %427 = tpu.matmul %35, %423, %cst_232 {dimension_numbers = #tpu.dot_dimension_numbers<[1], [0], [0], [1], [0, 0, 1, 1], [], []>} : vector<256x32xf32>, vector<32x32xf32>, vector<256x32xf32> -> vector<256x32xf32>
    %428 = arith.mulf %427, %37 : vector<256x32xf32>
    %cst_233 = arith.constant dense<0.000000e+00> : vector<32x256xf32>
    %429 = tpu.matmul %421, %426, %cst_233 {dimension_numbers = #tpu.dot_dimension_numbers<[1], [0], [0], [1], [0, 0, 1, 1], [], []>} : vector<32x32xf32>, vector<32x256xf32>, vector<32x256xf32> -> vector<32x256xf32>
    %430 = arith.addf %429, %33 : vector<32x256xf32>
    %cst_234 = arith.constant dense<0xFF800000> : vector<32xf32>
    %431 = vector.multi_reduction <maximumf>, %430, %cst_234 [1] : vector<32x256xf32> to vector<32xf32>
    %432 = vector.shape_cast %431 : vector<32xf32> to vector<32x1xf32>
    %433 = vector.broadcast %432 : vector<32x1xf32> to vector<32x256xf32>
    %434 = arith.subf %430, %433 : vector<32x256xf32>
    %435 = math.exp %434 : vector<32x256xf32>
    %cst_235 = arith.constant dense<0.000000e+00> : vector<32x8xf32>
    %436 = tpu.matmul %435, %38, %cst_235 {dimension_numbers = #tpu.dot_dimension_numbers<[1], [0], [0], [1], [0, 0, 1, 1], [], []>} : vector<32x256xf32>, vector<256x8xf32>, vector<32x8xf32> -> vector<32x8xf32>
    %cst_236 = arith.constant dense<0.000000e+00> : vector<32x256xf32>
    %437 = tpu.matmul %436, %39, %cst_236 {dimension_numbers = #tpu.dot_dimension_numbers<[1], [0], [0], [1], [0, 0, 1, 1], [], []>} : vector<32x8xf32>, vector<8x256xf32>, vector<32x256xf32> -> vector<32x256xf32>
    %438 = tpu.reciprocal %437 {approx = true} : vector<32x256xf32> -> vector<32x256xf32>
    %439 = arith.mulf %435, %438 : vector<32x256xf32>
    %cst_237 = arith.constant dense<0.000000e+00> : vector<32x32xf32>
    %440 = tpu.matmul %439, %428, %cst_237 {dimension_numbers = #tpu.dot_dimension_numbers<[1], [0], [0], [1], [0, 0, 1, 1], [], []>} : vector<32x256xf32>, vector<256x32xf32>, vector<32x32xf32> -> vector<32x32xf32>
    %c3_238 = arith.constant 3 : index
    %c0_239 = arith.constant 0 : index
    %c0_240 = arith.constant 0 : index
    %441 = vector.load %arg18[%c3_238, %c0_239, %c0_240] : memref<5x32x32xf32, #tpu.memory_space<vmem>>, vector<1x32x32xf32>
    %442 = vector.shape_cast %441 : vector<1x32x32xf32> to vector<32x32xf32>
    %cst_241 = arith.constant dense<0.000000e+00> : vector<32x32xf32>
    %443 = tpu.matmul %440, %442, %cst_241 {dimension_numbers = #tpu.dot_dimension_numbers<[1], [0], [0], [1], [0, 0, 1, 1], [], []>} : vector<32x32xf32>, vector<32x32xf32>, vector<32x32xf32> -> vector<32x32xf32>
    %c3_242 = arith.constant 3 : index
    %c0_243 = arith.constant 0 : index
    %c0_244 = arith.constant 0 : index
    %444 = vector.load %arg19[%c3_242, %c0_243, %c0_244] : memref<5x1x32xf32, #tpu.memory_space<vmem>>, vector<1x1x32xf32>
    %445 = vector.shape_cast %444 : vector<1x1x32xf32> to vector<1x32xf32>
    %446 = vector.broadcast %445 : vector<1x32xf32> to vector<32x32xf32>
    %447 = arith.addf %443, %446 : vector<32x32xf32>
    %448 = arith.addf %387, %447 : vector<32x32xf32>
    %449 = arith.addf %448, %21 : vector<32x32xf32>
    %c3_245 = arith.constant 3 : index
    %c0_246 = arith.constant 0 : index
    %c0_247 = arith.constant 0 : index
    %450 = vector.load %arg20[%c3_245, %c0_246, %c0_247] : memref<5x1x32xf32, #tpu.memory_space<vmem>>, vector<1x1x32xf32>
    %451 = vector.shape_cast %450 : vector<1x1x32xf32> to vector<1x32xf32>
    %c3_248 = arith.constant 3 : index
    %c0_249 = arith.constant 0 : index
    %c0_250 = arith.constant 0 : index
    %452 = vector.load %arg21[%c3_248, %c0_249, %c0_250] : memref<5x1x32xf32, #tpu.memory_space<vmem>>, vector<1x1x32xf32>
    %453 = vector.shape_cast %452 : vector<1x1x32xf32> to vector<1x32xf32>
    %cst_251 = arith.constant dense<0.000000e+00> : vector<32xf32>
    %454 = vector.multi_reduction <add>, %449, %cst_251 [1] : vector<32x32xf32> to vector<32xf32>
    %455 = vector.shape_cast %454 : vector<32xf32> to vector<32x1xf32>
    %cst_252 = arith.constant 3.200000e+01 : f32
    %456 = vector.broadcast %cst_252 : f32 to vector<32x1xf32>
    %457 = arith.divf %455, %456 : vector<32x1xf32>
    %458 = vector.broadcast %457 : vector<32x1xf32> to vector<32x32xf32>
    %459 = arith.subf %449, %458 : vector<32x32xf32>
    %460 = arith.mulf %459, %459 : vector<32x32xf32>
    %cst_253 = arith.constant dense<0.000000e+00> : vector<32xf32>
    %461 = vector.multi_reduction <add>, %460, %cst_253 [1] : vector<32x32xf32> to vector<32xf32>
    %462 = vector.shape_cast %461 : vector<32xf32> to vector<32x1xf32>
    %cst_254 = arith.constant 3.200000e+01 : f32
    %463 = vector.broadcast %cst_254 : f32 to vector<32x1xf32>
    %464 = arith.divf %462, %463 : vector<32x1xf32>
    %465 = vector.broadcast %457 : vector<32x1xf32> to vector<32x32xf32>
    %466 = arith.subf %449, %465 : vector<32x32xf32>
    %cst_255 = arith.constant 9.99999997E-7 : f32
    %467 = vector.broadcast %cst_255 : f32 to vector<32x1xf32>
    %468 = arith.addf %464, %467 : vector<32x1xf32>
    %469 = math.rsqrt %468 : vector<32x1xf32>
    %470 = vector.broadcast %469 : vector<32x1xf32> to vector<32x32xf32>
    %471 = arith.mulf %466, %470 : vector<32x32xf32>
    %472 = vector.broadcast %451 : vector<1x32xf32> to vector<32x32xf32>
    %473 = arith.mulf %471, %472 : vector<32x32xf32>
    %474 = vector.broadcast %453 : vector<1x32xf32> to vector<32x32xf32>
    %475 = arith.addf %473, %474 : vector<32x32xf32>
    %c3_256 = arith.constant 3 : index
    %c0_257 = arith.constant 0 : index
    %c0_258 = arith.constant 0 : index
    %476 = vector.load %arg22[%c3_256, %c0_257, %c0_258] : memref<5x32x128xf32, #tpu.memory_space<vmem>>, vector<1x32x128xf32>
    %477 = vector.shape_cast %476 : vector<1x32x128xf32> to vector<32x128xf32>
    %cst_259 = arith.constant dense<0.000000e+00> : vector<32x128xf32>
    %478 = tpu.matmul %475, %477, %cst_259 {dimension_numbers = #tpu.dot_dimension_numbers<[1], [0], [0], [1], [0, 0, 1, 1], [], []>} : vector<32x32xf32>, vector<32x128xf32>, vector<32x128xf32> -> vector<32x128xf32>
    %c3_260 = arith.constant 3 : index
    %c0_261 = arith.constant 0 : index
    %c0_262 = arith.constant 0 : index
    %479 = vector.load %arg23[%c3_260, %c0_261, %c0_262] : memref<5x1x128xf32, #tpu.memory_space<vmem>>, vector<1x1x128xf32>
    %480 = vector.shape_cast %479 : vector<1x1x128xf32> to vector<1x128xf32>
    %481 = vector.broadcast %480 : vector<1x128xf32> to vector<32x128xf32>
    %482 = arith.addf %478, %481 : vector<32x128xf32>
    %cst_263 = arith.constant 5.000000e-01 : f32
    %483 = vector.broadcast %cst_263 : f32 to vector<32x128xf32>
    %484 = arith.mulf %483, %482 : vector<32x128xf32>
    %cst_264 = arith.constant 4.471500e-02 : f32
    %485 = vector.broadcast %cst_264 : f32 to vector<32x128xf32>
    %486 = arith.mulf %485, %482 : vector<32x128xf32>
    %487 = arith.mulf %486, %482 : vector<32x128xf32>
    %488 = arith.mulf %487, %482 : vector<32x128xf32>
    %489 = arith.addf %482, %488 : vector<32x128xf32>
    %cst_265 = arith.constant 0.797884583 : f32
    %490 = vector.broadcast %cst_265 : f32 to vector<32x128xf32>
    %491 = arith.mulf %490, %489 : vector<32x128xf32>
    %492 = math.tanh %491 : vector<32x128xf32>
    %cst_266 = arith.constant 1.000000e+00 : f32
    %493 = vector.broadcast %cst_266 : f32 to vector<32x128xf32>
    %494 = arith.addf %493, %492 : vector<32x128xf32>
    %495 = arith.mulf %484, %494 : vector<32x128xf32>
    %c3_267 = arith.constant 3 : index
    %c0_268 = arith.constant 0 : index
    %c0_269 = arith.constant 0 : index
    %496 = vector.load %arg24[%c3_267, %c0_268, %c0_269] : memref<5x128x32xf32, #tpu.memory_space<vmem>>, vector<1x128x32xf32>
    %497 = vector.shape_cast %496 : vector<1x128x32xf32> to vector<128x32xf32>
    %cst_270 = arith.constant dense<0.000000e+00> : vector<32x32xf32>
    %498 = tpu.matmul %495, %497, %cst_270 {dimension_numbers = #tpu.dot_dimension_numbers<[1], [0], [0], [1], [0, 0, 1, 1], [], []>} : vector<32x128xf32>, vector<128x32xf32>, vector<32x32xf32> -> vector<32x32xf32>
    %c3_271 = arith.constant 3 : index
    %c0_272 = arith.constant 0 : index
    %c0_273 = arith.constant 0 : index
    %499 = vector.load %arg25[%c3_271, %c0_272, %c0_273] : memref<5x1x32xf32, #tpu.memory_space<vmem>>, vector<1x1x32xf32>
    %500 = vector.shape_cast %499 : vector<1x1x32xf32> to vector<1x32xf32>
    %501 = vector.broadcast %500 : vector<1x32xf32> to vector<32x32xf32>
    %502 = arith.addf %498, %501 : vector<32x32xf32>
    %503 = arith.addf %449, %502 : vector<32x32xf32>
    %c4 = arith.constant 4 : index
    %c0_274 = arith.constant 0 : index
    %c0_275 = arith.constant 0 : index
    %504 = vector.load %arg14[%c4, %c0_274, %c0_275] : memref<5x1x32xf32, #tpu.memory_space<vmem>>, vector<1x1x32xf32>
    %505 = vector.shape_cast %504 : vector<1x1x32xf32> to vector<1x32xf32>
    %c4_276 = arith.constant 4 : index
    %c0_277 = arith.constant 0 : index
    %c0_278 = arith.constant 0 : index
    %506 = vector.load %arg15[%c4_276, %c0_277, %c0_278] : memref<5x1x32xf32, #tpu.memory_space<vmem>>, vector<1x1x32xf32>
    %507 = vector.shape_cast %506 : vector<1x1x32xf32> to vector<1x32xf32>
    %cst_279 = arith.constant dense<0.000000e+00> : vector<32xf32>
    %508 = vector.multi_reduction <add>, %503, %cst_279 [1] : vector<32x32xf32> to vector<32xf32>
    %509 = vector.shape_cast %508 : vector<32xf32> to vector<32x1xf32>
    %cst_280 = arith.constant 3.200000e+01 : f32
    %510 = vector.broadcast %cst_280 : f32 to vector<32x1xf32>
    %511 = arith.divf %509, %510 : vector<32x1xf32>
    %512 = vector.broadcast %511 : vector<32x1xf32> to vector<32x32xf32>
    %513 = arith.subf %503, %512 : vector<32x32xf32>
    %514 = arith.mulf %513, %513 : vector<32x32xf32>
    %cst_281 = arith.constant dense<0.000000e+00> : vector<32xf32>
    %515 = vector.multi_reduction <add>, %514, %cst_281 [1] : vector<32x32xf32> to vector<32xf32>
    %516 = vector.shape_cast %515 : vector<32xf32> to vector<32x1xf32>
    %cst_282 = arith.constant 3.200000e+01 : f32
    %517 = vector.broadcast %cst_282 : f32 to vector<32x1xf32>
    %518 = arith.divf %516, %517 : vector<32x1xf32>
    %519 = vector.broadcast %511 : vector<32x1xf32> to vector<32x32xf32>
    %520 = arith.subf %503, %519 : vector<32x32xf32>
    %cst_283 = arith.constant 9.99999997E-7 : f32
    %521 = vector.broadcast %cst_283 : f32 to vector<32x1xf32>
    %522 = arith.addf %518, %521 : vector<32x1xf32>
    %523 = math.rsqrt %522 : vector<32x1xf32>
    %524 = vector.broadcast %523 : vector<32x1xf32> to vector<32x32xf32>
    %525 = arith.mulf %520, %524 : vector<32x32xf32>
    %526 = vector.broadcast %505 : vector<1x32xf32> to vector<32x32xf32>
    %527 = arith.mulf %525, %526 : vector<32x32xf32>
    %528 = vector.broadcast %507 : vector<1x32xf32> to vector<32x32xf32>
    %529 = arith.addf %527, %528 : vector<32x32xf32>
    %c4_284 = arith.constant 4 : index
    %c0_285 = arith.constant 0 : index
    %c0_286 = arith.constant 0 : index
    %530 = vector.load %arg16[%c4_284, %c0_285, %c0_286] : memref<5x32x96xf32, #tpu.memory_space<vmem>>, vector<1x32x96xf32>
    %531 = vector.shape_cast %530 : vector<1x32x96xf32> to vector<32x96xf32>
    %cst_287 = arith.constant dense<0.000000e+00> : vector<32x96xf32>
    %532 = tpu.matmul %529, %531, %cst_287 {dimension_numbers = #tpu.dot_dimension_numbers<[1], [0], [0], [1], [0, 0, 1, 1], [], []>} : vector<32x32xf32>, vector<32x96xf32>, vector<32x96xf32> -> vector<32x96xf32>
    %c4_288 = arith.constant 4 : index
    %c0_289 = arith.constant 0 : index
    %c0_290 = arith.constant 0 : index
    %533 = vector.load %arg17[%c4_288, %c0_289, %c0_290] : memref<5x1x96xf32, #tpu.memory_space<vmem>>, vector<1x1x96xf32>
    %534 = vector.shape_cast %533 : vector<1x1x96xf32> to vector<1x96xf32>
    %535 = vector.broadcast %534 : vector<1x96xf32> to vector<32x96xf32>
    %536 = arith.addf %532, %535 : vector<32x96xf32>
    %537 = vector.extract_strided_slice %536 {offsets = [0, 0], sizes = [32, 32], strides = [1, 1]} : vector<32x96xf32> to vector<32x32xf32>
    %538 = vector.extract_strided_slice %536 {offsets = [0, 32], sizes = [32, 32], strides = [1, 1]} : vector<32x96xf32> to vector<32x32xf32>
    %539 = vector.extract_strided_slice %536 {offsets = [0, 64], sizes = [32, 32], strides = [1, 1]} : vector<32x96xf32> to vector<32x32xf32>
    %540 = tpu.transpose %538, [1, 0] : vector<32x32xf32> -> vector<32x32xf32>
    %cst_291 = arith.constant dense<0.000000e+00> : vector<32x256xf32>
    %541 = tpu.matmul %540, %34, %cst_291 {dimension_numbers = #tpu.dot_dimension_numbers<[1], [0], [0], [1], [0, 0, 1, 1], [], []>} : vector<32x32xf32>, vector<32x256xf32>, vector<32x256xf32> -> vector<32x256xf32>
    %542 = arith.mulf %541, %36 : vector<32x256xf32>
    %cst_292 = arith.constant dense<0.000000e+00> : vector<256x32xf32>
    %543 = tpu.matmul %35, %539, %cst_292 {dimension_numbers = #tpu.dot_dimension_numbers<[1], [0], [0], [1], [0, 0, 1, 1], [], []>} : vector<256x32xf32>, vector<32x32xf32>, vector<256x32xf32> -> vector<256x32xf32>
    %544 = arith.mulf %543, %37 : vector<256x32xf32>
    %cst_293 = arith.constant dense<0.000000e+00> : vector<32x256xf32>
    %545 = tpu.matmul %537, %542, %cst_293 {dimension_numbers = #tpu.dot_dimension_numbers<[1], [0], [0], [1], [0, 0, 1, 1], [], []>} : vector<32x32xf32>, vector<32x256xf32>, vector<32x256xf32> -> vector<32x256xf32>
    %546 = arith.addf %545, %33 : vector<32x256xf32>
    %cst_294 = arith.constant dense<0xFF800000> : vector<32xf32>
    %547 = vector.multi_reduction <maximumf>, %546, %cst_294 [1] : vector<32x256xf32> to vector<32xf32>
    %548 = vector.shape_cast %547 : vector<32xf32> to vector<32x1xf32>
    %549 = vector.broadcast %548 : vector<32x1xf32> to vector<32x256xf32>
    %550 = arith.subf %546, %549 : vector<32x256xf32>
    %551 = math.exp %550 : vector<32x256xf32>
    %cst_295 = arith.constant dense<0.000000e+00> : vector<32x8xf32>
    %552 = tpu.matmul %551, %38, %cst_295 {dimension_numbers = #tpu.dot_dimension_numbers<[1], [0], [0], [1], [0, 0, 1, 1], [], []>} : vector<32x256xf32>, vector<256x8xf32>, vector<32x8xf32> -> vector<32x8xf32>
    %cst_296 = arith.constant dense<0.000000e+00> : vector<32x256xf32>
    %553 = tpu.matmul %552, %39, %cst_296 {dimension_numbers = #tpu.dot_dimension_numbers<[1], [0], [0], [1], [0, 0, 1, 1], [], []>} : vector<32x8xf32>, vector<8x256xf32>, vector<32x256xf32> -> vector<32x256xf32>
    %554 = tpu.reciprocal %553 {approx = true} : vector<32x256xf32> -> vector<32x256xf32>
    %555 = arith.mulf %551, %554 : vector<32x256xf32>
    %cst_297 = arith.constant dense<0.000000e+00> : vector<32x32xf32>
    %556 = tpu.matmul %555, %544, %cst_297 {dimension_numbers = #tpu.dot_dimension_numbers<[1], [0], [0], [1], [0, 0, 1, 1], [], []>} : vector<32x256xf32>, vector<256x32xf32>, vector<32x32xf32> -> vector<32x32xf32>
    %c4_298 = arith.constant 4 : index
    %c0_299 = arith.constant 0 : index
    %c0_300 = arith.constant 0 : index
    %557 = vector.load %arg18[%c4_298, %c0_299, %c0_300] : memref<5x32x32xf32, #tpu.memory_space<vmem>>, vector<1x32x32xf32>
    %558 = vector.shape_cast %557 : vector<1x32x32xf32> to vector<32x32xf32>
    %cst_301 = arith.constant dense<0.000000e+00> : vector<32x32xf32>
    %559 = tpu.matmul %556, %558, %cst_301 {dimension_numbers = #tpu.dot_dimension_numbers<[1], [0], [0], [1], [0, 0, 1, 1], [], []>} : vector<32x32xf32>, vector<32x32xf32>, vector<32x32xf32> -> vector<32x32xf32>
    %c4_302 = arith.constant 4 : index
    %c0_303 = arith.constant 0 : index
    %c0_304 = arith.constant 0 : index
    %560 = vector.load %arg19[%c4_302, %c0_303, %c0_304] : memref<5x1x32xf32, #tpu.memory_space<vmem>>, vector<1x1x32xf32>
    %561 = vector.shape_cast %560 : vector<1x1x32xf32> to vector<1x32xf32>
    %562 = vector.broadcast %561 : vector<1x32xf32> to vector<32x32xf32>
    %563 = arith.addf %559, %562 : vector<32x32xf32>
    %564 = arith.addf %503, %563 : vector<32x32xf32>
    %565 = arith.addf %564, %21 : vector<32x32xf32>
    %c4_305 = arith.constant 4 : index
    %c0_306 = arith.constant 0 : index
    %c0_307 = arith.constant 0 : index
    %566 = vector.load %arg20[%c4_305, %c0_306, %c0_307] : memref<5x1x32xf32, #tpu.memory_space<vmem>>, vector<1x1x32xf32>
    %567 = vector.shape_cast %566 : vector<1x1x32xf32> to vector<1x32xf32>
    %c4_308 = arith.constant 4 : index
    %c0_309 = arith.constant 0 : index
    %c0_310 = arith.constant 0 : index
    %568 = vector.load %arg21[%c4_308, %c0_309, %c0_310] : memref<5x1x32xf32, #tpu.memory_space<vmem>>, vector<1x1x32xf32>
    %569 = vector.shape_cast %568 : vector<1x1x32xf32> to vector<1x32xf32>
    %cst_311 = arith.constant dense<0.000000e+00> : vector<32xf32>
    %570 = vector.multi_reduction <add>, %565, %cst_311 [1] : vector<32x32xf32> to vector<32xf32>
    %571 = vector.shape_cast %570 : vector<32xf32> to vector<32x1xf32>
    %cst_312 = arith.constant 3.200000e+01 : f32
    %572 = vector.broadcast %cst_312 : f32 to vector<32x1xf32>
    %573 = arith.divf %571, %572 : vector<32x1xf32>
    %574 = vector.broadcast %573 : vector<32x1xf32> to vector<32x32xf32>
    %575 = arith.subf %565, %574 : vector<32x32xf32>
    %576 = arith.mulf %575, %575 : vector<32x32xf32>
    %cst_313 = arith.constant dense<0.000000e+00> : vector<32xf32>
    %577 = vector.multi_reduction <add>, %576, %cst_313 [1] : vector<32x32xf32> to vector<32xf32>
    %578 = vector.shape_cast %577 : vector<32xf32> to vector<32x1xf32>
    %cst_314 = arith.constant 3.200000e+01 : f32
    %579 = vector.broadcast %cst_314 : f32 to vector<32x1xf32>
    %580 = arith.divf %578, %579 : vector<32x1xf32>
    %581 = vector.broadcast %573 : vector<32x1xf32> to vector<32x32xf32>
    %582 = arith.subf %565, %581 : vector<32x32xf32>
    %cst_315 = arith.constant 9.99999997E-7 : f32
    %583 = vector.broadcast %cst_315 : f32 to vector<32x1xf32>
    %584 = arith.addf %580, %583 : vector<32x1xf32>
    %585 = math.rsqrt %584 : vector<32x1xf32>
    %586 = vector.broadcast %585 : vector<32x1xf32> to vector<32x32xf32>
    %587 = arith.mulf %582, %586 : vector<32x32xf32>
    %588 = vector.broadcast %567 : vector<1x32xf32> to vector<32x32xf32>
    %589 = arith.mulf %587, %588 : vector<32x32xf32>
    %590 = vector.broadcast %569 : vector<1x32xf32> to vector<32x32xf32>
    %591 = arith.addf %589, %590 : vector<32x32xf32>
    %c4_316 = arith.constant 4 : index
    %c0_317 = arith.constant 0 : index
    %c0_318 = arith.constant 0 : index
    %592 = vector.load %arg22[%c4_316, %c0_317, %c0_318] : memref<5x32x128xf32, #tpu.memory_space<vmem>>, vector<1x32x128xf32>
    %593 = vector.shape_cast %592 : vector<1x32x128xf32> to vector<32x128xf32>
    %cst_319 = arith.constant dense<0.000000e+00> : vector<32x128xf32>
    %594 = tpu.matmul %591, %593, %cst_319 {dimension_numbers = #tpu.dot_dimension_numbers<[1], [0], [0], [1], [0, 0, 1, 1], [], []>} : vector<32x32xf32>, vector<32x128xf32>, vector<32x128xf32> -> vector<32x128xf32>
    %c4_320 = arith.constant 4 : index
    %c0_321 = arith.constant 0 : index
    %c0_322 = arith.constant 0 : index
    %595 = vector.load %arg23[%c4_320, %c0_321, %c0_322] : memref<5x1x128xf32, #tpu.memory_space<vmem>>, vector<1x1x128xf32>
    %596 = vector.shape_cast %595 : vector<1x1x128xf32> to vector<1x128xf32>
    %597 = vector.broadcast %596 : vector<1x128xf32> to vector<32x128xf32>
    %598 = arith.addf %594, %597 : vector<32x128xf32>
    %cst_323 = arith.constant 5.000000e-01 : f32
    %599 = vector.broadcast %cst_323 : f32 to vector<32x128xf32>
    %600 = arith.mulf %599, %598 : vector<32x128xf32>
    %cst_324 = arith.constant 4.471500e-02 : f32
    %601 = vector.broadcast %cst_324 : f32 to vector<32x128xf32>
    %602 = arith.mulf %601, %598 : vector<32x128xf32>
    %603 = arith.mulf %602, %598 : vector<32x128xf32>
    %604 = arith.mulf %603, %598 : vector<32x128xf32>
    %605 = arith.addf %598, %604 : vector<32x128xf32>
    %cst_325 = arith.constant 0.797884583 : f32
    %606 = vector.broadcast %cst_325 : f32 to vector<32x128xf32>
    %607 = arith.mulf %606, %605 : vector<32x128xf32>
    %608 = math.tanh %607 : vector<32x128xf32>
    %cst_326 = arith.constant 1.000000e+00 : f32
    %609 = vector.broadcast %cst_326 : f32 to vector<32x128xf32>
    %610 = arith.addf %609, %608 : vector<32x128xf32>
    %611 = arith.mulf %600, %610 : vector<32x128xf32>
    %c4_327 = arith.constant 4 : index
    %c0_328 = arith.constant 0 : index
    %c0_329 = arith.constant 0 : index
    %612 = vector.load %arg24[%c4_327, %c0_328, %c0_329] : memref<5x128x32xf32, #tpu.memory_space<vmem>>, vector<1x128x32xf32>
    %613 = vector.shape_cast %612 : vector<1x128x32xf32> to vector<128x32xf32>
    %cst_330 = arith.constant dense<0.000000e+00> : vector<32x32xf32>
    %614 = tpu.matmul %611, %613, %cst_330 {dimension_numbers = #tpu.dot_dimension_numbers<[1], [0], [0], [1], [0, 0, 1, 1], [], []>} : vector<32x128xf32>, vector<128x32xf32>, vector<32x32xf32> -> vector<32x32xf32>
    %c4_331 = arith.constant 4 : index
    %c0_332 = arith.constant 0 : index
    %c0_333 = arith.constant 0 : index
    %615 = vector.load %arg25[%c4_331, %c0_332, %c0_333] : memref<5x1x32xf32, #tpu.memory_space<vmem>>, vector<1x1x32xf32>
    %616 = vector.shape_cast %615 : vector<1x1x32xf32> to vector<1x32xf32>
    %617 = vector.broadcast %616 : vector<1x32xf32> to vector<32x32xf32>
    %618 = arith.addf %614, %617 : vector<32x32xf32>
    %619 = arith.addf %565, %618 : vector<32x32xf32>
    %620 = vector.extract_strided_slice %619 {offsets = [0, 0], sizes = [1, 32], strides = [1, 1]} : vector<32x32xf32> to vector<1x32xf32>
    %621 = vector.extract_strided_slice %619 {offsets = [1, 0], sizes = [1, 32], strides = [1, 1]} : vector<32x32xf32> to vector<1x32xf32>
    %622 = vector.extract_strided_slice %619 {offsets = [2, 0], sizes = [1, 32], strides = [1, 1]} : vector<32x32xf32> to vector<1x32xf32>
    %623 = vector.extract_strided_slice %619 {offsets = [3, 0], sizes = [1, 32], strides = [1, 1]} : vector<32x32xf32> to vector<1x32xf32>
    %624 = vector.extract_strided_slice %619 {offsets = [4, 0], sizes = [1, 32], strides = [1, 1]} : vector<32x32xf32> to vector<1x32xf32>
    %625 = vector.extract_strided_slice %619 {offsets = [5, 0], sizes = [1, 32], strides = [1, 1]} : vector<32x32xf32> to vector<1x32xf32>
    %626 = vector.extract_strided_slice %619 {offsets = [6, 0], sizes = [1, 32], strides = [1, 1]} : vector<32x32xf32> to vector<1x32xf32>
    %627 = vector.extract_strided_slice %619 {offsets = [7, 0], sizes = [1, 32], strides = [1, 1]} : vector<32x32xf32> to vector<1x32xf32>
    %628 = vector.extract_strided_slice %619 {offsets = [8, 0], sizes = [1, 32], strides = [1, 1]} : vector<32x32xf32> to vector<1x32xf32>
    %629 = vector.extract_strided_slice %619 {offsets = [9, 0], sizes = [1, 32], strides = [1, 1]} : vector<32x32xf32> to vector<1x32xf32>
    %630 = vector.extract_strided_slice %619 {offsets = [10, 0], sizes = [1, 32], strides = [1, 1]} : vector<32x32xf32> to vector<1x32xf32>
    %631 = vector.extract_strided_slice %619 {offsets = [11, 0], sizes = [1, 32], strides = [1, 1]} : vector<32x32xf32> to vector<1x32xf32>
    %632 = vector.extract_strided_slice %619 {offsets = [12, 0], sizes = [1, 32], strides = [1, 1]} : vector<32x32xf32> to vector<1x32xf32>
    %633 = vector.extract_strided_slice %619 {offsets = [13, 0], sizes = [1, 32], strides = [1, 1]} : vector<32x32xf32> to vector<1x32xf32>
    %634 = vector.extract_strided_slice %619 {offsets = [14, 0], sizes = [1, 32], strides = [1, 1]} : vector<32x32xf32> to vector<1x32xf32>
    %635 = vector.extract_strided_slice %619 {offsets = [15, 0], sizes = [1, 32], strides = [1, 1]} : vector<32x32xf32> to vector<1x32xf32>
    %636 = tpu.concatenate %620, %621, %622, %623, %624, %625, %626, %627, %628, %629, %630, %631, %632, %633, %634, %635 in 1 : vector<1x32xf32>, vector<1x32xf32>, vector<1x32xf32>, vector<1x32xf32>, vector<1x32xf32>, vector<1x32xf32>, vector<1x32xf32>, vector<1x32xf32>, vector<1x32xf32>, vector<1x32xf32>, vector<1x32xf32>, vector<1x32xf32>, vector<1x32xf32>, vector<1x32xf32>, vector<1x32xf32>, vector<1x32xf32> -> vector<1x512xf32>
    %637 = vector.extract_strided_slice %619 {offsets = [16, 0], sizes = [1, 32], strides = [1, 1]} : vector<32x32xf32> to vector<1x32xf32>
    %638 = vector.extract_strided_slice %619 {offsets = [17, 0], sizes = [1, 32], strides = [1, 1]} : vector<32x32xf32> to vector<1x32xf32>
    %639 = vector.extract_strided_slice %619 {offsets = [18, 0], sizes = [1, 32], strides = [1, 1]} : vector<32x32xf32> to vector<1x32xf32>
    %640 = vector.extract_strided_slice %619 {offsets = [19, 0], sizes = [1, 32], strides = [1, 1]} : vector<32x32xf32> to vector<1x32xf32>
    %641 = vector.extract_strided_slice %619 {offsets = [20, 0], sizes = [1, 32], strides = [1, 1]} : vector<32x32xf32> to vector<1x32xf32>
    %642 = vector.extract_strided_slice %619 {offsets = [21, 0], sizes = [1, 32], strides = [1, 1]} : vector<32x32xf32> to vector<1x32xf32>
    %643 = vector.extract_strided_slice %619 {offsets = [22, 0], sizes = [1, 32], strides = [1, 1]} : vector<32x32xf32> to vector<1x32xf32>
    %644 = vector.extract_strided_slice %619 {offsets = [23, 0], sizes = [1, 32], strides = [1, 1]} : vector<32x32xf32> to vector<1x32xf32>
    %645 = vector.extract_strided_slice %619 {offsets = [24, 0], sizes = [1, 32], strides = [1, 1]} : vector<32x32xf32> to vector<1x32xf32>
    %646 = vector.extract_strided_slice %619 {offsets = [25, 0], sizes = [1, 32], strides = [1, 1]} : vector<32x32xf32> to vector<1x32xf32>
    %647 = vector.extract_strided_slice %619 {offsets = [26, 0], sizes = [1, 32], strides = [1, 1]} : vector<32x32xf32> to vector<1x32xf32>
    %648 = vector.extract_strided_slice %619 {offsets = [27, 0], sizes = [1, 32], strides = [1, 1]} : vector<32x32xf32> to vector<1x32xf32>
    %649 = vector.extract_strided_slice %619 {offsets = [28, 0], sizes = [1, 32], strides = [1, 1]} : vector<32x32xf32> to vector<1x32xf32>
    %650 = vector.extract_strided_slice %619 {offsets = [29, 0], sizes = [1, 32], strides = [1, 1]} : vector<32x32xf32> to vector<1x32xf32>
    %651 = vector.extract_strided_slice %619 {offsets = [30, 0], sizes = [1, 32], strides = [1, 1]} : vector<32x32xf32> to vector<1x32xf32>
    %652 = vector.extract_strided_slice %619 {offsets = [31, 0], sizes = [1, 32], strides = [1, 1]} : vector<32x32xf32> to vector<1x32xf32>
    %653 = tpu.concatenate %637, %638, %639, %640, %641, %642, %643, %644, %645, %646, %647, %648, %649, %650, %651, %652 in 1 : vector<1x32xf32>, vector<1x32xf32>, vector<1x32xf32>, vector<1x32xf32>, vector<1x32xf32>, vector<1x32xf32>, vector<1x32xf32>, vector<1x32xf32>, vector<1x32xf32>, vector<1x32xf32>, vector<1x32xf32>, vector<1x32xf32>, vector<1x32xf32>, vector<1x32xf32>, vector<1x32xf32>, vector<1x32xf32> -> vector<1x512xf32>
    %654 = tpu.concatenate %636, %653 in 0 : vector<1x512xf32>, vector<1x512xf32> -> vector<2x512xf32>
    %c0_334 = arith.constant 0 : index
    %c0_335 = arith.constant 0 : index
    %655 = vector.load %arg26[%c0_334, %c0_335] : memref<2x512xf32, #tpu.memory_space<vmem>>, vector<2x512xf32>
    tpu.vector_store %arg26[%c0_334, %c0_335], %654 {strides = array<i32>} : memref<2x512xf32, #tpu.memory_space<vmem>>, vector<2x512xf32>,
    return
  }
}

</mosaic_0001>

<bundles_post_ra>
// kernel: nl_encoder_forward.1
= control target key start
LH: loop header
LB: loop body
LE: loop exit
PB: predicated region body
PF: predicated region fallthrough
CT: control target
= control target key end

     0   :  { %vm134_vm0 = vcmask 1043456   ;;  %v7587_v0 = vmov 0   ;;  %v87_v13 = vlaneseq  ;;  %vm121_vm1 = vcmask 490496   ;;  %s12063_s0 = inlined_call_operand.vmem [shape: s32[32,1], index: 0, kind: input, shape index: {}]   ;;  %s12064_s2 = inlined_call_operand.vmem [shape: f32[60,32], index: 2, kind: input, shape index: {}]   ;;  %s12065_s14 = inlined_call_operand.vmem [shape: f32[5,1,32], index: 14, kind: input, shape index: {}]   ;;  %s12066_s5 = inlined_call_operand.vmem [shape: f32[8,320], index: 5, kind: input, shape index: {}]   ;;  %s12067_s1 = inlined_call_operand.vmem [shape: s32[32,8], index: 1, kind: input, shape index: {}]   ;;  %s12068_s15 = inlined_call_operand.vmem [shape: f32[5,1,32], index: 15, kind: input, shape index: {}]   ;;  %s12069_s3 = inlined_call_operand.vmem [shape: f32[320,32], index: 3, kind: input, shape index: {}]   ;;  %s12070_s6 = inlined_call_operand.vmem [shape: f32[1,320], index: 6, kind: input, shape index: {}]   ;;  %s12071_s7 = inlined_call_operand.vmem [shape: f32[32,256], index: 7, kind: input, shape index: {}]   ;;  %s12072_s4 = inlined_call_operand.vmem [shape: f32[1,32], index: 4, kind: input, shape index: {}]   ;;  %s12073_s16 = inlined_call_operand.vmem [shape: f32[5,32,96], index: 16, kind: input, shape index: {}]   ;;  %s12074_s17 = inlined_call_operand.vmem [shape: f32[5,1,96], index: 17, kind: input, shape index: {}]   ;;  %s12075_s8 = inlined_call_operand.vmem [shape: f32[256,32], index: 8, kind: input, shape index: {}]   ;;  %s12076_s9 = inlined_call_operand.vmem [shape: f32[32,256], index: 9, kind: input, shape index: {}]   ;;  %s12077_s11 = inlined_call_operand.vmem [shape: f32[32,256], index: 11, kind: input, shape index: {}]   ;;  %s12078_s12 = inlined_call_operand.vmem [shape: f32[256,8], index: 12, kind: input, shape index: {}]   ;;  %s12079_s10 = inlined_call_operand.vmem [shape: f32[256,32], index: 10, kind: input, shape index: {}]   ;;  %s12080_s13 = inlined_call_operand.vmem [shape: f32[8,256], index: 13, kind: input, shape index: {}]   ;;  %s12081_s19 = inlined_call_operand.vmem [shape: f32[5,1,32], index: 19, kind: input, shape index: {}]   ;;  %s12082_s18 = inlined_call_operand.vmem [shape: f32[5,32,32], index: 18, kind: input, shape index: {}]   ;;  %s12083_s20 = inlined_call_operand.vmem [shape: f32[5,1,32], index: 20, kind: input, shape index: {}]   ;;  %s12084_s21 = inlined_call_operand.vmem [shape: f32[5,1,32], index: 21, kind: input, shape index: {}]   ;;  %s12085_s23 = inlined_call_operand.vmem [shape: f32[5,1,128], index: 23, kind: input, shape index: {}]   ;;  %s12086_s22 = inlined_call_operand.vmem [shape: f32[5,32,128], index: 22, kind: input, shape index: {}]   ;;  %s12087_s24 = inlined_call_operand.vmem [shape: f32[5,128,32], index: 24, kind: input, shape index: {}]   ;;  %s12088_s25 = inlined_call_operand.vmem [shape: f32[5,1,32], index: 25, kind: input, shape index: {}]   ;;  %s12089_s26 = inlined_call_operand.vmem [shape: f32[2,512], index: 26, kind: output, shape index: {}]  }
   0x1   :  { %12101 = sst [smem:[#allocation2_spill]] %s12063_s0  ;;  %6758 = vset.pattern.permute.xlu0 %v7587_v0  ;;  %6759 = vset.pattern.permute.xlu1 %v7587_v0  ;;  %v7588_v16 = vmov 0.0   ;;  %vm522_vm6 = vcmask 261120   ;;  %v7589_v32 = vmov 32.0   ;;  %vm178_vm8 = vcmask 64512  }
   0x2   :  { %12102 = sst [smem:[#allocation3_spill]] %s12064_s2  ;;  %v88_v14 = vand.u32 127, %v87_v13  ;;  %6851 = vrcp.f32 %v7589_v32  ;;  %vm366_vm15 = vcmask 523264  }
   0x3   :  { %12103 = sst [smem:[#allocation4_spill]] %s12065_s14 }
   0x4   :  { %12104 = sst [smem:[#allocation5_spill]] %s12066_s5 }
   0x5   :  { %12105 = sst [smem:[#allocation6_spill]] %s12067_s1 }
   0x6   :  { %12106 = sst [smem:[#allocation7_spill]] %s12068_s15 }
   0x7   :  { %12107 = sst [smem:[#allocation8_spill]] %s12069_s3 }
   0x8   :  { %12108 = sst [smem:[#allocation9_spill]] %s12070_s6  ;;  %v6852_v33 = vpop.eup %6851 }
   0x9   :  { %12109 = sst [smem:[#allocation10_spill]] %s12071_s7  ;;  %v705_v34 = vmul.f32 32.0, %v6852_v33  ;;  %vm709_vm7 = vweird.f32 %v6852_v33 }
   0xa   :  { %12110 = sst [smem:[#allocation11_spill]] %s12072_s4  ;;  %s12099_s4 = smov 64  }
   0xb   :  { %12111 = sst [smem:[#allocation12_spill]] %s12073_s16  ;;  %v706_v35 = vsub.f32 1.0, %v705_v34 }
   0xc   :  { %s12112_s6 = sld [smem:[#allocation2_spill]] }
   0xd   :  { %s12113_s0 = sld [smem:[#allocation3_spill]]  ;;  %v707_v36 = vmul.f32 %v6852_v33, %v706_v35 }
   0xe   :  { %s12114_s3 = sld [smem:[#allocation5_spill]] }
   0xf   :  { %v708_v37 = vadd.f32 %v6852_v33, %v707_v36  ;;  %s12115_s5 = sld [smem:[#allocation6_spill]] }
  0x10   :  { %s12116_s2 = sld [smem:[#allocation8_spill]] }
  0x11   :  { %v7802_v38 = vsel %vm709_vm7, %v6852_v33, %v708_v37  ;;  %s12117_s1 = sld [smem:[#allocation9_spill]] }
  0x12   :  { %v7732_v1 = vld [vmem:[%s12112_s6] sm:$0xff]  ;;  %v7737_v2 = vld [vmem:[%s12112_s6 + $0x10] sm:$0xff]  ;;  %v7757_v7 = vld [vmem:[%s12112_s6 + $0x8] sm:$0xff]  ;;  %s12118_s29 = sld [smem:[#allocation10_spill]] }
  0x13   :  { %90 = vperm.xlu0 %6758, %v7732_v1   ;;  %96 = vperm.xlu1 %6759, %v7737_v2   ;;  %v120_v3 = vld [vmem:[%s12113_s0 + $0x38] sm:$0xf]  ;;  %v119_v4 = vld [vmem:[%s12113_s0 + $0x30] sm:$0xff]  ;;  %v118_v5 = vld [vmem:[%s12113_s0 + $0x28] sm:$0xff]  ;;  %vm466_vm9 = vcmp.le.s32.totalorder %v7732_v1, 0  ;;  %vm467_vm10 = vcmp.le.s32.totalorder %v7757_v7, 0 }
  0x14   :  { %6208 = vmatpush.msk.msra.mxu0 %vm134_vm0, %v120_v3  ;;  %v117_v6 = vld [vmem:[%s12113_s0 + $0x20] sm:$0xff]  ;;  %v7762_v8 = vld [vmem:[%s12112_s6 + $0x18] sm:$0xff]  ;;  %v115_v10 = vld [vmem:[%s12113_s0 + $0x10] sm:$0xff]  ;;  %vm468_vm11 = vcmp.le.s32.totalorder %v7737_v2, 0  ;;  %s12119_s28 = sld [smem:[#allocation12_spill]] }
  0x15   :  { %v116_v9 = vld [vmem:[%s12113_s0 + $0x18] sm:$0xff]  ;;  %v114_v11 = vld [vmem:[%s12113_s0 + $0x8] sm:$0xff]  ;;  %v113_v12 = vld [vmem:[%s12113_s0] sm:$0xff]  ;;  %vm469_vm12 = vcmp.le.s32.totalorder %v7762_v8, 0  ;;  %s12120_s0 = sld [smem:[#allocation4_spill]] }
  0x16   :  { %147 = vmatpush.msra.mxu0 %v119_v4  ;;  %v176_v40 = vld [vmem:[%s12114_s3 + $0x8] sm:$0xff]  ;;  %v167_v41 = vld [vmem:[%s12115_s5] sm:$0xff]  ;;  %v177_v42 = vld [vmem:[%s12114_s3 + $0x10] sm:$0xff]  ;;  %v6252_v1 = vsel %vm469_vm12, 1.0, %v7588_v16  ;;  %s12121_s27 = sld [smem:[#allocation7_spill]] }
  0x17   :  { %235 = vmatpush.msra.mxu2 %v176_v40  ;;  %v171_v44 = vcvt.s32.f32 %v167_v41  ;;  %264 = vmatpush.msra.mxu3 %v177_v42  ;;  %v175_v45 = vld [vmem:[%s12114_s3] sm:$0xff]  ;;  %v168_v47 = vld [vmem:[%s12115_s5 + $0x8] sm:$0xff]  ;;  %v169_v54 = vld [vmem:[%s12115_s5 + $0x10] sm:$0xff] }
  0x18   :  { %148 = vmatpush.msra.mxu0 %v118_v5  ;;  %206 = vmatpush.msra.mxu1 %v175_v45  ;;  %v172_v50 = vcvt.s32.f32 %v168_v47  ;;  %v173_v57 = vcvt.s32.f32 %v169_v54  ;;  %v352_v2 = vld [vmem:[%s12116_s2 + $0xf0] sm:$0xff]  ;;  %v333_v33 = vld [vmem:[%s12116_s2 + $0x58] sm:$0xff]  ;;  %v343_v34 = vld [vmem:[%s12116_s2 + $0xa8] sm:$0xff] }
  0x19   :  { %6217 = vmatmul.msk.f32.vlgmr.msra.gmra.mxu2 %vm178_vm8, %v171_v44  ;;  %6221 = vmatmul.msk.f32.vlgmr.msra.gmra.mxu3 %vm178_vm8, %v171_v44  ;;  %v344_v32 = vld [vmem:[%s12116_s2 + $0xb0] sm:$0xff]  ;;  %v361_v35 = vld [vmem:[%s12116_s2 + $0x138] sm:$0xff]  ;;  %v342_v37 = vld [vmem:[%s12116_s2 + $0xa0] sm:$0xff] }
  0x1a   :  { %149 = vmatpush.msra.mxu0 %v117_v6  ;;  %6213 = vmatmul.msk.f32.vlgmr.msra.gmra.mxu1 %vm178_vm8, %v171_v44  ;;  %v170_v6 = vld [vmem:[%s12115_s5 + $0x18] sm:$0xff]  ;;  %v332_v36 = vld [vmem:[%s12116_s2 + $0x50] sm:$0xff]  ;;  %v7936_v40 = vld [vmem:[%s12116_s2 + $0x128] sm:$0xff]  ;;  %s12123_s5 = smov 64  }
  0x1b   :  { %93 = vperm.xlu0 %6758, %v7757_v7   ;;  %99 = vperm.xlu1 %6759, %v7762_v8   ;;  %v353_v7 = vld [vmem:[%s12116_s2 + $0xf8] sm:$0xff]  ;;  %v350_v8 = vld [vmem:[%s12116_s2 + $0xe0] sm:$0xff]  ;;  %v331_v41 = vld [vmem:[%s12116_s2 + $0x48] sm:$0xff] }
  0x1c   :  { %150 = vmatpush.msra.mxu0 %v116_v9  ;;  %v174_v9 = vcvt.s32.f32 %v170_v6  ;;  %408 = vmatpush.msrb.mxu2 %v353_v7  ;;  %v341_v42 = vld [vmem:[%s12116_s2 + $0x98] sm:$0xff]  ;;  %v278_v44 = vld [vmem:[%s12117_s1] sm:$0x7]  ;;  %s7591_s1 = smov 96  }
  0x1d   :  { %v7950_v45 = vld [vmem:[%s12116_s2 + $0x120] sm:$0xff]  ;;  %v329_v54 = vld [vmem:[%s12116_s2 + $0x38] sm:$0xff] }
  0x1e   :  { %151 = vmatpush.msra.mxu0 %v115_v10  ;;  %v6249_v10 = vsel %vm466_vm9, 1.0, %v7588_v16  ;;  %409 = vmatpush.msrb.mxu2 %v352_v2  ;;  %v330_v47 = vld [vmem:[%s12116_s2 + $0x40] sm:$0xff]  ;;  %v8010_v6 = vld [vmem:[%s12118_s29 + $0x38] sm:$0xff] }
  0x1f   :  { %v322_v7 = vld [vmem:[%s12116_s2] sm:$0xff] }
  0x20   :  { %152 = vmatpush.msra.mxu0 %v114_v11  ;;  %v478_v11 = vmul.f32 -1e+09, %v6249_v10 }
  0x21   :  { %6218 = vmatmul.msk.f32.gmra.mxu2 %vm178_vm8, %v172_v50  ;;  %6222 = vmatmul.msk.f32.gmra.mxu3 %vm178_vm8, %v172_v50 }
  0x22   :  { %153 = vmatpush.msra.mxu0 %v113_v12  ;;  %6214 = vmatmul.msk.f32.gmra.mxu1 %vm178_vm8, %v172_v50  ;;  %v6250_v12 = vsel %vm467_vm10, 1.0, %v7588_v16  ;;  %v7959_v50 = vperm.slane %v278_v44, 1 }
  0x23   :  { %v479_v13 = vmul.f32 -1e+09, %v6250_v12  ;;  %v8019_v12 = vld [vmem:[%s12118_s29 + $0x28] sm:$0xff] }
  0x24   :  { %445 = vmatpush.msrb.mxu0 %v361_v35 }
  0x29   :  { %6219 = vmatmul.msk.f32.gmra.mxu2 %vm178_vm8, %v173_v57  ;;  %6223 = vmatmul.msk.f32.gmra.mxu3 %vm178_vm8, %v173_v57 }
  0x2a   :  { %6215 = vmatmul.msk.f32.gmra.mxu1 %vm178_vm8, %v173_v57  ;;  %v328_v57 = vld [vmem:[%s12116_s2 + $0x30] sm:$0xff] }
  0x31   :  { %6220 = vmatmul.msk.f32.gmra.mxu2 %vm178_vm8, %v174_v9  ;;  %6224 = vmatmul.msk.f32.gmra.mxu3 %vm178_vm8, %v174_v9 }
  0x32   :  { %6216 = vmatmul.msk.f32.gmra.mxu1 %vm178_vm8, %v174_v9  ;;  %v325_v9 = vld [vmem:[%s12116_s2 + $0x18] sm:$0xff] }
  0x85   :  { %v91_v15 = vpop.permute.xlu0 %90  ;;  %v97_v19 = vpop.permute.xlu1 %96 }
  0x86   :  { %vm101_vm2 = vcmp.eq.s32.totalorder %v91_v15, %v88_v14  ;;  %vm103_vm4 = vcmp.eq.s32.totalorder %v97_v19, %v88_v14  ;;  %v349_v19 = vld [vmem:[%s12116_s2 + $0xd8] sm:$0xff] }
  0x87   :  { %v6204_v17 = vsel %vm101_vm2, 1.0, %v7588_v16  ;;  %v6206_v21 = vsel %vm103_vm4, 1.0, %v7588_v16 }
  0x88   :  { %6209 = vmatmul.msk.f32.vlgmr.msra.gmra.mxu0 %vm121_vm1, %v6204_v17  ;;  %v481_v17 = vmul.f32 -1e+09, %v6252_v1  ;;  %v323_v1 = vld [vmem:[%s12116_s2 + $0x8] sm:$0xff] }
  0x8d   :  { %v94_v18 = vpop.permute.xlu0 %93  ;;  %v100_v22 = vpop.permute.xlu1 %99 }
  0x8e   :  { %vm102_vm3 = vcmp.eq.s32.totalorder %v94_v18, %v88_v14  ;;  %vm104_vm5 = vcmp.eq.s32.totalorder %v100_v22, %v88_v14  ;;  %v6251_v14 = vsel %vm468_vm11, 1.0, %v7588_v16  ;;  %v351_v18 = vld [vmem:[%s12116_s2 + $0xe8] sm:$0xff] }
  0x8f   :  { %v6205_v20 = vsel %vm102_vm3, 1.0, %v7588_v16  ;;  %v6207_v23 = vsel %vm104_vm5, 1.0, %v7588_v16  ;;  %v480_v15 = vmul.f32 -1e+09, %v6251_v14  ;;  %410 = vmatpush.msrb.mxu2 %v351_v18  ;;  %v347_v22 = vld [vmem:[%s12116_s2 + $0xc8] sm:$0xff]  ;;  %v8026_v14 = vperm.slane %v278_v44, 0 }
  0x90   :  { %6210 = vmatmul.msk.f32.gmra.mxu0 %vm121_vm1, %v6205_v20  ;;  %v348_v20 = vld [vmem:[%s12116_s2 + $0xd0] sm:$0xff] }
  0x91   :  { %411 = vmatpush.msrb.mxu2 %v350_v8 }
  0x93   :  { %412 = vmatpush.msrb.mxu2 %v349_v19 }
  0x95   :  { %413 = vmatpush.msrb.mxu2 %v348_v20  ;;  %v520_v20 = vld [vmem:[%s12118_s29 + $0x30] sm:$0xff] }
  0x97   :  { %414 = vmatpush.msrb.mxu2 %v347_v22  ;;  %v208_v10 = vpop.f32.mrf.mxu1 }
  0x98   :  { %6211 = vmatmul.msk.f32.gmra.mxu0 %vm121_vm1, %v6206_v21  ;;  %v337_v21 = vld [vmem:[%s12116_s2 + $0x78] sm:$0xff]  ;;  %vm286_vm3 = vcmp.eq.f32.partialorder %v208_v10, %v8026_v14  ;;  %v6810_v10 = vld [vmem:[%s12120_s0] ss:$0 sm:$0xff] }
  0x99   :  { %379 = vmatpush.msrb.mxu1 %v337_v21  ;;  %v518_v21 = vld [vmem:[%s12118_s29 + $0x20] sm:$0xff] }
  0x9f   :  { %v211_v8 = vpop.f32.mrf.mxu1 }
  0xa0   :  { %6212 = vmatmul.msk.f32.gmra.mxu0 %vm121_vm1, %v6207_v23  ;;  %v336_v23 = vld [vmem:[%s12116_s2 + $0x70] sm:$0xff]  ;;  %vm289_vm7 = vcmp.eq.f32.partialorder %v211_v8, %v8026_v14 }
  0xa1   :  { %380 = vmatpush.msrb.mxu1 %v336_v23  ;;  %v516_v23 = vld [vmem:[%s12118_s29 + $0x10] sm:$0xff] }
 0x105   :  { %v7786_v24 = vpop.f32.mrf.mxu0 }
 0x106   :  { %v692_v25 = vsel %vm522_vm6, %v7786_v24, 0.0 }
 0x107   :  { %693 = vadd.xlane.f32.xlu2 %v692_v25  ;;  %v346_v25 = vld [vmem:[%s12116_s2 + $0xc0] sm:$0xff] }
 0x108   :  { %415 = vmatpush.msrb.mxu2 %v346_v25 }
 0x10d   :  { %v7790_v26 = vpop.f32.mrf.mxu0 }
 0x10e   :  { %v695_v27 = vsel %vm522_vm6, %v7790_v26, 0.0 }
 0x10f   :  { %696 = vadd.xlane.f32.xlu2 %v695_v27  ;;  %v335_v27 = vld [vmem:[%s12116_s2 + $0x68] sm:$0xff] }
 0x110   :  { %381 = vmatpush.msrb.mxu1 %v335_v27  ;;  %v514_v27 = vld [vmem:[%s12118_s29] sm:$0xff] }
 0x115   :  { %v7794_v28 = vpop.f32.mrf.mxu0 }
 0x116   :  { %v698_v29 = vsel %vm522_vm6, %v7794_v28, 0.0 }
 0x117   :  { %699 = vadd.xlane.f32.xlu0 %v698_v29  ;;  %v345_v29 = vld [vmem:[%s12116_s2 + $0xb8] sm:$0xff] }
 0x118   :  { %416 = vmatpush.msrb.mxu2 %v345_v29 }
 0x11a   :  { %417 = vmatpush.msrb.mxu2 %v344_v32 }
 0x11c   :  { %418 = vmatpush.msrb.mxu2 %v343_v34 }
 0x11d   :  { %v7798_v30 = vpop.f32.mrf.mxu0 }
 0x11e   :  { %v701_v31 = vsel %vm522_vm6, %v7798_v30, 0.0  ;;  %419 = vmatpush.msrb.mxu2 %v342_v37 }
 0x11f   :  { %702 = vadd.xlane.f32.xlu1 %v701_v31  ;;  %v334_v31 = vld [vmem:[%s12116_s2 + $0x60] sm:$0xff] }
 0x120   :  { %382 = vmatpush.msrb.mxu1 %v334_v31  ;;  %420 = vmatpush.msrb.mxu2 %v341_v42  ;;  %v214_v31 = vpop.f32.mrf.mxu1  ;;  %v802_v42 = vld [vmem:[%s12119_s28 + $0x8] sm:$0xff] }
 0x121   :  { %vm292_vm10 = vcmp.eq.f32.partialorder %v214_v31, %v8026_v14 }
 0x122   :  { %383 = vmatpush.msrb.mxu1 %v333_v33 }
 0x124   :  { %384 = vmatpush.msrb.mxu1 %v332_v36 }
 0x126   :  { %385 = vmatpush.msrb.mxu1 %v331_v41 }
 0x128   :  { %386 = vmatpush.msrb.mxu1 %v330_v47 }
 0x12a   :  { %387 = vmatpush.msrb.mxu1 %v329_v54 }
 0x12c   :  { %388 = vmatpush.msrb.mxu1 %v328_v57 }
 0x17a   :  { %v694_v39 = vpop.xlane.xlu2 %693 }
 0x17b   :  { %v711_v43 = vmul.f32 %v7802_v38, %v694_v39  ;;  %v360_v39 = vld [vmem:[%s12116_s2 + $0x130] sm:$0xff] }
 0x17c   :  { %446 = vmatpush.msrb.mxu0 %v360_v39 }
 0x17d   :  { %v7818_v46 = vsub.f32 %v7786_v24, %v711_v43  ;;  %v237_v43 = vpop.f32.mrf.mxu2 }
 0x17e   :  { %447 = vmatpush.msrb.mxu0 %v7936_v40  ;;  %vm287_vm13 = vcmp.eq.f32.partialorder %v237_v43, %v7959_v50 }
 0x17f   :  { %v719_v48 = vmul.f32 %v7818_v46, %v7818_v46 }
 0x180   :  { %448 = vmatpush.msrb.mxu0 %v7950_v45 }
 0x181   :  { %v723_v49 = vsel %vm522_vm6, %v719_v48, 0.0  ;;  %v340_v48 = vld [vmem:[%s12116_s2 + $0x90] sm:$0xff] }
 0x182   :  { %724 = vadd.xlane.f32.xlu2 %v723_v49  ;;  %v697_v51 = vpop.xlane.xlu2 %696  ;;  %v266_v49 = vpop.f32.mrf.mxu3  ;;  %421 = vmatpush.msrb.mxu2 %v340_v48 }
 0x183   :  { %v712_v52 = vmul.f32 %v7802_v38, %v697_v51  ;;  %v7961_v51 = vperm.slane %v278_v44, 2  ;;  %v801_v44 = vld [vmem:[%s12119_s28] sm:$0xff] }
 0x185   :  { %v7831_v53 = vsub.f32 %v7790_v26, %v712_v52  ;;  %v7966_v52 = vld [vmem:[%s12116_s2 + $0x118] sm:$0xff]  ;;  %vm288_vm14 = vcmp.eq.f32.partialorder %v266_v49, %v7961_v51 }
 0x186   :  { %449 = vmatpush.msrb.mxu0 %v7966_v52 }
 0x187   :  { %v720_v55 = vmul.f32 %v7831_v53, %v7831_v53 }
 0x189   :  { %v726_v56 = vsel %vm522_vm6, %v720_v55, 0.0  ;;  %v339_v55 = vld [vmem:[%s12116_s2 + $0x88] sm:$0xff] }
 0x18a   :  { %727 = vadd.xlane.f32.xlu2 %v726_v56  ;;  %v700_v58 = vpop.xlane.xlu0 %699  ;;  %v7978_v56 = vld [vmem:[%s12116_s2 + $0x110] sm:$0xff]  ;;  %422 = vmatpush.msrb.mxu2 %v339_v55 }
 0x18b   :  { %v713_v59 = vmul.f32 %v7802_v38, %v700_v58  ;;  %v338_v58 = vld [vmem:[%s12116_s2 + $0x80] sm:$0xff]  ;;  %450 = vmatpush.msrb.mxu0 %v7978_v56 }
 0x18c   :  { %423 = vmatpush.msrb.mxu2 %v338_v58 }
 0x18d   :  { %v7844_v60 = vsub.f32 %v7794_v28, %v713_v59  ;;  %v7992_v59 = vld [vmem:[%s12116_s2 + $0x108] sm:$0xff] }
 0x18e   :  { %451 = vmatpush.msrb.mxu0 %v7992_v59  ;;  %6739 = vmatpush.msra.mxu2 %v361_v35 }
 0x18f   :  { %v721_v61 = vmul.f32 %v7844_v60, %v7844_v60 }
 0x190   :  { %6740 = vmatpush.msra.mxu2 %v360_v39  ;;  %v804_v39 = vld [vmem:[%s12119_s28 + $0x18] sm:$0xff] }
 0x191   :  { %v729_v62 = vsel %vm522_vm6, %v721_v61, 0.0  ;;  %v327_v61 = vld [vmem:[%s12116_s2 + $0x28] sm:$0xff] }
 0x192   :  { %730 = vadd.xlane.f32.xlu2 %v729_v62  ;;  %v703_v63 = vpop.xlane.xlu1 %702  ;;  %v354_v62 = vld [vmem:[%s12116_s2 + $0x100] sm:$0xff]  ;;  %389 = vmatpush.msrb.mxu1 %v327_v61 }
 0x193   :  { %v714_v0 = vmul.f32 %v7802_v38, %v703_v63  ;;  %v7590_v63 = vmov 1.0   ;;  %452 = vmatpush.msrb.mxu0 %v354_v62  ;;  %6741 = vmatpush.msra.mxu2 %v7936_v40 }
 0x194   :  { %6241 = vmatmul.msk.f32.vlgmr.msrb.gmra.mxu2 %vm287_vm13, %v7590_v63 }
 0x195   :  { %v7854_v3 = vsub.f32 %v7798_v30, %v714_v0  ;;  %v326_v0 = vld [vmem:[%s12116_s2 + $0x20] sm:$0xff]  ;;  %558 = vmatpush.msra.mxu0 %v8010_v6  ;;  %6742 = vmatpush.msra.mxu2 %v7950_v45 }
 0x196   :  { %390 = vmatpush.msrb.mxu1 %v326_v0 }
 0x197   :  { %v722_v4 = vmul.f32 %v7854_v3, %v7854_v3  ;;  %559 = vmatpush.msra.mxu0 %v8019_v12  ;;  %6743 = vmatpush.msra.mxu2 %v7966_v52 }
 0x198   :  { %391 = vmatpush.msrb.mxu1 %v325_v9 }
 0x199   :  { %v732_v5 = vsel %vm522_vm6, %v722_v4, 0.0  ;;  %v6227_v4 = vsel %vm288_vm14, 1.0, %v7588_v16  ;;  %6744 = vmatpush.msra.mxu2 %v7978_v56 }
 0x19a   :  { %733 = vadd.xlane.f32.xlu2 %v732_v5  ;;  %v240_v5 = vpop.f32.mrf.mxu2  ;;  %6245 = vmatmul.msk.f32.vlgmr.msrb.gmra.mxu0 %vm366_vm15, %v6227_v4 }
 0x19b   :  { %vm290_vm1 = vcmp.eq.f32.partialorder %v240_v5, %v7959_v50  ;;  %6745 = vmatpush.msra.mxu2 %v7992_v59 }
 0x19c   :  { %6242 = vmatmul.msk.f32.gmra.mxu2 %vm290_vm1, %v7590_v63 }
 0x19d   :  { %6746 = vmatpush.msra.mxu2 %v354_v62 }
 0x19f   :  { %538 = vmatpush.msrb.mxu2 %v520_v20 }
 0x1a1   :  { %539 = vmatpush.msrb.mxu2 %v518_v21 }
 0x1a2   :  { %v243_v18 = vpop.f32.mrf.mxu2 }
 0x1a3   :  { %vm293_vm4 = vcmp.eq.f32.partialorder %v243_v18, %v7959_v50  ;;  %540 = vmatpush.msrb.mxu2 %v516_v23 }
 0x1a4   :  { %6243 = vmatmul.msk.f32.gmra.mxu2 %vm293_vm4, %v7590_v63 }
 0x1a5   :  { %541 = vmatpush.msrb.mxu2 %v514_v27 }
 0x1aa   :  { %v246_v25 = vpop.f32.mrf.mxu2 }
 0x1ab   :  { %vm296_vm9 = vcmp.eq.f32.partialorder %v246_v25, %v7959_v50 }
 0x1ac   :  { %6244 = vmatmul.msk.f32.gmra.mxu2 %vm296_vm9, %v7590_v63 }
 0x1c3   :  { %482 = vxpose.xlu2.b32.start [1/4] (short) (narrow) %v478_v11, 8  ;;  %v269_v11 = vpop.f32.mrf.mxu3 }
 0x1c4   :  { %vm291_vm2 = vcmp.eq.f32.partialorder %v269_v11, %v7961_v51 }
 0x1c5   :  { %v6230_v2 = vsel %vm291_vm2, 1.0, %v7588_v16 }
 0x1c6   :  { %6246 = vmatmul.msk.f32.gmra.mxu0 %vm366_vm15, %v6230_v2 }
 0x1cb   :  { %483 = vxpose.xlu2.b32.cont [2/4] (short) (narrow) %v479_v13, 8  ;;  %v324_v13 = vld [vmem:[%s12116_s2 + $0x10] sm:$0xff]  ;;  %v272_v19 = vpop.f32.mrf.mxu3 }
 0x1cc   :  { %392 = vmatpush.msrb.mxu1 %v324_v13  ;;  %vm294_vm5 = vcmp.eq.f32.partialorder %v272_v19, %v7961_v51 }
 0x1cd   :  { %v6233_v22 = vsel %vm294_vm5, 1.0, %v7588_v16 }
 0x1ce   :  { %393 = vmatpush.msrb.mxu1 %v323_v1  ;;  %6247 = vmatmul.msk.f32.gmra.mxu0 %vm366_vm15, %v6233_v22 }
 0x1d0   :  { %394 = vmatpush.msrb.mxu1 %v322_v7  ;;  %v6811_v7 = vld [vmem:[%s12121_s27] ss:$0 sm:$0xff] }
 0x1d1   :  { %6237 = vmatmul.msk.f32.vlgmr.msrb.gmra.mxu1 %vm286_vm3, %v7590_v63 }
 0x1d2   :  { %922 = vmatpush.msra.mxu1 %v520_v20 }
 0x1d3   :  { %484 = vxpose.xlu2.b32.cont [3/4] (short) (narrow) %v480_v15, 8  ;;  %v517_v15 = vld [vmem:[%s12118_s29 + $0x18] sm:$0xff]  ;;  %v275_v32 = vpop.f32.mrf.mxu3 }
 0x1d4   :  { %560 = vmatpush.msra.mxu0 %v517_v15  ;;  %923 = vmatpush.msra.mxu1 %v518_v21  ;;  %vm297_vm11 = vcmp.eq.f32.partialorder %v275_v32, %v7961_v51 }
 0x1d5   :  { %v6236_v33 = vsel %vm297_vm11, 1.0, %v7588_v16  ;;  %v803_v16 = vld [vmem:[%s12119_s28 + $0x10] sm:$0xff] }
 0x1d6   :  { %924 = vmatpush.msra.mxu1 %v516_v23  ;;  %6248 = vmatmul.msk.f32.vlgmr.msra.gmra.mxu2 %vm366_vm15, %v6236_v33 }
 0x1d7   :  { %951 = vmatpush.msra.mxu2 %v8010_v6 }
 0x1d8   :  { %925 = vmatpush.msra.mxu1 %v514_v27 }
 0x1d9   :  { %6238 = vmatmul.msk.f32.gmra.mxu1 %vm289_vm7, %v7590_v63  ;;  %952 = vmatpush.msra.mxu2 %v8019_v12 }
 0x1db   :  { %485 = vxpose.xlu2.b32.end [4/4] (short) (narrow) %v481_v17, 8  ;;  %v515_v17 = vld [vmem:[%s12118_s29 + $0x8] sm:$0xff]  ;;  %953 = vmatpush.msra.mxu2 %v517_v15 }
 0x1dc   :  { %561 = vmatpush.msra.mxu0 %v515_v17 }
 0x1dd   :  { %954 = vmatpush.msra.mxu2 %v515_v17 }
 0x1de   :  { %833 = vmatpush.msrb.mxu0 %v804_v39 }
 0x1e0   :  { %834 = vmatpush.msrb.mxu0 %v803_v16 }
 0x1e1   :  { %6239 = vmatmul.msk.f32.gmra.mxu1 %vm292_vm10, %v7590_v63 }
 0x1e2   :  { %835 = vmatpush.msrb.mxu0 %v802_v42 }
 0x1e4   :  { %836 = vmatpush.msrb.mxu0 %v801_v44 }
 0x1f5   :  { %v725_v29 = vpop.xlane.xlu2 %724 }
 0x1f6   :  { %v735_v34 = vmul.f32 %v725_v29, %v7802_v38 }
 0x1f8   :  { %v739_v36 = vadd.f32 1e-06, %v735_v34 }
 0x1fa   :  { %6853 = vrsqrt.f32 %v739_v36  ;;  %vm749_vm13 = vweird.f32 %v739_v36 }
 0x1fd   :  { %v728_v35 = vpop.xlane.xlu2 %727 }
 0x1fe   :  { %v736_v37 = vmul.f32 %v728_v35, %v7802_v38 }
 0x200   :  { %v740_v41 = vadd.f32 1e-06, %v736_v37  ;;  %v6854_v43 = vpop.eup %6853 }
 0x201   :  { %v744_v47 = vmul.f32 %v6854_v43, %v739_v36  ;;  %vm750_vm12 = vweird.f32 %v6854_v43 }
 0x202   :  { %6855 = vrsqrt.f32 %v740_v41  ;;  %vm751_vm14 = vmor %vm749_vm13, %vm750_vm12  ;;  %vm759_vm2 = vweird.f32 %v740_v41 }
 0x203   :  { %v745_v49 = vmul.f32 %v6854_v43, %v744_v47 }
 0x205   :  { %v731_v40 = vpop.xlane.xlu2 %730  ;;  %v746_v54 = vmul.f32 0.5, %v745_v49 }
 0x206   :  { %v737_v45 = vmul.f32 %v731_v40, %v7802_v38  ;;  %v6813_v40 = vld [vmem:[%s12074_s17] ss:$0 sm:$0xff] }
 0x207   :  { %v747_v57 = vsub.f32 1.5, %v746_v54  ;;  %v217_v54 = vpop.f32.mrf.mxu1 }
 0x208   :  { %v741_v48 = vadd.f32 1e-06, %v737_v45  ;;  %v6856_v51 = vpop.eup %6855  ;;  %vm295_vm12 = vcmp.eq.f32.partialorder %v217_v54, %v8026_v14 }
 0x209   :  { %v754_v55 = vmul.f32 %v6856_v51, %v740_v41  ;;  %v748_v61 = vmul.f32 %v6854_v43, %v747_v57  ;;  %vm760_vm1 = vweird.f32 %v6856_v51  ;;  %6240 = vmatmul.msk.f32.gmra.mxu1 %vm295_vm12, %v7590_v63 }
 0x20a   :  { %6857 = vrsqrt.f32 %v741_v48  ;;  %vm761_vm3 = vmor %vm759_vm2, %vm760_vm1  ;;  %vm769_vm5 = vweird.f32 %v741_v48 }
 0x20b   :  { %v755_v58 = vmul.f32 %v6856_v51, %v754_v55  ;;  %v752_v4 = vsel %vm751_vm14, %v6854_v43, %v748_v61 }
 0x20c   :  { %v783_v11 = vmul.f32 %v752_v4, %v7818_v46 }
 0x20d   :  { %v734_v50 = vpop.xlane.xlu2 %733  ;;  %v756_v62 = vmul.f32 0.5, %v755_v58 }
 0x20e   :  { %v738_v52 = vmul.f32 %v734_v50, %v7802_v38  ;;  %v790_v17 = vmul.f32 %v6810_v10, %v783_v11 }
 0x20f   :  { %v757_v5 = vsub.f32 1.5, %v756_v62 }
 0x210   :  { %v742_v56 = vadd.f32 1e-06, %v738_v52  ;;  %v6858_v59 = vpop.eup %6857  ;;  %v797_v46 = vadd.f32 %v6811_v7, %v790_v17  ;;  %v585_v17 = vld [vmem:[%s12075_s8 + $0x8] sm:$0xff] }
 0x211   :  { %v764_v0 = vmul.f32 %v6858_v59, %v741_v48  ;;  %v758_v12 = vmul.f32 %v6856_v51, %v757_v5  ;;  %vm770_vm4 = vweird.f32 %v6858_v59 }
 0x212   :  { %6859 = vrsqrt.f32 %v742_v56  ;;  %vm771_vm7 = vmor %vm769_vm5, %vm770_vm4  ;;  %vm779_vm10 = vweird.f32 %v742_v56 }
 0x213   :  { %v765_v6 = vmul.f32 %v6858_v59, %v764_v0  ;;  %v762_v8 = vsel %vm761_vm3, %v6856_v51, %v758_v12 }
 0x214   :  { %v784_v19 = vmul.f32 %v762_v8, %v7831_v53 }
 0x215   :  { %v766_v13 = vmul.f32 0.5, %v765_v6 }
 0x216   :  { %v791_v22 = vmul.f32 %v6810_v10, %v784_v19 }
 0x217   :  { %v767_v2 = vsub.f32 1.5, %v766_v13  ;;  %v8112_v37 = vpop.f32.mrf.mxu0  ;;  %v8155_v6 = vpop.f32.mrf.mxu2  ;;  %v584_v13 = vld [vmem:[%s12075_s8] sm:$0xff] }
 0x218   :  { %v6860_v9 = vpop.eup %6859  ;;  %v798_v27 = vadd.f32 %v6811_v7, %v791_v22  ;;  %v588_v22 = vld [vmem:[%s12075_s8 + $0x20] sm:$0xff] }
 0x219   :  { %v774_v15 = vmul.f32 %v6860_v9, %v742_v56  ;;  %v768_v20 = vmul.f32 %v6858_v59, %v767_v2  ;;  %vm780_vm9 = vweird.f32 %v6860_v9 }
 0x21a   :  { %vm781_vm11 = vmor %vm779_vm10, %vm780_vm9 }
 0x21b   :  { %v775_v18 = vmul.f32 %v6860_v9, %v774_v15  ;;  %v772_v25 = vsel %vm771_vm7, %v6858_v59, %v768_v20 }
 0x21c   :  { %v785_v29 = vmul.f32 %v772_v25, %v7844_v60 }
 0x21d   :  { %v776_v21 = vmul.f32 0.5, %v775_v18  ;;  %v586_v18 = vld [vmem:[%s12075_s8 + $0x10] sm:$0xff] }
 0x21e   :  { %v792_v53 = vmul.f32 %v6810_v10, %v785_v29 }
 0x21f   :  { %v777_v23 = vsub.f32 1.5, %v776_v21 }
 0x220   :  { %v799_v33 = vadd.f32 %v6811_v7, %v792_v53  ;;  %v620_v53 = vld [vmem:[%s12076_s9 + $0x20] sm:$0xff] }
 0x221   :  { %v778_v31 = vmul.f32 %v6860_v9, %v777_v23 }
 0x223   :  { %v782_v32 = vsel %vm781_vm11, %v6860_v9, %v778_v31  ;;  %v8157_v9 = vpop.f32.mrf.mxu2  ;;  %v622_v31 = vld [vmem:[%s12076_s9 + $0x30] sm:$0xff] }
 0x224   :  { %v786_v34 = vmul.f32 %v782_v32, %v7854_v3 }
 0x226   :  { %v793_v35 = vmul.f32 %v6810_v10, %v786_v34 }
 0x228   :  { %v800_v36 = vadd.f32 %v6811_v7, %v793_v35  ;;  %v618_v35 = vld [vmem:[%s12076_s9 + $0x10] sm:$0xff] }
 0x22b   :  { %v8161_v11 = vpop.f32.mrf.mxu2 }
 0x233   :  { %v8169_v15 = vpop.f32.mrf.mxu2 }
 0x243   :  { %v8114_v60 = vpop.f32.mrf.mxu0 }
 0x24b   :  { %v8116_v39 = vpop.f32.mrf.mxu0 }
 0x24e   :  { %v8159_v10 = vpop.f32.mrf.mxu1 }
 0x256   :  { %v8163_v12 = vpop.f32.mrf.mxu1 }
 0x259   :  { %v8177_v7 = vpop.f32.mrf.mxu2 }
 0x25c   :  { %v498_v1 = vpop.trf.xlu2 }
 0x25d   :  { %6253 = vmatmul.msk.f32.vlgmr.msrb.gmra.mxu2 %vm522_vm6, %v498_v1  ;;  %6254 = vmatmul.msk.f32.vlgmr.msra.gmra.mxu0 %vm522_vm6, %v498_v1 }
 0x25e   :  { %v8171_v1 = vpop.f32.mrf.mxu1 }
 0x265   :  { %6255 = vmatmul.msk.f32.vlgmr.msrb.gmra.mxu0 %vm522_vm6, %v797_v46  ;;  %v587_v46 = vld [vmem:[%s12075_s8 + $0x18] sm:$0xff] }
 0x26d   :  { %6256 = vmatmul.msk.f32.gmra.mxu0 %vm522_vm6, %v798_v27  ;;  %v589_v27 = vld [vmem:[%s12075_s8 + $0x28] sm:$0xff] }
 0x275   :  { %6257 = vmatmul.msk.f32.gmra.mxu0 %vm522_vm6, %v799_v33  ;;  %v590_v33 = vld [vmem:[%s12075_s8 + $0x30] sm:$0xff] }
 0x27d   :  { %6258 = vmatmul.msk.f32.gmra.mxu0 %vm522_vm6, %v800_v36 }
 0x286   :  { %v8179_v2 = vpop.f32.mrf.mxu1 }
 0x2da   :  { %v8118_v16 = vpop.f32.mrf.mxu0 }
 0x2e0   :  { %v8185_v8 = vpop.f32.mrf.mxu2 }
 0x2e2   :  { %v838_v41 = vpop.f32.mrf.mxu0 }
 0x2e3   :  { %v8123_v3 = vadd.f32 %v6813_v40, %v838_v41  ;;  %v623_v41 = vld [vmem:[%s12076_s9 + $0x38] sm:$0xff] }
 0x2e5   :  { %854 = vrot.lane.b32.xlu0 %v8123_v3, %s7591_s1 }
 0x2ea   :  { %v841_v42 = vpop.f32.mrf.mxu0 }
 0x2eb   :  { %v8127_v43 = vadd.f32 %v6813_v40, %v841_v42 }
 0x2ed   :  { %856 = vrot.lane.b32.xlu1 %v8127_v43, %s7591_s1  ;;  %v6765_v50 = vpack.i.bf16 %v8123_v3, %v8127_v43 }
 0x2f2   :  { %v844_v44 = vpop.f32.mrf.mxu0 }
 0x2f3   :  { %v8131_v45 = vadd.f32 %v6813_v40, %v844_v44  ;;  %v621_v44 = vld [vmem:[%s12076_s9 + $0x28] sm:$0xff] }
 0x2f5   :  { %858 = vrot.lane.b32.xlu0 %v8131_v45, %s7591_s1 }
 0x2fa   :  { %v847_v47 = vpop.f32.mrf.mxu0 }
 0x2fb   :  { %v8135_v48 = vadd.f32 %v6813_v40, %v847_v47  ;;  %v616_v40 = vld [vmem:[%s12076_s9] sm:$0xff] }
 0x2fd   :  { %860 = vrot.lane.b32.xlu1 %v8135_v48, %s7591_s1  ;;  %v6760_v49 = vpack.i.bf16 %v8131_v45, %v8135_v48 }
 0x305   :  { %6761 = vrot.lane.b32.xlu1 %v6760_v49, %s12099_s4 }
 0x30d   :  { %6766 = vrot.lane.b32.xlu1 %v6765_v50, %s12099_s4  ;;  %s7593_s4 = smov 32  }
 0x357   :  { %v855_v51 = vpop.permute.xlu0 %854 }
 0x358   :  { %866 = vxpose.xlu0.b32.start [1/4] (short) (narrow) %v855_v51, 32  ;;  %v619_v51 = vld [vmem:[%s12076_s9 + $0x18] sm:$0xff] }
 0x35f   :  { %v857_v52 = vpop.permute.xlu1 %856 }
 0x360   :  { %867 = vxpose.xlu0.b32.cont [2/4] (short) (narrow) %v857_v52, 32  ;;  %v591_v52 = vld [vmem:[%s12075_s8 + $0x38] sm:$0xff] }
 0x367   :  { %v859_v55 = vpop.permute.xlu0 %858 }
 0x368   :  { %868 = vxpose.xlu0.b32.cont [3/4] (short) (narrow) %v859_v55, 32  ;;  %v617_v55 = vld [vmem:[%s12076_s9 + $0x8] sm:$0xff] }
 0x36f   :  { %v861_v56 = vpop.permute.xlu1 %860 }
 0x370   :  { %869 = vxpose.xlu0.b32.end [4/4] (short) (narrow) %v861_v56, 32 }
 0x377   :  { %v6762_v57 = vpop.permute.xlu1 %6761 }
 0x378   :  { %v6763_v58 = vunpack.i.l.bf16 %v6762_v57  ;;  %v6764_v59 = vunpack.i.h.bf16 %v6762_v57 }
 0x37a   :  { %1096 = vmatpush.msrb.mxu3 %v6763_v58  ;;  %v592_v58 = vld [vmem:[%s12075_s8 + $0x40] sm:$0xff] }
 0x37c   :  { %1097 = vmatpush.msrb.mxu3 %v6764_v59  ;;  %v593_v59 = vld [vmem:[%s12075_s8 + $0x48] sm:$0xff] }
 0x37f   :  { %v6767_v61 = vpop.permute.xlu1 %6766 }
 0x380   :  { %v6768_v62 = vunpack.i.l.bf16 %v6767_v61  ;;  %v6769_v0 = vunpack.i.h.bf16 %v6767_v61  ;;  %v596_v61 = vld [vmem:[%s12075_s8 + $0x60] sm:$0xff] }
 0x382   :  { %1098 = vmatpush.msrb.mxu3 %v6768_v62  ;;  %v598_v62 = vld [vmem:[%s12075_s8 + $0x70] sm:$0xff] }
 0x384   :  { %1099 = vmatpush.msrb.mxu3 %v6769_v0  ;;  %v600_v0 = vld [vmem:[%s12075_s8 + $0x80] sm:$0xff] }
 0x385   :  { %6267 = vmatmul.msk.f32.vlgmr.msrb.gmra.mxu3 %vm522_vm6, %v584_v13 }
 0x38d   :  { %6268 = vmatmul.msk.f32.gmra.mxu3 %vm522_vm6, %v585_v17  ;;  %v603_v17 = vld [vmem:[%s12075_s8 + $0x98] sm:$0xff] }
 0x395   :  { %6269 = vmatmul.msk.f32.gmra.mxu3 %vm522_vm6, %v586_v18 }
 0x39d   :  { %6270 = vmatmul.msk.f32.gmra.mxu3 %vm522_vm6, %v587_v46  ;;  %v604_v46 = vld [vmem:[%s12075_s8 + $0xa0] sm:$0xff] }
 0x3a5   :  { %6271 = vmatmul.msk.f32.gmra.mxu3 %vm522_vm6, %v588_v22  ;;  %v606_v22 = vld [vmem:[%s12075_s8 + $0xb0] sm:$0xff] }
 0x3ad   :  { %6272 = vmatmul.msk.f32.gmra.mxu3 %vm522_vm6, %v589_v27  ;;  %v607_v27 = vld [vmem:[%s12075_s8 + $0xb8] sm:$0xff] }
 0x3b5   :  { %6273 = vmatmul.msk.f32.gmra.mxu3 %vm522_vm6, %v590_v33 }
 0x3bd   :  { %6274 = vmatmul.msk.f32.gmra.mxu3 %vm522_vm6, %v591_v52 }
 0x3c5   :  { %6275 = vmatmul.msk.f32.gmra.mxu3 %vm522_vm6, %v592_v58  ;;  %v685_v58 = vld [vmem:[%s12078_s12 + $0xe8] sm:$0xff] }
 0x3cd   :  { %6276 = vmatmul.msk.f32.gmra.mxu3 %vm522_vm6, %v593_v59  ;;  %v684_v59 = vld [vmem:[%s12078_s12 + $0xe0] sm:$0xff] }
 0x3fc   :  { %v882_v4 = vpop.trf.xlu0 }
 0x3fd   :  { %6259 = vmatmul.msk.f32.vlgmr.msra.gmra.mxu1 %vm522_vm6, %v882_v4  ;;  %6263 = vmatmul.msk.f32.vlgmr.msra.gmra.mxu2 %vm522_vm6, %v882_v4 }
 0x404   :  { %v883_v63 = vpop.trf.xlu0 }
 0x405   :  { %6260 = vmatmul.msk.f32.gmra.mxu1 %vm522_vm6, %v883_v63  ;;  %6264 = vmatmul.msk.f32.gmra.mxu2 %vm522_vm6, %v883_v63  ;;  %v601_v63 = vld [vmem:[%s12075_s8 + $0x88] sm:$0xff] }
 0x408   :  { %v8283_v4 = vpop.f32.mrf.mxu3 }
 0x40c   :  { %v884_v14 = vpop.trf.xlu0 }
 0x40d   :  { %6261 = vmatmul.msk.f32.gmra.mxu1 %vm522_vm6, %v884_v14  ;;  %6265 = vmatmul.msk.f32.gmra.mxu2 %vm522_vm6, %v884_v14 }
 0x410   :  { %v8289_v14 = vpop.f32.mrf.mxu3 }
 0x414   :  { %v885_v5 = vpop.trf.xlu0 }
 0x415   :  { %6262 = vmatmul.msk.f32.gmra.mxu1 %vm522_vm6, %v885_v5  ;;  %6266 = vmatmul.msk.f32.gmra.mxu2 %vm522_vm6, %v885_v5  ;;  %v602_v5 = vld [vmem:[%s12075_s8 + $0x90] sm:$0xff] }
 0x418   :  { %v8295_v13 = vpop.f32.mrf.mxu3 }
 0x420   :  { %v8301_v18 = vpop.f32.mrf.mxu3 }
 0x47a   :  { %v927_v19 = vpop.f32.mrf.mxu1 }
 0x47b   :  { %v968_v49 = vmul.f32 %v927_v19, %v616_v40  ;;  %v8307_v19 = vpop.f32.mrf.mxu3  ;;  %v687_v40 = vld [vmem:[%s12078_s12 + $0xf8] sm:$0xff] }
 0x480   :  { %v956_v20 = vpop.f32.mrf.mxu2 }
 0x481   :  { %v969_v57 = vmul.f32 %v956_v20, %v617_v55  ;;  %v605_v20 = vld [vmem:[%s12075_s8 + $0xa8] sm:$0xff] }
 0x482   :  { %v930_v21 = vpop.f32.mrf.mxu1 }
 0x483   :  { %v970_v42 = vmul.f32 %v930_v21, %v618_v35  ;;  %v8313_v21 = vpop.f32.mrf.mxu3 }
 0x488   :  { %v959_v23 = vpop.f32.mrf.mxu2 }
 0x489   :  { %v971_v56 = vmul.f32 %v959_v23, %v619_v51 }
 0x48a   :  { %v933_v25 = vpop.f32.mrf.mxu1 }
 0x48b   :  { %v972_v36 = vmul.f32 %v933_v25, %v620_v53  ;;  %v8319_v23 = vpop.f32.mrf.mxu3  ;;  %v567_v53 = vld [vmem:[%s12077_s11 + $0x8] sm:$0xff] }
 0x490   :  { %v962_v29 = vpop.f32.mrf.mxu2 }
 0x491   :  { %v973_v54 = vmul.f32 %v962_v29, %v621_v44  ;;  %v8325_v29 = vperm.slane %v8118_v16, 0 }
 0x492   :  { %v936_v32 = vpop.f32.mrf.mxu1 }
 0x493   :  { %v974_v34 = vmul.f32 %v936_v32, %v622_v31  ;;  %v8328_v31 = vperm.slane %v8185_v8, 0  ;;  %v566_v32 = vld [vmem:[%s12077_s11] sm:$0xff]  ;;  %v8338_v33 = vadd.f32 %v8325_v29, %v567_v53  ;;  %v8343_v35 = vpop.f32.mrf.mxu3  ;;  %v610_v53 = vld [vmem:[%s12075_s8 + $0xd0] sm:$0xff] }
 0x495   :  { %1249 = vmatpush.msra.mxu0 %v974_v34  ;;  %v8341_v34 = vadd.f32 %v8328_v31, %v566_v32 }
 0x497   :  { %1250 = vmatpush.msra.mxu0 %v972_v36 }
 0x498   :  { %v965_v47 = vpop.f32.mrf.mxu2 }
 0x499   :  { %v975_v50 = vmul.f32 %v965_v47, %v623_v41  ;;  %1251 = vmatpush.msra.mxu0 %v970_v42  ;;  %v608_v42 = vld [vmem:[%s12075_s8 + $0xc0] sm:$0xff]  ;;  %v569_v47 = vld [vmem:[%s12077_s11 + $0x18] sm:$0xff] }
 0x49a   :  { %v8370_v51 = vadd.f32 %v8325_v29, %v569_v47 }
 0x49b   :  { %1252 = vmatpush.msra.mxu0 %v968_v49  ;;  %1278 = vmatpush.msrb.mxu1 %v975_v50  ;;  %v568_v49 = vld [vmem:[%s12077_s11 + $0x10] sm:$0xff]  ;;  %v8375_v55 = vpop.f32.mrf.mxu3 }
 0x49c   :  { %6299 = vmatmul.msk.f32.vlgmr.msra.gmra.mxu0 %vm522_vm6, %v8123_v3  ;;  %v686_v50 = vld [vmem:[%s12078_s12 + $0xf0] sm:$0xff]  ;;  %v8373_v52 = vadd.f32 %v8328_v31, %v568_v49 }
 0x49d   :  { %1279 = vmatpush.msrb.mxu1 %v973_v54  ;;  %1360 = vmatpush.msrb.mxu0 %v687_v40  ;;  %v573_v40 = vld [vmem:[%s12077_s11 + $0x38] sm:$0xff] }
 0x49e   :  { %v8446_v47 = vadd.f32 %v8325_v29, %v573_v40  ;;  %v668_v40 = vld [vmem:[%s12078_s12 + $0x60] sm:$0xff] }
 0x49f   :  { %1280 = vmatpush.msrb.mxu1 %v971_v56  ;;  %1361 = vmatpush.msrb.mxu0 %v686_v50 }
 0x4a1   :  { %1281 = vmatpush.msrb.mxu1 %v969_v57  ;;  %1362 = vmatpush.msrb.mxu0 %v685_v58 }
 0x4a2   :  { %6303 = vmatmul.msk.f32.vlgmr.msrb.gmra.mxu1 %vm522_vm6, %v8123_v3  ;;  %v594_v3 = vld [vmem:[%s12075_s8 + $0x50] sm:$0xff] }
 0x4a3   :  { %6277 = vmatmul.msk.f32.gmra.mxu3 %vm522_vm6, %v594_v3  ;;  %v609_v3 = vld [vmem:[%s12075_s8 + $0xc8] sm:$0xff]  ;;  %1363 = vmatpush.msrb.mxu0 %v684_v59 }
 0x4a4   :  { %6300 = vmatmul.msk.f32.gmra.mxu0 %vm522_vm6, %v8127_v43 }
 0x4aa   :  { %6304 = vmatmul.msk.f32.gmra.mxu1 %vm522_vm6, %v8127_v43  ;;  %v595_v43 = vld [vmem:[%s12075_s8 + $0x58] sm:$0xff] }
 0x4ab   :  { %6278 = vmatmul.msk.f32.gmra.mxu3 %vm522_vm6, %v595_v43 }
 0x4ac   :  { %6301 = vmatmul.msk.f32.gmra.mxu0 %vm522_vm6, %v8131_v45 }
 0x4b2   :  { %6305 = vmatmul.msk.f32.gmra.mxu1 %vm522_vm6, %v8131_v45  ;;  %v597_v45 = vld [vmem:[%s12075_s8 + $0x68] sm:$0xff] }
 0x4b3   :  { %6279 = vmatmul.msk.f32.gmra.mxu3 %vm522_vm6, %v596_v61  ;;  %v683_v61 = vld [vmem:[%s12078_s12 + $0xd8] sm:$0xff] }
 0x4b4   :  { %6302 = vmatmul.msk.f32.gmra.mxu0 %vm522_vm6, %v8135_v48 }
 0x4b5   :  { %1364 = vmatpush.msrb.mxu0 %v683_v61  ;;  %v675_v61 = vld [vmem:[%s12078_s12 + $0x98] sm:$0xff] }
 0x4ba   :  { %6306 = vmatmul.msk.f32.gmra.mxu1 %vm522_vm6, %v8135_v48  ;;  %v599_v48 = vld [vmem:[%s12075_s8 + $0x78] sm:$0xff] }
 0x4bb   :  { %6280 = vmatmul.msk.f32.gmra.mxu3 %vm522_vm6, %v597_v45  ;;  %v571_v45 = vld [vmem:[%s12077_s11 + $0x28] sm:$0xff] }
 0x4c3   :  { %6281 = vmatmul.msk.f32.gmra.mxu3 %vm522_vm6, %v598_v62  ;;  %v570_v62 = vld [vmem:[%s12077_s11 + $0x20] sm:$0xff] }
 0x4cb   :  { %6282 = vmatmul.msk.f32.gmra.mxu3 %vm522_vm6, %v599_v48 }
 0x4d3   :  { %6283 = vmatmul.msk.f32.gmra.mxu3 %vm522_vm6, %v600_v0  ;;  %v682_v0 = vld [vmem:[%s12078_s12 + $0xd0] sm:$0xff] }
 0x4d4   :  { %1365 = vmatpush.msrb.mxu0 %v682_v0  ;;  %v672_v0 = vld [vmem:[%s12078_s12 + $0x80] sm:$0xff] }
 0x4db   :  { %6284 = vmatmul.msk.f32.gmra.mxu3 %vm522_vm6, %v601_v63  ;;  %v8408_v63 = vadd.f32 %v8325_v29, %v571_v45  ;;  %v676_v29 = vld [vmem:[%s12078_s12 + $0xa0] sm:$0xff]  ;;  %v674_v45 = vld [vmem:[%s12078_s12 + $0x90] sm:$0xff] }
 0x4e3   :  { %6285 = vmatmul.msk.f32.gmra.mxu3 %vm522_vm6, %v602_v5  ;;  %v8411_v5 = vadd.f32 %v8328_v31, %v570_v62 }
 0x4eb   :  { %6286 = vmatmul.msk.f32.gmra.mxu3 %vm522_vm6, %v603_v17 }
 0x4f3   :  { %6287 = vmatmul.msk.f32.gmra.mxu3 %vm522_vm6, %v604_v46  ;;  %v8413_v46 = vpop.f32.mrf.mxu3 }
 0x4fb   :  { %6288 = vmatmul.msk.f32.gmra.mxu3 %vm522_vm6, %v605_v20 }
 0x503   :  { %6289 = vmatmul.msk.f32.gmra.mxu3 %vm522_vm6, %v606_v22 }
 0x50b   :  { %6290 = vmatmul.msk.f32.gmra.mxu3 %vm522_vm6, %v607_v27  ;;  %v680_v27 = vld [vmem:[%s12078_s12 + $0xc0] sm:$0xff] }
 0x513   :  { %6291 = vmatmul.msk.f32.gmra.mxu3 %vm522_vm6, %v608_v42  ;;  %v678_v42 = vld [vmem:[%s12078_s12 + $0xb0] sm:$0xff] }
 0x519   :  { %v1254_v25 = vpop.f32.mrf.mxu0 }
 0x51a   :  { %v8346_v8 = vadd.f32 %v1254_v25, %v8341_v34  ;;  %v681_v25 = vld [vmem:[%s12078_s12 + $0xc8] sm:$0xff] }
 0x51b   :  { %6292 = vmatmul.msk.f32.gmra.mxu3 %vm522_vm6, %v609_v3  ;;  %1366 = vmatpush.msrb.mxu0 %v681_v25  ;;  %v677_v3 = vld [vmem:[%s12078_s12 + $0xa8] sm:$0xff]  ;;  %v671_v25 = vld [vmem:[%s12078_s12 + $0x78] sm:$0xff] }
 0x51c   :  { %1331 = vmatpush.msrb.mxu2 %v671_v25 }
 0x51d   :  { %1367 = vmatpush.msrb.mxu0 %v680_v27 }
 0x51f   :  { %v1283_v16 = vpop.f32.mrf.mxu1 }
 0x520   :  { %v8349_v36 = vadd.f32 %v1283_v16, %v8338_v33  ;;  %v679_v16 = vld [vmem:[%s12078_s12 + $0xb8] sm:$0xff] }
 0x521   :  { %v1257_v41 = vpop.f32.mrf.mxu0  ;;  %1368 = vmatpush.msrb.mxu0 %v679_v16  ;;  %v613_v16 = vld [vmem:[%s12075_s8 + $0xe8] sm:$0xff] }
 0x522   :  { %v1295_v44 = vmax.f32 %v8346_v8, %v8349_v36  ;;  %v8378_v56 = vadd.f32 %v1257_v41, %v8373_v52  ;;  %v572_v41 = vld [vmem:[%s12077_s11 + $0x30] sm:$0xff]  ;;  %s12122_s11 = sld [smem:[#allocation11_spill]] }
 0x523   :  { %6293 = vmatmul.msk.f32.gmra.mxu3 %vm522_vm6, %v610_v53  ;;  %v8449_v49 = vadd.f32 %v8328_v31, %v572_v41  ;;  %1369 = vmatpush.msrb.mxu0 %v678_v42  ;;  %v611_v31 = vld [vmem:[%s12075_s8 + $0xd8] sm:$0xff]  ;;  %v670_v53 = vld [vmem:[%s12078_s12 + $0x70] sm:$0xff] }
 0x524   :  { %1296 = vmax.xlane.f32.xlu1 %v1295_v44  ;;  %1332 = vmatpush.msrb.mxu2 %v670_v53  ;;  %v667_v41 = vld [vmem:[%s12078_s12 + $0x58] sm:$0xff] }
 0x525   :  { %1370 = vmatpush.msrb.mxu0 %v677_v3  ;;  %v614_v3 = vld [vmem:[%s12075_s8 + $0xf0] sm:$0xff] }
 0x527   :  { %v1286_v54 = vpop.f32.mrf.mxu1  ;;  %1371 = vmatpush.msrb.mxu0 %v676_v29  ;;  %v664_v29 = vld [vmem:[%s12078_s12 + $0x40] sm:$0xff] }
 0x528   :  { %v8381_v57 = vadd.f32 %v1286_v54, %v8370_v51  ;;  %v8451_v54 = vpop.f32.mrf.mxu3 }
 0x529   :  { %v1260_v48 = vpop.f32.mrf.mxu0  ;;  %1372 = vmatpush.msrb.mxu0 %v675_v61  ;;  %v662_v61 = vld [vmem:[%s12078_s12 + $0x30] sm:$0xff] }
 0x52a   :  { %v1298_v43 = vmax.f32 %v8378_v56, %v8381_v57  ;;  %v8416_v20 = vadd.f32 %v1260_v48, %v8411_v5  ;;  %v673_v48 = vld [vmem:[%s12078_s12 + $0x88] sm:$0xff] }
 0x52b   :  { %6294 = vmatmul.msk.f32.gmra.mxu3 %vm522_vm6, %v611_v31  ;;  %1373 = vmatpush.msrb.mxu0 %v674_v45  ;;  %v663_v31 = vld [vmem:[%s12078_s12 + $0x38] sm:$0xff] }
 0x52c   :  { %1299 = vmax.xlane.f32.xlu2 %v1298_v43  ;;  %v615_v45 = vld [vmem:[%s12075_s8 + $0xf8] sm:$0xff] }
 0x52d   :  { %1374 = vmatpush.msrb.mxu0 %v673_v48  ;;  %v638_v48 = vld [vmem:[%s12079_s10 + $0x70] sm:$0xff] }
 0x52f   :  { %v1289_v17 = vpop.f32.mrf.mxu1  ;;  %1375 = vmatpush.msrb.mxu0 %v672_v0  ;;  %v639_v0 = vld [vmem:[%s12079_s10 + $0x78] sm:$0xff] }
 0x530   :  { %v8419_v22 = vadd.f32 %v1289_v17, %v8408_v63  ;;  %v1134_v62 = vpop.f32.mrf.mxu3  ;;  %v612_v17 = vld [vmem:[%s12075_s8 + $0xe0] sm:$0xff] }
 0x531   :  { %v1263_v44 = vpop.f32.mrf.mxu0 }
 0x532   :  { %v1301_v32 = vmax.f32 %v8416_v20, %v8419_v22  ;;  %v8454_v58 = vadd.f32 %v1263_v44, %v8449_v49  ;;  %v666_v44 = vld [vmem:[%s12078_s12 + $0x50] sm:$0xff] }
 0x533   :  { %6295 = vmatmul.msk.f32.gmra.mxu3 %vm522_vm6, %v612_v17  ;;  %v637_v17 = vld [vmem:[%s12079_s10 + $0x68] sm:$0xff] }
 0x534   :  { %1302 = vmax.xlane.f32.xlu0 %v1301_v32  ;;  %v669_v32 = vld [vmem:[%s12078_s12 + $0x68] sm:$0xff] }
 0x535   :  { %1333 = vmatpush.msrb.mxu2 %v669_v32 }
 0x537   :  { %v1292_v50 = vpop.f32.mrf.mxu1  ;;  %1334 = vmatpush.msrb.mxu2 %v668_v40 }
 0x538   :  { %v8457_v59 = vadd.f32 %v1292_v50, %v8446_v47  ;;  %v1137_v27 = vpop.f32.mrf.mxu3  ;;  %v665_v50 = vld [vmem:[%s12078_s12 + $0x48] sm:$0xff] }
 0x539   :  { %1335 = vmatpush.msrb.mxu2 %v667_v41  ;;  %v635_v41 = vld [vmem:[%s12079_s10 + $0x58] sm:$0xff] }
 0x53a   :  { %v1304_v43 = vmax.f32 %v8454_v58, %v8457_v59 }
 0x53b   :  { %6296 = vmatmul.msk.f32.gmra.mxu3 %vm522_vm6, %v613_v16  ;;  %1336 = vmatpush.msrb.mxu2 %v666_v44  ;;  %v636_v16 = vld [vmem:[%s12079_s10 + $0x60] sm:$0xff] }
 0x53c   :  { %1305 = vmax.xlane.f32.xlu1 %v1304_v43  ;;  %v1209_v44 = vmul.f32 %v1137_v27, %v636_v16  ;;  %v632_v27 = vld [vmem:[%s12079_s10 + $0x40] sm:$0xff] }
 0x53d   :  { %1337 = vmatpush.msrb.mxu2 %v665_v50  ;;  %v634_v50 = vld [vmem:[%s12079_s10 + $0x50] sm:$0xff] }
 0x53f   :  { %1338 = vmatpush.msrb.mxu2 %v664_v29  ;;  %v633_v29 = vld [vmem:[%s12079_s10 + $0x48] sm:$0xff] }
 0x540   :  { %v1140_v42 = vpop.f32.mrf.mxu3 }
 0x541   :  { %1339 = vmatpush.msrb.mxu2 %v663_v31  ;;  %v1210_v40 = vmul.f32 %v1140_v42, %v637_v17  ;;  %v1207_v42 = vmul.f32 %v8451_v54, %v634_v50  ;;  %v658_v50 = vld [vmem:[%s12078_s12 + $0x10] sm:$0xff] }
 0x543   :  { %6297 = vmatmul.msk.f32.gmra.mxu3 %vm522_vm6, %v614_v3  ;;  %1340 = vmatpush.msrb.mxu2 %v662_v61  ;;  %v1208_v3 = vmul.f32 %v1134_v62, %v635_v41  ;;  %v631_v62 = vld [vmem:[%s12079_s10 + $0x38] sm:$0xff]  ;;  %v1205_v61 = vmul.f32 %v8375_v55, %v632_v27  ;;  %v628_v55 = vld [vmem:[%s12079_s10 + $0x20] sm:$0xff] }
 0x544   :  { %v1204_v54 = vmul.f32 %v8343_v35, %v631_v62  ;;  %v627_v35 = vld [vmem:[%s12079_s10 + $0x18] sm:$0xff]  ;;  %v660_v41 = vld [vmem:[%s12078_s12 + $0x20] sm:$0xff] }
 0x548   :  { %v1143_v43 = vpop.f32.mrf.mxu3 }
 0x549   :  { %v1211_v53 = vmul.f32 %v1143_v43, %v638_v48  ;;  %v1206_v43 = vmul.f32 %v8413_v46, %v633_v29  ;;  %v629_v48 = vld [vmem:[%s12079_s10 + $0x28] sm:$0xff] }
 0x54a   :  { %v1202_v17 = vmul.f32 %v8313_v21, %v629_v48 }
 0x54b   :  { %6298 = vmatmul.msk.f32.gmra.mxu3 %vm522_vm6, %v615_v45  ;;  %v630_v45 = vld [vmem:[%s12079_s10 + $0x30] sm:$0xff] }
 0x550   :  { %v1146_v25 = vpop.f32.mrf.mxu3 }
 0x551   :  { %v1212_v32 = vmul.f32 %v1146_v25, %v639_v0  ;;  %v1203_v0 = vmul.f32 %v8319_v23, %v630_v45  ;;  %v1201_v25 = vmul.f32 %v8307_v19, %v628_v55  ;;  %v1200_v23 = vmul.f32 %v8301_v18, %v627_v35  ;;  %v661_v19 = vld [vmem:[%s12078_s12 + $0x28] sm:$0xff] }
 0x552   :  { %1341 = vmatpush.msrb.mxu2 %v661_v19 }
 0x553   :  { %1475 = vmatpush.msra.mxu0 %v1212_v32  ;;  %v625_v32 = vld [vmem:[%s12079_s10 + $0x8] sm:$0xff] }
 0x554   :  { %v1198_v18 = vmul.f32 %v8289_v14, %v625_v32  ;;  %1342 = vmatpush.msrb.mxu2 %v660_v41 }
 0x555   :  { %1476 = vmatpush.msra.mxu0 %v1211_v53  ;;  %v626_v53 = vld [vmem:[%s12079_s10 + $0x10] sm:$0xff] }
 0x556   :  { %v1199_v16 = vmul.f32 %v8295_v13, %v626_v53 }
 0x557   :  { %1477 = vmatpush.msra.mxu0 %v1210_v40  ;;  %v624_v40 = vld [vmem:[%s12079_s10] sm:$0xff] }
 0x558   :  { %v8550_v31 = vpop.f32.mrf.mxu3  ;;  %v1197_v13 = vmul.f32 %v8283_v4, %v624_v40  ;;  %v656_v4 = vld [vmem:[%s12078_s12] sm:$0xff] }
 0x559   :  { %1478 = vmatpush.msra.mxu0 %v1209_v44  ;;  %v659_v44 = vld [vmem:[%s12078_s12 + $0x18] sm:$0xff] }
 0x55a   :  { %1343 = vmatpush.msrb.mxu2 %v659_v44 }
 0x55b   :  { %1479 = vmatpush.msra.mxu0 %v1208_v3  ;;  %v657_v3 = vld [vmem:[%s12078_s12 + $0x8] sm:$0xff] }
 0x55c   :  { %1344 = vmatpush.msrb.mxu2 %v658_v50 }
 0x55d   :  { %1480 = vmatpush.msra.mxu0 %v1207_v42 }
 0x55e   :  { %1345 = vmatpush.msrb.mxu2 %v657_v3 }
 0x55f   :  { %1481 = vmatpush.msra.mxu0 %v1206_v43 }
 0x560   :  { %v8568_v46 = vpop.f32.mrf.mxu3  ;;  %1346 = vmatpush.msrb.mxu2 %v656_v4 }
 0x561   :  { %1482 = vmatpush.msra.mxu0 %v1205_v61 }
 0x563   :  { %1483 = vmatpush.msra.mxu0 %v1204_v54 }
 0x565   :  { %1484 = vmatpush.msra.mxu0 %v1203_v0 }
 0x567   :  { %1485 = vmatpush.msra.mxu0 %v1202_v17 }
 0x568   :  { %v8586_v21 = vpop.f32.mrf.mxu3 }
 0x569   :  { %1486 = vmatpush.msra.mxu0 %v1201_v25 }
 0x56b   :  { %1487 = vmatpush.msra.mxu0 %v1200_v23 }
 0x56d   :  { %1488 = vmatpush.msra.mxu0 %v1199_v16 }
 0x56f   :  { %1489 = vmatpush.msra.mxu0 %v1198_v18 }
 0x570   :  { %v8606_v14 = vpop.f32.mrf.mxu3 }
 0x571   :  { %1490 = vmatpush.msra.mxu0 %v1197_v13 }
 0x578   :  { %v8614_v29 = vpop.f32.mrf.mxu3 }
 0x580   :  { %v8616_v42 = vpop.f32.mrf.mxu3 }
 0x588   :  { %v8618_v43 = vpop.f32.mrf.mxu3 }
 0x590   :  { %v8622_v0 = vpop.f32.mrf.mxu3 }
 0x597   :  { %v1297_v27 = vpop.xlane.xlu1 %1296 }
 0x598   :  { %v1307_v62 = vsub.f32 %v8346_v8, %v1297_v27  ;;  %v1308_v61 = vsub.f32 %v8349_v36, %v1297_v27  ;;  %v1173_v36 = vpop.f32.mrf.mxu3 }
 0x59a   :  { %v1315_v45 = vmul.f32 1.442695, %v1307_v62  ;;  %v1317_v54 = vmul.f32 1.442695, %v1308_v61 }
 0x59c   :  { %6861 = vpow2.f32 %v1315_v45 }
 0x59d   :  { %6863 = vpow2.f32 %v1317_v54 }
 0x59f   :  { %v1300_v48 = vpop.xlane.xlu2 %1299 }
 0x5a0   :  { %v1309_v55 = vsub.f32 %v8378_v56, %v1300_v48  ;;  %v1310_v17 = vsub.f32 %v8381_v57, %v1300_v48  ;;  %v1176_v41 = vpop.f32.mrf.mxu3  ;;  %v654_v48 = vld [vmem:[%s12079_s10 + $0xf0] sm:$0xff] }
 0x5a2   :  { %v8626_v35 = vpop.eup %6861  ;;  %v1319_v25 = vmul.f32 1.442695, %v1309_v55  ;;  %v1321_v53 = vmul.f32 1.442695, %v1310_v17  ;;  %v655_v55 = vld [vmem:[%s12079_s10 + $0xf8] sm:$0xff]  ;;  %v653_v17 = vld [vmem:[%s12079_s10 + $0xe8] sm:$0xff] }
 0x5a3   :  { %v8628_v23 = vpop.eup %6863  ;;  %1347 = vmatmul.f32.vlgmr.msrb.gmra.mxu2 %v8626_v35 }
 0x5a4   :  { %6865 = vpow2.f32 %v1319_v25  ;;  %1376 = vmatmul.f32.vlgmr.msrb.gmra.mxu0 %v8628_v23 }
 0x5a5   :  { %6867 = vpow2.f32 %v1321_v53 }
 0x5a7   :  { %v1303_v8 = vpop.xlane.xlu0 %1302 }
 0x5a8   :  { %v1311_v32 = vsub.f32 %v8416_v20, %v1303_v8  ;;  %v1312_v56 = vsub.f32 %v8419_v22, %v1303_v8  ;;  %v1179_v4 = vpop.f32.mrf.mxu3 }
 0x5aa   :  { %v8634_v16 = vpop.eup %6865  ;;  %v1323_v57 = vmul.f32 1.442695, %v1311_v32  ;;  %v1325_v19 = vmul.f32 1.442695, %v1312_v56  ;;  %v652_v32 = vld [vmem:[%s12079_s10 + $0xe0] sm:$0xff] }
 0x5ab   :  { %v8636_v40 = vpop.eup %6867  ;;  %1350 = vmatmul.f32.gmra.mxu2 %v8634_v16 }
 0x5ac   :  { %6869 = vpow2.f32 %v1323_v57  ;;  %1379 = vmatmul.f32.gmra.mxu0 %v8636_v40  ;;  %v651_v57 = vld [vmem:[%s12079_s10 + $0xd8] sm:$0xff] }
 0x5ad   :  { %6871 = vpow2.f32 %v1325_v19 }
 0x5af   :  { %v1306_v18 = vpop.xlane.xlu1 %1305 }
 0x5b0   :  { %v1313_v13 = vsub.f32 %v8454_v58, %v1306_v18  ;;  %v1314_v20 = vsub.f32 %v8457_v59, %v1306_v18  ;;  %v1182_v58 = vpop.f32.mrf.mxu3  ;;  %v688_v59 = vld [vmem:[%s12080_s13] sm:$0xff]  ;;  %v650_v18 = vld [vmem:[%s12079_s10 + $0xd0] sm:$0xff] }
 0x5b1   :  { %1416 = vmatpush.msra.mxu1 %v688_v59 }
 0x5b2   :  { %v8642_v44 = vpop.eup %6869  ;;  %v1327_v22 = vmul.f32 1.442695, %v1313_v13  ;;  %v1329_v50 = vmul.f32 1.442695, %v1314_v20  ;;  %v1224_v13 = vmul.f32 %v1182_v58, %v651_v57  ;;  %v649_v20 = vld [vmem:[%s12079_s10 + $0xc8] sm:$0xff]  ;;  %v646_v58 = vld [vmem:[%s12079_s10 + $0xb0] sm:$0xff] }
 0x5b3   :  { %v8644_v3 = vpop.eup %6871  ;;  %1353 = vmatmul.f32.gmra.mxu2 %v8642_v44  ;;  %v1222_v59 = vmul.f32 %v1176_v41, %v649_v20  ;;  %v1219_v41 = vmul.f32 %v8618_v43, %v646_v58 }
 0x5b4   :  { %6873 = vpow2.f32 %v1327_v22  ;;  %1382 = vmatmul.f32.gmra.mxu0 %v8644_v3  ;;  %v1223_v22 = vmul.f32 %v1179_v4, %v650_v18  ;;  %v645_v4 = vld [vmem:[%s12079_s10 + $0xa8] sm:$0xff] }
 0x5b5   :  { %6875 = vpow2.f32 %v1329_v50  ;;  %v648_v50 = vld [vmem:[%s12079_s10 + $0xc0] sm:$0xff] }
 0x5b8   :  { %v1185_v61 = vpop.f32.mrf.mxu3 }
 0x5b9   :  { %v1225_v19 = vmul.f32 %v1185_v61, %v652_v32  ;;  %v647_v61 = vld [vmem:[%s12079_s10 + $0xb8] sm:$0xff] }
 0x5ba   :  { %v8648_v27 = vpop.eup %6873 }
 0x5bb   :  { %v8650_v62 = vpop.eup %6875  ;;  %1356 = vmatmul.f32.gmra.mxu2 %v8648_v27 }
 0x5bc   :  { %1385 = vmatmul.f32.gmra.mxu0 %v8650_v62 }
 0x5c0   :  { %v1188_v45 = vpop.f32.mrf.mxu3 }
 0x5c1   :  { %v1226_v56 = vmul.f32 %v1188_v45, %v653_v17  ;;  %v1221_v45 = vmul.f32 %v1173_v36, %v648_v50  ;;  %v1218_v36 = vmul.f32 %v8616_v42, %v645_v4  ;;  %v642_v17 = vld [vmem:[%s12079_s10 + $0x90] sm:$0xff] }
 0x5c2   :  { %v1215_v42 = vmul.f32 %v8586_v21, %v642_v17 }
 0x5c8   :  { %v1191_v54 = vpop.f32.mrf.mxu3 }
 0x5c9   :  { %v1227_v53 = vmul.f32 %v1191_v54, %v654_v48  ;;  %v1220_v54 = vmul.f32 %v8622_v0, %v647_v61  ;;  %v644_v48 = vld [vmem:[%s12079_s10 + $0xa0] sm:$0xff] }
 0x5ca   :  { %v1217_v0 = vmul.f32 %v8614_v29, %v644_v48 }
 0x5d0   :  { %v1194_v25 = vpop.f32.mrf.mxu3 }
 0x5d1   :  { %v1228_v8 = vmul.f32 %v1194_v25, %v655_v55  ;;  %v643_v55 = vld [vmem:[%s12079_s10 + $0x98] sm:$0xff]  ;;  %v641_v25 = vld [vmem:[%s12079_s10 + $0x88] sm:$0xff] }
 0x5d2   :  { %v1216_v43 = vmul.f32 %v8606_v14, %v643_v55  ;;  %v1214_v29 = vmul.f32 %v8568_v46, %v641_v25  ;;  %v689_v14 = vld [vmem:[%s12080_s13 + $0x8] sm:$0xff] }
 0x5d3   :  { %1504 = vmatpush.msrb.mxu1 %v1228_v8  ;;  %1445 = vmatpush.msra.mxu2 %v689_v14 }
 0x5d5   :  { %1505 = vmatpush.msrb.mxu1 %v1227_v53  ;;  %v640_v53 = vld [vmem:[%s12079_s10 + $0x80] sm:$0xff] }
 0x5d6   :  { %v1213_v8 = vmul.f32 %v8550_v31, %v640_v53 }
 0x5d7   :  { %1506 = vmatpush.msrb.mxu1 %v1226_v56 }
 0x5d9   :  { %1507 = vmatpush.msrb.mxu1 %v1225_v19 }
 0x5db   :  { %1508 = vmatpush.msrb.mxu1 %v1224_v13 }
 0x5dd   :  { %1509 = vmatpush.msrb.mxu1 %v1223_v22 }
 0x5df   :  { %1510 = vmatpush.msrb.mxu1 %v1222_v59 }
 0x5e1   :  { %1511 = vmatpush.msrb.mxu1 %v1221_v45 }
 0x5e3   :  { %1512 = vmatpush.msrb.mxu1 %v1220_v54 }
 0x5e5   :  { %1513 = vmatpush.msrb.mxu1 %v1219_v41 }
 0x5e7   :  { %1514 = vmatpush.msrb.mxu1 %v1218_v36 }
 0x5e9   :  { %1515 = vmatpush.msrb.mxu1 %v1217_v0 }
 0x5eb   :  { %1516 = vmatpush.msrb.mxu1 %v1216_v43 }
 0x5ed   :  { %1517 = vmatpush.msrb.mxu1 %v1215_v42 }
 0x5ef   :  { %1518 = vmatpush.msrb.mxu1 %v1214_v29 }
 0x5f1   :  { %1519 = vmatpush.msrb.mxu1 %v1213_v8 }
 0x621   :  { %v1377_v32 = vpop.f32.mrf.mxu0 }
 0x626   :  { %v1348_v21 = vpop.f32.mrf.mxu2 }
 0x627   :  { %v1378_v56 = vadd.f32 %v1377_v32, %v1348_v21  ;;  %v1535_v21 = vld [vmem:[%s12082_s18 + $0x10] sm:$0xff] }
 0x629   :  { %6307 = vmatmul.msk.f32.vlgmr.msra.gmra.mxu1 %vm178_vm8, %v1378_v56  ;;  %6311 = vmatmul.msk.f32.vlgmr.msra.gmra.mxu2 %vm178_vm8, %v1378_v56  ;;  %v1380_v57 = vpop.f32.mrf.mxu0 }
 0x62e   :  { %v1351_v46 = vpop.f32.mrf.mxu2 }
 0x62f   :  { %v1381_v19 = vadd.f32 %v1380_v57, %v1351_v46 }
 0x631   :  { %6308 = vmatmul.msk.f32.gmra.mxu1 %vm178_vm8, %v1381_v19  ;;  %6312 = vmatmul.msk.f32.gmra.mxu2 %vm178_vm8, %v1381_v19  ;;  %v1383_v31 = vpop.f32.mrf.mxu0 }
 0x636   :  { %v1354_v18 = vpop.f32.mrf.mxu2 }
 0x637   :  { %v1384_v13 = vadd.f32 %v1383_v31, %v1354_v18 }
 0x639   :  { %6309 = vmatmul.msk.f32.gmra.mxu1 %vm178_vm8, %v1384_v13  ;;  %6313 = vmatmul.msk.f32.gmra.mxu2 %vm178_vm8, %v1384_v13  ;;  %v1386_v20 = vpop.f32.mrf.mxu0 }
 0x63e   :  { %v1357_v22 = vpop.f32.mrf.mxu2 }
 0x63f   :  { %v1387_v50 = vadd.f32 %v1386_v20, %v1357_v22 }
 0x641   :  { %6310 = vmatmul.msk.f32.gmra.mxu1 %vm178_vm8, %v1387_v50  ;;  %6314 = vmatmul.msk.f32.gmra.mxu2 %vm178_vm8, %v1387_v50 }
 0x6a6   :  { %v1418_v59 = vpop.f32.mrf.mxu1 }
 0x6a7   :  { %6877 = vrcp.f32 %v1418_v59 }
 0x6ac   :  { %v1447_v61 = vpop.f32.mrf.mxu2 }
 0x6ad   :  { %v6878_v45 = vpop.eup %6877  ;;  %6879 = vrcp.f32 %v1447_v61  ;;  %v6812_v61 = vld [vmem:[%s12122_s11] ss:$0 sm:$0xff] }
 0x6ae   :  { %v1421_v58 = vpop.f32.mrf.mxu1  ;;  %v1467_v54 = vmul.f32 %v6878_v45, %v8626_v35  ;;  %v397_v45 = vadd.f32 %v6812_v61, %v8159_v10 }
 0x6af   :  { %6881 = vrcp.f32 %v1421_v58  ;;  %v6814_v58 = vld [vmem:[%s12081_s19] ss:$0 sm:$0xff] }
 0x6b0   :  { %1491 = vmatmul.f32.vlgmr.msra.gmra.mxu0 %v1467_v54  ;;  %v426_v54 = vadd.f32 %v8155_v6, %v397_v45  ;;  %v1695_v45 = vld [vmem:[%s12086_s22 + $0x8] sm:$0xff] }
 0x6b3   :  { %v6880_v4 = vpop.eup %6879 }
 0x6b4   :  { %v1450_v41 = vpop.f32.mrf.mxu2  ;;  %v1468_v48 = vmul.f32 %v6880_v4, %v8628_v23 }
 0x6b5   :  { %v6882_v36 = vpop.eup %6881  ;;  %6883 = vrcp.f32 %v1450_v41 }
 0x6b6   :  { %v1424_v55 = vpop.f32.mrf.mxu1  ;;  %1520 = vmatmul.f32.vlgmr.msrb.gmra.mxu1 %v1468_v48  ;;  %v1469_v0 = vmul.f32 %v6882_v36, %v8634_v16  ;;  %v8757_v48 = vadd.f32 %v8112_v37, %v426_v54  ;;  %v400_v36 = vadd.f32 %v6812_v61, %v8163_v12  ;;  %v403_v37 = vadd.f32 %v6812_v61, %v8171_v1  ;;  %v7133_v54 = vld [vmem:[%s12118_s29 + $0x30] sm:$0xff] }
 0x6b7   :  { %6885 = vrcp.f32 %v1424_v55 }
 0x6b8   :  { %1494 = vmatmul.f32.gmra.mxu0 %v1469_v0  ;;  %v429_v10 = vadd.f32 %v8157_v9, %v400_v36 }
 0x6bb   :  { %v6884_v17 = vpop.eup %6883 }
 0x6bc   :  { %v1453_v43 = vpop.f32.mrf.mxu2  ;;  %v1470_v25 = vmul.f32 %v6884_v17, %v8636_v40 }
 0x6bd   :  { %v6886_v42 = vpop.eup %6885  ;;  %6887 = vrcp.f32 %v1453_v43 }
 0x6be   :  { %v1427_v35 = vpop.f32.mrf.mxu1  ;;  %1523 = vmatmul.f32.gmra.mxu1 %v1470_v25  ;;  %v1471_v53 = vmul.f32 %v6886_v42, %v8642_v44  ;;  %v1536_v44 = vld [vmem:[%s12082_s18 + $0x18] sm:$0xff]  ;;  %v8768_v25 = vadd.f32 %v8114_v60, %v429_v10  ;;  %v432_v42 = vadd.f32 %v8161_v11, %v403_v37  ;;  %v406_v60 = vadd.f32 %v6812_v61, %v8179_v2  ;;  %v1696_v61 = vld [vmem:[%s12086_s22 + $0x10] sm:$0xff] }
 0x6bf   :  { %6889 = vrcp.f32 %v1427_v35  ;;  %1565 = vmatpush.msrb.mxu2 %v1536_v44 }
 0x6c0   :  { %1497 = vmatmul.f32.gmra.mxu0 %v1471_v53 }
 0x6c1   :  { %1566 = vmatpush.msrb.mxu2 %v1535_v21 }
 0x6c3   :  { %v6888_v23 = vpop.eup %6887 }
 0x6c4   :  { %v1456_v29 = vpop.f32.mrf.mxu2  ;;  %v1472_v8 = vmul.f32 %v6888_v23, %v8644_v3  ;;  %v1534_v3 = vld [vmem:[%s12082_s18 + $0x8] sm:$0xff]  ;;  %v8779_v23 = vadd.f32 %v8116_v39, %v432_v42 }
 0x6c5   :  { %v6890_v14 = vpop.eup %6889  ;;  %6891 = vrcp.f32 %v1456_v29  ;;  %1567 = vmatpush.msrb.mxu2 %v1534_v3  ;;  %v435_v29 = vadd.f32 %v8169_v15, %v406_v60 }
 0x6c6   :  { %1526 = vmatmul.f32.gmra.mxu1 %v1472_v8  ;;  %v1473_v16 = vmul.f32 %v6890_v14, %v8648_v27  ;;  %v1533_v27 = vld [vmem:[%s12082_s18] sm:$0xff] }
 0x6c7   :  { %1568 = vmatpush.msrb.mxu2 %v1533_v27 }
 0x6c8   :  { %1500 = vmatmul.f32.gmra.mxu0 %v1473_v16  ;;  %v8790_v16 = vadd.f32 %v8177_v7, %v435_v29 }
 0x6cb   :  { %v6892_v32 = vpop.eup %6891 }
 0x6cc   :  { %v1474_v40 = vmul.f32 %v6892_v32, %v8650_v62 }
 0x6ce   :  { %1529 = vmatmul.f32.gmra.mxu1 %v1474_v40 }
 0x72d   :  { %v1492_v62 = vpop.f32.mrf.mxu0 }
 0x733   :  { %v1521_v56 = vpop.f32.mrf.mxu1 }
 0x734   :  { %v1522_v57 = vadd.f32 %v1521_v56, %v1492_v62 }
 0x735   :  { %v1495_v46 = vpop.f32.mrf.mxu0 }
 0x736   :  { %6315 = vmatmul.msk.f32.vlgmr.msrb.gmra.mxu2 %vm522_vm6, %v1522_v57 }
 0x73b   :  { %v1524_v19 = vpop.f32.mrf.mxu1 }
 0x73c   :  { %v1525_v31 = vadd.f32 %v1524_v19, %v1495_v46 }
 0x73d   :  { %v1498_v18 = vpop.f32.mrf.mxu0 }
 0x73e   :  { %6316 = vmatmul.msk.f32.gmra.mxu2 %vm522_vm6, %v1525_v31 }
 0x743   :  { %v1527_v13 = vpop.f32.mrf.mxu1 }
 0x744   :  { %v1528_v20 = vadd.f32 %v1527_v13, %v1498_v18 }
 0x745   :  { %v1501_v22 = vpop.f32.mrf.mxu0 }
 0x746   :  { %6317 = vmatmul.msk.f32.gmra.mxu2 %vm522_vm6, %v1528_v20 }
 0x74b   :  { %v1530_v50 = vpop.f32.mrf.mxu1 }
 0x74c   :  { %v1531_v59 = vadd.f32 %v1530_v50, %v1501_v22 }
 0x74e   :  { %6318 = vmatmul.msk.f32.gmra.mxu2 %vm522_vm6, %v1531_v59  ;;  %v1697_v59 = vld [vmem:[%s12086_s22 + $0x18] sm:$0xff] }
 0x74f   :  { %1726 = vmatpush.msrb.mxu0 %v1697_v59 }
 0x751   :  { %1727 = vmatpush.msrb.mxu0 %v1696_v61 }
 0x753   :  { %1728 = vmatpush.msrb.mxu0 %v1695_v45 }
 0x7b9   :  { %v1570_v4 = vpop.f32.mrf.mxu2 }
 0x7ba   :  { %v1571_v41 = vadd.f32 %v6814_v58, %v1570_v4 }
 0x7bc   :  { %v1582_v55 = vadd.f32 %v1571_v41, %v7786_v24  ;;  %v7134_v41 = vld [vmem:[%s12118_s29 + $0x20] sm:$0xff] }
 0x7be   :  { %v8762_v0 = vadd.f32 %v1582_v55, %v8757_v48  ;;  %v7135_v55 = vld [vmem:[%s12118_s29 + $0x10] sm:$0xff] }
 0x7c0   :  { %v1592_v17 = vsel %vm522_vm6, %v8762_v0, 0.0 }
 0x7c1   :  { %v1573_v43 = vpop.f32.mrf.mxu2  ;;  %1593 = vadd.xlane.f32.xlu1 %v1592_v17  ;;  %v7136_v17 = vld [vmem:[%s12118_s29] sm:$0xff] }
 0x7c2   :  { %v1574_v6 = vadd.f32 %v6814_v58, %v1573_v43 }
 0x7c4   :  { %v1583_v12 = vadd.f32 %v1574_v6, %v7790_v26 }
 0x7c6   :  { %v8773_v24 = vadd.f32 %v1583_v12, %v8768_v25 }
 0x7c8   :  { %v1595_v9 = vsel %vm522_vm6, %v8773_v24, 0.0 }
 0x7c9   :  { %v1576_v35 = vpop.f32.mrf.mxu2  ;;  %1596 = vadd.xlane.f32.xlu1 %v1595_v9 }
 0x7ca   :  { %v1577_v53 = vadd.f32 %v6814_v58, %v1576_v35 }
 0x7cc   :  { %v1584_v1 = vadd.f32 %v1577_v53, %v7794_v28 }
 0x7ce   :  { %v8784_v26 = vadd.f32 %v1584_v1, %v8779_v23 }
 0x7d0   :  { %v1598_v11 = vsel %vm522_vm6, %v8784_v26, 0.0 }
 0x7d1   :  { %1599 = vadd.xlane.f32.xlu1 %v1598_v11  ;;  %v1579_v8 = vpop.f32.mrf.mxu2 }
 0x7d2   :  { %v1580_v14 = vadd.f32 %v6814_v58, %v1579_v8  ;;  %v1694_v58 = vld [vmem:[%s12086_s22] sm:$0xff] }
 0x7d3   :  { %1729 = vmatpush.msrb.mxu0 %v1694_v58  ;;  %v6815_v8 = vld [vmem:[%s12083_s20] ss:$0 sm:$0xff] }
 0x7d4   :  { %v1585_v39 = vadd.f32 %v1580_v14, %v7798_v30 }
 0x7d5   :  { %2061 = vmatpush.msra.mxu0 %v7133_v54 }
 0x7d6   :  { %v8794_v2 = vadd.f32 %v1585_v39, %v8790_v16 }
 0x7d7   :  { %2062 = vmatpush.msra.mxu0 %v7134_v41 }
 0x7d8   :  { %v1601_v28 = vsel %vm522_vm6, %v8794_v2, 0.0 }
 0x7d9   :  { %1602 = vadd.xlane.f32.xlu1 %v1601_v28  ;;  %2063 = vmatpush.msra.mxu0 %v7135_v55  ;;  %v1794_v28 = vld [vmem:[%s12087_s24 + $0x78] sm:$0xff] }
 0x7da   :  { %1799 = vmatpush.msra.mxu1 %v1794_v28  ;;  %v1783_v28 = vld [vmem:[%s12087_s24 + $0x20] sm:$0xff] }
 0x7db   :  { %2064 = vmatpush.msra.mxu0 %v7136_v17 }
 0x834   :  { %v1594_v32 = vpop.xlane.xlu1 %1593 }
 0x835   :  { %v1604_v15 = vmul.f32 %v1594_v32, %v7802_v38  ;;  %v1793_v32 = vld [vmem:[%s12087_s24 + $0x70] sm:$0xff] }
 0x836   :  { %1800 = vmatpush.msra.mxu1 %v1793_v32  ;;  %v1782_v32 = vld [vmem:[%s12087_s24 + $0x18] sm:$0xff] }
 0x837   :  { %v8800_v40 = vsub.f32 %v8762_v0, %v1604_v15 }
 0x839   :  { %v1612_v44 = vmul.f32 %v8800_v40, %v8800_v40 }
 0x83b   :  { %v1616_v7 = vsel %vm522_vm6, %v1612_v44, 0.0 }
 0x83c   :  { %v1597_v21 = vpop.xlane.xlu1 %1596  ;;  %1617 = vadd.xlane.f32.xlu1 %v1616_v7  ;;  %v6816_v7 = vld [vmem:[%s12084_s21] ss:$0 sm:$0xff] }
 0x83d   :  { %v1605_v30 = vmul.f32 %v1597_v21, %v7802_v38 }
 0x83f   :  { %v8807_v3 = vsub.f32 %v8773_v24, %v1605_v30  ;;  %v1792_v30 = vld [vmem:[%s12087_s24 + $0x68] sm:$0xff] }
 0x840   :  { %1801 = vmatpush.msra.mxu1 %v1792_v30  ;;  %v7138_v30 = vld [vmem:[%s12118_s29 + $0x28] sm:$0xff] }
 0x841   :  { %v1613_v27 = vmul.f32 %v8807_v3, %v8807_v3 }
 0x843   :  { %v1619_v62 = vsel %vm522_vm6, %v1613_v27, 0.0 }
 0x844   :  { %v1600_v56 = vpop.xlane.xlu1 %1599  ;;  %1620 = vadd.xlane.f32.xlu1 %v1619_v62 }
 0x845   :  { %v1606_v57 = vmul.f32 %v1600_v56, %v7802_v38 }
 0x847   :  { %v8814_v46 = vsub.f32 %v8784_v26, %v1606_v57 }
 0x849   :  { %v1614_v19 = vmul.f32 %v8814_v46, %v8814_v46 }
 0x84b   :  { %v1622_v31 = vsel %vm522_vm6, %v1614_v19, 0.0  ;;  %v1791_v19 = vld [vmem:[%s12087_s24 + $0x60] sm:$0xff] }
 0x84c   :  { %1623 = vadd.xlane.f32.xlu1 %v1622_v31  ;;  %v1603_v18 = vpop.xlane.xlu1 %1602  ;;  %1802 = vmatpush.msra.mxu1 %v1791_v19 }
 0x84d   :  { %v1607_v13 = vmul.f32 %v1603_v18, %v7802_v38 }
 0x84f   :  { %v8821_v20 = vsub.f32 %v8794_v2, %v1607_v13 }
 0x851   :  { %v1615_v22 = vmul.f32 %v8821_v20, %v8821_v20 }
 0x853   :  { %v1625_v50 = vsel %vm522_vm6, %v1615_v22, 0.0 }
 0x854   :  { %1626 = vadd.xlane.f32.xlu1 %v1625_v50 }
 0x8af   :  { %v1618_v4 = vpop.xlane.xlu1 %1617 }
 0x8b0   :  { %v1628_v36 = vmul.f32 %v1618_v4, %v7802_v38 }
 0x8b2   :  { %v1632_v10 = vadd.f32 1e-06, %v1628_v36 }
 0x8b4   :  { %6893 = vrsqrt.f32 %v1632_v10  ;;  %vm1642_vm14 = vweird.f32 %v1632_v10 }
 0x8b7   :  { %v1621_v43 = vpop.xlane.xlu1 %1620 }
 0x8b8   :  { %v1629_v6 = vmul.f32 %v1621_v43, %v7802_v38 }
 0x8ba   :  { %v6894_v37 = vpop.eup %6893  ;;  %v1633_v12 = vadd.f32 1e-06, %v1629_v6 }
 0x8bb   :  { %v1637_v42 = vmul.f32 %v6894_v37, %v1632_v10  ;;  %vm1643_vm13 = vweird.f32 %v6894_v37 }
 0x8bc   :  { %6895 = vrsqrt.f32 %v1633_v12  ;;  %vm1644_vm1 = vmor %vm1642_vm14, %vm1643_vm13  ;;  %vm1652_vm3 = vweird.f32 %v1633_v12 }
 0x8bd   :  { %v1638_v9 = vmul.f32 %v6894_v37, %v1637_v42 }
 0x8bf   :  { %v1639_v35 = vmul.f32 0.5, %v1638_v9  ;;  %v1624_v53 = vpop.xlane.xlu1 %1623 }
 0x8c0   :  { %v1630_v60 = vmul.f32 %v1624_v53, %v7802_v38 }
 0x8c1   :  { %v1640_v1 = vsub.f32 1.5, %v1639_v35 }
 0x8c2   :  { %v6896_v29 = vpop.eup %6895  ;;  %v1634_v11 = vadd.f32 1e-06, %v1630_v60 }
 0x8c3   :  { %v1641_v14 = vmul.f32 %v6894_v37, %v1640_v1  ;;  %v1647_v39 = vmul.f32 %v6896_v29, %v1633_v12  ;;  %vm1653_vm2 = vweird.f32 %v6896_v29 }
 0x8c4   :  { %6897 = vrsqrt.f32 %v1634_v11  ;;  %vm1654_vm4 = vmor %vm1652_vm3, %vm1653_vm2  ;;  %vm1662_vm7 = vweird.f32 %v1634_v11 }
 0x8c5   :  { %v1645_v15 = vsel %vm1644_vm1, %v6894_v37, %v1641_v14  ;;  %v1648_v44 = vmul.f32 %v6896_v29, %v1647_v39  ;;  %v1785_v14 = vld [vmem:[%s12087_s24 + $0x30] sm:$0xff]  ;;  %v1784_v39 = vld [vmem:[%s12087_s24 + $0x28] sm:$0xff] }
 0x8c6   :  { %v1676_v21 = vmul.f32 %v1645_v15, %v8800_v40  ;;  %v1781_v15 = vld [vmem:[%s12087_s24 + $0x10] sm:$0xff] }
 0x8c7   :  { %v1649_v27 = vmul.f32 0.5, %v1648_v44  ;;  %v1627_v62 = vpop.xlane.xlu1 %1626  ;;  %v1780_v44 = vld [vmem:[%s12087_s24 + $0x8] sm:$0xff] }
 0x8c8   :  { %v1683_v56 = vmul.f32 %v6815_v8, %v1676_v21  ;;  %v1631_v57 = vmul.f32 %v1627_v62, %v7802_v38  ;;  %v7137_v21 = vld [vmem:[%s12118_s29 + $0x38] sm:$0xff] }
 0x8c9   :  { %v1650_v31 = vsub.f32 1.5, %v1649_v27  ;;  %v6817_v27 = vld [vmem:[%s12085_s23] ss:$0 sm:$0xff]  ;;  %v7139_v62 = vld [vmem:[%s12118_s29 + $0x18] sm:$0xff] }
 0x8ca   :  { %v6898_v18 = vpop.eup %6897  ;;  %v1690_v13 = vadd.f32 %v6816_v7, %v1683_v56  ;;  %v1635_v40 = vadd.f32 1e-06, %v1631_v57  ;;  %v7140_v56 = vld [vmem:[%s12118_s29 + $0x8] sm:$0xff] }
 0x8cb   :  { %v1651_v22 = vmul.f32 %v6896_v29, %v1650_v31  ;;  %v1657_v50 = vmul.f32 %v6898_v18, %v1634_v11  ;;  %vm1663_vm5 = vweird.f32 %v6898_v18  ;;  %v1788_v11 = vld [vmem:[%s12087_s24 + $0x48] sm:$0xff] }
 0x8cc   :  { %6899 = vrsqrt.f32 %v1635_v40  ;;  %6319 = vmatmul.msk.f32.vlgmr.msrb.gmra.mxu0 %vm522_vm6, %v1690_v13  ;;  %vm1664_vm9 = vmor %vm1662_vm7, %vm1663_vm5  ;;  %vm1672_vm11 = vweird.f32 %v1635_v40 }
 0x8cd   :  { %v1655_v59 = vsel %vm1654_vm4, %v6896_v29, %v1651_v22  ;;  %v1658_v61 = vmul.f32 %v6898_v18, %v1657_v50  ;;  %v1789_v29 = vld [vmem:[%s12087_s24 + $0x50] sm:$0xff] }
 0x8ce   :  { %v1677_v45 = vmul.f32 %v1655_v59, %v8807_v3 }
 0x8cf   :  { %v1659_v58 = vmul.f32 0.5, %v1658_v61 }
 0x8d0   :  { %v1684_v54 = vmul.f32 %v6815_v8, %v1677_v45 }
 0x8d1   :  { %v1660_v4 = vsub.f32 1.5, %v1659_v58 }
 0x8d2   :  { %v6900_v41 = vpop.eup %6899  ;;  %v1691_v36 = vadd.f32 %v6816_v7, %v1684_v54 }
 0x8d3   :  { %v1661_v55 = vmul.f32 %v6898_v18, %v1660_v4  ;;  %v1667_v10 = vmul.f32 %v6900_v41, %v1635_v40  ;;  %vm1673_vm10 = vweird.f32 %v6900_v41 }
 0x8d4   :  { %6320 = vmatmul.msk.f32.gmra.mxu0 %vm522_vm6, %v1691_v36  ;;  %vm1674_vm12 = vmor %vm1672_vm11, %vm1673_vm10 }
 0x8d5   :  { %v1665_v17 = vsel %vm1664_vm9, %v6898_v18, %v1661_v55  ;;  %v1668_v43 = vmul.f32 %v6900_v41, %v1667_v10 }
 0x8d6   :  { %v1678_v6 = vmul.f32 %v1665_v17, %v8814_v46  ;;  %v1790_v46 = vld [vmem:[%s12087_s24 + $0x58] sm:$0xff] }
 0x8d7   :  { %v1669_v37 = vmul.f32 0.5, %v1668_v43  ;;  %1803 = vmatpush.msra.mxu1 %v1790_v46 }
 0x8d8   :  { %v1685_v12 = vmul.f32 %v6815_v8, %v1678_v6 }
 0x8d9   :  { %v1670_v42 = vsub.f32 1.5, %v1669_v37  ;;  %1804 = vmatpush.msra.mxu1 %v1789_v29 }
 0x8da   :  { %v1692_v3 = vadd.f32 %v6816_v7, %v1685_v12 }
 0x8db   :  { %v1671_v9 = vmul.f32 %v6900_v41, %v1670_v42  ;;  %1805 = vmatpush.msra.mxu1 %v1788_v11 }
 0x8dc   :  { %6321 = vmatmul.msk.f32.gmra.mxu0 %vm522_vm6, %v1692_v3 }
 0x8dd   :  { %v1675_v35 = vsel %vm1674_vm12, %v6900_v41, %v1671_v9 }
 0x8de   :  { %v1679_v53 = vmul.f32 %v1675_v35, %v8821_v20  ;;  %v1787_v20 = vld [vmem:[%s12087_s24 + $0x40] sm:$0xff] }
 0x8df   :  { %1806 = vmatpush.msra.mxu1 %v1787_v20 }
 0x8e0   :  { %v1686_v60 = vmul.f32 %v6815_v8, %v1679_v53  ;;  %v1786_v8 = vld [vmem:[%s12087_s24 + $0x38] sm:$0xff] }
 0x8e1   :  { %1807 = vmatpush.msra.mxu1 %v1786_v8 }
 0x8e2   :  { %v1693_v1 = vadd.f32 %v6816_v7, %v1686_v60  ;;  %v1779_v7 = vld [vmem:[%s12087_s24] sm:$0xff] }
 0x8e3   :  { %1808 = vmatpush.msra.mxu1 %v1785_v14 }
 0x8e4   :  { %6322 = vmatmul.msk.f32.gmra.mxu0 %vm522_vm6, %v1693_v1 }
 0x8e5   :  { %1809 = vmatpush.msra.mxu1 %v1784_v39 }
 0x8e7   :  { %1810 = vmatpush.msra.mxu1 %v1783_v28 }
 0x8e9   :  { %1811 = vmatpush.msra.mxu1 %v1782_v32 }
 0x8eb   :  { %1812 = vmatpush.msra.mxu1 %v1781_v15 }
 0x8ed   :  { %1813 = vmatpush.msra.mxu1 %v1780_v44 }
 0x8ef   :  { %1814 = vmatpush.msra.mxu1 %v1779_v7 }
 0x8f1   :  { %2090 = vmatpush.msrb.mxu1 %v7137_v21 }
 0x8f3   :  { %2091 = vmatpush.msrb.mxu1 %v7138_v30 }
 0x8f5   :  { %2092 = vmatpush.msrb.mxu1 %v7139_v62 }
 0x8f7   :  { %2093 = vmatpush.msrb.mxu1 %v7140_v56 }
 0x949   :  { %v1731_v57 = vpop.f32.mrf.mxu0 }
 0x94a   :  { %v1732_v19 = vadd.f32 %v6817_v27, %v1731_v57 }
 0x94c   :  { %v1747_v31 = vmul.f32 0.044715, %v1732_v19  ;;  %v1743_v17 = vmul.f32 0.5, %v1732_v19 }
 0x94e   :  { %v1751_v18 = vmul.f32 %v1747_v31, %v1732_v19 }
 0x950   :  { %v1755_v13 = vmul.f32 %v1751_v18, %v1732_v19 }
 0x951   :  { %v1734_v40 = vpop.f32.mrf.mxu0 }
 0x952   :  { %v1759_v22 = vadd.f32 %v1755_v13, %v1732_v19  ;;  %v1735_v50 = vadd.f32 %v6817_v27, %v1734_v40 }
 0x954   :  { %v1763_v59 = vmul.f32 0.7978846, %v1759_v22  ;;  %v1748_v61 = vmul.f32 0.044715, %v1735_v50  ;;  %v1744_v1 = vmul.f32 0.5, %v1735_v50 }
 0x956   :  { %6901 = vtanh.f32 %v1763_v59  ;;  %v1752_v45 = vmul.f32 %v1748_v61, %v1735_v50 }
 0x958   :  { %v1756_v58 = vmul.f32 %v1752_v45, %v1735_v50 }
 0x959   :  { %v1737_v54 = vpop.f32.mrf.mxu0 }
 0x95a   :  { %v1738_v4 = vadd.f32 %v6817_v27, %v1737_v54  ;;  %v1760_v41 = vadd.f32 %v1756_v58, %v1735_v50 }
 0x95c   :  { %v6902_v36 = vpop.eup %6901  ;;  %v1749_v55 = vmul.f32 0.044715, %v1738_v4  ;;  %v1764_v10 = vmul.f32 0.7978846, %v1760_v41  ;;  %v1745_v28 = vmul.f32 0.5, %v1738_v4 }
 0x95d   :  { %v1771_v43 = vadd.f32 1.0, %v6902_v36 }
 0x95e   :  { %6903 = vtanh.f32 %v1764_v10  ;;  %v1753_v6 = vmul.f32 %v1749_v55, %v1738_v4 }
 0x95f   :  { %v1775_v37 = vmul.f32 %v1771_v43, %v1743_v17 }
 0x960   :  { %v1757_v12 = vmul.f32 %v1753_v6, %v1738_v4 }
 0x961   :  { %v1740_v42 = vpop.f32.mrf.mxu0  ;;  %1815 = vmatmul.f32.vlgmr.msra.gmra.mxu1 %v1775_v37 }
 0x962   :  { %v1741_v3 = vadd.f32 %v6817_v27, %v1740_v42  ;;  %v1761_v9 = vadd.f32 %v1757_v12, %v1738_v4  ;;  %v6818_v27 = vld [vmem:[%s12088_s25] ss:$0 sm:$0xff] }
 0x964   :  { %v6904_v35 = vpop.eup %6903  ;;  %v1750_v53 = vmul.f32 0.044715, %v1741_v3  ;;  %v1765_v60 = vmul.f32 0.7978846, %v1761_v9  ;;  %v1746_v7 = vmul.f32 0.5, %v1741_v3 }
 0x965   :  { %v1772_v46 = vadd.f32 1.0, %v6904_v35 }
 0x966   :  { %6905 = vtanh.f32 %v1765_v60  ;;  %v1754_v29 = vmul.f32 %v1750_v53, %v1741_v3 }
 0x967   :  { %v1776_v11 = vmul.f32 %v1772_v46, %v1744_v1  ;;  %v6328_v46 = vld [vmem:[%s12119_s28 + $0x38] sm:$0xff] }
 0x968   :  { %v1758_v20 = vmul.f32 %v1754_v29, %v1741_v3  ;;  %1972 = vmatpush.msra.mxu2 %v6328_v46  ;;  %v6327_v29 = vld [vmem:[%s12119_s28 + $0x30] sm:$0xff] }
 0x969   :  { %1818 = vmatmul.f32.gmra.mxu1 %v1776_v11  ;;  %v6326_v11 = vld [vmem:[%s12119_s28 + $0x28] sm:$0xff] }
 0x96a   :  { %v1762_v8 = vadd.f32 %v1758_v20, %v1741_v3  ;;  %1973 = vmatpush.msra.mxu2 %v6327_v29  ;;  %v6325_v20 = vld [vmem:[%s12119_s28 + $0x20] sm:$0xff] }
 0x96c   :  { %v6906_v14 = vpop.eup %6905  ;;  %v1766_v39 = vmul.f32 0.7978846, %v1762_v8  ;;  %1974 = vmatpush.msra.mxu2 %v6326_v11 }
 0x96d   :  { %v1773_v32 = vadd.f32 1.0, %v6906_v14 }
 0x96e   :  { %6907 = vtanh.f32 %v1766_v39  ;;  %1975 = vmatpush.msra.mxu2 %v6325_v20 }
 0x96f   :  { %v1777_v15 = vmul.f32 %v1773_v32, %v1745_v28 }
 0x971   :  { %1821 = vmatmul.f32.gmra.mxu1 %v1777_v15 }
 0x974   :  { %v6908_v44 = vpop.eup %6907 }
 0x975   :  { %v1774_v21 = vadd.f32 1.0, %v6908_v44 }
 0x977   :  { %v1778_v30 = vmul.f32 %v1774_v21, %v1746_v7 }
 0x979   :  { %1824 = vmatmul.f32.gmra.mxu1 %v1778_v30 }
 0x9de   :  { %v1816_v62 = vpop.f32.mrf.mxu1 }
 0x9df   :  { %v1817_v56 = vadd.f32 %v6818_v27, %v1816_v62 }
 0x9e1   :  { %v8935_v57 = vadd.f32 %v1817_v56, %v8762_v0 }
 0x9e3   :  { %v1836_v19 = vsel %vm522_vm6, %v8935_v57, 0.0 }
 0x9e4   :  { %1837 = vadd.xlane.f32.xlu1 %v1836_v19 }
 0x9e6   :  { %v1819_v31 = vpop.f32.mrf.mxu1 }
 0x9e7   :  { %v1820_v18 = vadd.f32 %v6818_v27, %v1819_v31 }
 0x9e9   :  { %v8940_v13 = vadd.f32 %v1820_v18, %v8773_v24 }
 0x9eb   :  { %v1839_v40 = vsel %vm522_vm6, %v8940_v13, 0.0 }
 0x9ec   :  { %1840 = vadd.xlane.f32.xlu2 %v1839_v40 }
 0x9ee   :  { %v1822_v22 = vpop.f32.mrf.mxu1 }
 0x9ef   :  { %v1823_v50 = vadd.f32 %v6818_v27, %v1822_v22  ;;  %v6819_v22 = vld [vmem:[%s12120_s0 + $0x1] ss:$0 sm:$0xff] }
 0x9f1   :  { %v8945_v59 = vadd.f32 %v1823_v50, %v8784_v26 }
 0x9f3   :  { %v1842_v0 = vsel %vm522_vm6, %v8945_v59, 0.0 }
 0x9f4   :  { %1843 = vadd.xlane.f32.xlu1 %v1842_v0 }
 0x9f6   :  { %v1825_v61 = vpop.f32.mrf.mxu1 }
 0x9f7   :  { %v1826_v45 = vadd.f32 %v6818_v27, %v1825_v61  ;;  %v6820_v61 = vld [vmem:[%s12121_s27 + $0x1] ss:$0 sm:$0xff] }
 0x9f9   :  { %v8950_v58 = vadd.f32 %v1826_v45, %v8794_v2 }
 0x9fb   :  { %v1845_v24 = vsel %vm522_vm6, %v8950_v58, 0.0 }
 0x9fc   :  { %1846 = vadd.xlane.f32.xlu2 %v1845_v24 }
 0xa57   :  { %v1838_v54 = vpop.xlane.xlu1 %1837 }
 0xa58   :  { %v1848_v4 = vmul.f32 %v1838_v54, %v7802_v38 }
 0xa5a   :  { %v1852_v41 = vsub.f32 %v8935_v57, %v1848_v4 }
 0xa5c   :  { %v1856_v26 = vmul.f32 %v1852_v41, %v1852_v41 }
 0xa5e   :  { %v1860_v36 = vsel %vm522_vm6, %v1856_v26, 0.0 }
 0xa5f   :  { %v1841_v55 = vpop.xlane.xlu2 %1840  ;;  %1861 = vadd.xlane.f32.xlu1 %v1860_v36 }
 0xa60   :  { %v1849_v10 = vmul.f32 %v1841_v55, %v7802_v38 }
 0xa62   :  { %v8959_v17 = vsub.f32 %v8940_v13, %v1849_v10 }
 0xa64   :  { %v1857_v2 = vmul.f32 %v8959_v17, %v8959_v17 }
 0xa66   :  { %v1863_v43 = vsel %vm522_vm6, %v1857_v2, 0.0 }
 0xa67   :  { %1864 = vadd.xlane.f32.xlu2 %v1863_v43  ;;  %v1844_v6 = vpop.xlane.xlu1 %1843 }
 0xa68   :  { %v1850_v37 = vmul.f32 %v1844_v6, %v7802_v38 }
 0xa6a   :  { %v8966_v12 = vsub.f32 %v8945_v59, %v1850_v37 }
 0xa6c   :  { %v1858_v42 = vmul.f32 %v8966_v12, %v8966_v12 }
 0xa6e   :  { %v1866_v3 = vsel %vm522_vm6, %v1858_v42, 0.0 }
 0xa6f   :  { %v1847_v9 = vpop.xlane.xlu2 %1846  ;;  %1867 = vadd.xlane.f32.xlu1 %v1866_v3 }
 0xa70   :  { %v1851_v35 = vmul.f32 %v1847_v9, %v7802_v38 }
 0xa72   :  { %v8973_v53 = vsub.f32 %v8950_v58, %v1851_v35 }
 0xa74   :  { %v1859_v60 = vmul.f32 %v8973_v53, %v8973_v53 }
 0xa76   :  { %v1869_v1 = vsel %vm522_vm6, %v1859_v60, 0.0 }
 0xa77   :  { %1870 = vadd.xlane.f32.xlu2 %v1869_v1 }
 0xad2   :  { %v1862_v8 = vpop.xlane.xlu1 %1861 }
 0xad3   :  { %v1872_v14 = vmul.f32 %v1862_v8, %v7802_v38 }
 0xad5   :  { %v1876_v39 = vadd.f32 1e-06, %v1872_v14 }
 0xad7   :  { %6909 = vrsqrt.f32 %v1876_v39  ;;  %vm1886_vm14 = vweird.f32 %v1876_v39 }
 0xada   :  { %v1865_v28 = vpop.xlane.xlu2 %1864 }
 0xadb   :  { %v1873_v32 = vmul.f32 %v1865_v28, %v7802_v38 }
 0xadd   :  { %v6910_v15 = vpop.eup %6909  ;;  %v1877_v44 = vadd.f32 1e-06, %v1873_v32 }
 0xade   :  { %v1881_v7 = vmul.f32 %v6910_v15, %v1876_v39  ;;  %vm1887_vm13 = vweird.f32 %v6910_v15 }
 0xadf   :  { %6911 = vrsqrt.f32 %v1877_v44  ;;  %vm1888_vm1 = vmor %vm1886_vm14, %vm1887_vm13  ;;  %vm1896_vm3 = vweird.f32 %v1877_v44 }
 0xae0   :  { %v1882_v21 = vmul.f32 %v6910_v15, %v1881_v7 }
 0xae2   :  { %v1883_v30 = vmul.f32 0.5, %v1882_v21  ;;  %v1868_v27 = vpop.xlane.xlu1 %1867 }
 0xae3   :  { %v1874_v62 = vmul.f32 %v1868_v27, %v7802_v38 }
 0xae4   :  { %v1884_v56 = vsub.f32 1.5, %v1883_v30 }
 0xae5   :  { %v6912_v19 = vpop.eup %6911  ;;  %v1878_v31 = vadd.f32 1e-06, %v1874_v62 }
 0xae6   :  { %v1885_v18 = vmul.f32 %v6910_v15, %v1884_v56  ;;  %v1891_v40 = vmul.f32 %v6912_v19, %v1877_v44  ;;  %vm1897_vm2 = vweird.f32 %v6912_v19 }
 0xae7   :  { %6913 = vrsqrt.f32 %v1878_v31  ;;  %vm1898_vm4 = vmor %vm1896_vm3, %vm1897_vm2  ;;  %vm1906_vm7 = vweird.f32 %v1878_v31 }
 0xae8   :  { %v1889_v50 = vsel %vm1888_vm1, %v6910_v15, %v1885_v18  ;;  %v1892_v0 = vmul.f32 %v6912_v19, %v1891_v40 }
 0xae9   :  { %v1920_v45 = vmul.f32 %v1889_v50, %v1852_v41 }
 0xaea   :  { %v1893_v24 = vmul.f32 0.5, %v1892_v0  ;;  %v1871_v54 = vpop.xlane.xlu2 %1870 }
 0xaeb   :  { %v1927_v4 = vmul.f32 %v6819_v22, %v1920_v45  ;;  %v1875_v26 = vmul.f32 %v1871_v54, %v7802_v38 }
 0xaec   :  { %v1894_v36 = vsub.f32 1.5, %v1893_v24 }
 0xaed   :  { %v6914_v55 = vpop.eup %6913  ;;  %v1934_v10 = vadd.f32 %v6820_v61, %v1927_v4  ;;  %v1879_v2 = vadd.f32 1e-06, %v1875_v26 }
 0xaee   :  { %v1895_v43 = vmul.f32 %v6912_v19, %v1894_v36  ;;  %v1901_v6 = vmul.f32 %v6914_v55, %v1878_v31  ;;  %vm1907_vm5 = vweird.f32 %v6914_v55 }
 0xaef   :  { %6915 = vrsqrt.f32 %v1879_v2  ;;  %6330 = vmatmul.msk.f32.vlgmr.msra.gmra.mxu2 %vm522_vm6, %v1934_v10  ;;  %vm1908_vm9 = vmor %vm1906_vm7, %vm1907_vm5  ;;  %vm1916_vm11 = vweird.f32 %v1879_v2  ;;  %v7141_v10 = vld [vmem:[%s12075_s8] sm:$0xff] }
 0xaf0   :  { %v1899_v37 = vsel %vm1898_vm4, %v6912_v19, %v1895_v43  ;;  %v1902_v42 = vmul.f32 %v6914_v55, %v1901_v6  ;;  %v7143_v43 = vld [vmem:[%s12075_s8 + $0x8] sm:$0xff]  ;;  %v7144_v6 = vld [vmem:[%s12075_s8 + $0x10] sm:$0xff] }
 0xaf1   :  { %v1921_v41 = vmul.f32 %v1899_v37, %v8959_v17  ;;  %v7145_v37 = vld [vmem:[%s12075_s8 + $0x18] sm:$0xff] }
 0xaf2   :  { %v1903_v3 = vmul.f32 0.5, %v1902_v42  ;;  %v7146_v42 = vld [vmem:[%s12075_s8 + $0x20] sm:$0xff] }
 0xaf3   :  { %v1928_v9 = vmul.f32 %v6819_v22, %v1921_v41  ;;  %v7147_v41 = vld [vmem:[%s12075_s8 + $0x28] sm:$0xff] }
 0xaf4   :  { %v1904_v35 = vsub.f32 1.5, %v1903_v3  ;;  %v7148_v3 = vld [vmem:[%s12075_s8 + $0x30] sm:$0xff] }
 0xaf5   :  { %v6916_v60 = vpop.eup %6915  ;;  %v1935_v1 = vadd.f32 %v6820_v61, %v1928_v9  ;;  %v7149_v9 = vld [vmem:[%s12075_s8 + $0x38] sm:$0xff] }
 0xaf6   :  { %v1905_v46 = vmul.f32 %v6914_v55, %v1904_v35  ;;  %v1911_v29 = vmul.f32 %v6916_v60, %v1879_v2  ;;  %vm1917_vm10 = vweird.f32 %v6916_v60  ;;  %v9039_v2 = vld [vmem:[%s12080_s13] sm:$0xff] }
 0xaf7   :  { %6331 = vmatmul.msk.f32.gmra.mxu2 %vm522_vm6, %v1935_v1  ;;  %vm1918_vm12 = vmor %vm1916_vm11, %vm1917_vm10  ;;  %v7150_v35 = vld [vmem:[%s12075_s8 + $0x40] sm:$0xff]  ;;  %v7152_v1 = vld [vmem:[%s12075_s8 + $0x50] sm:$0xff] }
 0xaf8   :  { %v1909_v11 = vsel %vm1908_vm9, %v6914_v55, %v1905_v46  ;;  %v1912_v20 = vmul.f32 %v6916_v60, %v1911_v29  ;;  %v7153_v46 = vld [vmem:[%s12075_s8 + $0x58] sm:$0xff]  ;;  %v7154_v29 = vld [vmem:[%s12075_s8 + $0x60] sm:$0xff] }
 0xaf9   :  { %v1922_v8 = vmul.f32 %v1909_v11, %v8966_v12  ;;  %v6821_v12 = vld [vmem:[%s12074_s17 + $0x1] ss:$0 sm:$0xff]  ;;  %v7155_v11 = vld [vmem:[%s12075_s8 + $0x68] sm:$0xff] }
 0xafa   :  { %v1913_v14 = vmul.f32 0.5, %v1912_v20  ;;  %v7156_v20 = vld [vmem:[%s12075_s8 + $0x70] sm:$0xff] }
 0xafb   :  { %v1929_v39 = vmul.f32 %v6819_v22, %v1922_v8  ;;  %v7157_v8 = vld [vmem:[%s12075_s8 + $0x78] sm:$0xff] }
 0xafc   :  { %v1914_v28 = vsub.f32 1.5, %v1913_v14 }
 0xafd   :  { %v1936_v17 = vadd.f32 %v6820_v61, %v1929_v39  ;;  %v7158_v39 = vld [vmem:[%s12075_s8 + $0x80] sm:$0xff] }
 0xafe   :  { %v1915_v32 = vmul.f32 %v6916_v60, %v1914_v28 }
 0xaff   :  { %6332 = vmatmul.msk.f32.gmra.mxu2 %vm522_vm6, %v1936_v17  ;;  %v7159_v17 = vld [vmem:[%s12075_s8 + $0x88] sm:$0xff] }
 0xb00   :  { %v1919_v15 = vsel %vm1918_vm12, %v6916_v60, %v1915_v32  ;;  %v7151_v60 = vld [vmem:[%s12075_s8 + $0x48] sm:$0xff] }
 0xb01   :  { %v1923_v44 = vmul.f32 %v1919_v15, %v8973_v53  ;;  %v7160_v15 = vld [vmem:[%s12075_s8 + $0x90] sm:$0xff] }
 0xb03   :  { %v1930_v7 = vmul.f32 %v6819_v22, %v1923_v44 }
 0xb05   :  { %v1937_v21 = vadd.f32 %v6820_v61, %v1930_v7  ;;  %v7161_v7 = vld [vmem:[%s12075_s8 + $0x98] sm:$0xff] }
 0xb07   :  { %6333 = vmatmul.msk.f32.gmra.mxu2 %vm522_vm6, %v1937_v21  ;;  %v7162_v21 = vld [vmem:[%s12075_s8 + $0xa0] sm:$0xff] }
 0xb72   :  { %v1977_v30 = vpop.f32.mrf.mxu2 }
 0xb73   :  { %v9010_v27 = vadd.f32 %v6821_v12, %v1977_v30  ;;  %v7164_v30 = vld [vmem:[%s12075_s8 + $0xb0] sm:$0xff] }
 0xb75   :  { %1993 = vrot.lane.b32.xlu1 %v9010_v27, %s7591_s1 }
 0xb7a   :  { %v1980_v62 = vpop.f32.mrf.mxu2 }
 0xb7b   :  { %v9014_v56 = vadd.f32 %v6821_v12, %v1980_v62  ;;  %v7165_v62 = vld [vmem:[%s12075_s8 + $0xb8] sm:$0xff] }
 0xb7d   :  { %1995 = vrot.lane.b32.xlu0 %v9014_v56, %s7591_s1  ;;  %v6775_v22 = vpack.i.bf16 %v9010_v27, %v9014_v56 }
 0xb82   :  { %v1983_v53 = vpop.f32.mrf.mxu2 }
 0xb83   :  { %v9018_v19 = vadd.f32 %v6821_v12, %v1983_v53 }
 0xb85   :  { %1997 = vrot.lane.b32.xlu2 %v9018_v19, %s7591_s1 }
 0xb8a   :  { %v1986_v31 = vpop.f32.mrf.mxu2 }
 0xb8b   :  { %v9022_v18 = vadd.f32 %v6821_v12, %v1986_v31  ;;  %v7163_v12 = vld [vmem:[%s12075_s8 + $0xa8] sm:$0xff] }
 0xb8d   :  { %1999 = vrot.lane.b32.xlu0 %v9022_v18, %s7591_s1  ;;  %v6770_v40 = vpack.i.bf16 %v9018_v19, %v9022_v18 }
 0xb8f   :  { %6771 = vrot.lane.b32.xlu2 %v6770_v40, %s12123_s5 }
 0xb95   :  { %6776 = vrot.lane.b32.xlu0 %v6775_v22, %s12123_s5 }
 0xbdf   :  { %v1998_v50 = vpop.permute.xlu2 %1997 }
 0xbe7   :  { %v1994_v0 = vpop.permute.xlu1 %1993 }
 0xbe8   :  { %2005 = vxpose.xlu1.b32.start [1/4] (short) (narrow) %v1994_v0, 32 }
 0xbe9   :  { %v6772_v61 = vpop.permute.xlu2 %6771 }
 0xbea   :  { %v6773_v45 = vunpack.i.l.bf16 %v6772_v61  ;;  %v6774_v24 = vunpack.i.h.bf16 %v6772_v61 }
 0xbec   :  { %2139 = vmatpush.msrb.mxu2 %v6773_v45 }
 0xbee   :  { %2140 = vmatpush.msrb.mxu2 %v6774_v24  ;;  %v7166_v24 = vld [vmem:[%s12076_s9 + $0x30] sm:$0xff] }
 0xbef   :  { %v1996_v54 = vpop.permute.xlu0 %1995 }
 0xbf0   :  { %2006 = vxpose.xlu1.b32.cont [2/4] (short) (narrow) %v1996_v54, 32 }
 0xbf8   :  { %2007 = vxpose.xlu1.b32.cont [3/4] (short) (narrow) %v1998_v50, 32 }
 0xbff   :  { %v2000_v4 = vpop.permute.xlu0 %1999 }
 0xc00   :  { %2008 = vxpose.xlu1.b32.end [4/4] (short) (narrow) %v2000_v4, 32  ;;  %v7167_v4 = vld [vmem:[%s12076_s9 + $0x38] sm:$0xff] }
 0xc07   :  { %v6777_v26 = vpop.permute.xlu0 %6776 }
 0xc08   :  { %v6778_v36 = vunpack.i.l.bf16 %v6777_v26  ;;  %v6779_v55 = vunpack.i.h.bf16 %v6777_v26 }
 0xc0a   :  { %2141 = vmatpush.msrb.mxu2 %v6778_v36 }
 0xc0c   :  { %2142 = vmatpush.msrb.mxu2 %v6779_v55  ;;  %v7168_v55 = vld [vmem:[%s12075_s8 + $0xc0] sm:$0xff] }
 0xc0d   :  { %6342 = vmatmul.msk.f32.vlgmr.msrb.gmra.mxu2 %vm522_vm6, %v7141_v10  ;;  %v7169_v10 = vld [vmem:[%s12076_s9 + $0x20] sm:$0xff] }
 0xc0e   :  { %3510 = vmatpush.msra.mxu2 %v9039_v2 }
 0xc15   :  { %6343 = vmatmul.msk.f32.gmra.mxu2 %vm522_vm6, %v7143_v43 }
 0xc1d   :  { %6344 = vmatmul.msk.f32.gmra.mxu2 %vm522_vm6, %v7144_v6  ;;  %v7170_v6 = vld [vmem:[%s12076_s9 + $0x28] sm:$0xff] }
 0xc25   :  { %6345 = vmatmul.msk.f32.gmra.mxu2 %vm522_vm6, %v7145_v37 }
 0xc2d   :  { %6346 = vmatmul.msk.f32.gmra.mxu2 %vm522_vm6, %v7146_v42  ;;  %v7171_v42 = vld [vmem:[%s12076_s9 + $0x10] sm:$0xff] }
 0xc35   :  { %6347 = vmatmul.msk.f32.gmra.mxu2 %vm522_vm6, %v7147_v41 }
 0xc3d   :  { %6348 = vmatmul.msk.f32.gmra.mxu2 %vm522_vm6, %v7148_v3  ;;  %v7172_v3 = vld [vmem:[%s12076_s9 + $0x18] sm:$0xff] }
 0xc45   :  { %6349 = vmatmul.msk.f32.gmra.mxu2 %vm522_vm6, %v7149_v9 }
 0xc4d   :  { %6350 = vmatmul.msk.f32.gmra.mxu2 %vm522_vm6, %v7150_v35  ;;  %v7173_v35 = vld [vmem:[%s12076_s9] sm:$0xff] }
 0xc55   :  { %6351 = vmatmul.msk.f32.gmra.mxu2 %vm522_vm6, %v7151_v60 }
 0xc5d   :  { %6352 = vmatmul.msk.f32.gmra.mxu2 %vm522_vm6, %v7152_v1  ;;  %v7174_v1 = vld [vmem:[%s12076_s9 + $0x8] sm:$0xff] }
 0xc65   :  { %6353 = vmatmul.msk.f32.gmra.mxu2 %vm522_vm6, %v7153_v46 }
 0xc6d   :  { %6354 = vmatmul.msk.f32.gmra.mxu2 %vm522_vm6, %v7154_v29 }
 0xc75   :  { %6355 = vmatmul.msk.f32.gmra.mxu2 %vm522_vm6, %v7155_v11  ;;  %v7175_v11 = vld [vmem:[%s12075_s8 + $0xc8] sm:$0xff] }
 0xc7d   :  { %6356 = vmatmul.msk.f32.gmra.mxu2 %vm522_vm6, %v7156_v20  ;;  %v7176_v20 = vld [vmem:[%s12078_s12 + $0x78] sm:$0xff] }
 0xc85   :  { %6357 = vmatmul.msk.f32.gmra.mxu2 %vm522_vm6, %v7157_v8  ;;  %v7177_v8 = vld [vmem:[%s12078_s12 + $0xf8] sm:$0xff] }
 0xc8c   :  { %v2021_v14 = vpop.trf.xlu1 }
 0xc8d   :  { %6334 = vmatmul.msk.f32.vlgmr.msra.gmra.mxu0 %vm522_vm6, %v2021_v14  ;;  %6338 = vmatmul.msk.f32.vlgmr.msrb.gmra.mxu1 %vm522_vm6, %v2021_v14  ;;  %v7179_v14 = vld [vmem:[%s12078_s12 + $0xf0] sm:$0xff] }
 0xc8e   :  { %6358 = vmatmul.msk.f32.gmra.mxu2 %vm522_vm6, %v7158_v39  ;;  %v7180_v39 = vld [vmem:[%s12078_s12 + $0x68] sm:$0xff] }
 0xc90   :  { %v9148_v36 = vpop.f32.mrf.mxu2 }
 0xc94   :  { %v2022_v28 = vpop.trf.xlu1 }
 0xc95   :  { %6335 = vmatmul.msk.f32.gmra.mxu0 %vm522_vm6, %v2022_v28  ;;  %6339 = vmatmul.msk.f32.gmra.mxu1 %vm522_vm6, %v2022_v28  ;;  %v7181_v28 = vld [vmem:[%s12078_s12 + $0xe8] sm:$0xff] }
 0xc96   :  { %6359 = vmatmul.msk.f32.gmra.mxu2 %vm522_vm6, %v7159_v17  ;;  %v7182_v17 = vld [vmem:[%s12078_s12 + $0x60] sm:$0xff] }
 0xc98   :  { %v9176_v29 = vpop.f32.mrf.mxu2 }
 0xc9c   :  { %v2023_v32 = vpop.trf.xlu1 }
 0xc9d   :  { %6336 = vmatmul.msk.f32.gmra.mxu0 %vm522_vm6, %v2023_v32  ;;  %6340 = vmatmul.msk.f32.gmra.mxu1 %vm522_vm6, %v2023_v32 }
 0xc9e   :  { %6360 = vmatmul.msk.f32.gmra.mxu2 %vm522_vm6, %v7160_v15  ;;  %v7183_v15 = vld [vmem:[%s12075_s8 + $0xd0] sm:$0xff] }
 0xca0   :  { %v9207_v32 = vpop.f32.mrf.mxu2 }
 0xca4   :  { %v2024_v44 = vpop.trf.xlu1 }
 0xca5   :  { %6337 = vmatmul.msk.f32.gmra.mxu0 %vm522_vm6, %v2024_v44  ;;  %6341 = vmatmul.msk.f32.gmra.mxu1 %vm522_vm6, %v2024_v44  ;;  %v7184_v44 = vld [vmem:[%s12078_s12 + $0xe0] sm:$0xff] }
 0xca6   :  { %6361 = vmatmul.msk.f32.gmra.mxu2 %vm522_vm6, %v7161_v7  ;;  %v7185_v7 = vld [vmem:[%s12078_s12 + $0x58] sm:$0xff] }
 0xcae   :  { %6362 = vmatmul.msk.f32.gmra.mxu2 %vm522_vm6, %v7162_v21  ;;  %v7187_v21 = vld [vmem:[%s12078_s12 + $0x50] sm:$0xff] }
 0xcb6   :  { %6363 = vmatmul.msk.f32.gmra.mxu2 %vm522_vm6, %v7163_v12  ;;  %v7188_v12 = vld [vmem:[%s12078_s12 + $0xd0] sm:$0xff] }
 0xcbe   :  { %6364 = vmatmul.msk.f32.gmra.mxu2 %vm522_vm6, %v7164_v30  ;;  %v7189_v30 = vld [vmem:[%s12078_s12 + $0x48] sm:$0xff] }
 0xcc6   :  { %6365 = vmatmul.msk.f32.gmra.mxu2 %vm522_vm6, %v7165_v62  ;;  %v7190_v62 = vld [vmem:[%s12078_s12 + $0xc8] sm:$0xff] }
 0xcce   :  { %6366 = vmatmul.msk.f32.gmra.mxu2 %vm522_vm6, %v7168_v55  ;;  %v7203_v55 = vld [vmem:[%s12078_s12 + $0x18] sm:$0xff] }
 0xcd6   :  { %6367 = vmatmul.msk.f32.gmra.mxu2 %vm522_vm6, %v7175_v11 }
 0xcde   :  { %6368 = vmatmul.msk.f32.gmra.mxu2 %vm522_vm6, %v7183_v15 }
 0xd0a   :  { %v2066_v53 = vpop.f32.mrf.mxu0  ;;  %v2095_v31 = vpop.f32.mrf.mxu1 }
 0xd0b   :  { %v2107_v60 = vmul.f32 %v7173_v35, %v2066_v53  ;;  %v2108_v46 = vmul.f32 %v7174_v1, %v2095_v31  ;;  %v9238_v53 = vpop.f32.mrf.mxu2  ;;  %v7191_v31 = vld [vmem:[%s12075_s8 + $0xd8] sm:$0xff]  ;;  %v7211_v35 = vld [vmem:[%s12078_s12 + $0x80] sm:$0xff] }
 0xd0c   :  { %6369 = vmatmul.msk.f32.gmra.mxu2 %vm522_vm6, %v7191_v31 }
 0xd12   :  { %v2069_v40 = vpop.f32.mrf.mxu0  ;;  %v2098_v22 = vpop.f32.mrf.mxu1 }
 0xd13   :  { %v2109_v41 = vmul.f32 %v7171_v42, %v2069_v40  ;;  %v2110_v9 = vmul.f32 %v7172_v3, %v2098_v22  ;;  %v7192_v40 = vld [vmem:[%s12078_s12 + $0x40] sm:$0xff]  ;;  %v7207_v42 = vld [vmem:[%s12078_s12 + $0x8] sm:$0xff] }
 0xd14   :  { %v7193_v22 = vld [vmem:[%s12078_s12 + $0xc0] sm:$0xff]  ;;  %v7209_v3 = vld [vmem:[%s12078_s12 + $0x88] sm:$0xff] }
 0xd1a   :  { %v2072_v50 = vpop.f32.mrf.mxu0  ;;  %v2101_v0 = vpop.f32.mrf.mxu1 }
 0xd1b   :  { %v2111_v43 = vmul.f32 %v7169_v10, %v2072_v50  ;;  %v2112_v37 = vmul.f32 %v7170_v6, %v2101_v0  ;;  %v7195_v50 = vld [vmem:[%s12078_s12 + $0xb8] sm:$0xff]  ;;  %v7196_v0 = vld [vmem:[%s12078_s12 + $0x30] sm:$0xff] }
 0xd1c   :  { %v7204_v10 = vld [vmem:[%s12078_s12 + $0x98] sm:$0xff]  ;;  %v7206_v6 = vld [vmem:[%s12078_s12 + $0x90] sm:$0xff] }
 0xd22   :  { %v2075_v61 = vpop.f32.mrf.mxu0  ;;  %v2104_v45 = vpop.f32.mrf.mxu1 }
 0xd23   :  { %v2113_v54 = vmul.f32 %v7166_v24, %v2075_v61  ;;  %v2114_v26 = vmul.f32 %v7167_v4, %v2104_v45  ;;  %v7197_v61 = vld [vmem:[%s12078_s12 + $0xb0] sm:$0xff]  ;;  %v7198_v45 = vld [vmem:[%s12078_s12 + $0x28] sm:$0xff]  ;;  %v9269_v24 = vpop.f32.mrf.mxu2 }
 0xd24   :  { %v7200_v4 = vld [vmem:[%s12078_s12 + $0xa8] sm:$0xff] }
 0xd25   :  { %2292 = vmatpush.msrb.mxu0 %v2113_v54  ;;  %2321 = vmatpush.msra.mxu1 %v2114_v26  ;;  %v7199_v54 = vld [vmem:[%s12075_s8 + $0xe0] sm:$0xff] }
 0xd26   :  { %6370 = vmatmul.msk.f32.gmra.mxu2 %vm522_vm6, %v7199_v54  ;;  %v7201_v26 = vld [vmem:[%s12078_s12 + $0x20] sm:$0xff] }
 0xd27   :  { %2293 = vmatpush.msrb.mxu0 %v2111_v43  ;;  %2322 = vmatpush.msra.mxu1 %v2112_v37  ;;  %v7205_v43 = vld [vmem:[%s12078_s12 + $0x10] sm:$0xff] }
 0xd29   :  { %2294 = vmatpush.msrb.mxu0 %v2109_v41  ;;  %2323 = vmatpush.msra.mxu1 %v2110_v9  ;;  %v7208_v41 = vld [vmem:[%s12075_s8 + $0xe8] sm:$0xff]  ;;  %v7210_v9 = vld [vmem:[%s12078_s12] sm:$0xff] }
 0xd2b   :  { %2295 = vmatpush.msrb.mxu0 %v2107_v60  ;;  %2324 = vmatpush.msra.mxu1 %v2108_v46  ;;  %v9296_v37 = vpop.f32.mrf.mxu2  ;;  %v7212_v60 = vld [vmem:[%s12080_s13 + $0x8] sm:$0xff]  ;;  %v7213_v46 = vld [vmem:[%s12075_s8 + $0xf0] sm:$0xff] }
 0xd2c   :  { %6374 = vmatmul.msk.f32.vlgmr.msrb.gmra.mxu0 %vm522_vm6, %v9010_v27  ;;  %6378 = vmatmul.msk.f32.vlgmr.msra.gmra.mxu1 %vm522_vm6, %v9010_v27  ;;  %v7178_v27 = vld [vmem:[%s12078_s12 + $0x70] sm:$0xff] }
 0xd2d   :  { %2374 = vmatpush.msra.mxu0 %v7176_v20  ;;  %2403 = vmatpush.msrb.mxu1 %v7177_v8  ;;  %v7214_v20 = vld [vmem:[%s12075_s8 + $0xf8] sm:$0xff] }
 0xd2e   :  { %6371 = vmatmul.msk.f32.gmra.mxu2 %vm522_vm6, %v7208_v41  ;;  %v7217_v41 = vld [vmem:[%s12079_s10 + $0x68] sm:$0xff] }
 0xd2f   :  { %2375 = vmatpush.msra.mxu0 %v7178_v27  ;;  %2404 = vmatpush.msrb.mxu1 %v7179_v14 }
 0xd31   :  { %2376 = vmatpush.msra.mxu0 %v7180_v39  ;;  %2405 = vmatpush.msrb.mxu1 %v7181_v28 }
 0xd33   :  { %2377 = vmatpush.msra.mxu0 %v7182_v17  ;;  %2406 = vmatpush.msrb.mxu1 %v7184_v44  ;;  %v9318_v1 = vpop.f32.mrf.mxu2 }
 0xd34   :  { %6375 = vmatmul.msk.f32.gmra.mxu0 %vm522_vm6, %v9014_v56  ;;  %6379 = vmatmul.msk.f32.gmra.mxu1 %vm522_vm6, %v9014_v56  ;;  %v7186_v56 = vld [vmem:[%s12078_s12 + $0xd8] sm:$0xff] }
 0xd35   :  { %2378 = vmatpush.msra.mxu0 %v7185_v7  ;;  %2407 = vmatpush.msrb.mxu1 %v7186_v56 }
 0xd36   :  { %6372 = vmatmul.msk.f32.gmra.mxu2 %vm522_vm6, %v7213_v46 }
 0xd37   :  { %2379 = vmatpush.msra.mxu0 %v7187_v21  ;;  %2408 = vmatpush.msrb.mxu1 %v7188_v12 }
 0xd39   :  { %2380 = vmatpush.msra.mxu0 %v7189_v30  ;;  %2409 = vmatpush.msrb.mxu1 %v7190_v62 }
 0xd3b   :  { %2381 = vmatpush.msra.mxu0 %v7192_v40  ;;  %2410 = vmatpush.msrb.mxu1 %v7193_v22  ;;  %v2165_v11 = vpop.f32.mrf.mxu2 }
 0xd3c   :  { %6376 = vmatmul.msk.f32.gmra.mxu0 %vm522_vm6, %v9018_v19  ;;  %6380 = vmatmul.msk.f32.gmra.mxu1 %vm522_vm6, %v9018_v19  ;;  %v7194_v19 = vld [vmem:[%s12078_s12 + $0x38] sm:$0xff] }
 0xd3d   :  { %2382 = vmatpush.msra.mxu0 %v7194_v19  ;;  %2411 = vmatpush.msrb.mxu1 %v7195_v50 }
 0xd3e   :  { %6373 = vmatmul.msk.f32.gmra.mxu2 %vm522_vm6, %v7214_v20  ;;  %v7220_v20 = vld [vmem:[%s12079_s10 + $0x50] sm:$0xff] }
 0xd3f   :  { %2383 = vmatpush.msra.mxu0 %v7196_v0  ;;  %2412 = vmatpush.msrb.mxu1 %v7197_v61 }
 0xd41   :  { %2384 = vmatpush.msra.mxu0 %v7198_v45  ;;  %2413 = vmatpush.msrb.mxu1 %v7200_v4 }
 0xd43   :  { %2385 = vmatpush.msra.mxu0 %v7201_v26 }
 0xd44   :  { %6377 = vmatmul.msk.f32.gmra.mxu0 %vm522_vm6, %v9022_v18  ;;  %6381 = vmatmul.msk.f32.gmra.mxu1 %vm522_vm6, %v9022_v18  ;;  %v7202_v18 = vld [vmem:[%s12078_s12 + $0xa0] sm:$0xff] }
 0xd45   :  { %2414 = vmatpush.msrb.mxu1 %v7202_v18  ;;  %2386 = vmatpush.msra.mxu0 %v7203_v55  ;;  %v7215_v55 = vld [vmem:[%s12079_s10 + $0x70] sm:$0xff] }
 0xd47   :  { %2415 = vmatpush.msrb.mxu1 %v7204_v10  ;;  %2387 = vmatpush.msra.mxu0 %v7205_v43  ;;  %v7216_v43 = vld [vmem:[%s12079_s10 + $0x78] sm:$0xff] }
 0xd49   :  { %2416 = vmatpush.msrb.mxu1 %v7206_v6  ;;  %2388 = vmatpush.msra.mxu0 %v7207_v42 }
 0xd4b   :  { %2417 = vmatpush.msrb.mxu1 %v7209_v3  ;;  %2389 = vmatpush.msra.mxu0 %v7210_v9  ;;  %v7218_v9 = vld [vmem:[%s12079_s10 + $0x60] sm:$0xff] }
 0xd4d   :  { %2418 = vmatpush.msrb.mxu1 %v7211_v35  ;;  %2459 = vmatpush.msrb.mxu0 %v9039_v2  ;;  %v2168_v2 = vpop.f32.mrf.mxu2 }
 0xd4f   :  { %2488 = vmatpush.msra.mxu1 %v7212_v60  ;;  %v7219_v60 = vld [vmem:[%s12079_s10 + $0x58] sm:$0xff] }
 0xd55   :  { %v2171_v8 = vpop.f32.mrf.mxu2 }
 0xd5d   :  { %v2174_v27 = vpop.f32.mrf.mxu2 }
 0xd65   :  { %v2177_v14 = vpop.f32.mrf.mxu2 }
 0xd66   :  { %v2251_v46 = vmul.f32 %v7219_v60, %v2177_v14  ;;  %v7223_v14 = vld [vmem:[%s12079_s10 + $0x38] sm:$0xff] }
 0xd6d   :  { %v2180_v44 = vpop.f32.mrf.mxu2 }
 0xd6e   :  { %v2252_v35 = vmul.f32 %v7218_v9, %v2180_v44  ;;  %v7222_v44 = vld [vmem:[%s12079_s10 + $0x40] sm:$0xff] }
 0xd75   :  { %v2183_v62 = vpop.f32.mrf.mxu2 }
 0xd76   :  { %v2253_v3 = vmul.f32 %v7217_v41, %v2183_v62 }
 0xd7d   :  { %v2186_v0 = vpop.f32.mrf.mxu2 }
 0xd7e   :  { %v2254_v10 = vmul.f32 %v7215_v55, %v2186_v0  ;;  %v7229_v0 = vld [vmem:[%s12079_s10 + $0x8] sm:$0xff] }
 0xd85   :  { %v2189_v18 = vpop.f32.mrf.mxu2 }
 0xd86   :  { %v2255_v6 = vmul.f32 %v7216_v43, %v2189_v18 }
 0xd88   :  { %2518 = vmatpush.msra.mxu3 %v2255_v6 }
 0xd8a   :  { %2519 = vmatpush.msra.mxu3 %v2254_v10 }
 0xd8c   :  { %2520 = vmatpush.msra.mxu3 %v2253_v3 }
 0xd8e   :  { %2521 = vmatpush.msra.mxu3 %v2252_v35 }
 0xd90   :  { %2522 = vmatpush.msra.mxu3 %v2251_v46 }
 0xda9   :  { %v2297_v39 = vpop.f32.mrf.mxu0  ;;  %v2326_v28 = vpop.f32.mrf.mxu1 }
 0xdaa   :  { %v9329_v17 = vadd.f32 %v2297_v39, %v8341_v34  ;;  %v9332_v15 = vadd.f32 %v2326_v28, %v8338_v33  ;;  %v2250_v39 = vmul.f32 %v7220_v20, %v2174_v27  ;;  %v7221_v28 = vld [vmem:[%s12079_s10 + $0x48] sm:$0xff]  ;;  %v7224_v27 = vld [vmem:[%s12079_s10 + $0x30] sm:$0xff] }
 0xdab   :  { %v2246_v62 = vmul.f32 %v7224_v27, %v9318_v1 }
 0xdac   :  { %v2338_v7 = vmax.f32 %v9329_v17, %v9332_v15  ;;  %2523 = vmatpush.msra.mxu3 %v2250_v39 }
 0xdae   :  { %2339 = vmax.xlane.f32.xlu2 %v2338_v7  ;;  %v2249_v7 = vmul.f32 %v7221_v28, %v2171_v8  ;;  %v7225_v8 = vld [vmem:[%s12079_s10 + $0x28] sm:$0xff] }
 0xdb0   :  { %2524 = vmatpush.msra.mxu3 %v2249_v7 }
 0xdb1   :  { %v2300_v56 = vpop.f32.mrf.mxu0  ;;  %v2329_v21 = vpop.f32.mrf.mxu1 }
 0xdb2   :  { %v9337_v12 = vadd.f32 %v2300_v56, %v8373_v52  ;;  %v9340_v30 = vadd.f32 %v2329_v21, %v8370_v51  ;;  %v2248_v56 = vmul.f32 %v7222_v44, %v2168_v2  ;;  %v2247_v21 = vmul.f32 %v7223_v14, %v2165_v11 }
 0xdb3   :  { %v2245_v2 = vmul.f32 %v7225_v8, %v9296_v37 }
 0xdb4   :  { %v2341_v31 = vmax.f32 %v9337_v12, %v9340_v30  ;;  %2525 = vmatpush.msra.mxu3 %v2248_v56 }
 0xdb6   :  { %2342 = vmax.xlane.f32.xlu0 %v2341_v31  ;;  %2526 = vmatpush.msra.mxu3 %v2247_v21  ;;  %v7226_v31 = vld [vmem:[%s12079_s10 + $0x20] sm:$0xff] }
 0xdb7   :  { %v2244_v11 = vmul.f32 %v7226_v31, %v9269_v24  ;;  %v2241_v24 = vmul.f32 %v7229_v0, %v9176_v29 }
 0xdb8   :  { %2527 = vmatpush.msra.mxu3 %v2246_v62 }
 0xdb9   :  { %v2303_v40 = vpop.f32.mrf.mxu0  ;;  %v2332_v22 = vpop.f32.mrf.mxu1 }
 0xdba   :  { %v9345_v19 = vadd.f32 %v2303_v40, %v8411_v5  ;;  %v9348_v50 = vadd.f32 %v2332_v22, %v8408_v63  ;;  %v7227_v40 = vld [vmem:[%s12079_s10 + $0x18] sm:$0xff]  ;;  %2528 = vmatpush.msra.mxu3 %v2245_v2  ;;  %v7228_v22 = vld [vmem:[%s12079_s10 + $0x10] sm:$0xff] }
 0xdbb   :  { %v2243_v1 = vmul.f32 %v7227_v40, %v9238_v53  ;;  %v2242_v37 = vmul.f32 %v7228_v22, %v9207_v32 }
 0xdbc   :  { %v2344_v61 = vmax.f32 %v9345_v19, %v9348_v50  ;;  %2529 = vmatpush.msra.mxu3 %v2244_v11 }
 0xdbe   :  { %2345 = vmax.xlane.f32.xlu2 %v2344_v61  ;;  %2530 = vmatpush.msra.mxu3 %v2243_v1  ;;  %v7230_v61 = vld [vmem:[%s12079_s10] sm:$0xff] }
 0xdbf   :  { %v2240_v53 = vmul.f32 %v7230_v61, %v9148_v36 }
 0xdc0   :  { %2531 = vmatpush.msra.mxu3 %v2242_v37 }
 0xdc1   :  { %v2306_v45 = vpop.f32.mrf.mxu0  ;;  %v2335_v54 = vpop.f32.mrf.mxu1 }
 0xdc2   :  { %v9353_v4 = vadd.f32 %v2306_v45, %v8449_v49  ;;  %v9356_v26 = vadd.f32 %v2335_v54, %v8446_v47  ;;  %2532 = vmatpush.msra.mxu3 %v2241_v24  ;;  %v9415_v45 = vpop.f32.mrf.mxu2  ;;  %v7231_v24 = vld [vmem:[%s12079_s10 + $0xf0] sm:$0xff] }
 0xdc4   :  { %v2347_v42 = vmax.f32 %v9353_v4, %v9356_v26  ;;  %2533 = vmatpush.msra.mxu3 %v2240_v53  ;;  %v7232_v53 = vld [vmem:[%s12079_s10 + $0xf8] sm:$0xff] }
 0xdc6   :  { %2348 = vmax.xlane.f32.xlu0 %v2347_v42 }
 0xdca   :  { %v9417_v32 = vpop.f32.mrf.mxu2 }
 0xdd2   :  { %v9419_v54 = vpop.f32.mrf.mxu2 }
 0xdda   :  { %v9421_v18 = vpop.f32.mrf.mxu2 }
 0xde2   :  { %v9423_v55 = vpop.f32.mrf.mxu2 }
 0xdea   :  { %v9425_v29 = vpop.f32.mrf.mxu2 }
 0xdf2   :  { %v9427_v10 = vpop.f32.mrf.mxu2 }
 0xdfa   :  { %v9431_v42 = vpop.f32.mrf.mxu2 }
 0xe02   :  { %v2216_v46 = vpop.f32.mrf.mxu2 }
 0xe0a   :  { %v2219_v44 = vpop.f32.mrf.mxu2 }
 0xe12   :  { %v2222_v8 = vpop.f32.mrf.mxu2 }
 0xe1a   :  { %v2225_v40 = vpop.f32.mrf.mxu2 }
 0xe21   :  { %v2340_v43 = vpop.xlane.xlu2 %2339 }
 0xe22   :  { %v2350_v36 = vsub.f32 %v9329_v17, %v2340_v43  ;;  %v2351_v6 = vsub.f32 %v9332_v15, %v2340_v43 }
 0xe24   :  { %v2358_v41 = vmul.f32 1.442695, %v2350_v36  ;;  %v2360_v3 = vmul.f32 1.442695, %v2351_v6  ;;  %v7233_v36 = vld [vmem:[%s12079_s10 + $0xe8] sm:$0xff] }
 0xe26   :  { %6917 = vpow2.f32 %v2358_v41  ;;  %v7234_v41 = vld [vmem:[%s12079_s10 + $0xe0] sm:$0xff] }
 0xe27   :  { %6919 = vpow2.f32 %v2360_v3 }
 0xe29   :  { %v2343_v9 = vpop.xlane.xlu0 %2342 }
 0xe2a   :  { %v2352_v35 = vsub.f32 %v9337_v12, %v2343_v9  ;;  %v2353_v60 = vsub.f32 %v9340_v30, %v2343_v9  ;;  %v7235_v9 = vld [vmem:[%s12079_s10 + $0xd8] sm:$0xff] }
 0xe2c   :  { %v9435_v20 = vpop.eup %6917  ;;  %v2362_v39 = vmul.f32 1.442695, %v2352_v35  ;;  %v2364_v28 = vmul.f32 1.442695, %v2353_v60  ;;  %v2267_v35 = vmul.f32 %v7235_v9, %v2225_v40  ;;  %v7236_v60 = vld [vmem:[%s12079_s10 + $0xd0] sm:$0xff]  ;;  %v7246_v40 = vld [vmem:[%s12079_s10 + $0x80] sm:$0xff] }
 0xe2d   :  { %v9437_v7 = vpop.eup %6919  ;;  %2390 = vmatmul.f32.vlgmr.msra.gmra.mxu0 %v9435_v20 }
 0xe2e   :  { %6921 = vpow2.f32 %v2362_v39  ;;  %2419 = vmatmul.f32.vlgmr.msrb.gmra.mxu1 %v9437_v7  ;;  %v2266_v39 = vmul.f32 %v7236_v60, %v2222_v8  ;;  %v7243_v8 = vld [vmem:[%s12079_s10 + $0x98] sm:$0xff] }
 0xe2f   :  { %6923 = vpow2.f32 %v2364_v28  ;;  %v7237_v28 = vld [vmem:[%s12079_s10 + $0xc8] sm:$0xff] }
 0xe31   :  { %v2346_v17 = vpop.xlane.xlu2 %2345 }
 0xe32   :  { %v2354_v15 = vsub.f32 %v9345_v19, %v2346_v17  ;;  %v2355_v12 = vsub.f32 %v9348_v50, %v2346_v17  ;;  %v2265_v17 = vmul.f32 %v7237_v28, %v2219_v44 }
 0xe34   :  { %v9443_v30 = vpop.eup %6921  ;;  %v2366_v56 = vmul.f32 1.442695, %v2354_v15  ;;  %v2368_v14 = vmul.f32 1.442695, %v2355_v12  ;;  %v7238_v15 = vld [vmem:[%s12079_s10 + $0xc0] sm:$0xff] }
 0xe35   :  { %v9445_v21 = vpop.eup %6923  ;;  %2393 = vmatmul.f32.gmra.mxu0 %v9443_v30  ;;  %v2264_v12 = vmul.f32 %v7238_v15, %v2216_v46 }
 0xe36   :  { %6925 = vpow2.f32 %v2366_v56  ;;  %2422 = vmatmul.f32.gmra.mxu1 %v9445_v21  ;;  %v7239_v56 = vld [vmem:[%s12079_s10 + $0xb8] sm:$0xff] }
 0xe37   :  { %6927 = vpow2.f32 %v2368_v14  ;;  %v2263_v14 = vmul.f32 %v7239_v56, %v9431_v42 }
 0xe39   :  { %v2349_v27 = vpop.xlane.xlu0 %2348 }
 0xe3a   :  { %v2356_v62 = vsub.f32 %v9353_v4, %v2349_v27  ;;  %v2357_v19 = vsub.f32 %v9356_v26, %v2349_v27  ;;  %v2228_v4 = vpop.f32.mrf.mxu2  ;;  %v7240_v27 = vld [vmem:[%s12079_s10 + $0xb0] sm:$0xff] }
 0xe3b   :  { %v2268_v3 = vmul.f32 %v7234_v41, %v2228_v4  ;;  %v2262_v44 = vmul.f32 %v7240_v27, %v9427_v10  ;;  %v2259_v10 = vmul.f32 %v7243_v8, %v9421_v18  ;;  %v2256_v18 = vmul.f32 %v7246_v40, %v9415_v45 }
 0xe3c   :  { %v9451_v50 = vpop.eup %6925  ;;  %v2370_v2 = vmul.f32 1.442695, %v2356_v62  ;;  %v2372_v31 = vmul.f32 1.442695, %v2357_v19  ;;  %v7241_v62 = vld [vmem:[%s12079_s10 + $0xa8] sm:$0xff]  ;;  %v7242_v19 = vld [vmem:[%s12079_s10 + $0xa0] sm:$0xff] }
 0xe3d   :  { %v9453_v11 = vpop.eup %6927  ;;  %2396 = vmatmul.f32.gmra.mxu0 %v9451_v50  ;;  %v2261_v46 = vmul.f32 %v7241_v62, %v9425_v29  ;;  %v2260_v42 = vmul.f32 %v7242_v19, %v9423_v55 }
 0xe3e   :  { %6929 = vpow2.f32 %v2370_v2  ;;  %2425 = vmatmul.f32.gmra.mxu1 %v9453_v11  ;;  %v7244_v2 = vld [vmem:[%s12079_s10 + $0x90] sm:$0xff] }
 0xe3f   :  { %6931 = vpow2.f32 %v2372_v31  ;;  %v2258_v29 = vmul.f32 %v7244_v2, %v9419_v54  ;;  %v7245_v31 = vld [vmem:[%s12079_s10 + $0x88] sm:$0xff] }
 0xe40   :  { %v2257_v55 = vmul.f32 %v7245_v31, %v9417_v32 }
 0xe42   :  { %v2231_v26 = vpop.f32.mrf.mxu2 }
 0xe43   :  { %v2269_v6 = vmul.f32 %v7233_v36, %v2231_v26 }
 0xe44   :  { %v9457_v1 = vpop.eup %6929 }
 0xe45   :  { %v9459_v22 = vpop.eup %6931  ;;  %2399 = vmatmul.f32.gmra.mxu0 %v9457_v1 }
 0xe46   :  { %2428 = vmatmul.f32.gmra.mxu1 %v9459_v22 }
 0xe4a   :  { %v2234_v37 = vpop.f32.mrf.mxu2 }
 0xe4b   :  { %v2270_v61 = vmul.f32 %v7231_v24, %v2234_v37 }
 0xe52   :  { %v2237_v0 = vpop.f32.mrf.mxu2 }
 0xe53   :  { %v2271_v43 = vmul.f32 %v7232_v53, %v2237_v0 }
 0xe55   :  { %2547 = vmatpush.msra.mxu0 %v2271_v43 }
 0xe57   :  { %2548 = vmatpush.msra.mxu0 %v2270_v61 }
 0xe59   :  { %2549 = vmatpush.msra.mxu0 %v2269_v6 }
 0xe5b   :  { %2550 = vmatpush.msra.mxu0 %v2268_v3 }
 0xe5d   :  { %2551 = vmatpush.msra.mxu0 %v2267_v35 }
 0xe5f   :  { %2552 = vmatpush.msra.mxu0 %v2266_v39 }
 0xe61   :  { %2553 = vmatpush.msra.mxu0 %v2265_v17 }
 0xe63   :  { %2554 = vmatpush.msra.mxu0 %v2264_v12 }
 0xe65   :  { %2555 = vmatpush.msra.mxu0 %v2263_v14 }
 0xe67   :  { %2556 = vmatpush.msra.mxu0 %v2262_v44 }
 0xe69   :  { %2557 = vmatpush.msra.mxu0 %v2261_v46 }
 0xe6b   :  { %2558 = vmatpush.msra.mxu0 %v2260_v42 }
 0xe6d   :  { %2559 = vmatpush.msra.mxu0 %v2259_v10  ;;  %v6393_v10 = vld [vmem:[%s12082_s18 + $0x38] sm:$0xff] }
 0xe6e   :  { %2610 = vmatpush.msrb.mxu1 %v6393_v10 }
 0xe6f   :  { %2560 = vmatpush.msra.mxu0 %v2258_v29 }
 0xe71   :  { %2561 = vmatpush.msra.mxu0 %v2257_v55 }
 0xe73   :  { %2562 = vmatpush.msra.mxu0 %v2256_v18 }
 0xeaa   :  { %v2391_v4 = vpop.f32.mrf.mxu0 }
 0xeab   :  { %v2420_v26 = vpop.f32.mrf.mxu1 }
 0xeac   :  { %v2421_v54 = vadd.f32 %v2420_v26, %v2391_v4 }
 0xeae   :  { %6382 = vmatmul.msk.f32.vlgmr.msrb.gmra.mxu0 %vm178_vm8, %v2421_v54  ;;  %6386 = vmatmul.msk.f32.vlgmr.msra.gmra.mxu1 %vm178_vm8, %v2421_v54 }
 0xeb2   :  { %v2394_v37 = vpop.f32.mrf.mxu0 }
 0xeb3   :  { %v2423_v0 = vpop.f32.mrf.mxu1 }
 0xeb4   :  { %v2424_v32 = vadd.f32 %v2423_v0, %v2394_v37 }
 0xeb6   :  { %6383 = vmatmul.msk.f32.gmra.mxu0 %vm178_vm8, %v2424_v32  ;;  %6387 = vmatmul.msk.f32.gmra.mxu1 %vm178_vm8, %v2424_v32  ;;  %v6822_v32 = vld [vmem:[%s12081_s19 + $0x1] ss:$0 sm:$0xff] }
 0xeba   :  { %v2397_v24 = vpop.f32.mrf.mxu0 }
 0xebb   :  { %v2426_v61 = vpop.f32.mrf.mxu1 }
 0xebc   :  { %v2427_v45 = vadd.f32 %v2426_v61, %v2397_v24 }
 0xebe   :  { %6384 = vmatmul.msk.f32.gmra.mxu0 %vm178_vm8, %v2427_v45  ;;  %6388 = vmatmul.msk.f32.gmra.mxu1 %vm178_vm8, %v2427_v45 }
 0xec2   :  { %v2400_v53 = vpop.f32.mrf.mxu0 }
 0xec3   :  { %v2429_v43 = vpop.f32.mrf.mxu1 }
 0xec4   :  { %v2430_v36 = vadd.f32 %v2429_v43, %v2400_v53 }
 0xec6   :  { %6385 = vmatmul.msk.f32.gmra.mxu0 %vm178_vm8, %v2430_v36  ;;  %6389 = vmatmul.msk.f32.gmra.mxu1 %vm178_vm8, %v2430_v36 }
 0xf2b   :  { %v2461_v6 = vpop.f32.mrf.mxu0  ;;  %v2490_v41 = vpop.f32.mrf.mxu1 }
 0xf2c   :  { %6933 = vrcp.f32 %v2461_v6 }
 0xf2d   :  { %6935 = vrcp.f32 %v2490_v41 }
 0xf32   :  { %v6934_v3 = vpop.eup %6933 }
 0xf33   :  { %v6936_v9 = vpop.eup %6935  ;;  %v2510_v35 = vmul.f32 %v6934_v3, %v9435_v20  ;;  %v2464_v60 = vpop.f32.mrf.mxu0 }
 0xf34   :  { %v2493_v39 = vpop.f32.mrf.mxu1  ;;  %v2511_v28 = vmul.f32 %v6936_v9, %v9437_v7  ;;  %6937 = vrcp.f32 %v2464_v60 }
 0xf35   :  { %6939 = vrcp.f32 %v2493_v39  ;;  %2534 = vmatmul.f32.vlgmr.msra.gmra.mxu3 %v2510_v35 }
 0xf36   :  { %2563 = vmatmul.f32.vlgmr.msra.gmra.mxu0 %v2511_v28 }
 0xf3a   :  { %v6938_v17 = vpop.eup %6937 }
 0xf3b   :  { %v6940_v15 = vpop.eup %6939  ;;  %v2467_v12 = vpop.f32.mrf.mxu0  ;;  %v2512_v14 = vmul.f32 %v6938_v17, %v9443_v30 }
 0xf3c   :  { %v2496_v56 = vpop.f32.mrf.mxu1  ;;  %6941 = vrcp.f32 %v2467_v12  ;;  %v2513_v27 = vmul.f32 %v6940_v15, %v9445_v21 }
 0xf3d   :  { %6943 = vrcp.f32 %v2496_v56  ;;  %2537 = vmatmul.f32.gmra.mxu3 %v2512_v14 }
 0xf3e   :  { %2566 = vmatmul.f32.gmra.mxu0 %v2513_v27 }
 0xf42   :  { %v6942_v20 = vpop.eup %6941 }
 0xf43   :  { %v6944_v44 = vpop.eup %6943  ;;  %v2470_v62 = vpop.f32.mrf.mxu0  ;;  %v2514_v46 = vmul.f32 %v6942_v20, %v9451_v50  ;;  %v6392_v50 = vld [vmem:[%s12082_s18 + $0x30] sm:$0xff] }
 0xf44   :  { %v2499_v7 = vpop.f32.mrf.mxu1  ;;  %6945 = vrcp.f32 %v2470_v62  ;;  %v2515_v19 = vmul.f32 %v6944_v44, %v9453_v11  ;;  %2611 = vmatpush.msrb.mxu1 %v6392_v50  ;;  %v6391_v11 = vld [vmem:[%s12082_s18 + $0x28] sm:$0xff] }
 0xf45   :  { %6947 = vrcp.f32 %v2499_v7  ;;  %2540 = vmatmul.f32.gmra.mxu3 %v2514_v46 }
 0xf46   :  { %2569 = vmatmul.f32.gmra.mxu0 %v2515_v19  ;;  %2612 = vmatpush.msrb.mxu1 %v6391_v11 }
 0xf4a   :  { %v6946_v42 = vpop.eup %6945 }
 0xf4b   :  { %v6948_v30 = vpop.eup %6947  ;;  %v2516_v8 = vmul.f32 %v6946_v42, %v9457_v1  ;;  %v6390_v1 = vld [vmem:[%s12082_s18 + $0x20] sm:$0xff] }
 0xf4c   :  { %v2517_v21 = vmul.f32 %v6948_v30, %v9459_v22  ;;  %2613 = vmatpush.msrb.mxu1 %v6390_v1 }
 0xf4d   :  { %2543 = vmatmul.f32.gmra.mxu3 %v2516_v8 }
 0xf4e   :  { %2572 = vmatmul.f32.gmra.mxu0 %v2517_v21 }
 0xfb3   :  { %v2564_v22 = vpop.f32.mrf.mxu0 }
 0xfb8   :  { %v2535_v2 = vpop.f32.mrf.mxu3 }
 0xfb9   :  { %v2565_v29 = vadd.f32 %v2564_v22, %v2535_v2 }
 0xfbb   :  { %6395 = vmatmul.msk.f32.vlgmr.msrb.gmra.mxu1 %vm522_vm6, %v2565_v29  ;;  %v2567_v31 = vpop.f32.mrf.mxu0  ;;  %v6404_v29 = vld [vmem:[%s12086_s22 + $0x38] sm:$0xff] }
 0xfbc   :  { %2775 = vmatpush.msrb.mxu3 %v6404_v29 }
 0xfc0   :  { %v2538_v55 = vpop.f32.mrf.mxu3 }
 0xfc1   :  { %v2568_v40 = vadd.f32 %v2567_v31, %v2538_v55  ;;  %v6403_v31 = vld [vmem:[%s12086_s22 + $0x30] sm:$0xff]  ;;  %v6402_v55 = vld [vmem:[%s12086_s22 + $0x28] sm:$0xff] }
 0xfc2   :  { %2776 = vmatpush.msrb.mxu3 %v6403_v31 }
 0xfc3   :  { %6396 = vmatmul.msk.f32.gmra.mxu1 %vm522_vm6, %v2568_v40  ;;  %v2570_v18 = vpop.f32.mrf.mxu0  ;;  %v6401_v40 = vld [vmem:[%s12086_s22 + $0x20] sm:$0xff] }
 0xfc4   :  { %2777 = vmatpush.msrb.mxu3 %v6402_v55 }
 0xfc6   :  { %2778 = vmatpush.msrb.mxu3 %v6401_v40 }
 0xfc8   :  { %v2541_v4 = vpop.f32.mrf.mxu3 }
 0xfc9   :  { %v2571_v26 = vadd.f32 %v2570_v18, %v2541_v4  ;;  %v7247_v18 = vld [vmem:[%s12118_s29 + $0x30] sm:$0xff] }
 0xfca   :  { %3112 = vmatpush.msra.mxu3 %v7247_v18 }
 0xfcb   :  { %6397 = vmatmul.msk.f32.gmra.mxu1 %vm522_vm6, %v2571_v26  ;;  %v2573_v54 = vpop.f32.mrf.mxu0  ;;  %v7248_v26 = vld [vmem:[%s12118_s29 + $0x20] sm:$0xff] }
 0xfcc   :  { %3113 = vmatpush.msra.mxu3 %v7248_v26 }
 0xfd0   :  { %v2544_v37 = vpop.f32.mrf.mxu3 }
 0xfd1   :  { %v2574_v0 = vadd.f32 %v2573_v54, %v2544_v37  ;;  %v7249_v37 = vld [vmem:[%s12118_s29 + $0x10] sm:$0xff] }
 0xfd2   :  { %3114 = vmatpush.msra.mxu3 %v7249_v37 }
 0xfd3   :  { %6398 = vmatmul.msk.f32.gmra.mxu1 %vm522_vm6, %v2574_v0 }
0x1038   :  { %v2615_v24 = vpop.f32.mrf.mxu1 }
0x1039   :  { %v2616_v61 = vadd.f32 %v6822_v32, %v2615_v24 }
0x103b   :  { %v2627_v45 = vadd.f32 %v2616_v61, %v8935_v57 }
0x103d   :  { %v9556_v53 = vadd.f32 %v2627_v45, %v8757_v48 }
0x103f   :  { %v2639_v43 = vsel %vm522_vm6, %v9556_v53, 0.0 }
0x1040   :  { %v2618_v36 = vpop.f32.mrf.mxu1  ;;  %2640 = vadd.xlane.f32.xlu2 %v2639_v43 }
0x1041   :  { %v2619_v6 = vadd.f32 %v6822_v32, %v2618_v36 }
0x1043   :  { %v2628_v41 = vadd.f32 %v2619_v6, %v8940_v13 }
0x1045   :  { %v9562_v3 = vadd.f32 %v2628_v41, %v8768_v25 }
0x1047   :  { %v2642_v9 = vsel %vm522_vm6, %v9562_v3, 0.0 }
0x1048   :  { %v2621_v35 = vpop.f32.mrf.mxu1  ;;  %2643 = vadd.xlane.f32.xlu0 %v2642_v9 }
0x1049   :  { %v2622_v57 = vadd.f32 %v6822_v32, %v2621_v35 }
0x104b   :  { %v2629_v60 = vadd.f32 %v2622_v57, %v8945_v59 }
0x104d   :  { %v9568_v39 = vadd.f32 %v2629_v60, %v8779_v23 }
0x104f   :  { %v2645_v28 = vsel %vm522_vm6, %v9568_v39, 0.0 }
0x1050   :  { %2646 = vadd.xlane.f32.xlu2 %v2645_v28  ;;  %v2624_v17 = vpop.f32.mrf.mxu1 }
0x1051   :  { %v2625_v13 = vadd.f32 %v6822_v32, %v2624_v17  ;;  %v7250_v32 = vld [vmem:[%s12118_s29] sm:$0xff] }
0x1052   :  { %3115 = vmatpush.msra.mxu3 %v7250_v32  ;;  %v6823_v17 = vld [vmem:[%s12083_s20 + $0x1] ss:$0 sm:$0xff] }
0x1053   :  { %v2630_v15 = vadd.f32 %v2625_v13, %v8950_v58 }
0x1055   :  { %v9574_v12 = vadd.f32 %v2630_v15, %v8790_v16 }
0x1057   :  { %v2648_v56 = vsel %vm522_vm6, %v9574_v12, 0.0 }
0x1058   :  { %2649 = vadd.xlane.f32.xlu0 %v2648_v56  ;;  %v6425_v56 = vld [vmem:[%s12087_s24 + $0xf8] sm:$0xff] }
0x1059   :  { %2850 = vmatpush.msrb.mxu0 %v6425_v56  ;;  %v6414_v56 = vld [vmem:[%s12087_s24 + $0xa0] sm:$0xff] }
0x10b3   :  { %v2641_v14 = vpop.xlane.xlu2 %2640 }
0x10b4   :  { %v2651_v59 = vmul.f32 %v2641_v14, %v7802_v38  ;;  %v6424_v14 = vld [vmem:[%s12087_s24 + $0xf0] sm:$0xff] }
0x10b5   :  { %2851 = vmatpush.msrb.mxu0 %v6424_v14  ;;  %v6413_v14 = vld [vmem:[%s12087_s24 + $0x98] sm:$0xff] }
0x10b6   :  { %v9580_v27 = vsub.f32 %v9556_v53, %v2651_v59 }
0x10b8   :  { %v2659_v20 = vmul.f32 %v9580_v27, %v9580_v27 }
0x10ba   :  { %v2663_v44 = vsel %vm522_vm6, %v2659_v20, 0.0 }
0x10bb   :  { %v2644_v62 = vpop.xlane.xlu0 %2643  ;;  %2664 = vadd.xlane.f32.xlu1 %v2663_v44  ;;  %v6824_v44 = vld [vmem:[%s12084_s21 + $0x1] ss:$0 sm:$0xff] }
0x10bc   :  { %v2652_v58 = vmul.f32 %v2644_v62, %v7802_v38 }
0x10be   :  { %v9587_v7 = vsub.f32 %v9562_v3, %v2652_v58  ;;  %v6423_v58 = vld [vmem:[%s12087_s24 + $0xe8] sm:$0xff] }
0x10bf   :  { %2852 = vmatpush.msrb.mxu0 %v6423_v58  ;;  %v7252_v58 = vld [vmem:[%s12118_s29 + $0x28] sm:$0xff] }
0x10c0   :  { %v2660_v46 = vmul.f32 %v9587_v7, %v9587_v7 }
0x10c2   :  { %v2666_v19 = vsel %vm522_vm6, %v2660_v46, 0.0 }
0x10c3   :  { %2667 = vadd.xlane.f32.xlu2 %v2666_v19  ;;  %v2647_v42 = vpop.xlane.xlu2 %2646 }
0x10c4   :  { %v2653_v30 = vmul.f32 %v2647_v42, %v7802_v38 }
0x10c6   :  { %v9594_v8 = vsub.f32 %v9568_v39, %v2653_v30 }
0x10c8   :  { %v2661_v21 = vmul.f32 %v9594_v8, %v9594_v8 }
0x10ca   :  { %v2669_v10 = vsel %vm522_vm6, %v2661_v21, 0.0  ;;  %v6422_v21 = vld [vmem:[%s12087_s24 + $0xe0] sm:$0xff] }
0x10cb   :  { %2670 = vadd.xlane.f32.xlu0 %v2669_v10  ;;  %v2650_v50 = vpop.xlane.xlu0 %2649  ;;  %2853 = vmatpush.msrb.mxu0 %v6422_v21 }
0x10cc   :  { %v2654_v11 = vmul.f32 %v2650_v50, %v7802_v38 }
0x10ce   :  { %v9601_v1 = vsub.f32 %v9574_v12, %v2654_v11 }
0x10d0   :  { %v2662_v22 = vmul.f32 %v9601_v1, %v9601_v1 }
0x10d2   :  { %v2672_v2 = vsel %vm522_vm6, %v2662_v22, 0.0 }
0x10d3   :  { %2673 = vadd.xlane.f32.xlu2 %v2672_v2 }
0x112e   :  { %v2665_v4 = vpop.xlane.xlu1 %2664 }
0x112f   :  { %v2675_v54 = vmul.f32 %v2665_v4, %v7802_v38 }
0x1131   :  { %v2679_v0 = vadd.f32 1e-06, %v2675_v54 }
0x1133   :  { %6949 = vrsqrt.f32 %v2679_v0  ;;  %vm2689_vm14 = vweird.f32 %v2679_v0 }
0x1136   :  { %v2668_v24 = vpop.xlane.xlu2 %2667 }
0x1137   :  { %v2676_v61 = vmul.f32 %v2668_v24, %v7802_v38 }
0x1139   :  { %v6950_v45 = vpop.eup %6949  ;;  %v2680_v43 = vadd.f32 1e-06, %v2676_v61 }
0x113a   :  { %v2684_v36 = vmul.f32 %v6950_v45, %v2679_v0  ;;  %vm2690_vm13 = vweird.f32 %v6950_v45 }
0x113b   :  { %6951 = vrsqrt.f32 %v2680_v43  ;;  %vm2691_vm1 = vmor %vm2689_vm14, %vm2690_vm13  ;;  %vm2699_vm3 = vweird.f32 %v2680_v43 }
0x113c   :  { %v2685_v6 = vmul.f32 %v6950_v45, %v2684_v36 }
0x113e   :  { %v2686_v41 = vmul.f32 0.5, %v2685_v6  ;;  %v2671_v9 = vpop.xlane.xlu0 %2670 }
0x113f   :  { %v2677_v35 = vmul.f32 %v2671_v9, %v7802_v38 }
0x1140   :  { %v2687_v57 = vsub.f32 1.5, %v2686_v41 }
0x1141   :  { %v6952_v60 = vpop.eup %6951  ;;  %v2681_v28 = vadd.f32 1e-06, %v2677_v35 }
0x1142   :  { %v2688_v13 = vmul.f32 %v6950_v45, %v2687_v57  ;;  %v2694_v15 = vmul.f32 %v6952_v60, %v2680_v43  ;;  %vm2700_vm2 = vweird.f32 %v6952_v60 }
0x1143   :  { %6953 = vrsqrt.f32 %v2681_v28  ;;  %vm2701_vm4 = vmor %vm2699_vm3, %vm2700_vm2  ;;  %vm2709_vm7 = vweird.f32 %v2681_v28 }
0x1144   :  { %v2692_v59 = vsel %vm2691_vm1, %v6950_v45, %v2688_v13  ;;  %v2695_v20 = vmul.f32 %v6952_v60, %v2694_v15  ;;  %v6416_v13 = vld [vmem:[%s12087_s24 + $0xb0] sm:$0xff]  ;;  %v6415_v15 = vld [vmem:[%s12087_s24 + $0xa8] sm:$0xff] }
0x1145   :  { %v2723_v62 = vmul.f32 %v2692_v59, %v9580_v27  ;;  %v6412_v59 = vld [vmem:[%s12087_s24 + $0x90] sm:$0xff] }
0x1146   :  { %v2696_v46 = vmul.f32 0.5, %v2695_v20  ;;  %v2674_v19 = vpop.xlane.xlu2 %2673  ;;  %v6411_v20 = vld [vmem:[%s12087_s24 + $0x88] sm:$0xff] }
0x1147   :  { %v2730_v42 = vmul.f32 %v6823_v17, %v2723_v62  ;;  %v2678_v30 = vmul.f32 %v2674_v19, %v7802_v38  ;;  %v7251_v62 = vld [vmem:[%s12118_s29 + $0x38] sm:$0xff] }
0x1148   :  { %v2697_v10 = vsub.f32 1.5, %v2696_v46  ;;  %v6825_v46 = vld [vmem:[%s12085_s23 + $0x1] ss:$0 sm:$0xff]  ;;  %v7253_v19 = vld [vmem:[%s12118_s29 + $0x18] sm:$0xff] }
0x1149   :  { %v6954_v50 = vpop.eup %6953  ;;  %v2737_v11 = vadd.f32 %v6824_v44, %v2730_v42  ;;  %v2682_v27 = vadd.f32 1e-06, %v2678_v30  ;;  %v7254_v42 = vld [vmem:[%s12118_s29 + $0x8] sm:$0xff] }
0x114a   :  { %v2698_v22 = vmul.f32 %v6952_v60, %v2697_v10  ;;  %v2704_v2 = vmul.f32 %v6954_v50, %v2681_v28  ;;  %vm2710_vm5 = vweird.f32 %v6954_v50  ;;  %v6419_v28 = vld [vmem:[%s12087_s24 + $0xc8] sm:$0xff] }
0x114b   :  { %6955 = vrsqrt.f32 %v2682_v27  ;;  %6406 = vmatmul.msk.f32.vlgmr.msrb.gmra.mxu3 %vm522_vm6, %v2737_v11  ;;  %vm2711_vm9 = vmor %vm2709_vm7, %vm2710_vm5  ;;  %vm2719_vm11 = vweird.f32 %v2682_v27 }
0x114c   :  { %v2702_v29 = vsel %vm2701_vm4, %v6952_v60, %v2698_v22  ;;  %v2705_v31 = vmul.f32 %v6954_v50, %v2704_v2  ;;  %v6420_v60 = vld [vmem:[%s12087_s24 + $0xd0] sm:$0xff] }
0x114d   :  { %v2724_v55 = vmul.f32 %v2702_v29, %v9587_v7 }
0x114e   :  { %v2706_v40 = vmul.f32 0.5, %v2705_v31 }
0x114f   :  { %v2731_v18 = vmul.f32 %v6823_v17, %v2724_v55 }
0x1150   :  { %v2707_v4 = vsub.f32 1.5, %v2706_v40 }
0x1151   :  { %v6956_v26 = vpop.eup %6955  ;;  %v2738_v54 = vadd.f32 %v6824_v44, %v2731_v18 }
0x1152   :  { %v2708_v37 = vmul.f32 %v6954_v50, %v2707_v4  ;;  %v2714_v0 = vmul.f32 %v6956_v26, %v2682_v27  ;;  %vm2720_vm10 = vweird.f32 %v6956_v26 }
0x1153   :  { %6407 = vmatmul.msk.f32.gmra.mxu3 %vm522_vm6, %v2738_v54  ;;  %vm2721_vm12 = vmor %vm2719_vm11, %vm2720_vm10 }
0x1154   :  { %v2712_v32 = vsel %vm2711_vm9, %v6954_v50, %v2708_v37  ;;  %v2715_v24 = vmul.f32 %v6956_v26, %v2714_v0 }
0x1155   :  { %v2725_v61 = vmul.f32 %v2712_v32, %v9594_v8  ;;  %v6421_v8 = vld [vmem:[%s12087_s24 + $0xd8] sm:$0xff] }
0x1156   :  { %v2716_v45 = vmul.f32 0.5, %v2715_v24  ;;  %2854 = vmatpush.msrb.mxu0 %v6421_v8 }
0x1157   :  { %v2732_v43 = vmul.f32 %v6823_v17, %v2725_v61 }
0x1158   :  { %v2717_v36 = vsub.f32 1.5, %v2716_v45  ;;  %2855 = vmatpush.msrb.mxu0 %v6420_v60 }
0x1159   :  { %v2739_v7 = vadd.f32 %v6824_v44, %v2732_v43 }
0x115a   :  { %v2718_v6 = vmul.f32 %v6956_v26, %v2717_v36  ;;  %2856 = vmatpush.msrb.mxu0 %v6419_v28 }
0x115b   :  { %6408 = vmatmul.msk.f32.gmra.mxu3 %vm522_vm6, %v2739_v7 }
0x115c   :  { %v2722_v41 = vsel %vm2721_vm12, %v6956_v26, %v2718_v6 }
0x115d   :  { %v2726_v9 = vmul.f32 %v2722_v41, %v9601_v1  ;;  %v6418_v1 = vld [vmem:[%s12087_s24 + $0xc0] sm:$0xff] }
0x115e   :  { %2857 = vmatpush.msrb.mxu0 %v6418_v1 }
0x115f   :  { %v2733_v35 = vmul.f32 %v6823_v17, %v2726_v9  ;;  %v6417_v17 = vld [vmem:[%s12087_s24 + $0xb8] sm:$0xff] }
0x1160   :  { %2858 = vmatpush.msrb.mxu0 %v6417_v17 }
0x1161   :  { %v2740_v57 = vadd.f32 %v6824_v44, %v2733_v35  ;;  %v6410_v44 = vld [vmem:[%s12087_s24 + $0x80] sm:$0xff] }
0x1162   :  { %2859 = vmatpush.msrb.mxu0 %v6416_v13 }
0x1163   :  { %6409 = vmatmul.msk.f32.gmra.mxu3 %vm522_vm6, %v2740_v57 }
0x1164   :  { %2860 = vmatpush.msrb.mxu0 %v6415_v15 }
0x1166   :  { %2861 = vmatpush.msrb.mxu0 %v6414_v56 }
0x1168   :  { %2862 = vmatpush.msrb.mxu0 %v6413_v14 }
0x116a   :  { %2863 = vmatpush.msrb.mxu0 %v6412_v59 }
0x116c   :  { %2864 = vmatpush.msrb.mxu0 %v6411_v20 }
0x116e   :  { %2865 = vmatpush.msrb.mxu0 %v6410_v44 }
0x1170   :  { %3141 = vmatpush.msra.mxu0 %v7251_v62 }
0x1172   :  { %3142 = vmatpush.msra.mxu0 %v7252_v58 }
0x1174   :  { %3143 = vmatpush.msra.mxu0 %v7253_v19 }
0x1176   :  { %3144 = vmatpush.msra.mxu0 %v7254_v42 }
0x11ce   :  { %v2780_v30 = vpop.f32.mrf.mxu3 }
0x11cf   :  { %v2781_v21 = vadd.f32 %v6825_v46, %v2780_v30 }
0x11d1   :  { %v2796_v10 = vmul.f32 0.044715, %v2781_v21  ;;  %v2792_v32 = vmul.f32 0.5, %v2781_v21 }
0x11d3   :  { %v2800_v50 = vmul.f32 %v2796_v10, %v2781_v21 }
0x11d5   :  { %v2804_v11 = vmul.f32 %v2800_v50, %v2781_v21 }
0x11d6   :  { %v2783_v27 = vpop.f32.mrf.mxu3 }
0x11d7   :  { %v2808_v22 = vadd.f32 %v2804_v11, %v2781_v21  ;;  %v2784_v2 = vadd.f32 %v6825_v46, %v2783_v27 }
0x11d9   :  { %v2812_v29 = vmul.f32 0.7978846, %v2808_v22  ;;  %v2797_v31 = vmul.f32 0.044715, %v2784_v2  ;;  %v2793_v57 = vmul.f32 0.5, %v2784_v2 }
0x11db   :  { %6957 = vtanh.f32 %v2812_v29  ;;  %v2801_v55 = vmul.f32 %v2797_v31, %v2784_v2 }
0x11dd   :  { %v2805_v40 = vmul.f32 %v2801_v55, %v2784_v2 }
0x11de   :  { %v2786_v18 = vpop.f32.mrf.mxu3 }
0x11df   :  { %v2787_v4 = vadd.f32 %v6825_v46, %v2786_v18  ;;  %v2809_v26 = vadd.f32 %v2805_v40, %v2784_v2 }
0x11e1   :  { %v6958_v54 = vpop.eup %6957  ;;  %v2798_v37 = vmul.f32 0.044715, %v2787_v4  ;;  %v2813_v0 = vmul.f32 0.7978846, %v2809_v26  ;;  %v2794_v56 = vmul.f32 0.5, %v2787_v4 }
0x11e2   :  { %v2820_v24 = vadd.f32 1.0, %v6958_v54 }
0x11e3   :  { %6959 = vtanh.f32 %v2813_v0  ;;  %v2802_v61 = vmul.f32 %v2798_v37, %v2787_v4 }
0x11e4   :  { %v2824_v45 = vmul.f32 %v2820_v24, %v2792_v32 }
0x11e5   :  { %v2806_v43 = vmul.f32 %v2802_v61, %v2787_v4 }
0x11e6   :  { %v2789_v36 = vpop.f32.mrf.mxu3  ;;  %2866 = vmatmul.f32.vlgmr.msrb.gmra.mxu0 %v2824_v45 }
0x11e7   :  { %v2790_v7 = vadd.f32 %v6825_v46, %v2789_v36  ;;  %v2810_v6 = vadd.f32 %v2806_v43, %v2787_v4  ;;  %v6826_v46 = vld [vmem:[%s12088_s25 + $0x1] ss:$0 sm:$0xff] }
0x11e9   :  { %v6960_v41 = vpop.eup %6959  ;;  %v2799_v9 = vmul.f32 0.044715, %v2790_v7  ;;  %v2814_v35 = vmul.f32 0.7978846, %v2810_v6  ;;  %v2795_v44 = vmul.f32 0.5, %v2790_v7 }
0x11ea   :  { %v2821_v8 = vadd.f32 1.0, %v6960_v41 }
0x11eb   :  { %6961 = vtanh.f32 %v2814_v35  ;;  %v2803_v60 = vmul.f32 %v2799_v9, %v2790_v7 }
0x11ec   :  { %v2825_v28 = vmul.f32 %v2821_v8, %v2793_v57  ;;  %v6432_v8 = vld [vmem:[%s12119_s28 + $0x58] sm:$0xff] }
0x11ed   :  { %v2807_v1 = vmul.f32 %v2803_v60, %v2790_v7  ;;  %3023 = vmatpush.msra.mxu1 %v6432_v8  ;;  %v6431_v60 = vld [vmem:[%s12119_s28 + $0x50] sm:$0xff] }
0x11ee   :  { %2869 = vmatmul.f32.gmra.mxu0 %v2825_v28  ;;  %v6430_v28 = vld [vmem:[%s12119_s28 + $0x48] sm:$0xff] }
0x11ef   :  { %v2811_v17 = vadd.f32 %v2807_v1, %v2790_v7  ;;  %3024 = vmatpush.msra.mxu1 %v6431_v60  ;;  %v6429_v1 = vld [vmem:[%s12119_s28 + $0x40] sm:$0xff] }
0x11f1   :  { %v6962_v13 = vpop.eup %6961  ;;  %v2815_v15 = vmul.f32 0.7978846, %v2811_v17  ;;  %3025 = vmatpush.msra.mxu1 %v6430_v28 }
0x11f2   :  { %v2822_v14 = vadd.f32 1.0, %v6962_v13 }
0x11f3   :  { %6963 = vtanh.f32 %v2815_v15  ;;  %3026 = vmatpush.msra.mxu1 %v6429_v1 }
0x11f4   :  { %v2826_v59 = vmul.f32 %v2822_v14, %v2794_v56 }
0x11f6   :  { %2872 = vmatmul.f32.gmra.mxu0 %v2826_v59 }
0x11f9   :  { %v6964_v20 = vpop.eup %6963 }
0x11fa   :  { %v2823_v62 = vadd.f32 1.0, %v6964_v20 }
0x11fc   :  { %v2827_v58 = vmul.f32 %v2823_v62, %v2795_v44 }
0x11fe   :  { %2875 = vmatmul.f32.gmra.mxu0 %v2827_v58 }
0x1263   :  { %v2867_v19 = vpop.f32.mrf.mxu0 }
0x1264   :  { %v2868_v42 = vadd.f32 %v6826_v46, %v2867_v19 }
0x1266   :  { %v9715_v30 = vadd.f32 %v2868_v42, %v9556_v53 }
0x1268   :  { %v2887_v21 = vsel %vm522_vm6, %v9715_v30, 0.0 }
0x1269   :  { %2888 = vadd.xlane.f32.xlu0 %v2887_v21 }
0x126b   :  { %v2870_v10 = vpop.f32.mrf.mxu0 }
0x126c   :  { %v2871_v50 = vadd.f32 %v6826_v46, %v2870_v10 }
0x126e   :  { %v9720_v11 = vadd.f32 %v2871_v50, %v9562_v3 }
0x1270   :  { %v2890_v27 = vsel %vm522_vm6, %v9720_v11, 0.0 }
0x1271   :  { %2891 = vadd.xlane.f32.xlu2 %v2890_v27 }
0x1273   :  { %v2873_v22 = vpop.f32.mrf.mxu0 }
0x1274   :  { %v2874_v2 = vadd.f32 %v6826_v46, %v2873_v22  ;;  %v6827_v22 = vld [vmem:[%s12120_s0 + $0x2] ss:$0 sm:$0xff] }
0x1276   :  { %v9725_v29 = vadd.f32 %v2874_v2, %v9568_v39 }
0x1278   :  { %v2893_v53 = vsel %vm522_vm6, %v9725_v29, 0.0 }
0x1279   :  { %2894 = vadd.xlane.f32.xlu0 %v2893_v53 }
0x127b   :  { %v2876_v31 = vpop.f32.mrf.mxu0 }
0x127c   :  { %v2877_v55 = vadd.f32 %v6826_v46, %v2876_v31  ;;  %v6828_v31 = vld [vmem:[%s12121_s27 + $0x2] ss:$0 sm:$0xff] }
0x127e   :  { %v9730_v40 = vadd.f32 %v2877_v55, %v9574_v12 }
0x1280   :  { %v2896_v3 = vsel %vm522_vm6, %v9730_v40, 0.0 }
0x1281   :  { %2897 = vadd.xlane.f32.xlu2 %v2896_v3 }
0x12dc   :  { %v2889_v18 = vpop.xlane.xlu0 %2888 }
0x12dd   :  { %v2899_v4 = vmul.f32 %v2889_v18, %v7802_v38 }
0x12df   :  { %v2903_v26 = vsub.f32 %v9715_v30, %v2899_v4 }
0x12e1   :  { %v2907_v39 = vmul.f32 %v2903_v26, %v2903_v26 }
0x12e3   :  { %v2911_v54 = vsel %vm522_vm6, %v2907_v39, 0.0 }
0x12e4   :  { %v2892_v37 = vpop.xlane.xlu2 %2891  ;;  %2912 = vadd.xlane.f32.xlu0 %v2911_v54 }
0x12e5   :  { %v2900_v0 = vmul.f32 %v2892_v37, %v7802_v38 }
0x12e7   :  { %v9739_v32 = vsub.f32 %v9720_v11, %v2900_v0 }
0x12e9   :  { %v2908_v12 = vmul.f32 %v9739_v32, %v9739_v32 }
0x12eb   :  { %v2914_v24 = vsel %vm522_vm6, %v2908_v12, 0.0 }
0x12ec   :  { %2915 = vadd.xlane.f32.xlu2 %v2914_v24  ;;  %v2895_v61 = vpop.xlane.xlu0 %2894 }
0x12ed   :  { %v2901_v45 = vmul.f32 %v2895_v61, %v7802_v38 }
0x12ef   :  { %v9746_v43 = vsub.f32 %v9725_v29, %v2901_v45 }
0x12f1   :  { %v2909_v36 = vmul.f32 %v9746_v43, %v9746_v43 }
0x12f3   :  { %v2917_v7 = vsel %vm522_vm6, %v2909_v36, 0.0 }
0x12f4   :  { %v2898_v6 = vpop.xlane.xlu2 %2897  ;;  %2918 = vadd.xlane.f32.xlu0 %v2917_v7 }
0x12f5   :  { %v2902_v41 = vmul.f32 %v2898_v6, %v7802_v38 }
0x12f7   :  { %v9753_v9 = vsub.f32 %v9730_v40, %v2902_v41 }
0x12f9   :  { %v2910_v35 = vmul.f32 %v9753_v9, %v9753_v9 }
0x12fb   :  { %v2920_v57 = vsel %vm522_vm6, %v2910_v35, 0.0 }
0x12fc   :  { %2921 = vadd.xlane.f32.xlu2 %v2920_v57 }
0x1357   :  { %v2913_v17 = vpop.xlane.xlu0 %2912 }
0x1358   :  { %v2923_v13 = vmul.f32 %v2913_v17, %v7802_v38 }
0x135a   :  { %v2927_v15 = vadd.f32 1e-06, %v2923_v13 }
0x135c   :  { %6965 = vrsqrt.f32 %v2927_v15  ;;  %vm2937_vm14 = vweird.f32 %v2927_v15 }
0x135f   :  { %v2916_v56 = vpop.xlane.xlu2 %2915 }
0x1360   :  { %v2924_v14 = vmul.f32 %v2916_v56, %v7802_v38 }
0x1362   :  { %v6966_v59 = vpop.eup %6965  ;;  %v2928_v20 = vadd.f32 1e-06, %v2924_v14 }
0x1363   :  { %v2932_v44 = vmul.f32 %v6966_v59, %v2927_v15  ;;  %vm2938_vm13 = vweird.f32 %v6966_v59 }
0x1364   :  { %6967 = vrsqrt.f32 %v2928_v20  ;;  %vm2939_vm1 = vmor %vm2937_vm14, %vm2938_vm13  ;;  %vm2947_vm3 = vweird.f32 %v2928_v20 }
0x1365   :  { %v2933_v62 = vmul.f32 %v6966_v59, %v2932_v44 }
0x1367   :  { %v2934_v58 = vmul.f32 0.5, %v2933_v62  ;;  %v2919_v46 = vpop.xlane.xlu0 %2918 }
0x1368   :  { %v2925_v19 = vmul.f32 %v2919_v46, %v7802_v38 }
0x1369   :  { %v2935_v42 = vsub.f32 1.5, %v2934_v58 }
0x136a   :  { %v6968_v21 = vpop.eup %6967  ;;  %v2929_v10 = vadd.f32 1e-06, %v2925_v19 }
0x136b   :  { %v2936_v50 = vmul.f32 %v6966_v59, %v2935_v42  ;;  %v2942_v27 = vmul.f32 %v6968_v21, %v2928_v20  ;;  %vm2948_vm2 = vweird.f32 %v6968_v21 }
0x136c   :  { %6969 = vrsqrt.f32 %v2929_v10  ;;  %vm2949_vm4 = vmor %vm2947_vm3, %vm2948_vm2  ;;  %vm2957_vm7 = vweird.f32 %v2929_v10 }
0x136d   :  { %v2940_v2 = vsel %vm2939_vm1, %v6966_v59, %v2936_v50  ;;  %v2943_v53 = vmul.f32 %v6968_v21, %v2942_v27 }
0x136e   :  { %v2971_v55 = vmul.f32 %v2940_v2, %v2903_v26 }
0x136f   :  { %v2944_v3 = vmul.f32 0.5, %v2943_v53  ;;  %v2922_v18 = vpop.xlane.xlu2 %2921 }
0x1370   :  { %v2978_v4 = vmul.f32 %v6827_v22, %v2971_v55  ;;  %v2926_v39 = vmul.f32 %v2922_v18, %v7802_v38 }
0x1371   :  { %v2945_v54 = vsub.f32 1.5, %v2944_v3 }
0x1372   :  { %v6970_v37 = vpop.eup %6969  ;;  %v2985_v0 = vadd.f32 %v6828_v31, %v2978_v4  ;;  %v2930_v12 = vadd.f32 1e-06, %v2926_v39 }
0x1373   :  { %v2946_v24 = vmul.f32 %v6968_v21, %v2945_v54  ;;  %v2952_v61 = vmul.f32 %v6970_v37, %v2929_v10  ;;  %vm2958_vm5 = vweird.f32 %v6970_v37 }
0x1374   :  { %6971 = vrsqrt.f32 %v2930_v12  ;;  %6434 = vmatmul.msk.f32.vlgmr.msra.gmra.mxu1 %vm522_vm6, %v2985_v0  ;;  %vm2959_vm9 = vmor %vm2957_vm7, %vm2958_vm5  ;;  %vm2967_vm11 = vweird.f32 %v2930_v12  ;;  %v7255_v0 = vld [vmem:[%s12075_s8] sm:$0xff] }
0x1375   :  { %v2950_v45 = vsel %vm2949_vm4, %v6968_v21, %v2946_v24  ;;  %v2953_v36 = vmul.f32 %v6970_v37, %v2952_v61  ;;  %v7257_v24 = vld [vmem:[%s12075_s8 + $0x8] sm:$0xff]  ;;  %v7258_v61 = vld [vmem:[%s12075_s8 + $0x10] sm:$0xff] }
0x1376   :  { %v2972_v26 = vmul.f32 %v2950_v45, %v9739_v32  ;;  %v7259_v45 = vld [vmem:[%s12075_s8 + $0x18] sm:$0xff] }
0x1377   :  { %v2954_v7 = vmul.f32 0.5, %v2953_v36  ;;  %v7260_v36 = vld [vmem:[%s12075_s8 + $0x20] sm:$0xff] }
0x1378   :  { %v2979_v6 = vmul.f32 %v6827_v22, %v2972_v26  ;;  %v7261_v26 = vld [vmem:[%s12075_s8 + $0x28] sm:$0xff] }
0x1379   :  { %v2955_v41 = vsub.f32 1.5, %v2954_v7  ;;  %v7262_v7 = vld [vmem:[%s12075_s8 + $0x30] sm:$0xff] }
0x137a   :  { %v6972_v35 = vpop.eup %6971  ;;  %v2986_v57 = vadd.f32 %v6828_v31, %v2979_v6  ;;  %v7263_v6 = vld [vmem:[%s12075_s8 + $0x38] sm:$0xff] }
0x137b   :  { %v2956_v8 = vmul.f32 %v6970_v37, %v2955_v41  ;;  %v2962_v60 = vmul.f32 %v6972_v35, %v2930_v12  ;;  %vm2968_vm10 = vweird.f32 %v6972_v35  ;;  %v9819_v12 = vld [vmem:[%s12080_s13 + $0x8] sm:$0xff]  ;;  %v7264_v41 = vld [vmem:[%s12075_s8 + $0x40] sm:$0xff] }
0x137c   :  { %6435 = vmatmul.msk.f32.gmra.mxu1 %vm522_vm6, %v2986_v57  ;;  %vm2969_vm12 = vmor %vm2967_vm11, %vm2968_vm10  ;;  %v7266_v57 = vld [vmem:[%s12075_s8 + $0x50] sm:$0xff] }
0x137d   :  { %v2960_v28 = vsel %vm2959_vm9, %v6970_v37, %v2956_v8  ;;  %v2963_v1 = vmul.f32 %v6972_v35, %v2962_v60  ;;  %v7267_v8 = vld [vmem:[%s12075_s8 + $0x58] sm:$0xff]  ;;  %v7268_v60 = vld [vmem:[%s12075_s8 + $0x60] sm:$0xff] }
0x137e   :  { %v2973_v17 = vmul.f32 %v2960_v28, %v9746_v43  ;;  %v6829_v43 = vld [vmem:[%s12074_s17 + $0x2] ss:$0 sm:$0xff]  ;;  %v7269_v28 = vld [vmem:[%s12075_s8 + $0x68] sm:$0xff] }
0x137f   :  { %v2964_v13 = vmul.f32 0.5, %v2963_v1 }
0x1380   :  { %v2980_v15 = vmul.f32 %v6827_v22, %v2973_v17  ;;  %v7270_v17 = vld [vmem:[%s12075_s8 + $0x70] sm:$0xff] }
0x1381   :  { %v2965_v56 = vsub.f32 1.5, %v2964_v13 }
0x1382   :  { %v2987_v32 = vadd.f32 %v6828_v31, %v2980_v15  ;;  %v7271_v15 = vld [vmem:[%s12075_s8 + $0x78] sm:$0xff] }
0x1383   :  { %v2966_v14 = vmul.f32 %v6972_v35, %v2965_v56 }
0x1384   :  { %6436 = vmatmul.msk.f32.gmra.mxu1 %vm522_vm6, %v2987_v32  ;;  %v7272_v32 = vld [vmem:[%s12075_s8 + $0x80] sm:$0xff] }
0x1385   :  { %v2970_v59 = vsel %vm2969_vm12, %v6972_v35, %v2966_v14  ;;  %v7265_v35 = vld [vmem:[%s12075_s8 + $0x48] sm:$0xff] }
0x1386   :  { %v2974_v20 = vmul.f32 %v2970_v59, %v9753_v9  ;;  %v7273_v59 = vld [vmem:[%s12075_s8 + $0x88] sm:$0xff] }
0x1388   :  { %v2981_v44 = vmul.f32 %v6827_v22, %v2974_v20  ;;  %v7274_v20 = vld [vmem:[%s12075_s8 + $0xb0] sm:$0xff] }
0x138a   :  { %v2988_v62 = vadd.f32 %v6828_v31, %v2981_v44  ;;  %v7275_v44 = vld [vmem:[%s12075_s8 + $0x90] sm:$0xff] }
0x138c   :  { %6437 = vmatmul.msk.f32.gmra.mxu1 %vm522_vm6, %v2988_v62  ;;  %v7276_v62 = vld [vmem:[%s12075_s8 + $0xb8] sm:$0xff] }
0x13f1   :  { %v3028_v58 = vpop.f32.mrf.mxu1 }
0x13f2   :  { %v9790_v46 = vadd.f32 %v6829_v43, %v3028_v58  ;;  %v7278_v58 = vld [vmem:[%s12075_s8 + $0xc0] sm:$0xff] }
0x13f4   :  { %3044 = vrot.lane.b32.xlu0 %v9790_v46, %s7591_s1 }
0x13f9   :  { %v3031_v19 = vpop.f32.mrf.mxu1 }
0x13fa   :  { %v9794_v42 = vadd.f32 %v6829_v43, %v3031_v19  ;;  %v7279_v19 = vld [vmem:[%s12075_s8 + $0xa0] sm:$0xff] }
0x13fc   :  { %3046 = vrot.lane.b32.xlu2 %v9794_v42, %s7591_s1  ;;  %v6785_v22 = vpack.i.bf16 %v9790_v46, %v9794_v42 }
0x1401   :  { %v3034_v9 = vpop.f32.mrf.mxu1 }
0x1402   :  { %v9798_v21 = vadd.f32 %v6829_v43, %v3034_v9  ;;  %v7280_v9 = vld [vmem:[%s12075_s8 + $0xc8] sm:$0xff] }
0x1404   :  { %3048 = vrot.lane.b32.xlu0 %v9798_v21, %s7591_s1 }
0x1409   :  { %v3037_v10 = vpop.f32.mrf.mxu1 }
0x140a   :  { %v9802_v50 = vadd.f32 %v6829_v43, %v3037_v10  ;;  %v7277_v43 = vld [vmem:[%s12075_s8 + $0x98] sm:$0xff]  ;;  %v7281_v10 = vld [vmem:[%s12075_s8 + $0xa8] sm:$0xff] }
0x140c   :  { %3050 = vrot.lane.b32.xlu0 %v9802_v50, %s7591_s1  ;;  %v6780_v27 = vpack.i.bf16 %v9798_v21, %v9802_v50 }
0x1414   :  { %6781 = vrot.lane.b32.xlu0 %v6780_v27, %s12123_s5  ;;  %v7282_v27 = vld [vmem:[%s12075_s8 + $0xd0] sm:$0xff] }
0x141c   :  { %6786 = vrot.lane.b32.xlu0 %v6785_v22, %s12123_s5  ;;  %v7283_v22 = vld [vmem:[%s12075_s8 + $0xd8] sm:$0xff] }
0x1456   :  { %v3047_v53 = vpop.permute.xlu2 %3046 }
0x1466   :  { %v3045_v2 = vpop.permute.xlu0 %3044 }
0x1467   :  { %3056 = vxpose.xlu2.b32.start [1/4] (short) (narrow) %v3045_v2, 32  ;;  %v7284_v2 = vld [vmem:[%s12075_s8 + $0xe0] sm:$0xff] }
0x146f   :  { %3057 = vxpose.xlu2.b32.cont [2/4] (short) (narrow) %v3047_v53, 32  ;;  %v7285_v53 = vld [vmem:[%s12075_s8 + $0xe8] sm:$0xff] }
0x1476   :  { %v3049_v31 = vpop.permute.xlu0 %3048 }
0x1477   :  { %3058 = vxpose.xlu2.b32.cont [3/4] (short) (narrow) %v3049_v31, 32  ;;  %v7286_v31 = vld [vmem:[%s12075_s8 + $0xf0] sm:$0xff] }
0x147e   :  { %v3051_v55 = vpop.permute.xlu0 %3050 }
0x147f   :  { %3059 = vxpose.xlu2.b32.end [4/4] (short) (narrow) %v3051_v55, 32  ;;  %v7287_v55 = vld [vmem:[%s12075_s8 + $0xf8] sm:$0xff] }
0x1486   :  { %v6782_v3 = vpop.permute.xlu0 %6781 }
0x1487   :  { %v6783_v18 = vunpack.i.l.bf16 %v6782_v3  ;;  %v6784_v4 = vunpack.i.h.bf16 %v6782_v3 }
0x1489   :  { %3190 = vmatpush.msrb.mxu1 %v6783_v18  ;;  %6747 = vmatpush.msrb.mxu3 %v6783_v18 }
0x148b   :  { %3191 = vmatpush.msrb.mxu1 %v6784_v4  ;;  %6748 = vmatpush.msrb.mxu3 %v6784_v4 }
0x148e   :  { %v6787_v39 = vpop.permute.xlu0 %6786 }
0x148f   :  { %v6788_v54 = vunpack.i.l.bf16 %v6787_v39  ;;  %v6789_v37 = vunpack.i.h.bf16 %v6787_v39 }
0x1491   :  { %3192 = vmatpush.msrb.mxu1 %v6788_v54  ;;  %6749 = vmatpush.msrb.mxu3 %v6788_v54 }
0x1493   :  { %3193 = vmatpush.msrb.mxu1 %v6789_v37  ;;  %6750 = vmatpush.msrb.mxu3 %v6789_v37 }
0x1494   :  { %6446 = vmatmul.msk.f32.vlgmr.msrb.gmra.mxu1 %vm522_vm6, %v7255_v0 }
0x1495   :  { %4590 = vmatpush.msra.mxu1 %v9819_v12 }
0x149c   :  { %6447 = vmatmul.msk.f32.gmra.mxu1 %vm522_vm6, %v7257_v24  ;;  %v7288_v24 = vld [vmem:[%s12076_s9 + $0x38] sm:$0xff] }
0x14a4   :  { %6448 = vmatmul.msk.f32.gmra.mxu1 %vm522_vm6, %v7258_v61 }
0x14ac   :  { %6449 = vmatmul.msk.f32.gmra.mxu1 %vm522_vm6, %v7259_v45  ;;  %v7289_v45 = vld [vmem:[%s12076_s9 + $0x28] sm:$0xff] }
0x14b4   :  { %6450 = vmatmul.msk.f32.gmra.mxu1 %vm522_vm6, %v7260_v36 }
0x14bc   :  { %6451 = vmatmul.msk.f32.gmra.mxu1 %vm522_vm6, %v7261_v26  ;;  %v7290_v26 = vld [vmem:[%s12076_s9 + $0x18] sm:$0xff] }
0x14c4   :  { %6452 = vmatmul.msk.f32.gmra.mxu1 %vm522_vm6, %v7262_v7 }
0x14cc   :  { %6453 = vmatmul.msk.f32.gmra.mxu1 %vm522_vm6, %v7263_v6 }
0x14d4   :  { %6454 = vmatmul.msk.f32.gmra.mxu1 %vm522_vm6, %v7264_v41  ;;  %v7291_v41 = vld [vmem:[%s12076_s9 + $0x8] sm:$0xff] }
0x14dc   :  { %6455 = vmatmul.msk.f32.gmra.mxu1 %vm522_vm6, %v7265_v35 }
0x14e4   :  { %6456 = vmatmul.msk.f32.gmra.mxu1 %vm522_vm6, %v7266_v57  ;;  %v7292_v57 = vld [vmem:[%s12076_s9 + $0x30] sm:$0xff] }
0x14ec   :  { %6457 = vmatmul.msk.f32.gmra.mxu1 %vm522_vm6, %v7267_v8 }
0x14f4   :  { %6458 = vmatmul.msk.f32.gmra.mxu1 %vm522_vm6, %v7268_v60  ;;  %v7293_v60 = vld [vmem:[%s12076_s9 + $0x20] sm:$0xff] }
0x14fc   :  { %6459 = vmatmul.msk.f32.gmra.mxu1 %vm522_vm6, %v7269_v28 }
0x1500   :  { %v3072_v1 = vpop.trf.xlu2 }
0x1501   :  { %6438 = vmatmul.msk.f32.vlgmr.msra.gmra.mxu3 %vm522_vm6, %v3072_v1  ;;  %6442 = vmatmul.msk.f32.vlgmr.msra.gmra.mxu0 %vm522_vm6, %v3072_v1  ;;  %v7294_v1 = vld [vmem:[%s12076_s9 + $0x10] sm:$0xff] }
0x1504   :  { %6460 = vmatmul.msk.f32.gmra.mxu1 %vm522_vm6, %v7270_v17 }
0x1508   :  { %v3073_v13 = vpop.trf.xlu2 }
0x1509   :  { %6439 = vmatmul.msk.f32.gmra.mxu3 %vm522_vm6, %v3073_v13  ;;  %6443 = vmatmul.msk.f32.gmra.mxu0 %vm522_vm6, %v3073_v13  ;;  %v7295_v13 = vld [vmem:[%s12078_s12 + $0xf8] sm:$0xff] }
0x150c   :  { %6461 = vmatmul.msk.f32.gmra.mxu1 %vm522_vm6, %v7271_v15  ;;  %v7296_v15 = vld [vmem:[%s12076_s9] sm:$0xff] }
0x1510   :  { %v3074_v56 = vpop.trf.xlu2 }
0x1511   :  { %6440 = vmatmul.msk.f32.gmra.mxu3 %vm522_vm6, %v3074_v56  ;;  %6444 = vmatmul.msk.f32.gmra.mxu0 %vm522_vm6, %v3074_v56 }
0x1514   :  { %6462 = vmatmul.msk.f32.gmra.mxu1 %vm522_vm6, %v7272_v32  ;;  %v7297_v32 = vld [vmem:[%s12078_s12 + $0xf0] sm:$0xff] }
0x1518   :  { %v3075_v14 = vpop.trf.xlu2 }
0x1519   :  { %6441 = vmatmul.msk.f32.gmra.mxu3 %vm522_vm6, %v3075_v14  ;;  %6445 = vmatmul.msk.f32.gmra.mxu0 %vm522_vm6, %v3075_v14 }
0x151c   :  { %6463 = vmatmul.msk.f32.gmra.mxu1 %vm522_vm6, %v7273_v59  ;;  %v7298_v59 = vld [vmem:[%s12078_s12 + $0xe8] sm:$0xff] }
0x1521   :  { %6468 = vmatmul.msk.f32.vlgmr.msrb.gmra.mxu3 %vm522_vm6, %v7274_v20  ;;  %v7299_v20 = vld [vmem:[%s12078_s12 + $0x78] sm:$0xff] }
0x1524   :  { %6464 = vmatmul.msk.f32.gmra.mxu1 %vm522_vm6, %v7275_v44  ;;  %v7300_v44 = vld [vmem:[%s12078_s12 + $0xe0] sm:$0xff] }
0x1529   :  { %6469 = vmatmul.msk.f32.gmra.mxu3 %vm522_vm6, %v7276_v62  ;;  %v7301_v62 = vld [vmem:[%s12078_s12 + $0x70] sm:$0xff] }
0x152c   :  { %6465 = vmatmul.msk.f32.gmra.mxu1 %vm522_vm6, %v7277_v43  ;;  %v7303_v43 = vld [vmem:[%s12078_s12 + $0x68] sm:$0xff] }
0x1531   :  { %6470 = vmatmul.msk.f32.gmra.mxu3 %vm522_vm6, %v7278_v58  ;;  %v7304_v58 = vld [vmem:[%s12078_s12 + $0xd0] sm:$0xff] }
0x1534   :  { %6466 = vmatmul.msk.f32.gmra.mxu1 %vm522_vm6, %v7279_v19 }
0x1539   :  { %6471 = vmatmul.msk.f32.gmra.mxu3 %vm522_vm6, %v7280_v9  ;;  %v7305_v9 = vld [vmem:[%s12078_s12 + $0x60] sm:$0xff] }
0x153c   :  { %6467 = vmatmul.msk.f32.gmra.mxu1 %vm522_vm6, %v7281_v10  ;;  %v7306_v10 = vld [vmem:[%s12078_s12 + $0xc8] sm:$0xff] }
0x1541   :  { %6472 = vmatmul.msk.f32.gmra.mxu3 %vm522_vm6, %v7282_v27  ;;  %v7307_v27 = vld [vmem:[%s12078_s12 + $0x58] sm:$0xff] }
0x1549   :  { %6473 = vmatmul.msk.f32.gmra.mxu3 %vm522_vm6, %v7283_v22  ;;  %v7308_v22 = vld [vmem:[%s12078_s12 + $0xc0] sm:$0xff] }
0x1551   :  { %6474 = vmatmul.msk.f32.gmra.mxu3 %vm522_vm6, %v7284_v2  ;;  %v7309_v2 = vld [vmem:[%s12078_s12 + $0x50] sm:$0xff] }
0x1559   :  { %6475 = vmatmul.msk.f32.gmra.mxu3 %vm522_vm6, %v7285_v53  ;;  %v7311_v53 = vld [vmem:[%s12078_s12 + $0x48] sm:$0xff] }
0x1561   :  { %6476 = vmatmul.msk.f32.gmra.mxu3 %vm522_vm6, %v7286_v31  ;;  %v7312_v31 = vld [vmem:[%s12078_s12 + $0xb0] sm:$0xff] }
0x1569   :  { %6477 = vmatmul.msk.f32.gmra.mxu3 %vm522_vm6, %v7287_v55 }
0x157e   :  { %v3146_v3 = vpop.f32.mrf.mxu0 }
0x157f   :  { %v3159_v35 = vmul.f32 %v7291_v41, %v3146_v3  ;;  %v7313_v3 = vld [vmem:[%s12078_s12 + $0x40] sm:$0xff] }
0x1580   :  { %v7327_v41 = vld [vmem:[%s12078_s12] sm:$0xff] }
0x1584   :  { %v3117_v18 = vpop.f32.mrf.mxu3 }
0x1585   :  { %v3158_v56 = vmul.f32 %v7296_v15, %v3117_v18  ;;  %v7314_v18 = vld [vmem:[%s12078_s12 + $0xa8] sm:$0xff] }
0x1586   :  { %v3149_v4 = vpop.f32.mrf.mxu0 }
0x1587   :  { %v3161_v7 = vmul.f32 %v7290_v26, %v3149_v4  ;;  %v7315_v4 = vld [vmem:[%s12078_s12 + $0x38] sm:$0xff]  ;;  %v7324_v26 = vld [vmem:[%s12078_s12 + $0x80] sm:$0xff] }
0x158c   :  { %v3120_v39 = vpop.f32.mrf.mxu3 }
0x158d   :  { %v3160_v17 = vmul.f32 %v7294_v1, %v3120_v39  ;;  %v7316_v39 = vld [vmem:[%s12078_s12 + $0xa0] sm:$0xff]  ;;  %v7328_v1 = vld [vmem:[%s12079_s10 + $0xf0] sm:$0xff] }
0x158e   :  { %v3152_v54 = vpop.f32.mrf.mxu0 }
0x158f   :  { %v3163_v36 = vmul.f32 %v7289_v45, %v3152_v54  ;;  %v7317_v54 = vld [vmem:[%s12078_s12 + $0x30] sm:$0xff]  ;;  %v7322_v45 = vld [vmem:[%s12078_s12 + $0x88] sm:$0xff] }
0x1594   :  { %v3123_v37 = vpop.f32.mrf.mxu3 }
0x1595   :  { %v3162_v28 = vmul.f32 %v7293_v60, %v3123_v37  ;;  %v7319_v37 = vld [vmem:[%s12078_s12 + $0x28] sm:$0xff] }
0x1596   :  { %v3155_v0 = vpop.f32.mrf.mxu0 }
0x1597   :  { %v3165_v61 = vmul.f32 %v7288_v24, %v3155_v0  ;;  %v7320_v0 = vld [vmem:[%s12078_s12 + $0x90] sm:$0xff] }
0x1599   :  { %3372 = vmatpush.msrb.mxu0 %v3165_v61  ;;  %v7321_v61 = vld [vmem:[%s12078_s12 + $0x20] sm:$0xff] }
0x159b   :  { %3373 = vmatpush.msrb.mxu0 %v3163_v36  ;;  %v7323_v36 = vld [vmem:[%s12078_s12 + $0x18] sm:$0xff] }
0x159c   :  { %v3126_v6 = vpop.f32.mrf.mxu3 }
0x159d   :  { %v3164_v8 = vmul.f32 %v7292_v57, %v3126_v6  ;;  %3374 = vmatpush.msrb.mxu0 %v3161_v7  ;;  %v7325_v7 = vld [vmem:[%s12078_s12 + $0x10] sm:$0xff]  ;;  %v7326_v6 = vld [vmem:[%s12078_s12 + $0x8] sm:$0xff] }
0x159f   :  { %3343 = vmatpush.msra.mxu3 %v3164_v8  ;;  %3375 = vmatpush.msrb.mxu0 %v3159_v35 }
0x15a0   :  { %6482 = vmatmul.msk.f32.vlgmr.msrb.gmra.mxu0 %vm522_vm6, %v9790_v46 }
0x15a1   :  { %3344 = vmatpush.msra.mxu3 %v3162_v28  ;;  %3454 = vmatpush.msra.mxu0 %v7295_v13  ;;  %v7329_v13 = vld [vmem:[%s12079_s10 + $0xf8] sm:$0xff] }
0x15a3   :  { %3345 = vmatpush.msra.mxu3 %v3160_v17  ;;  %3455 = vmatpush.msra.mxu0 %v7297_v32  ;;  %v7331_v32 = vld [vmem:[%s12079_s10 + $0xe0] sm:$0xff] }
0x15a4   :  { %v9986_v14 = vpop.f32.mrf.mxu3 }
0x15a5   :  { %3346 = vmatpush.msra.mxu3 %v3158_v56  ;;  %3456 = vmatpush.msra.mxu0 %v7298_v59  ;;  %v7330_v56 = vld [vmem:[%s12079_s10 + $0xe8] sm:$0xff] }
0x15a6   :  { %6478 = vmatmul.msk.f32.vlgmr.msra.gmra.mxu3 %vm522_vm6, %v9790_v46  ;;  %v7302_v46 = vld [vmem:[%s12078_s12 + $0xd8] sm:$0xff] }
0x15a7   :  { %3425 = vmatpush.msrb.mxu3 %v7299_v20  ;;  %3457 = vmatpush.msra.mxu0 %v7300_v44  ;;  %v7332_v20 = vld [vmem:[%s12079_s10 + $0xd8] sm:$0xff] }
0x15a8   :  { %6483 = vmatmul.msk.f32.gmra.mxu0 %vm522_vm6, %v9794_v42 }
0x15a9   :  { %3426 = vmatpush.msrb.mxu3 %v7301_v62  ;;  %3458 = vmatpush.msra.mxu0 %v7302_v46  ;;  %v7333_v62 = vld [vmem:[%s12079_s10 + $0xd0] sm:$0xff] }
0x15ab   :  { %3427 = vmatpush.msrb.mxu3 %v7303_v43  ;;  %3459 = vmatpush.msra.mxu0 %v7304_v58  ;;  %v7334_v43 = vld [vmem:[%s12079_s10 + $0xc8] sm:$0xff] }
0x15ac   :  { %v10013_v19 = vpop.f32.mrf.mxu3 }
0x15ad   :  { %3428 = vmatpush.msrb.mxu3 %v7305_v9  ;;  %3460 = vmatpush.msra.mxu0 %v7306_v10  ;;  %v7335_v9 = vld [vmem:[%s12079_s10 + $0xc0] sm:$0xff] }
0x15ae   :  { %6479 = vmatmul.msk.f32.gmra.mxu3 %vm522_vm6, %v9794_v42  ;;  %v7310_v42 = vld [vmem:[%s12078_s12 + $0xb8] sm:$0xff] }
0x15af   :  { %3429 = vmatpush.msrb.mxu3 %v7307_v27  ;;  %3461 = vmatpush.msra.mxu0 %v7308_v22  ;;  %v7336_v27 = vld [vmem:[%s12079_s10 + $0xb8] sm:$0xff] }
0x15b0   :  { %6484 = vmatmul.msk.f32.gmra.mxu0 %vm522_vm6, %v9798_v21  ;;  %v3314_v22 = vmul.f32 %v7336_v27, %v10013_v19 }
0x15b1   :  { %3430 = vmatpush.msrb.mxu3 %v7309_v2  ;;  %3462 = vmatpush.msra.mxu0 %v7310_v42  ;;  %v7337_v2 = vld [vmem:[%s12079_s10 + $0xb0] sm:$0xff] }
0x15b2   :  { %v3313_v42 = vmul.f32 %v7337_v2, %v9986_v14 }
0x15b3   :  { %3431 = vmatpush.msrb.mxu3 %v7311_v53  ;;  %3463 = vmatpush.msra.mxu0 %v7312_v31 }
0x15b4   :  { %v10043_v55 = vpop.f32.mrf.mxu3 }
0x15b5   :  { %3432 = vmatpush.msrb.mxu3 %v7313_v3  ;;  %3464 = vmatpush.msra.mxu0 %v7314_v18  ;;  %v3315_v10 = vmul.f32 %v7335_v9, %v10043_v55 }
0x15b6   :  { %6480 = vmatmul.msk.f32.gmra.mxu3 %vm522_vm6, %v9798_v21  ;;  %v7318_v21 = vld [vmem:[%s12078_s12 + $0x98] sm:$0xff] }
0x15b7   :  { %3433 = vmatpush.msrb.mxu3 %v7315_v4  ;;  %3465 = vmatpush.msra.mxu0 %v7316_v39 }
0x15b8   :  { %6485 = vmatmul.msk.f32.gmra.mxu0 %vm522_vm6, %v9802_v50 }
0x15b9   :  { %3434 = vmatpush.msrb.mxu3 %v7317_v54  ;;  %3466 = vmatpush.msra.mxu0 %v7318_v21 }
0x15bb   :  { %3435 = vmatpush.msrb.mxu3 %v7319_v37  ;;  %3467 = vmatpush.msra.mxu0 %v7320_v0 }
0x15bc   :  { %v3270_v24 = vpop.f32.mrf.mxu3 }
0x15bd   :  { %3436 = vmatpush.msrb.mxu3 %v7321_v61  ;;  %3468 = vmatpush.msra.mxu0 %v7322_v45  ;;  %v3316_v58 = vmul.f32 %v7334_v43, %v3270_v24 }
0x15be   :  { %6481 = vmatmul.msk.f32.gmra.mxu3 %vm522_vm6, %v9802_v50 }
0x15bf   :  { %3437 = vmatpush.msrb.mxu3 %v7323_v36  ;;  %3469 = vmatpush.msra.mxu0 %v7324_v26 }
0x15c1   :  { %3438 = vmatpush.msrb.mxu3 %v7325_v7 }
0x15c3   :  { %3439 = vmatpush.msrb.mxu3 %v7326_v6 }
0x15c4   :  { %v3273_v50 = vpop.f32.mrf.mxu3 }
0x15c5   :  { %3440 = vmatpush.msrb.mxu3 %v7327_v41  ;;  %v3317_v46 = vmul.f32 %v7333_v62, %v3273_v50  ;;  %v10138_v50 = vpop.f32.mrf.mxu1 }
0x15c7   :  { %3539 = vmatpush.msra.mxu3 %v9819_v12 }
0x15cc   :  { %v3276_v35 = vpop.f32.mrf.mxu3 }
0x15cd   :  { %v3318_v44 = vmul.f32 %v7332_v20, %v3276_v35  ;;  %v10140_v41 = vpop.f32.mrf.mxu1 }
0x15d4   :  { %v3279_v57 = vpop.f32.mrf.mxu3 }
0x15d5   :  { %v3319_v59 = vmul.f32 %v7331_v32, %v3279_v57  ;;  %v10142_v35 = vpop.f32.mrf.mxu1 }
0x15dc   :  { %v3282_v8 = vpop.f32.mrf.mxu3 }
0x15dd   :  { %v3320_v12 = vmul.f32 %v7330_v56, %v3282_v8  ;;  %v10144_v57 = vpop.f32.mrf.mxu1 }
0x15e4   :  { %v3285_v60 = vpop.f32.mrf.mxu3 }
0x15e5   :  { %v3321_v17 = vmul.f32 %v7328_v1, %v3285_v60  ;;  %v10146_v8 = vpop.f32.mrf.mxu1 }
0x15ec   :  { %v3288_v28 = vpop.f32.mrf.mxu3 }
0x15ed   :  { %v3322_v15 = vmul.f32 %v7329_v13, %v3288_v28  ;;  %v10148_v60 = vpop.f32.mrf.mxu1 }
0x15ef   :  { %3598 = vmatpush.msrb.mxu2 %v3322_v15 }
0x15f1   :  { %3599 = vmatpush.msrb.mxu2 %v3321_v17 }
0x15f3   :  { %3600 = vmatpush.msrb.mxu2 %v3320_v12 }
0x15f5   :  { %3601 = vmatpush.msrb.mxu2 %v3319_v59  ;;  %v10150_v28 = vpop.f32.mrf.mxu1 }
0x15f7   :  { %3602 = vmatpush.msrb.mxu2 %v3318_v44 }
0x15f9   :  { %3603 = vmatpush.msrb.mxu2 %v3317_v46 }
0x15fb   :  { %3604 = vmatpush.msrb.mxu2 %v3316_v58 }
0x15fd   :  { %3605 = vmatpush.msrb.mxu2 %v3315_v10  ;;  %v10152_v1 = vpop.f32.mrf.mxu1 }
0x15ff   :  { %3606 = vmatpush.msrb.mxu2 %v3314_v22 }
0x1601   :  { %3607 = vmatpush.msrb.mxu2 %v3313_v42 }
0x1605   :  { %v10154_v17 = vpop.f32.mrf.mxu1 }
0x160d   :  { %v10156_v13 = vpop.f32.mrf.mxu1 }
0x1615   :  { %v3225_v20 = vpop.f32.mrf.mxu1 }
0x161d   :  { %v3377_v53 = vpop.f32.mrf.mxu0  ;;  %v3228_v27 = vpop.f32.mrf.mxu1 }
0x161e   :  { %v3378_v55 = vadd.f32 %v3377_v53, %v8338_v33 }
0x1625   :  { %v3380_v18 = vpop.f32.mrf.mxu0 }
0x1626   :  { %v3381_v19 = vadd.f32 %v3380_v18, %v8370_v51  ;;  %v3231_v18 = vpop.f32.mrf.mxu1 }
0x1629   :  { %v3348_v31 = vpop.f32.mrf.mxu3 }
0x162a   :  { %v3349_v3 = vadd.f32 %v3348_v31, %v8341_v34 }
0x162c   :  { %v3389_v4 = vmax.f32 %v3349_v3, %v3378_v55 }
0x162d   :  { %v3383_v37 = vpop.f32.mrf.mxu0 }
0x162e   :  { %3390 = vmax.xlane.f32.xlu0 %v3389_v4  ;;  %v3384_v0 = vadd.f32 %v3383_v37, %v8408_v63 }
0x1631   :  { %v3351_v39 = vpop.f32.mrf.mxu3 }
0x1632   :  { %v3352_v54 = vadd.f32 %v3351_v39, %v8373_v52 }
0x1634   :  { %v3392_v21 = vmax.f32 %v3352_v54, %v3381_v19 }
0x1635   :  { %v3386_v45 = vpop.f32.mrf.mxu0 }
0x1636   :  { %3393 = vmax.xlane.f32.xlu1 %v3392_v21  ;;  %v3387_v26 = vadd.f32 %v3386_v45, %v8446_v47 }
0x1639   :  { %v3354_v14 = vpop.f32.mrf.mxu3 }
0x163a   :  { %v3355_v24 = vadd.f32 %v3354_v14, %v8411_v5 }
0x163c   :  { %v3395_v61 = vmax.f32 %v3355_v24, %v3384_v0 }
0x163e   :  { %3396 = vmax.xlane.f32.xlu1 %v3395_v61 }
0x1641   :  { %v3357_v36 = vpop.f32.mrf.mxu3 }
0x1642   :  { %v3358_v7 = vadd.f32 %v3357_v36, %v8449_v49 }
0x1644   :  { %v3398_v6 = vmax.f32 %v3358_v7, %v3387_v26 }
0x1646   :  { %3399 = vmax.xlane.f32.xlu1 %v3398_v6  ;;  %v7339_v6 = vld [vmem:[%s12079_s10 + $0x78] sm:$0xff] }
0x16a1   :  { %v3391_v15 = vpop.xlane.xlu0 %3390 }
0x16a2   :  { %v3401_v56 = vsub.f32 %v3349_v3, %v3391_v15  ;;  %v3402_v12 = vsub.f32 %v3378_v55, %v3391_v15 }
0x16a4   :  { %v3409_v32 = vmul.f32 1.442695, %v3401_v56  ;;  %v3411_v59 = vmul.f32 1.442695, %v3402_v12  ;;  %v7340_v56 = vld [vmem:[%s12079_s10 + $0x68] sm:$0xff] }
0x16a6   :  { %6973 = vpow2.f32 %v3409_v32  ;;  %v7341_v32 = vld [vmem:[%s12079_s10 + $0x60] sm:$0xff] }
0x16a7   :  { %6975 = vpow2.f32 %v3411_v59  ;;  %v3303_v59 = vmul.f32 %v7341_v32, %v3231_v18  ;;  %v7349_v18 = vld [vmem:[%s12079_s10 + $0x20] sm:$0xff] }
0x16a9   :  { %v3394_v44 = vpop.xlane.xlu1 %3393 }
0x16aa   :  { %v3403_v62 = vsub.f32 %v3352_v54, %v3394_v44  ;;  %v3404_v46 = vsub.f32 %v3381_v19, %v3394_v44  ;;  %v7342_v44 = vld [vmem:[%s12079_s10 + $0x58] sm:$0xff] }
0x16ac   :  { %v10158_v43 = vpop.eup %6973  ;;  %v3413_v58 = vmul.f32 1.442695, %v3403_v62  ;;  %v3415_v9 = vmul.f32 1.442695, %v3404_v46  ;;  %v3302_v62 = vmul.f32 %v7342_v44, %v3228_v27  ;;  %v7343_v46 = vld [vmem:[%s12079_s10 + $0x50] sm:$0xff] }
0x16ad   :  { %v10160_v10 = vpop.eup %6975  ;;  %3441 = vmatmul.f32.vlgmr.msrb.gmra.mxu3 %v10158_v43 }
0x16ae   :  { %6977 = vpow2.f32 %v3413_v58  ;;  %3470 = vmatmul.f32.vlgmr.msra.gmra.mxu0 %v10160_v10  ;;  %v3301_v58 = vmul.f32 %v7343_v46, %v3225_v20 }
0x16af   :  { %6979 = vpow2.f32 %v3415_v9  ;;  %v7344_v9 = vld [vmem:[%s12079_s10 + $0x48] sm:$0xff] }
0x16b1   :  { %v3397_v22 = vpop.xlane.xlu1 %3396 }
0x16b2   :  { %v3405_v2 = vsub.f32 %v3355_v24, %v3397_v22  ;;  %v3406_v42 = vsub.f32 %v3384_v0, %v3397_v22  ;;  %v3234_v0 = vpop.f32.mrf.mxu1  ;;  %v3300_v22 = vmul.f32 %v7344_v9, %v10156_v13 }
0x16b3   :  { %v3304_v12 = vmul.f32 %v7340_v56, %v3234_v0 }
0x16b4   :  { %v10164_v53 = vpop.eup %6977  ;;  %v3417_v31 = vmul.f32 1.442695, %v3405_v2  ;;  %v3419_v55 = vmul.f32 1.442695, %v3406_v42  ;;  %v7345_v2 = vld [vmem:[%s12079_s10 + $0x40] sm:$0xff]  ;;  %v7346_v42 = vld [vmem:[%s12079_s10 + $0x38] sm:$0xff] }
0x16b5   :  { %v10166_v3 = vpop.eup %6979  ;;  %3444 = vmatmul.f32.gmra.mxu3 %v10164_v53  ;;  %v3299_v27 = vmul.f32 %v7345_v2, %v10154_v17  ;;  %v3298_v20 = vmul.f32 %v7346_v42, %v10152_v1  ;;  %v3295_v1 = vmul.f32 %v7349_v18, %v10146_v8 }
0x16b6   :  { %6981 = vpow2.f32 %v3417_v31  ;;  %3473 = vmatmul.f32.gmra.mxu0 %v10166_v3  ;;  %v7347_v31 = vld [vmem:[%s12079_s10 + $0x30] sm:$0xff] }
0x16b7   :  { %6983 = vpow2.f32 %v3419_v55  ;;  %v3297_v13 = vmul.f32 %v7347_v31, %v10150_v28  ;;  %v7348_v55 = vld [vmem:[%s12079_s10 + $0x28] sm:$0xff] }
0x16b8   :  { %v3296_v17 = vmul.f32 %v7348_v55, %v10148_v60 }
0x16b9   :  { %v3400_v4 = vpop.xlane.xlu1 %3399 }
0x16ba   :  { %v3407_v39 = vsub.f32 %v3358_v7, %v3400_v4  ;;  %v3408_v19 = vsub.f32 %v3387_v26, %v3400_v4  ;;  %v3237_v45 = vpop.f32.mrf.mxu1  ;;  %v7338_v26 = vld [vmem:[%s12079_s10 + $0x70] sm:$0xff]  ;;  %v7350_v4 = vld [vmem:[%s12079_s10 + $0x18] sm:$0xff] }
0x16bb   :  { %v3305_v7 = vmul.f32 %v7338_v26, %v3237_v45  ;;  %v3294_v28 = vmul.f32 %v7350_v4, %v10144_v57 }
0x16bc   :  { %v10170_v54 = vpop.eup %6981  ;;  %v3421_v21 = vmul.f32 1.442695, %v3407_v39  ;;  %v3423_v37 = vmul.f32 1.442695, %v3408_v19  ;;  %v7351_v39 = vld [vmem:[%s12079_s10 + $0x10] sm:$0xff]  ;;  %v7352_v19 = vld [vmem:[%s12079_s10 + $0x8] sm:$0xff] }
0x16bd   :  { %v10172_v14 = vpop.eup %6983  ;;  %3447 = vmatmul.f32.gmra.mxu3 %v10170_v54  ;;  %v3293_v60 = vmul.f32 %v7351_v39, %v10142_v35  ;;  %v3292_v8 = vmul.f32 %v7352_v19, %v10140_v41 }
0x16be   :  { %6985 = vpow2.f32 %v3421_v21  ;;  %3476 = vmatmul.f32.gmra.mxu0 %v10172_v14  ;;  %v7353_v21 = vld [vmem:[%s12079_s10] sm:$0xff] }
0x16bf   :  { %6987 = vpow2.f32 %v3423_v37  ;;  %v3291_v57 = vmul.f32 %v7353_v21, %v10138_v50 }
0x16c2   :  { %v3240_v36 = vpop.f32.mrf.mxu1 }
0x16c3   :  { %v3306_v15 = vmul.f32 %v7339_v6, %v3240_v36 }
0x16c4   :  { %v10176_v24 = vpop.eup %6985 }
0x16c5   :  { %v10178_v61 = vpop.eup %6987  ;;  %3450 = vmatmul.f32.gmra.mxu3 %v10176_v24  ;;  %3569 = vmatpush.msrb.mxu0 %v3306_v15 }
0x16c6   :  { %3479 = vmatmul.f32.gmra.mxu0 %v10178_v61 }
0x16c7   :  { %3570 = vmatpush.msrb.mxu0 %v3305_v7 }
0x16c9   :  { %3571 = vmatpush.msrb.mxu0 %v3304_v12 }
0x16ca   :  { %v3243_v0 = vpop.f32.mrf.mxu1 }
0x16cb   :  { %3572 = vmatpush.msrb.mxu0 %v3303_v59 }
0x16cd   :  { %3573 = vmatpush.msrb.mxu0 %v3302_v62 }
0x16cf   :  { %3574 = vmatpush.msrb.mxu0 %v3301_v58  ;;  %v7354_v58 = vld [vmem:[%s12079_s10 + $0xa0] sm:$0xff] }
0x16d1   :  { %3575 = vmatpush.msrb.mxu0 %v3300_v22  ;;  %v7355_v22 = vld [vmem:[%s12079_s10 + $0xa8] sm:$0xff] }
0x16d2   :  { %v3246_v36 = vpop.f32.mrf.mxu1 }
0x16d3   :  { %3576 = vmatpush.msrb.mxu0 %v3299_v27  ;;  %v7356_v27 = vld [vmem:[%s12079_s10 + $0x98] sm:$0xff] }
0x16d5   :  { %3577 = vmatpush.msrb.mxu0 %v3298_v20  ;;  %v7357_v20 = vld [vmem:[%s12079_s10 + $0x90] sm:$0xff] }
0x16d7   :  { %3578 = vmatpush.msrb.mxu0 %v3297_v13  ;;  %v7358_v13 = vld [vmem:[%s12079_s10 + $0x88] sm:$0xff] }
0x16d8   :  { %v3308_v55 = vmul.f32 %v7358_v13, %v3246_v36 }
0x16d9   :  { %3579 = vmatpush.msrb.mxu0 %v3296_v17  ;;  %v7359_v17 = vld [vmem:[%s12079_s10 + $0x80] sm:$0xff] }
0x16da   :  { %v3249_v50 = vpop.f32.mrf.mxu1  ;;  %v3307_v18 = vmul.f32 %v7359_v17, %v3243_v0 }
0x16db   :  { %3580 = vmatpush.msrb.mxu0 %v3295_v1  ;;  %v3309_v31 = vmul.f32 %v7357_v20, %v3249_v50 }
0x16dd   :  { %3581 = vmatpush.msrb.mxu0 %v3294_v28 }
0x16df   :  { %3582 = vmatpush.msrb.mxu0 %v3293_v60 }
0x16e1   :  { %3583 = vmatpush.msrb.mxu0 %v3292_v8 }
0x16e2   :  { %v3252_v12 = vpop.f32.mrf.mxu1 }
0x16e3   :  { %3584 = vmatpush.msrb.mxu0 %v3291_v57  ;;  %v3310_v42 = vmul.f32 %v7356_v27, %v3252_v12 }
0x16ea   :  { %v3255_v62 = vpop.f32.mrf.mxu1 }
0x16eb   :  { %v3311_v9 = vmul.f32 %v7354_v58, %v3255_v62 }
0x16f2   :  { %v3258_v46 = vpop.f32.mrf.mxu1 }
0x16f3   :  { %v3312_v2 = vmul.f32 %v7355_v22, %v3258_v46 }
0x16f5   :  { %3608 = vmatpush.msrb.mxu2 %v3312_v2 }
0x16f7   :  { %3609 = vmatpush.msrb.mxu2 %v3311_v9 }
0x16f9   :  { %3610 = vmatpush.msrb.mxu2 %v3310_v42  ;;  %v6830_v42 = vld [vmem:[%s12081_s19 + $0x2] ss:$0 sm:$0xff] }
0x16fb   :  { %3611 = vmatpush.msrb.mxu2 %v3309_v31 }
0x16fd   :  { %3612 = vmatpush.msrb.mxu2 %v3308_v55 }
0x16ff   :  { %3613 = vmatpush.msrb.mxu2 %v3307_v18 }
0x172b   :  { %v3471_v37 = vpop.f32.mrf.mxu0 }
0x1730   :  { %v3442_v35 = vpop.f32.mrf.mxu3 }
0x1731   :  { %v3472_v45 = vadd.f32 %v3471_v37, %v3442_v35 }
0x1733   :  { %6486 = vmatmul.msk.f32.vlgmr.msra.gmra.mxu2 %vm178_vm8, %v3472_v45  ;;  %6490 = vmatmul.msk.f32.vlgmr.msra.gmra.mxu3 %vm178_vm8, %v3472_v45  ;;  %v3474_v41 = vpop.f32.mrf.mxu0 }
0x1738   :  { %v3445_v26 = vpop.f32.mrf.mxu3 }
0x1739   :  { %v3475_v7 = vadd.f32 %v3474_v41, %v3445_v26 }
0x173b   :  { %6487 = vmatmul.msk.f32.gmra.mxu2 %vm178_vm8, %v3475_v7  ;;  %6491 = vmatmul.msk.f32.gmra.mxu3 %vm178_vm8, %v3475_v7  ;;  %v3477_v6 = vpop.f32.mrf.mxu0 }
0x1740   :  { %v3448_v15 = vpop.f32.mrf.mxu3 }
0x1741   :  { %v3478_v56 = vadd.f32 %v3477_v6, %v3448_v15 }
0x1743   :  { %6488 = vmatmul.msk.f32.gmra.mxu2 %vm178_vm8, %v3478_v56  ;;  %6492 = vmatmul.msk.f32.gmra.mxu3 %vm178_vm8, %v3478_v56  ;;  %v3480_v32 = vpop.f32.mrf.mxu0  ;;  %v6497_v56 = vld [vmem:[%s12082_s18 + $0x58] sm:$0xff] }
0x1744   :  { %3661 = vmatpush.msrb.mxu3 %v6497_v56 }
0x1748   :  { %v3451_v59 = vpop.f32.mrf.mxu3 }
0x1749   :  { %v3481_v44 = vadd.f32 %v3480_v32, %v3451_v59 }
0x174b   :  { %6489 = vmatmul.msk.f32.gmra.mxu2 %vm178_vm8, %v3481_v44  ;;  %6493 = vmatmul.msk.f32.gmra.mxu3 %vm178_vm8, %v3481_v44 }
0x17b6   :  { %v3512_v1 = vpop.f32.mrf.mxu2  ;;  %v3541_v4 = vpop.f32.mrf.mxu3 }
0x17b7   :  { %6989 = vrcp.f32 %v3512_v1 }
0x17b8   :  { %6991 = vrcp.f32 %v3541_v4 }
0x17bd   :  { %v6990_v28 = vpop.eup %6989 }
0x17be   :  { %v6992_v39 = vpop.eup %6991  ;;  %v3561_v60 = vmul.f32 %v6990_v28, %v10158_v43  ;;  %v3515_v19 = vpop.f32.mrf.mxu2 }
0x17bf   :  { %v3544_v8 = vpop.f32.mrf.mxu3  ;;  %v3562_v21 = vmul.f32 %v6992_v39, %v10160_v10  ;;  %6993 = vrcp.f32 %v3515_v19 }
0x17c0   :  { %6995 = vrcp.f32 %v3544_v8  ;;  %3585 = vmatmul.f32.vlgmr.msrb.gmra.mxu0 %v3561_v60 }
0x17c1   :  { %3614 = vmatmul.f32.vlgmr.msrb.gmra.mxu2 %v3562_v21 }
0x17c5   :  { %v6994_v57 = vpop.eup %6993 }
0x17c6   :  { %v6996_v37 = vpop.eup %6995  ;;  %v3518_v0 = vpop.f32.mrf.mxu2  ;;  %v3563_v45 = vmul.f32 %v6994_v57, %v10164_v53 }
0x17c7   :  { %v3547_v35 = vpop.f32.mrf.mxu3  ;;  %6997 = vrcp.f32 %v3518_v0  ;;  %v3564_v36 = vmul.f32 %v6996_v37, %v10166_v3 }
0x17c8   :  { %6999 = vrcp.f32 %v3547_v35  ;;  %3588 = vmatmul.f32.gmra.mxu0 %v3563_v45 }
0x17c9   :  { %3617 = vmatmul.f32.gmra.mxu2 %v3564_v36 }
0x17cd   :  { %v6998_v43 = vpop.eup %6997 }
0x17ce   :  { %v7000_v41 = vpop.eup %6999  ;;  %v3521_v26 = vpop.f32.mrf.mxu2  ;;  %v3565_v7 = vmul.f32 %v6998_v43, %v10170_v54  ;;  %v6496_v54 = vld [vmem:[%s12082_s18 + $0x50] sm:$0xff] }
0x17cf   :  { %v3550_v10 = vpop.f32.mrf.mxu3  ;;  %7001 = vrcp.f32 %v3521_v26  ;;  %v3566_v50 = vmul.f32 %v7000_v41, %v10172_v14  ;;  %3662 = vmatpush.msrb.mxu3 %v6496_v54  ;;  %v6495_v14 = vld [vmem:[%s12082_s18 + $0x48] sm:$0xff] }
0x17d0   :  { %7003 = vrcp.f32 %v3550_v10  ;;  %3591 = vmatmul.f32.gmra.mxu0 %v3565_v7 }
0x17d1   :  { %3620 = vmatmul.f32.gmra.mxu2 %v3566_v50  ;;  %3663 = vmatpush.msrb.mxu3 %v6495_v14 }
0x17d5   :  { %v7002_v6 = vpop.eup %7001 }
0x17d6   :  { %v7004_v53 = vpop.eup %7003  ;;  %v3567_v15 = vmul.f32 %v7002_v6, %v10176_v24  ;;  %v6494_v24 = vld [vmem:[%s12082_s18 + $0x40] sm:$0xff] }
0x17d7   :  { %v3568_v3 = vmul.f32 %v7004_v53, %v10178_v61  ;;  %3664 = vmatpush.msrb.mxu3 %v6494_v24 }
0x17d8   :  { %3594 = vmatmul.f32.gmra.mxu0 %v3567_v15 }
0x17d9   :  { %3623 = vmatmul.f32.gmra.mxu2 %v3568_v3 }
0x183d   :  { %v3586_v61 = vpop.f32.mrf.mxu0 }
0x1844   :  { %v3615_v12 = vpop.f32.mrf.mxu2 }
0x1845   :  { %v3616_v32 = vadd.f32 %v3615_v12, %v3586_v61  ;;  %v3589_v59 = vpop.f32.mrf.mxu0 }
0x1847   :  { %6499 = vmatmul.msk.f32.vlgmr.msrb.gmra.mxu3 %vm522_vm6, %v3616_v32  ;;  %v6508_v32 = vld [vmem:[%s12086_s22 + $0x58] sm:$0xff] }
0x1848   :  { %3826 = vmatpush.msra.mxu0 %v6508_v32 }
0x184c   :  { %v3618_v44 = vpop.f32.mrf.mxu2 }
0x184d   :  { %v3619_v62 = vadd.f32 %v3618_v44, %v3589_v59  ;;  %v3592_v46 = vpop.f32.mrf.mxu0  ;;  %v6507_v59 = vld [vmem:[%s12086_s22 + $0x50] sm:$0xff]  ;;  %v6506_v44 = vld [vmem:[%s12086_s22 + $0x48] sm:$0xff] }
0x184e   :  { %3827 = vmatpush.msra.mxu0 %v6507_v59 }
0x184f   :  { %6500 = vmatmul.msk.f32.gmra.mxu3 %vm522_vm6, %v3619_v62  ;;  %v6505_v62 = vld [vmem:[%s12086_s22 + $0x40] sm:$0xff] }
0x1850   :  { %3828 = vmatpush.msra.mxu0 %v6506_v44 }
0x1852   :  { %3829 = vmatpush.msra.mxu0 %v6505_v62 }
0x1854   :  { %v3621_v58 = vpop.f32.mrf.mxu2 }
0x1855   :  { %v3622_v9 = vadd.f32 %v3621_v58, %v3592_v46  ;;  %v3595_v22 = vpop.f32.mrf.mxu0  ;;  %v7360_v46 = vld [vmem:[%s12118_s29 + $0x30] sm:$0xff]  ;;  %v7361_v58 = vld [vmem:[%s12118_s29 + $0x20] sm:$0xff] }
0x1856   :  { %4163 = vmatpush.msrb.mxu0 %v7360_v46 }
0x1857   :  { %6501 = vmatmul.msk.f32.gmra.mxu3 %vm522_vm6, %v3622_v9 }
0x1858   :  { %4164 = vmatpush.msrb.mxu0 %v7361_v58 }
0x185c   :  { %v3624_v2 = vpop.f32.mrf.mxu2 }
0x185d   :  { %v3625_v27 = vadd.f32 %v3624_v2, %v3595_v22  ;;  %v7362_v2 = vld [vmem:[%s12118_s29 + $0x10] sm:$0xff] }
0x185e   :  { %4165 = vmatpush.msrb.mxu0 %v7362_v2 }
0x185f   :  { %6502 = vmatmul.msk.f32.gmra.mxu3 %vm522_vm6, %v3625_v27 }
0x18ca   :  { %v3666_v20 = vpop.f32.mrf.mxu3 }
0x18cb   :  { %v3667_v31 = vadd.f32 %v6830_v42, %v3666_v20 }
0x18cd   :  { %v3678_v13 = vadd.f32 %v3667_v31, %v9715_v30 }
0x18cf   :  { %v10295_v55 = vadd.f32 %v3678_v13, %v8757_v48 }
0x18d1   :  { %v3690_v17 = vsel %vm522_vm6, %v10295_v55, 0.0 }
0x18d2   :  { %v3669_v18 = vpop.f32.mrf.mxu3  ;;  %3691 = vadd.xlane.f32.xlu1 %v3690_v17 }
0x18d3   :  { %v3670_v1 = vadd.f32 %v6830_v42, %v3669_v18 }
0x18d5   :  { %v3679_v4 = vadd.f32 %v3670_v1, %v9720_v11 }
0x18d7   :  { %v10301_v28 = vadd.f32 %v3679_v4, %v8768_v25 }
0x18d9   :  { %v3693_v39 = vsel %vm522_vm6, %v10301_v28, 0.0 }
0x18da   :  { %v3672_v60 = vpop.f32.mrf.mxu3  ;;  %3694 = vadd.xlane.f32.xlu1 %v3693_v39 }
0x18db   :  { %v3673_v30 = vadd.f32 %v6830_v42, %v3672_v60 }
0x18dd   :  { %v3680_v19 = vadd.f32 %v3673_v30, %v9725_v29 }
0x18df   :  { %v10307_v8 = vadd.f32 %v3680_v19, %v8779_v23 }
0x18e1   :  { %v3696_v21 = vsel %vm522_vm6, %v10307_v8, 0.0 }
0x18e2   :  { %3697 = vadd.xlane.f32.xlu2 %v3696_v21  ;;  %v3675_v57 = vpop.f32.mrf.mxu3 }
0x18e3   :  { %v3676_v11 = vadd.f32 %v6830_v42, %v3675_v57  ;;  %v7363_v42 = vld [vmem:[%s12118_s29] sm:$0xff] }
0x18e4   :  { %4166 = vmatpush.msrb.mxu0 %v7363_v42  ;;  %v6831_v57 = vld [vmem:[%s12083_s20 + $0x2] ss:$0 sm:$0xff] }
0x18e5   :  { %v3681_v37 = vadd.f32 %v3676_v11, %v9730_v40 }
0x18e7   :  { %v10313_v0 = vadd.f32 %v3681_v37, %v8790_v16 }
0x18e9   :  { %v3699_v35 = vsel %vm522_vm6, %v10313_v0, 0.0 }
0x18ea   :  { %3700 = vadd.xlane.f32.xlu1 %v3699_v35  ;;  %v6529_v35 = vld [vmem:[%s12087_s24 + $0x178] sm:$0xff] }
0x18eb   :  { %3901 = vmatpush.msra.mxu2 %v6529_v35  ;;  %v6518_v35 = vld [vmem:[%s12087_s24 + $0x120] sm:$0xff] }
0x1945   :  { %v3692_v45 = vpop.xlane.xlu1 %3691 }
0x1946   :  { %v3702_v29 = vmul.f32 %v3692_v45, %v7802_v38  ;;  %v6528_v45 = vld [vmem:[%s12087_s24 + $0x170] sm:$0xff] }
0x1947   :  { %3902 = vmatpush.msra.mxu2 %v6528_v45  ;;  %v6517_v45 = vld [vmem:[%s12087_s24 + $0x118] sm:$0xff] }
0x1948   :  { %v10319_v36 = vsub.f32 %v10295_v55, %v3702_v29 }
0x194a   :  { %v3710_v43 = vmul.f32 %v10319_v36, %v10319_v36 }
0x194c   :  { %v3714_v41 = vsel %vm522_vm6, %v3710_v43, 0.0 }
0x194d   :  { %3715 = vadd.xlane.f32.xlu0 %v3714_v41  ;;  %v3695_v40 = vpop.xlane.xlu1 %3694  ;;  %v6832_v41 = vld [vmem:[%s12084_s21 + $0x2] ss:$0 sm:$0xff] }
0x194e   :  { %v3703_v26 = vmul.f32 %v3695_v40, %v7802_v38 }
0x1950   :  { %v10326_v10 = vsub.f32 %v10301_v28, %v3703_v26  ;;  %v6527_v26 = vld [vmem:[%s12087_s24 + $0x168] sm:$0xff] }
0x1951   :  { %3903 = vmatpush.msra.mxu2 %v6527_v26  ;;  %v7365_v26 = vld [vmem:[%s12118_s29 + $0x28] sm:$0xff] }
0x1952   :  { %v3711_v7 = vmul.f32 %v10326_v10, %v10326_v10 }
0x1954   :  { %v3717_v50 = vsel %vm522_vm6, %v3711_v7, 0.0 }
0x1955   :  { %v3698_v6 = vpop.xlane.xlu2 %3697  ;;  %3718 = vadd.xlane.f32.xlu1 %v3717_v50 }
0x1956   :  { %v3704_v53 = vmul.f32 %v3698_v6, %v7802_v38 }
0x1958   :  { %v10333_v15 = vsub.f32 %v10307_v8, %v3704_v53 }
0x195a   :  { %v3712_v3 = vmul.f32 %v10333_v15, %v10333_v15 }
0x195c   :  { %v3720_v56 = vsel %vm522_vm6, %v3712_v3, 0.0  ;;  %v6526_v3 = vld [vmem:[%s12087_s24 + $0x160] sm:$0xff] }
0x195d   :  { %3721 = vadd.xlane.f32.xlu0 %v3720_v56  ;;  %v3701_v54 = vpop.xlane.xlu1 %3700  ;;  %3904 = vmatpush.msra.mxu2 %v6526_v3 }
0x195e   :  { %v3705_v14 = vmul.f32 %v3701_v54, %v7802_v38 }
0x1960   :  { %v10340_v24 = vsub.f32 %v10313_v0, %v3705_v14 }
0x1962   :  { %v3713_v61 = vmul.f32 %v10340_v24, %v10340_v24 }
0x1964   :  { %v3723_v12 = vsel %vm522_vm6, %v3713_v61, 0.0 }
0x1965   :  { %3724 = vadd.xlane.f32.xlu1 %v3723_v12 }
0x19c0   :  { %v3716_v9 = vpop.xlane.xlu0 %3715 }
0x19c1   :  { %v3726_v22 = vmul.f32 %v3716_v9, %v7802_v38 }
0x19c3   :  { %v3730_v27 = vadd.f32 1e-06, %v3726_v22 }
0x19c5   :  { %7005 = vrsqrt.f32 %v3730_v27  ;;  %vm3740_vm14 = vweird.f32 %v3730_v27 }
0x19c8   :  { %v3719_v20 = vpop.xlane.xlu1 %3718 }
0x19c9   :  { %v3727_v31 = vmul.f32 %v3719_v20, %v7802_v38 }
0x19cb   :  { %v7006_v13 = vpop.eup %7005  ;;  %v3731_v17 = vadd.f32 1e-06, %v3727_v31 }
0x19cc   :  { %v3735_v18 = vmul.f32 %v7006_v13, %v3730_v27  ;;  %vm3741_vm13 = vweird.f32 %v7006_v13 }
0x19cd   :  { %7007 = vrsqrt.f32 %v3731_v17  ;;  %vm3742_vm1 = vmor %vm3740_vm14, %vm3741_vm13  ;;  %vm3750_vm3 = vweird.f32 %v3731_v17 }
0x19ce   :  { %v3736_v1 = vmul.f32 %v7006_v13, %v3735_v18 }
0x19d0   :  { %v3737_v4 = vmul.f32 0.5, %v3736_v1  ;;  %v3722_v39 = vpop.xlane.xlu0 %3721 }
0x19d1   :  { %v3728_v60 = vmul.f32 %v3722_v39, %v7802_v38 }
0x19d2   :  { %v3738_v30 = vsub.f32 1.5, %v3737_v4 }
0x19d3   :  { %v7008_v19 = vpop.eup %7007  ;;  %v3732_v21 = vadd.f32 1e-06, %v3728_v60 }
0x19d4   :  { %v3739_v11 = vmul.f32 %v7006_v13, %v3738_v30  ;;  %v3745_v37 = vmul.f32 %v7008_v19, %v3731_v17  ;;  %vm3751_vm2 = vweird.f32 %v7008_v19 }
0x19d5   :  { %7009 = vrsqrt.f32 %v3732_v21  ;;  %vm3752_vm4 = vmor %vm3750_vm3, %vm3751_vm2  ;;  %vm3760_vm7 = vweird.f32 %v3732_v21 }
0x19d6   :  { %v3743_v29 = vsel %vm3742_vm1, %v7006_v13, %v3739_v11  ;;  %v3746_v43 = vmul.f32 %v7008_v19, %v3745_v37  ;;  %v6520_v11 = vld [vmem:[%s12087_s24 + $0x130] sm:$0xff]  ;;  %v6519_v37 = vld [vmem:[%s12087_s24 + $0x128] sm:$0xff] }
0x19d7   :  { %v3774_v40 = vmul.f32 %v3743_v29, %v10319_v36  ;;  %v6516_v29 = vld [vmem:[%s12087_s24 + $0x110] sm:$0xff] }
0x19d8   :  { %v3747_v7 = vmul.f32 0.5, %v3746_v43  ;;  %v3725_v50 = vpop.xlane.xlu1 %3724  ;;  %v6515_v43 = vld [vmem:[%s12087_s24 + $0x108] sm:$0xff] }
0x19d9   :  { %v3781_v6 = vmul.f32 %v6831_v57, %v3774_v40  ;;  %v3729_v53 = vmul.f32 %v3725_v50, %v7802_v38  ;;  %v7364_v40 = vld [vmem:[%s12118_s29 + $0x38] sm:$0xff]  ;;  %v6833_v50 = vld [vmem:[%s12085_s23 + $0x2] ss:$0 sm:$0xff] }
0x19da   :  { %v3748_v56 = vsub.f32 1.5, %v3747_v7  ;;  %v7366_v7 = vld [vmem:[%s12118_s29 + $0x18] sm:$0xff] }
0x19db   :  { %v7010_v54 = vpop.eup %7009  ;;  %v3788_v14 = vadd.f32 %v6832_v41, %v3781_v6  ;;  %v3733_v36 = vadd.f32 1e-06, %v3729_v53  ;;  %v7367_v6 = vld [vmem:[%s12118_s29 + $0x8] sm:$0xff] }
0x19dc   :  { %v3749_v61 = vmul.f32 %v7008_v19, %v3748_v56  ;;  %v3755_v12 = vmul.f32 %v7010_v54, %v3732_v21  ;;  %vm3761_vm5 = vweird.f32 %v7010_v54  ;;  %v6523_v21 = vld [vmem:[%s12087_s24 + $0x148] sm:$0xff] }
0x19dd   :  { %7011 = vrsqrt.f32 %v3733_v36  ;;  %6510 = vmatmul.msk.f32.vlgmr.msra.gmra.mxu0 %vm522_vm6, %v3788_v14  ;;  %vm3762_vm9 = vmor %vm3760_vm7, %vm3761_vm5  ;;  %vm3770_vm11 = vweird.f32 %v3733_v36 }
0x19de   :  { %v3753_v32 = vsel %vm3752_vm4, %v7008_v19, %v3749_v61  ;;  %v3756_v59 = vmul.f32 %v7010_v54, %v3755_v12  ;;  %v6524_v19 = vld [vmem:[%s12087_s24 + $0x150] sm:$0xff] }
0x19df   :  { %v3775_v44 = vmul.f32 %v3753_v32, %v10326_v10 }
0x19e0   :  { %v3757_v62 = vmul.f32 0.5, %v3756_v59 }
0x19e1   :  { %v3782_v46 = vmul.f32 %v6831_v57, %v3775_v44 }
0x19e2   :  { %v3758_v58 = vsub.f32 1.5, %v3757_v62 }
0x19e3   :  { %v7012_v9 = vpop.eup %7011  ;;  %v3789_v22 = vadd.f32 %v6832_v41, %v3782_v46 }
0x19e4   :  { %v3759_v2 = vmul.f32 %v7010_v54, %v3758_v58  ;;  %v3765_v27 = vmul.f32 %v7012_v9, %v3733_v36  ;;  %vm3771_vm10 = vweird.f32 %v7012_v9 }
0x19e5   :  { %6511 = vmatmul.msk.f32.gmra.mxu0 %vm522_vm6, %v3789_v22  ;;  %vm3772_vm12 = vmor %vm3770_vm11, %vm3771_vm10 }
0x19e6   :  { %v3763_v42 = vsel %vm3762_vm9, %v7010_v54, %v3759_v2  ;;  %v3766_v20 = vmul.f32 %v7012_v9, %v3765_v27 }
0x19e7   :  { %v3776_v31 = vmul.f32 %v3763_v42, %v10333_v15  ;;  %v6525_v15 = vld [vmem:[%s12087_s24 + $0x158] sm:$0xff] }
0x19e8   :  { %v3767_v13 = vmul.f32 0.5, %v3766_v20  ;;  %3905 = vmatpush.msra.mxu2 %v6525_v15 }
0x19e9   :  { %v3783_v17 = vmul.f32 %v6831_v57, %v3776_v31 }
0x19ea   :  { %v3768_v18 = vsub.f32 1.5, %v3767_v13  ;;  %3906 = vmatpush.msra.mxu2 %v6524_v19 }
0x19eb   :  { %v3790_v10 = vadd.f32 %v6832_v41, %v3783_v17 }
0x19ec   :  { %v3769_v1 = vmul.f32 %v7012_v9, %v3768_v18  ;;  %3907 = vmatpush.msra.mxu2 %v6523_v21 }
0x19ed   :  { %6512 = vmatmul.msk.f32.gmra.mxu0 %vm522_vm6, %v3790_v10 }
0x19ee   :  { %v3773_v4 = vsel %vm3772_vm12, %v7012_v9, %v3769_v1 }
0x19ef   :  { %v3777_v39 = vmul.f32 %v3773_v4, %v10340_v24  ;;  %v6522_v24 = vld [vmem:[%s12087_s24 + $0x140] sm:$0xff] }
0x19f0   :  { %3908 = vmatpush.msra.mxu2 %v6522_v24 }
0x19f1   :  { %v3784_v60 = vmul.f32 %v6831_v57, %v3777_v39  ;;  %v6521_v57 = vld [vmem:[%s12087_s24 + $0x138] sm:$0xff] }
0x19f2   :  { %3909 = vmatpush.msra.mxu2 %v6521_v57 }
0x19f3   :  { %v3791_v30 = vadd.f32 %v6832_v41, %v3784_v60  ;;  %v6514_v41 = vld [vmem:[%s12087_s24 + $0x100] sm:$0xff] }
0x19f4   :  { %3910 = vmatpush.msra.mxu2 %v6520_v11 }
0x19f5   :  { %6513 = vmatmul.msk.f32.gmra.mxu0 %vm522_vm6, %v3791_v30 }
0x19f6   :  { %3911 = vmatpush.msra.mxu2 %v6519_v37 }
0x19f8   :  { %3912 = vmatpush.msra.mxu2 %v6518_v35 }
0x19fa   :  { %3913 = vmatpush.msra.mxu2 %v6517_v45 }
0x19fc   :  { %3914 = vmatpush.msra.mxu2 %v6516_v29 }
0x19fe   :  { %3915 = vmatpush.msra.mxu2 %v6515_v43 }
0x1a00   :  { %3916 = vmatpush.msra.mxu2 %v6514_v41 }
0x1a02   :  { %4192 = vmatpush.msrb.mxu2 %v7364_v40 }
0x1a04   :  { %4193 = vmatpush.msrb.mxu2 %v7365_v26 }
0x1a06   :  { %4194 = vmatpush.msrb.mxu2 %v7366_v7  ;;  %v6834_v7 = vld [vmem:[%s12088_s25 + $0x2] ss:$0 sm:$0xff] }
0x1a08   :  { %4195 = vmatpush.msrb.mxu2 %v7367_v6 }
0x1a5a   :  { %v3831_v53 = vpop.f32.mrf.mxu0 }
0x1a5b   :  { %v3832_v3 = vadd.f32 %v6833_v50, %v3831_v53 }
0x1a5d   :  { %v3847_v56 = vmul.f32 0.044715, %v3832_v3  ;;  %v3843_v42 = vmul.f32 0.5, %v3832_v3 }
0x1a5f   :  { %v3851_v54 = vmul.f32 %v3847_v56, %v3832_v3 }
0x1a61   :  { %v3855_v14 = vmul.f32 %v3851_v54, %v3832_v3 }
0x1a62   :  { %v3834_v36 = vpop.f32.mrf.mxu0 }
0x1a63   :  { %v3859_v61 = vadd.f32 %v3855_v14, %v3832_v3  ;;  %v3835_v12 = vadd.f32 %v6833_v50, %v3834_v36 }
0x1a65   :  { %v3863_v32 = vmul.f32 0.7978846, %v3859_v61  ;;  %v3848_v59 = vmul.f32 0.044715, %v3835_v12  ;;  %v3844_v30 = vmul.f32 0.5, %v3835_v12 }
0x1a67   :  { %7013 = vtanh.f32 %v3863_v32  ;;  %v3852_v44 = vmul.f32 %v3848_v59, %v3835_v12 }
0x1a69   :  { %v3856_v62 = vmul.f32 %v3852_v44, %v3835_v12 }
0x1a6a   :  { %v3837_v46 = vpop.f32.mrf.mxu0 }
0x1a6b   :  { %v3838_v58 = vadd.f32 %v6833_v50, %v3837_v46  ;;  %v3860_v9 = vadd.f32 %v3856_v62, %v3835_v12 }
0x1a6d   :  { %v7014_v22 = vpop.eup %7013  ;;  %v3849_v2 = vmul.f32 0.044715, %v3838_v58  ;;  %v3864_v27 = vmul.f32 0.7978846, %v3860_v9  ;;  %v3845_v35 = vmul.f32 0.5, %v3838_v58 }
0x1a6e   :  { %v3871_v20 = vadd.f32 1.0, %v7014_v22 }
0x1a6f   :  { %7015 = vtanh.f32 %v3864_v27  ;;  %v3853_v31 = vmul.f32 %v3849_v2, %v3838_v58 }
0x1a70   :  { %v3875_v13 = vmul.f32 %v3871_v20, %v3843_v42 }
0x1a71   :  { %v3857_v17 = vmul.f32 %v3853_v31, %v3838_v58 }
0x1a72   :  { %v3840_v18 = vpop.f32.mrf.mxu0  ;;  %3917 = vmatmul.f32.vlgmr.msra.gmra.mxu2 %v3875_v13 }
0x1a73   :  { %v3841_v10 = vadd.f32 %v6833_v50, %v3840_v18  ;;  %v3861_v1 = vadd.f32 %v3857_v17, %v3838_v58 }
0x1a75   :  { %v7016_v4 = vpop.eup %7015  ;;  %v3850_v39 = vmul.f32 0.044715, %v3841_v10  ;;  %v3865_v60 = vmul.f32 0.7978846, %v3861_v1  ;;  %v3846_v41 = vmul.f32 0.5, %v3841_v10 }
0x1a76   :  { %v3872_v15 = vadd.f32 1.0, %v7016_v4 }
0x1a77   :  { %7017 = vtanh.f32 %v3865_v60  ;;  %v3854_v19 = vmul.f32 %v3850_v39, %v3841_v10 }
0x1a78   :  { %v3876_v21 = vmul.f32 %v3872_v15, %v3844_v30  ;;  %v6536_v15 = vld [vmem:[%s12119_s28 + $0x78] sm:$0xff] }
0x1a79   :  { %v3858_v24 = vmul.f32 %v3854_v19, %v3841_v10  ;;  %4074 = vmatpush.msra.mxu3 %v6536_v15  ;;  %v6535_v19 = vld [vmem:[%s12119_s28 + $0x70] sm:$0xff] }
0x1a7a   :  { %3920 = vmatmul.f32.gmra.mxu2 %v3876_v21  ;;  %v6534_v21 = vld [vmem:[%s12119_s28 + $0x68] sm:$0xff] }
0x1a7b   :  { %v3862_v57 = vadd.f32 %v3858_v24, %v3841_v10  ;;  %4075 = vmatpush.msra.mxu3 %v6535_v19  ;;  %v6533_v24 = vld [vmem:[%s12119_s28 + $0x60] sm:$0xff] }
0x1a7d   :  { %v7018_v11 = vpop.eup %7017  ;;  %v3866_v37 = vmul.f32 0.7978846, %v3862_v57  ;;  %4076 = vmatpush.msra.mxu3 %v6534_v21 }
0x1a7e   :  { %v3873_v45 = vadd.f32 1.0, %v7018_v11 }
0x1a7f   :  { %7019 = vtanh.f32 %v3866_v37  ;;  %4077 = vmatpush.msra.mxu3 %v6533_v24 }
0x1a80   :  { %v3877_v29 = vmul.f32 %v3873_v45, %v3845_v35 }
0x1a82   :  { %3923 = vmatmul.f32.gmra.mxu2 %v3877_v29 }
0x1a85   :  { %v7020_v43 = vpop.eup %7019 }
0x1a86   :  { %v3874_v40 = vadd.f32 1.0, %v7020_v43 }
0x1a88   :  { %v3878_v26 = vmul.f32 %v3874_v40, %v3846_v41 }
0x1a8a   :  { %3926 = vmatmul.f32.gmra.mxu2 %v3878_v26 }
0x1af5   :  { %v3918_v50 = vpop.f32.mrf.mxu2 }
0x1af6   :  { %v3919_v6 = vadd.f32 %v6834_v7, %v3918_v50 }
0x1af8   :  { %v10454_v53 = vadd.f32 %v3919_v6, %v10295_v55 }
0x1afa   :  { %v3938_v3 = vsel %vm522_vm6, %v10454_v53, 0.0 }
0x1afb   :  { %3939 = vadd.xlane.f32.xlu0 %v3938_v3 }
0x1afd   :  { %v3921_v56 = vpop.f32.mrf.mxu2 }
0x1afe   :  { %v3922_v54 = vadd.f32 %v6834_v7, %v3921_v56 }
0x1b00   :  { %v10459_v14 = vadd.f32 %v3922_v54, %v10301_v28 }
0x1b02   :  { %v3941_v36 = vsel %vm522_vm6, %v10459_v14, 0.0 }
0x1b03   :  { %3942 = vadd.xlane.f32.xlu1 %v3941_v36 }
0x1b05   :  { %v3924_v61 = vpop.f32.mrf.mxu2 }
0x1b06   :  { %v3925_v12 = vadd.f32 %v6834_v7, %v3924_v61  ;;  %v6835_v61 = vld [vmem:[%s12120_s0 + $0x3] ss:$0 sm:$0xff] }
0x1b08   :  { %v10464_v32 = vadd.f32 %v3925_v12, %v10307_v8 }
0x1b0a   :  { %v3944_v55 = vsel %vm522_vm6, %v10464_v32, 0.0 }
0x1b0b   :  { %3945 = vadd.xlane.f32.xlu0 %v3944_v55 }
0x1b0d   :  { %v3927_v59 = vpop.f32.mrf.mxu2 }
0x1b0e   :  { %v3928_v44 = vadd.f32 %v6834_v7, %v3927_v59  ;;  %v6836_v59 = vld [vmem:[%s12121_s27 + $0x3] ss:$0 sm:$0xff] }
0x1b10   :  { %v10469_v62 = vadd.f32 %v3928_v44, %v10313_v0 }
0x1b12   :  { %v3947_v28 = vsel %vm522_vm6, %v10469_v62, 0.0 }
0x1b13   :  { %3948 = vadd.xlane.f32.xlu1 %v3947_v28 }
0x1b6e   :  { %v3940_v46 = vpop.xlane.xlu0 %3939 }
0x1b6f   :  { %v3950_v58 = vmul.f32 %v3940_v46, %v7802_v38 }
0x1b71   :  { %v3954_v9 = vsub.f32 %v10454_v53, %v3950_v58 }
0x1b73   :  { %v3958_v8 = vmul.f32 %v3954_v9, %v3954_v9 }
0x1b75   :  { %v3962_v22 = vsel %vm522_vm6, %v3958_v8, 0.0 }
0x1b76   :  { %3963 = vadd.xlane.f32.xlu0 %v3962_v22  ;;  %v3943_v2 = vpop.xlane.xlu1 %3942 }
0x1b77   :  { %v3951_v27 = vmul.f32 %v3943_v2, %v7802_v38 }
0x1b79   :  { %v10478_v42 = vsub.f32 %v10459_v14, %v3951_v27 }
0x1b7b   :  { %v3959_v0 = vmul.f32 %v10478_v42, %v10478_v42 }
0x1b7d   :  { %v3965_v20 = vsel %vm522_vm6, %v3959_v0, 0.0 }
0x1b7e   :  { %v3946_v31 = vpop.xlane.xlu0 %3945  ;;  %3966 = vadd.xlane.f32.xlu1 %v3965_v20 }
0x1b7f   :  { %v3952_v13 = vmul.f32 %v3946_v31, %v7802_v38 }
0x1b81   :  { %v10485_v17 = vsub.f32 %v10464_v32, %v3952_v13 }
0x1b83   :  { %v3960_v18 = vmul.f32 %v10485_v17, %v10485_v17 }
0x1b85   :  { %v3968_v10 = vsel %vm522_vm6, %v3960_v18, 0.0 }
0x1b86   :  { %3969 = vadd.xlane.f32.xlu0 %v3968_v10  ;;  %v3949_v1 = vpop.xlane.xlu1 %3948 }
0x1b87   :  { %v3953_v4 = vmul.f32 %v3949_v1, %v7802_v38 }
0x1b89   :  { %v10492_v39 = vsub.f32 %v10469_v62, %v3953_v4 }
0x1b8b   :  { %v3961_v60 = vmul.f32 %v10492_v39, %v10492_v39 }
0x1b8d   :  { %v3971_v30 = vsel %vm522_vm6, %v3961_v60, 0.0 }
0x1b8e   :  { %3972 = vadd.xlane.f32.xlu1 %v3971_v30 }
0x1be9   :  { %v3964_v57 = vpop.xlane.xlu0 %3963 }
0x1bea   :  { %v3974_v11 = vmul.f32 %v3964_v57, %v7802_v38 }
0x1bec   :  { %v3978_v37 = vadd.f32 1e-06, %v3974_v11 }
0x1bee   :  { %7021 = vrsqrt.f32 %v3978_v37  ;;  %vm3988_vm14 = vweird.f32 %v3978_v37 }
0x1bf1   :  { %v3967_v35 = vpop.xlane.xlu1 %3966 }
0x1bf2   :  { %v3975_v45 = vmul.f32 %v3967_v35, %v7802_v38 }
0x1bf4   :  { %v7022_v29 = vpop.eup %7021  ;;  %v3979_v43 = vadd.f32 1e-06, %v3975_v45 }
0x1bf5   :  { %v3983_v41 = vmul.f32 %v7022_v29, %v3978_v37  ;;  %vm3989_vm13 = vweird.f32 %v7022_v29 }
0x1bf6   :  { %7023 = vrsqrt.f32 %v3979_v43  ;;  %vm3990_vm1 = vmor %vm3988_vm14, %vm3989_vm13  ;;  %vm3998_vm3 = vweird.f32 %v3979_v43 }
0x1bf7   :  { %v3984_v40 = vmul.f32 %v7022_v29, %v3983_v41 }
0x1bf9   :  { %v3985_v26 = vmul.f32 0.5, %v3984_v40  ;;  %v3970_v7 = vpop.xlane.xlu0 %3969 }
0x1bfa   :  { %v3976_v50 = vmul.f32 %v3970_v7, %v7802_v38 }
0x1bfb   :  { %v3986_v6 = vsub.f32 1.5, %v3985_v26 }
0x1bfc   :  { %v7024_v3 = vpop.eup %7023  ;;  %v3980_v56 = vadd.f32 1e-06, %v3976_v50 }
0x1bfd   :  { %v3987_v54 = vmul.f32 %v7022_v29, %v3986_v6  ;;  %v3993_v36 = vmul.f32 %v7024_v3, %v3979_v43  ;;  %vm3999_vm2 = vweird.f32 %v7024_v3 }
0x1bfe   :  { %7025 = vrsqrt.f32 %v3980_v56  ;;  %vm4000_vm4 = vmor %vm3998_vm3, %vm3999_vm2  ;;  %vm4008_vm7 = vweird.f32 %v3980_v56 }
0x1bff   :  { %v3991_v12 = vsel %vm3990_vm1, %v7022_v29, %v3987_v54  ;;  %v3994_v55 = vmul.f32 %v7024_v3, %v3993_v36 }
0x1c00   :  { %v4022_v44 = vmul.f32 %v3991_v12, %v3954_v9 }
0x1c01   :  { %v3995_v28 = vmul.f32 0.5, %v3994_v55  ;;  %v3973_v46 = vpop.xlane.xlu1 %3972 }
0x1c02   :  { %v4029_v58 = vmul.f32 %v6835_v61, %v4022_v44  ;;  %v3977_v8 = vmul.f32 %v3973_v46, %v7802_v38 }
0x1c03   :  { %v3996_v22 = vsub.f32 1.5, %v3995_v28 }
0x1c04   :  { %v7026_v2 = vpop.eup %7025  ;;  %v4036_v27 = vadd.f32 %v6836_v59, %v4029_v58  ;;  %v3981_v0 = vadd.f32 1e-06, %v3977_v8 }
0x1c05   :  { %v3997_v20 = vmul.f32 %v7024_v3, %v3996_v22  ;;  %v4003_v31 = vmul.f32 %v7026_v2, %v3980_v56  ;;  %vm4009_vm5 = vweird.f32 %v7026_v2 }
0x1c06   :  { %7027 = vrsqrt.f32 %v3981_v0  ;;  %6538 = vmatmul.msk.f32.vlgmr.msra.gmra.mxu3 %vm522_vm6, %v4036_v27  ;;  %vm4010_vm9 = vmor %vm4008_vm7, %vm4009_vm5  ;;  %vm4018_vm11 = vweird.f32 %v3981_v0  ;;  %v7368_v27 = vld [vmem:[%s12075_s8] sm:$0xff] }
0x1c07   :  { %v4001_v13 = vsel %vm4000_vm4, %v7024_v3, %v3997_v20  ;;  %v4004_v18 = vmul.f32 %v7026_v2, %v4003_v31  ;;  %v7370_v20 = vld [vmem:[%s12075_s8 + $0x8] sm:$0xff]  ;;  %v7371_v31 = vld [vmem:[%s12075_s8 + $0x10] sm:$0xff] }
0x1c08   :  { %v4023_v9 = vmul.f32 %v4001_v13, %v10478_v42  ;;  %v7372_v13 = vld [vmem:[%s12075_s8 + $0x18] sm:$0xff] }
0x1c09   :  { %v4005_v10 = vmul.f32 0.5, %v4004_v18  ;;  %v7373_v18 = vld [vmem:[%s12075_s8 + $0x20] sm:$0xff] }
0x1c0a   :  { %v4030_v1 = vmul.f32 %v6835_v61, %v4023_v9  ;;  %v7374_v9 = vld [vmem:[%s12075_s8 + $0x28] sm:$0xff] }
0x1c0b   :  { %v4006_v4 = vsub.f32 1.5, %v4005_v10  ;;  %v7375_v10 = vld [vmem:[%s12075_s8 + $0x30] sm:$0xff] }
0x1c0c   :  { %v7028_v60 = vpop.eup %7027  ;;  %v4037_v30 = vadd.f32 %v6836_v59, %v4030_v1  ;;  %v7376_v1 = vld [vmem:[%s12075_s8 + $0x38] sm:$0xff] }
0x1c0d   :  { %v4007_v15 = vmul.f32 %v7026_v2, %v4006_v4  ;;  %v4013_v19 = vmul.f32 %v7028_v60, %v3981_v0  ;;  %vm4019_vm10 = vweird.f32 %v7028_v60  ;;  %v7369_v0 = vld [vmem:[%s12080_s13 + $0x8] sm:$0xff]  ;;  %v7377_v4 = vld [vmem:[%s12075_s8 + $0x40] sm:$0xff] }
0x1c0e   :  { %6539 = vmatmul.msk.f32.gmra.mxu3 %vm522_vm6, %v4037_v30  ;;  %vm4020_vm12 = vmor %vm4018_vm11, %vm4019_vm10  ;;  %v7379_v30 = vld [vmem:[%s12075_s8 + $0x50] sm:$0xff] }
0x1c0f   :  { %v4011_v21 = vsel %vm4010_vm9, %v7026_v2, %v4007_v15  ;;  %v4014_v24 = vmul.f32 %v7028_v60, %v4013_v19  ;;  %v7380_v15 = vld [vmem:[%s12075_s8 + $0x58] sm:$0xff]  ;;  %v7381_v19 = vld [vmem:[%s12075_s8 + $0x60] sm:$0xff] }
0x1c10   :  { %v4024_v57 = vmul.f32 %v4011_v21, %v10485_v17  ;;  %v6837_v17 = vld [vmem:[%s12074_s17 + $0x3] ss:$0 sm:$0xff]  ;;  %v7382_v21 = vld [vmem:[%s12075_s8 + $0x68] sm:$0xff] }
0x1c11   :  { %v4015_v11 = vmul.f32 0.5, %v4014_v24  ;;  %v7383_v24 = vld [vmem:[%s12075_s8 + $0x70] sm:$0xff] }
0x1c12   :  { %v4031_v37 = vmul.f32 %v6835_v61, %v4024_v57 }
0x1c13   :  { %v4016_v35 = vsub.f32 1.5, %v4015_v11  ;;  %v7384_v11 = vld [vmem:[%s12075_s8 + $0x78] sm:$0xff] }
0x1c14   :  { %v4038_v42 = vadd.f32 %v6836_v59, %v4031_v37 }
0x1c15   :  { %v4017_v45 = vmul.f32 %v7028_v60, %v4016_v35  ;;  %v7385_v35 = vld [vmem:[%s12075_s8 + $0x80] sm:$0xff] }
0x1c16   :  { %6540 = vmatmul.msk.f32.gmra.mxu3 %vm522_vm6, %v4038_v42 }
0x1c17   :  { %v4021_v29 = vsel %vm4020_vm12, %v7028_v60, %v4017_v45  ;;  %v7378_v60 = vld [vmem:[%s12075_s8 + $0x48] sm:$0xff] }
0x1c18   :  { %v4025_v43 = vmul.f32 %v4021_v29, %v10492_v39  ;;  %v7386_v45 = vld [vmem:[%s12075_s8 + $0x88] sm:$0xff] }
0x1c1a   :  { %v4032_v41 = vmul.f32 %v6835_v61, %v4025_v43  ;;  %v7387_v43 = vld [vmem:[%s12075_s8 + $0x90] sm:$0xff] }
0x1c1c   :  { %v4039_v40 = vadd.f32 %v6836_v59, %v4032_v41  ;;  %v7388_v41 = vld [vmem:[%s12075_s8 + $0x98] sm:$0xff] }
0x1c1e   :  { %6541 = vmatmul.msk.f32.gmra.mxu3 %vm522_vm6, %v4039_v40  ;;  %v7389_v40 = vld [vmem:[%s12075_s8 + $0xa0] sm:$0xff] }
0x1c89   :  { %v4079_v26 = vpop.f32.mrf.mxu3 }
0x1c8a   :  { %v10529_v7 = vadd.f32 %v6837_v17, %v4079_v26  ;;  %v7391_v26 = vld [vmem:[%s12075_s8 + $0xb0] sm:$0xff] }
0x1c8c   :  { %4095 = vrot.lane.b32.xlu0 %v10529_v7, %s7591_s1 }
0x1c91   :  { %v4082_v50 = vpop.f32.mrf.mxu3 }
0x1c92   :  { %v10533_v6 = vadd.f32 %v6837_v17, %v4082_v50  ;;  %v7392_v50 = vld [vmem:[%s12075_s8 + $0xb8] sm:$0xff] }
0x1c94   :  { %4097 = vrot.lane.b32.xlu1 %v10533_v6, %s7591_s1  ;;  %v6795_v61 = vpack.i.bf16 %v10529_v7, %v10533_v6 }
0x1c99   :  { %v4085_v39 = vpop.f32.mrf.mxu3 }
0x1c9a   :  { %v10537_v3 = vadd.f32 %v6837_v17, %v4085_v39 }
0x1c9c   :  { %4099 = vrot.lane.b32.xlu0 %v10537_v3, %s7591_s1 }
0x1ca1   :  { %v4088_v56 = vpop.f32.mrf.mxu3 }
0x1ca2   :  { %v10541_v54 = vadd.f32 %v6837_v17, %v4088_v56  ;;  %v7390_v17 = vld [vmem:[%s12075_s8 + $0xa8] sm:$0xff] }
0x1ca4   :  { %4101 = vrot.lane.b32.xlu0 %v10541_v54, %s7591_s1  ;;  %v6790_v36 = vpack.i.bf16 %v10537_v3, %v10541_v54 }
0x1cac   :  { %6791 = vrot.lane.b32.xlu0 %v6790_v36, %s12123_s5 }
0x1cb4   :  { %6796 = vrot.lane.b32.xlu0 %v6795_v61, %s12123_s5 }
0x1cfe   :  { %v4096_v12 = vpop.permute.xlu0 %4095 }
0x1cff   :  { %4107 = vxpose.xlu1.b32.start [1/4] (short) (narrow) %v4096_v12, 32 }
0x1d06   :  { %v4098_v55 = vpop.permute.xlu1 %4097 }
0x1d07   :  { %4108 = vxpose.xlu1.b32.cont [2/4] (short) (narrow) %v4098_v55, 32 }
0x1d0e   :  { %v4100_v59 = vpop.permute.xlu0 %4099 }
0x1d0f   :  { %4109 = vxpose.xlu1.b32.cont [3/4] (short) (narrow) %v4100_v59, 32 }
0x1d16   :  { %v4102_v44 = vpop.permute.xlu0 %4101 }
0x1d17   :  { %4110 = vxpose.xlu1.b32.end [4/4] (short) (narrow) %v4102_v44, 32  ;;  %v7393_v44 = vld [vmem:[%s12076_s9 + $0x30] sm:$0xff] }
0x1d1e   :  { %v6792_v28 = vpop.permute.xlu0 %6791 }
0x1d1f   :  { %v6793_v46 = vunpack.i.l.bf16 %v6792_v28  ;;  %v6794_v58 = vunpack.i.h.bf16 %v6792_v28 }
0x1d21   :  { %4241 = vmatpush.msrb.mxu3 %v6793_v46  ;;  %v7394_v46 = vld [vmem:[%s12076_s9 + $0x20] sm:$0xff] }
0x1d23   :  { %4242 = vmatpush.msrb.mxu3 %v6794_v58 }
0x1d26   :  { %v6797_v8 = vpop.permute.xlu0 %6796 }
0x1d27   :  { %v6798_v22 = vunpack.i.l.bf16 %v6797_v8  ;;  %v6799_v2 = vunpack.i.h.bf16 %v6797_v8  ;;  %v7395_v8 = vld [vmem:[%s12076_s9 + $0x10] sm:$0xff] }
0x1d29   :  { %4243 = vmatpush.msrb.mxu3 %v6798_v22 }
0x1d2b   :  { %4244 = vmatpush.msrb.mxu3 %v6799_v2 }
0x1d2c   :  { %6550 = vmatmul.msk.f32.vlgmr.msrb.gmra.mxu3 %vm522_vm6, %v7368_v27  ;;  %v7396_v27 = vld [vmem:[%s12076_s9] sm:$0xff] }
0x1d2d   :  { %5641 = vmatpush.msra.mxu3 %v7369_v0 }
0x1d34   :  { %6551 = vmatmul.msk.f32.gmra.mxu3 %vm522_vm6, %v7370_v20  ;;  %v7397_v20 = vld [vmem:[%s12076_s9 + $0x38] sm:$0xff] }
0x1d3c   :  { %6552 = vmatmul.msk.f32.gmra.mxu3 %vm522_vm6, %v7371_v31 }
0x1d44   :  { %6553 = vmatmul.msk.f32.gmra.mxu3 %vm522_vm6, %v7372_v13  ;;  %v7398_v13 = vld [vmem:[%s12076_s9 + $0x28] sm:$0xff] }
0x1d4c   :  { %6554 = vmatmul.msk.f32.gmra.mxu3 %vm522_vm6, %v7373_v18 }
0x1d54   :  { %6555 = vmatmul.msk.f32.gmra.mxu3 %vm522_vm6, %v7374_v9  ;;  %v7399_v9 = vld [vmem:[%s12076_s9 + $0x18] sm:$0xff] }
0x1d5c   :  { %6556 = vmatmul.msk.f32.gmra.mxu3 %vm522_vm6, %v7375_v10 }
0x1d64   :  { %6557 = vmatmul.msk.f32.gmra.mxu3 %vm522_vm6, %v7376_v1  ;;  %v7400_v1 = vld [vmem:[%s12078_s12 + $0x78] sm:$0xff] }
0x1d6c   :  { %6558 = vmatmul.msk.f32.gmra.mxu3 %vm522_vm6, %v7377_v4  ;;  %v7401_v4 = vld [vmem:[%s12076_s9 + $0x8] sm:$0xff] }
0x1d74   :  { %6559 = vmatmul.msk.f32.gmra.mxu3 %vm522_vm6, %v7378_v60 }
0x1d7c   :  { %6560 = vmatmul.msk.f32.gmra.mxu3 %vm522_vm6, %v7379_v30  ;;  %v7402_v30 = vld [vmem:[%s12078_s12 + $0x70] sm:$0xff] }
0x1d84   :  { %6561 = vmatmul.msk.f32.gmra.mxu3 %vm522_vm6, %v7380_v15  ;;  %v7403_v15 = vld [vmem:[%s12078_s12 + $0x68] sm:$0xff] }
0x1d8c   :  { %6562 = vmatmul.msk.f32.gmra.mxu3 %vm522_vm6, %v7381_v19  ;;  %v7404_v19 = vld [vmem:[%s12078_s12 + $0xf8] sm:$0xff] }
0x1d94   :  { %6563 = vmatmul.msk.f32.gmra.mxu3 %vm522_vm6, %v7382_v21  ;;  %v7405_v21 = vld [vmem:[%s12078_s12 + $0x60] sm:$0xff] }
0x1d9c   :  { %6564 = vmatmul.msk.f32.gmra.mxu3 %vm522_vm6, %v7383_v24  ;;  %v7406_v24 = vld [vmem:[%s12078_s12 + $0xf0] sm:$0xff] }
0x1da3   :  { %v4123_v57 = vpop.trf.xlu1 }
0x1da4   :  { %6542 = vmatmul.msk.f32.vlgmr.msrb.gmra.mxu0 %vm522_vm6, %v4123_v57  ;;  %6546 = vmatmul.msk.f32.vlgmr.msrb.gmra.mxu2 %vm522_vm6, %v4123_v57  ;;  %v7408_v57 = vld [vmem:[%s12078_s12 + $0xe8] sm:$0xff] }
0x1da5   :  { %6565 = vmatmul.msk.f32.gmra.mxu3 %vm522_vm6, %v7384_v11  ;;  %v7409_v11 = vld [vmem:[%s12078_s12 + $0x50] sm:$0xff] }
0x1dab   :  { %v4124_v37 = vpop.trf.xlu1 }
0x1dac   :  { %6543 = vmatmul.msk.f32.gmra.mxu0 %vm522_vm6, %v4124_v37  ;;  %6547 = vmatmul.msk.f32.gmra.mxu2 %vm522_vm6, %v4124_v37  ;;  %v7410_v37 = vld [vmem:[%s12078_s12 + $0xe0] sm:$0xff] }
0x1dad   :  { %6566 = vmatmul.msk.f32.gmra.mxu3 %vm522_vm6, %v7385_v35  ;;  %v7411_v35 = vld [vmem:[%s12078_s12 + $0x48] sm:$0xff] }
0x1db3   :  { %v4125_v42 = vpop.trf.xlu1 }
0x1db4   :  { %6544 = vmatmul.msk.f32.gmra.mxu0 %vm522_vm6, %v4125_v42  ;;  %6548 = vmatmul.msk.f32.gmra.mxu2 %vm522_vm6, %v4125_v42  ;;  %v7412_v42 = vld [vmem:[%s12078_s12 + $0xd8] sm:$0xff] }
0x1db5   :  { %6567 = vmatmul.msk.f32.gmra.mxu3 %vm522_vm6, %v7386_v45  ;;  %v7413_v45 = vld [vmem:[%s12078_s12 + $0x40] sm:$0xff] }
0x1dbb   :  { %v4126_v29 = vpop.trf.xlu1 }
0x1dbc   :  { %6545 = vmatmul.msk.f32.gmra.mxu0 %vm522_vm6, %v4126_v29  ;;  %6549 = vmatmul.msk.f32.gmra.mxu2 %vm522_vm6, %v4126_v29  ;;  %v7414_v29 = vld [vmem:[%s12078_s12 + $0xd0] sm:$0xff] }
0x1dbd   :  { %6568 = vmatmul.msk.f32.gmra.mxu3 %vm522_vm6, %v7387_v43  ;;  %v7416_v43 = vld [vmem:[%s12078_s12 + $0xc8] sm:$0xff] }
0x1dc5   :  { %6569 = vmatmul.msk.f32.gmra.mxu3 %vm522_vm6, %v7388_v41  ;;  %v7417_v41 = vld [vmem:[%s12078_s12 + $0x30] sm:$0xff] }
0x1dcd   :  { %6570 = vmatmul.msk.f32.gmra.mxu3 %vm522_vm6, %v7389_v40  ;;  %v7418_v40 = vld [vmem:[%s12078_s12 + $0xc0] sm:$0xff] }
0x1dd5   :  { %6571 = vmatmul.msk.f32.gmra.mxu3 %vm522_vm6, %v7390_v17  ;;  %v7419_v17 = vld [vmem:[%s12078_s12 + $0x28] sm:$0xff] }
0x1ddd   :  { %6572 = vmatmul.msk.f32.gmra.mxu3 %vm522_vm6, %v7391_v26  ;;  %v7420_v26 = vld [vmem:[%s12078_s12 + $0xb8] sm:$0xff] }
0x1de5   :  { %6573 = vmatmul.msk.f32.gmra.mxu3 %vm522_vm6, %v7392_v50  ;;  %v7421_v50 = vld [vmem:[%s12078_s12 + $0x20] sm:$0xff] }
0x1e21   :  { %v4168_v39 = vpop.f32.mrf.mxu0 }
0x1e22   :  { %v4209_v0 = vmul.f32 %v7396_v27, %v4168_v39  ;;  %v7422_v39 = vld [vmem:[%s12078_s12 + $0xb0] sm:$0xff] }
0x1e27   :  { %v4197_v56 = vpop.f32.mrf.mxu2 }
0x1e28   :  { %v4210_v60 = vmul.f32 %v7401_v4, %v4197_v56  ;;  %v7424_v56 = vld [vmem:[%s12078_s12 + $0xa8] sm:$0xff]  ;;  %v7440_v4 = vld [vmem:[%s12075_s8 + $0xf0] sm:$0xff] }
0x1e29   :  { %v4171_v36 = vpop.f32.mrf.mxu0 }
0x1e2a   :  { %v4211_v22 = vmul.f32 %v7395_v8, %v4171_v36  ;;  %v7425_v36 = vld [vmem:[%s12078_s12 + $0x10] sm:$0xff]  ;;  %v7434_v8 = vld [vmem:[%s12075_s8 + $0xc0] sm:$0xff] }
0x1e2f   :  { %v4200_v61 = vpop.f32.mrf.mxu2 }
0x1e30   :  { %v4212_v10 = vmul.f32 %v7399_v9, %v4200_v61  ;;  %v7426_v61 = vld [vmem:[%s12078_s12 + $0xa0] sm:$0xff] }
0x1e31   :  { %v4174_v12 = vpop.f32.mrf.mxu0 }
0x1e32   :  { %v4213_v58 = vmul.f32 %v7394_v46, %v4174_v12  ;;  %v7427_v12 = vld [vmem:[%s12078_s12 + $0x8] sm:$0xff]  ;;  %v7433_v46 = vld [vmem:[%s12078_s12 + $0x80] sm:$0xff] }
0x1e37   :  { %v4203_v55 = vpop.f32.mrf.mxu2 }
0x1e38   :  { %v4214_v18 = vmul.f32 %v7398_v13, %v4203_v55  ;;  %v7428_v55 = vld [vmem:[%s12078_s12 + $0x98] sm:$0xff] }
0x1e39   :  { %v4177_v59 = vpop.f32.mrf.mxu0 }
0x1e3a   :  { %v4215_v28 = vmul.f32 %v7393_v44, %v4177_v59  ;;  %v7429_v59 = vld [vmem:[%s12078_s12] sm:$0xff] }
0x1e3b   :  { %v7430_v44 = vld [vmem:[%s12080_s13] sm:$0xff] }
0x1e3c   :  { %4394 = vmatpush.msra.mxu0 %v4215_v28  ;;  %v7431_v28 = vld [vmem:[%s12078_s12 + $0x90] sm:$0xff] }
0x1e3e   :  { %4395 = vmatpush.msra.mxu0 %v4213_v58  ;;  %v10797_v58 = vpop.f32.mrf.mxu3  ;;  %6574 = vmatmul.msk.f32.gmra.mxu3 %vm522_vm6, %v7434_v8 }
0x1e3f   :  { %v4206_v2 = vpop.f32.mrf.mxu2 }
0x1e40   :  { %v4216_v31 = vmul.f32 %v7397_v20, %v4206_v2  ;;  %4396 = vmatpush.msra.mxu0 %v4211_v22  ;;  %v7435_v2 = vld [vmem:[%s12075_s8 + $0xc8] sm:$0xff] }
0x1e42   :  { %4397 = vmatpush.msra.mxu0 %v4209_v0  ;;  %4423 = vmatpush.msra.mxu2 %v4216_v31  ;;  %v7436_v0 = vld [vmem:[%s12075_s8 + $0xd0] sm:$0xff]  ;;  %v7437_v31 = vld [vmem:[%s12075_s8 + $0xd8] sm:$0xff] }
0x1e43   :  { %6582 = vmatmul.msk.f32.vlgmr.msra.gmra.mxu0 %vm522_vm6, %v10529_v7 }
0x1e44   :  { %4424 = vmatpush.msra.mxu2 %v4214_v18  ;;  %4476 = vmatpush.msrb.mxu0 %v7400_v1  ;;  %v7438_v18 = vld [vmem:[%s12075_s8 + $0xe0] sm:$0xff] }
0x1e46   :  { %4425 = vmatpush.msra.mxu2 %v4212_v10  ;;  %4477 = vmatpush.msrb.mxu0 %v7402_v30  ;;  %v10803_v22 = vpop.f32.mrf.mxu3  ;;  %v7439_v10 = vld [vmem:[%s12075_s8 + $0xe8] sm:$0xff] }
0x1e47   :  { %6575 = vmatmul.msk.f32.gmra.mxu3 %vm522_vm6, %v7435_v2  ;;  %v7444_v2 = vld [vmem:[%s12079_s10 + $0x60] sm:$0xff] }
0x1e48   :  { %4426 = vmatpush.msra.mxu2 %v4210_v60  ;;  %4478 = vmatpush.msrb.mxu0 %v7403_v15  ;;  %v7441_v15 = vld [vmem:[%s12075_s8 + $0xf8] sm:$0xff] }
0x1e49   :  { %6586 = vmatmul.msk.f32.vlgmr.msra.gmra.mxu2 %vm522_vm6, %v10529_v7  ;;  %v7407_v7 = vld [vmem:[%s12078_s12 + $0x58] sm:$0xff] }
0x1e4a   :  { %4505 = vmatpush.msrb.mxu2 %v7404_v19  ;;  %4479 = vmatpush.msrb.mxu0 %v7405_v21 }
0x1e4b   :  { %6583 = vmatmul.msk.f32.gmra.mxu0 %vm522_vm6, %v10533_v6 }
0x1e4c   :  { %4506 = vmatpush.msrb.mxu2 %v7406_v24  ;;  %4480 = vmatpush.msrb.mxu0 %v7407_v7 }
0x1e4e   :  { %4507 = vmatpush.msrb.mxu2 %v7408_v57  ;;  %4481 = vmatpush.msrb.mxu0 %v7409_v11  ;;  %v10809_v27 = vpop.f32.mrf.mxu3 }
0x1e4f   :  { %6576 = vmatmul.msk.f32.gmra.mxu3 %vm522_vm6, %v7436_v0 }
0x1e50   :  { %4508 = vmatpush.msrb.mxu2 %v7410_v37  ;;  %4482 = vmatpush.msrb.mxu0 %v7411_v35 }
0x1e51   :  { %6587 = vmatmul.msk.f32.gmra.mxu2 %vm522_vm6, %v10533_v6  ;;  %v7415_v6 = vld [vmem:[%s12078_s12 + $0x38] sm:$0xff] }
0x1e52   :  { %4509 = vmatpush.msrb.mxu2 %v7412_v42  ;;  %4483 = vmatpush.msrb.mxu0 %v7413_v45 }
0x1e53   :  { %6584 = vmatmul.msk.f32.gmra.mxu0 %vm522_vm6, %v10537_v3 }
0x1e54   :  { %4510 = vmatpush.msrb.mxu2 %v7414_v29  ;;  %4484 = vmatpush.msrb.mxu0 %v7415_v6 }
0x1e56   :  { %4511 = vmatpush.msrb.mxu2 %v7416_v43  ;;  %4485 = vmatpush.msrb.mxu0 %v7417_v41  ;;  %v10815_v20 = vpop.f32.mrf.mxu3 }
0x1e57   :  { %6577 = vmatmul.msk.f32.gmra.mxu3 %vm522_vm6, %v7437_v31  ;;  %v7445_v31 = vld [vmem:[%s12079_s10 + $0x68] sm:$0xff] }
0x1e58   :  { %4512 = vmatpush.msrb.mxu2 %v7418_v40  ;;  %4486 = vmatpush.msrb.mxu0 %v7419_v17 }
0x1e59   :  { %6588 = vmatmul.msk.f32.gmra.mxu2 %vm522_vm6, %v10537_v3  ;;  %v7423_v3 = vld [vmem:[%s12078_s12 + $0x18] sm:$0xff] }
0x1e5a   :  { %4513 = vmatpush.msrb.mxu2 %v7420_v26  ;;  %4487 = vmatpush.msrb.mxu0 %v7421_v50 }
0x1e5b   :  { %6585 = vmatmul.msk.f32.gmra.mxu0 %vm522_vm6, %v10541_v54 }
0x1e5c   :  { %4514 = vmatpush.msrb.mxu2 %v7422_v39  ;;  %4488 = vmatpush.msrb.mxu0 %v7423_v3 }
0x1e5e   :  { %4515 = vmatpush.msrb.mxu2 %v7424_v56  ;;  %4489 = vmatpush.msrb.mxu0 %v7425_v36  ;;  %v10821_v13 = vpop.f32.mrf.mxu3 }
0x1e5f   :  { %6578 = vmatmul.msk.f32.gmra.mxu3 %vm522_vm6, %v7438_v18 }
0x1e60   :  { %4516 = vmatpush.msrb.mxu2 %v7426_v61  ;;  %4490 = vmatpush.msrb.mxu0 %v7427_v12 }
0x1e61   :  { %6589 = vmatmul.msk.f32.gmra.mxu2 %vm522_vm6, %v10541_v54  ;;  %v7432_v54 = vld [vmem:[%s12078_s12 + $0x88] sm:$0xff] }
0x1e62   :  { %4517 = vmatpush.msrb.mxu2 %v7428_v55  ;;  %4491 = vmatpush.msrb.mxu0 %v7429_v59 }
0x1e64   :  { %4561 = vmatpush.msra.mxu0 %v7430_v44  ;;  %4518 = vmatpush.msrb.mxu2 %v7431_v28  ;;  %v7442_v28 = vld [vmem:[%s12079_s10 + $0x78] sm:$0xff] }
0x1e66   :  { %4519 = vmatpush.msrb.mxu2 %v7432_v54  ;;  %v10827_v9 = vpop.f32.mrf.mxu3 }
0x1e67   :  { %6579 = vmatmul.msk.f32.gmra.mxu3 %vm522_vm6, %v7439_v10  ;;  %v7446_v10 = vld [vmem:[%s12079_s10 + $0x58] sm:$0xff] }
0x1e68   :  { %4520 = vmatpush.msrb.mxu2 %v7433_v46  ;;  %v7443_v46 = vld [vmem:[%s12079_s10 + $0x70] sm:$0xff] }
0x1e6e   :  { %v10833_v1 = vpop.f32.mrf.mxu3 }
0x1e6f   :  { %6580 = vmatmul.msk.f32.gmra.mxu3 %vm522_vm6, %v7440_v4 }
0x1e76   :  { %v4267_v30 = vpop.f32.mrf.mxu3 }
0x1e77   :  { %6581 = vmatmul.msk.f32.gmra.mxu3 %vm522_vm6, %v7441_v15  ;;  %v7447_v15 = vld [vmem:[%s12079_s10 + $0x50] sm:$0xff] }
0x1e7e   :  { %v4270_v11 = vpop.f32.mrf.mxu3 }
0x1e86   :  { %v4273_v6 = vpop.f32.mrf.mxu3 }
0x1e8e   :  { %v4276_v50 = vpop.f32.mrf.mxu3 }
0x1e96   :  { %v4279_v61 = vpop.f32.mrf.mxu3 }
0x1e97   :  { %v4353_v4 = vmul.f32 %v7446_v10, %v4279_v61 }
0x1e9e   :  { %v4282_v12 = vpop.f32.mrf.mxu3 }
0x1e9f   :  { %v4354_v0 = vmul.f32 %v7444_v2, %v4282_v12 }
0x1ea6   :  { %v4285_v55 = vpop.f32.mrf.mxu3 }
0x1ea7   :  { %v4355_v18 = vmul.f32 %v7445_v31, %v4285_v55 }
0x1eae   :  { %v4288_v59 = vpop.f32.mrf.mxu3 }
0x1eaf   :  { %v4356_v8 = vmul.f32 %v7443_v46, %v4288_v59 }
0x1eb6   :  { %v4291_v44 = vpop.f32.mrf.mxu3 }
0x1eb7   :  { %v4357_v54 = vmul.f32 %v7442_v28, %v4291_v44 }
0x1eb9   :  { %4620 = vmatpush.msra.mxu2 %v4357_v54 }
0x1ebb   :  { %4621 = vmatpush.msra.mxu2 %v4356_v8 }
0x1ebd   :  { %4622 = vmatpush.msra.mxu2 %v4355_v18 }
0x1ebf   :  { %4623 = vmatpush.msra.mxu2 %v4354_v0 }
0x1ec0   :  { %v4399_v60 = vpop.f32.mrf.mxu0 }
0x1ec1   :  { %v10844_v21 = vadd.f32 %v4399_v60, %v8341_v34  ;;  %v10890_v60 = vpop.f32.mrf.mxu3  ;;  %4624 = vmatpush.msra.mxu2 %v4353_v4 }
0x1ec8   :  { %v4402_v7 = vpop.f32.mrf.mxu0 }
0x1ec9   :  { %v10852_v35 = vadd.f32 %v4402_v7, %v8373_v52  ;;  %v7448_v7 = vld [vmem:[%s12079_s10 + $0x48] sm:$0xff] }
0x1ecc   :  { %v4428_v19 = vpop.f32.mrf.mxu2 }
0x1ecd   :  { %v10847_v24 = vadd.f32 %v4428_v19, %v8338_v33  ;;  %v4352_v19 = vmul.f32 %v7447_v15, %v4276_v50 }
0x1ecf   :  { %v4440_v57 = vmax.f32 %v10844_v21, %v10847_v24  ;;  %4625 = vmatpush.msra.mxu2 %v4352_v19 }
0x1ed0   :  { %v4405_v29 = vpop.f32.mrf.mxu0 }
0x1ed1   :  { %4441 = vmax.xlane.f32.xlu0 %v4440_v57  ;;  %v10860_v41 = vadd.f32 %v4405_v29, %v8411_v5  ;;  %v4351_v57 = vmul.f32 %v7448_v7, %v4273_v6  ;;  %v7450_v29 = vld [vmem:[%s12079_s10 + $0x38] sm:$0xff] }
0x1ed3   :  { %4626 = vmatpush.msra.mxu2 %v4351_v57 }
0x1ed4   :  { %v4431_v37 = vpop.f32.mrf.mxu2 }
0x1ed5   :  { %v10855_v42 = vadd.f32 %v4431_v37, %v8370_v51  ;;  %v7449_v37 = vld [vmem:[%s12079_s10 + $0x40] sm:$0xff] }
0x1ed7   :  { %v4443_v45 = vmax.f32 %v10852_v35, %v10855_v42 }
0x1ed8   :  { %v4408_v26 = vpop.f32.mrf.mxu0 }
0x1ed9   :  { %4444 = vmax.xlane.f32.xlu2 %v4443_v45  ;;  %v10868_v3 = vadd.f32 %v4408_v26, %v8449_v49  ;;  %v4350_v45 = vmul.f32 %v7449_v37, %v4270_v11  ;;  %v7451_v26 = vld [vmem:[%s12079_s10 + $0x30] sm:$0xff]  ;;  %v7452_v11 = vld [vmem:[%s12079_s10 + $0x28] sm:$0xff] }
0x1eda   :  { %v4348_v6 = vmul.f32 %v7451_v26, %v10833_v1  ;;  %v4347_v50 = vmul.f32 %v7452_v11, %v10827_v9  ;;  %v7455_v9 = vld [vmem:[%s12079_s10 + $0x10] sm:$0xff] }
0x1edb   :  { %4627 = vmatpush.msra.mxu2 %v4350_v45  ;;  %v4344_v12 = vmul.f32 %v7455_v9, %v10809_v27 }
0x1edc   :  { %v4434_v43 = vpop.f32.mrf.mxu2 }
0x1edd   :  { %v10863_v40 = vadd.f32 %v4434_v43, %v8408_v63  ;;  %v4349_v43 = vmul.f32 %v7450_v29, %v4267_v30  ;;  %v7453_v30 = vld [vmem:[%s12079_s10 + $0x20] sm:$0xff] }
0x1edf   :  { %v4446_v17 = vmax.f32 %v10860_v41, %v10863_v40  ;;  %4628 = vmatpush.msra.mxu2 %v4349_v43 }
0x1ee1   :  { %4447 = vmax.xlane.f32.xlu2 %v4446_v17  ;;  %v10904_v17 = vpop.f32.mrf.mxu3  ;;  %4629 = vmatpush.msra.mxu2 %v4348_v6 }
0x1ee3   :  { %4630 = vmatpush.msra.mxu2 %v4347_v50 }
0x1ee4   :  { %v4437_v39 = vpop.f32.mrf.mxu2 }
0x1ee5   :  { %v10871_v56 = vadd.f32 %v4437_v39, %v8446_v47  ;;  %v4346_v39 = vmul.f32 %v7453_v30, %v10821_v13  ;;  %v7456_v13 = vld [vmem:[%s12079_s10 + $0x8] sm:$0xff] }
0x1ee6   :  { %v4343_v55 = vmul.f32 %v7456_v13, %v10803_v22 }
0x1ee7   :  { %v4449_v36 = vmax.f32 %v10868_v3, %v10871_v56  ;;  %4631 = vmatpush.msra.mxu2 %v4346_v39 }
0x1ee9   :  { %4450 = vmax.xlane.f32.xlu2 %v4449_v36  ;;  %v7454_v36 = vld [vmem:[%s12079_s10 + $0x18] sm:$0xff]  ;;  %v10922_v61 = vpop.f32.mrf.mxu3 }
0x1eea   :  { %v4345_v1 = vmul.f32 %v7454_v36, %v10815_v20  ;;  %v7457_v20 = vld [vmem:[%s12079_s10] sm:$0xff] }
0x1eeb   :  { %v4342_v59 = vmul.f32 %v7457_v20, %v10797_v58 }
0x1eec   :  { %4632 = vmatpush.msra.mxu2 %v4345_v1 }
0x1eee   :  { %4633 = vmatpush.msra.mxu2 %v4344_v12 }
0x1ef0   :  { %4634 = vmatpush.msra.mxu2 %v4343_v55  ;;  %v7458_v55 = vld [vmem:[%s12079_s10 + $0xf8] sm:$0xff] }
0x1ef1   :  { %v10936_v44 = vpop.f32.mrf.mxu3 }
0x1ef2   :  { %4635 = vmatpush.msra.mxu2 %v4342_v59  ;;  %v7459_v59 = vld [vmem:[%s12079_s10 + $0xe8] sm:$0xff] }
0x1ef9   :  { %v10938_v27 = vpop.f32.mrf.mxu3 }
0x1f01   :  { %v10940_v28 = vpop.f32.mrf.mxu3 }
0x1f09   :  { %v10942_v46 = vpop.f32.mrf.mxu3 }
0x1f11   :  { %v10946_v31 = vpop.f32.mrf.mxu3 }
0x1f44   :  { %v4442_v54 = vpop.xlane.xlu0 %4441 }
0x1f45   :  { %v4452_v22 = vsub.f32 %v10844_v21, %v4442_v54  ;;  %v4453_v8 = vsub.f32 %v10847_v24, %v4442_v54  ;;  %v4318_v24 = vpop.f32.mrf.mxu3 }
0x1f47   :  { %v4460_v2 = vmul.f32 1.442695, %v4452_v22  ;;  %v4462_v0 = vmul.f32 1.442695, %v4453_v8  ;;  %v7460_v22 = vld [vmem:[%s12079_s10 + $0xf0] sm:$0xff] }
0x1f49   :  { %7029 = vpow2.f32 %v4460_v2  ;;  %v7461_v2 = vld [vmem:[%s12079_s10 + $0xe0] sm:$0xff] }
0x1f4a   :  { %7031 = vpow2.f32 %v4462_v0 }
0x1f4c   :  { %v4445_v58 = vpop.xlane.xlu2 %4444 }
0x1f4d   :  { %v4454_v18 = vsub.f32 %v10852_v35, %v4445_v58  ;;  %v4455_v10 = vsub.f32 %v10855_v42, %v4445_v58  ;;  %v4321_v26 = vpop.f32.mrf.mxu3  ;;  %v7462_v58 = vld [vmem:[%s12079_s10 + $0xd8] sm:$0xff] }
0x1f4f   :  { %v10950_v4 = vpop.eup %7029  ;;  %v4464_v15 = vmul.f32 1.442695, %v4454_v18  ;;  %v4466_v19 = vmul.f32 1.442695, %v4455_v10  ;;  %v7463_v10 = vld [vmem:[%s12079_s10 + $0xd0] sm:$0xff] }
0x1f50   :  { %v10952_v7 = vpop.eup %7031  ;;  %4492 = vmatmul.f32.vlgmr.msrb.gmra.mxu0 %v10950_v4 }
0x1f51   :  { %7033 = vpow2.f32 %v4464_v15  ;;  %4521 = vmatmul.f32.vlgmr.msrb.gmra.mxu2 %v10952_v7 }
0x1f52   :  { %7035 = vpow2.f32 %v4466_v19  ;;  %v7464_v19 = vld [vmem:[%s12079_s10 + $0xc8] sm:$0xff] }
0x1f54   :  { %v4448_v21 = vpop.xlane.xlu2 %4447 }
0x1f55   :  { %v4456_v57 = vsub.f32 %v10860_v41, %v4448_v21  ;;  %v4457_v35 = vsub.f32 %v10863_v40, %v4448_v21  ;;  %v4324_v39 = vpop.f32.mrf.mxu3  ;;  %v4367_v21 = vmul.f32 %v7464_v19, %v4321_v26 }
0x1f56   :  { %v4368_v15 = vmul.f32 %v7463_v10, %v4324_v39  ;;  %v7472_v39 = vld [vmem:[%s12079_s10 + $0x88] sm:$0xff] }
0x1f57   :  { %v10958_v37 = vpop.eup %7033  ;;  %v4468_v42 = vmul.f32 1.442695, %v4456_v57  ;;  %v4470_v45 = vmul.f32 1.442695, %v4457_v35  ;;  %v7465_v57 = vld [vmem:[%s12079_s10 + $0xc0] sm:$0xff] }
0x1f58   :  { %v10960_v29 = vpop.eup %7035  ;;  %4495 = vmatmul.f32.gmra.mxu0 %v10958_v37  ;;  %v4366_v35 = vmul.f32 %v7465_v57, %v4318_v24 }
0x1f59   :  { %7037 = vpow2.f32 %v4468_v42  ;;  %4524 = vmatmul.f32.gmra.mxu2 %v10960_v29  ;;  %v7466_v42 = vld [vmem:[%s12079_s10 + $0xb8] sm:$0xff] }
0x1f5a   :  { %7039 = vpow2.f32 %v4470_v45  ;;  %v4365_v45 = vmul.f32 %v7466_v42, %v10946_v31 }
0x1f5c   :  { %v4451_v43 = vpop.xlane.xlu2 %4450 }
0x1f5d   :  { %v4458_v6 = vsub.f32 %v10868_v3, %v4451_v43  ;;  %v4459_v41 = vsub.f32 %v10871_v56, %v4451_v43  ;;  %v4327_v3 = vpop.f32.mrf.mxu3  ;;  %v7467_v43 = vld [vmem:[%s12079_s10 + $0xb0] sm:$0xff] }
0x1f5e   :  { %v4369_v18 = vmul.f32 %v7462_v58, %v4327_v3  ;;  %v4364_v26 = vmul.f32 %v7467_v43, %v10942_v46  ;;  %v7473_v3 = vld [vmem:[%s12079_s10 + $0x80] sm:$0xff] }
0x1f5f   :  { %v10966_v11 = vpop.eup %7037  ;;  %v4472_v40 = vmul.f32 1.442695, %v4458_v6  ;;  %v4474_v50 = vmul.f32 1.442695, %v4459_v41  ;;  %v7468_v6 = vld [vmem:[%s12079_s10 + $0xa8] sm:$0xff]  ;;  %v7469_v41 = vld [vmem:[%s12079_s10 + $0xa0] sm:$0xff] }
0x1f60   :  { %v10968_v30 = vpop.eup %7039  ;;  %4498 = vmatmul.f32.gmra.mxu0 %v10966_v11  ;;  %v4363_v24 = vmul.f32 %v7468_v6, %v10940_v28  ;;  %v4362_v31 = vmul.f32 %v7469_v41, %v10938_v27  ;;  %v4359_v27 = vmul.f32 %v7472_v39, %v10904_v17 }
0x1f61   :  { %7041 = vpow2.f32 %v4472_v40  ;;  %4527 = vmatmul.f32.gmra.mxu2 %v10968_v30  ;;  %v7470_v40 = vld [vmem:[%s12079_s10 + $0x98] sm:$0xff] }
0x1f62   :  { %7043 = vpow2.f32 %v4474_v50  ;;  %v4361_v46 = vmul.f32 %v7470_v40, %v10936_v44  ;;  %v7471_v50 = vld [vmem:[%s12079_s10 + $0x90] sm:$0xff]  ;;  %v4358_v44 = vmul.f32 %v7473_v3, %v10890_v60 }
0x1f63   :  { %v4360_v28 = vmul.f32 %v7471_v50, %v10922_v61 }
0x1f65   :  { %v4330_v56 = vpop.f32.mrf.mxu3 }
0x1f66   :  { %v4370_v0 = vmul.f32 %v7461_v2, %v4330_v56 }
0x1f67   :  { %v10972_v36 = vpop.eup %7041 }
0x1f68   :  { %v10974_v1 = vpop.eup %7043  ;;  %4501 = vmatmul.f32.gmra.mxu0 %v10972_v36 }
0x1f69   :  { %4530 = vmatmul.f32.gmra.mxu2 %v10974_v1 }
0x1f6d   :  { %v4333_v9 = vpop.f32.mrf.mxu3 }
0x1f6e   :  { %v4371_v54 = vmul.f32 %v7459_v59, %v4333_v9 }
0x1f75   :  { %v4336_v12 = vpop.f32.mrf.mxu3 }
0x1f76   :  { %v4372_v8 = vmul.f32 %v7460_v22, %v4336_v12 }
0x1f7d   :  { %v4339_v13 = vpop.f32.mrf.mxu3 }
0x1f7e   :  { %v4373_v20 = vmul.f32 %v7458_v55, %v4339_v13 }
0x1f80   :  { %4649 = vmatpush.msrb.mxu0 %v4373_v20 }
0x1f82   :  { %4650 = vmatpush.msrb.mxu0 %v4372_v8 }
0x1f84   :  { %4651 = vmatpush.msrb.mxu0 %v4371_v54 }
0x1f86   :  { %4652 = vmatpush.msrb.mxu0 %v4370_v0 }
0x1f88   :  { %4653 = vmatpush.msrb.mxu0 %v4369_v18 }
0x1f8a   :  { %4654 = vmatpush.msrb.mxu0 %v4368_v15 }
0x1f8c   :  { %4655 = vmatpush.msrb.mxu0 %v4367_v21 }
0x1f8e   :  { %4656 = vmatpush.msrb.mxu0 %v4366_v35 }
0x1f90   :  { %4657 = vmatpush.msrb.mxu0 %v4365_v45 }
0x1f92   :  { %4658 = vmatpush.msrb.mxu0 %v4364_v26 }
0x1f94   :  { %4659 = vmatpush.msrb.mxu0 %v4363_v24 }
0x1f96   :  { %4660 = vmatpush.msrb.mxu0 %v4362_v31 }
0x1f98   :  { %4661 = vmatpush.msrb.mxu0 %v4361_v46  ;;  %v6601_v46 = vld [vmem:[%s12082_s18 + $0x78] sm:$0xff] }
0x1f99   :  { %4712 = vmatpush.msrb.mxu1 %v6601_v46 }
0x1f9a   :  { %4662 = vmatpush.msrb.mxu0 %v4360_v28 }
0x1f9c   :  { %4663 = vmatpush.msrb.mxu0 %v4359_v27 }
0x1f9e   :  { %4664 = vmatpush.msrb.mxu0 %v4358_v44 }
0x1fcd   :  { %v4493_v56 = vpop.f32.mrf.mxu0 }
0x1fd4   :  { %v4522_v9 = vpop.f32.mrf.mxu2 }
0x1fd5   :  { %v4523_v61 = vadd.f32 %v4522_v9, %v4493_v56  ;;  %v4496_v12 = vpop.f32.mrf.mxu0 }
0x1fd7   :  { %6590 = vmatmul.msk.f32.vlgmr.msra.gmra.mxu0 %vm178_vm8, %v4523_v61  ;;  %6594 = vmatmul.msk.f32.vlgmr.msra.gmra.mxu1 %vm178_vm8, %v4523_v61 }
0x1fdc   :  { %v4525_v13 = vpop.f32.mrf.mxu2 }
0x1fdd   :  { %v4526_v17 = vadd.f32 %v4525_v13, %v4496_v12  ;;  %v4499_v55 = vpop.f32.mrf.mxu0 }
0x1fdf   :  { %6591 = vmatmul.msk.f32.gmra.mxu0 %vm178_vm8, %v4526_v17  ;;  %6595 = vmatmul.msk.f32.gmra.mxu1 %vm178_vm8, %v4526_v17  ;;  %v6838_v17 = vld [vmem:[%s12081_s19 + $0x3] ss:$0 sm:$0xff] }
0x1fe4   :  { %v4528_v20 = vpop.f32.mrf.mxu2 }
0x1fe5   :  { %v4529_v60 = vadd.f32 %v4528_v20, %v4499_v55  ;;  %v4502_v59 = vpop.f32.mrf.mxu0 }
0x1fe7   :  { %6592 = vmatmul.msk.f32.gmra.mxu0 %vm178_vm8, %v4529_v60  ;;  %6596 = vmatmul.msk.f32.gmra.mxu1 %vm178_vm8, %v4529_v60 }
0x1fec   :  { %v4531_v54 = vpop.f32.mrf.mxu2 }
0x1fed   :  { %v4532_v22 = vadd.f32 %v4531_v54, %v4502_v59 }
0x1fef   :  { %6593 = vmatmul.msk.f32.gmra.mxu0 %vm178_vm8, %v4532_v22  ;;  %6597 = vmatmul.msk.f32.gmra.mxu1 %vm178_vm8, %v4532_v22 }
0x2054   :  { %v4563_v8 = vpop.f32.mrf.mxu0  ;;  %v4592_v2 = vpop.f32.mrf.mxu1 }
0x2055   :  { %7045 = vrcp.f32 %v4563_v8 }
0x2056   :  { %7047 = vrcp.f32 %v4592_v2 }
0x205b   :  { %v7046_v0 = vpop.eup %7045 }
0x205c   :  { %v7048_v58 = vpop.eup %7047  ;;  %v4612_v18 = vmul.f32 %v7046_v0, %v10950_v4  ;;  %v4566_v10 = vpop.f32.mrf.mxu0 }
0x205d   :  { %v4595_v15 = vpop.f32.mrf.mxu1  ;;  %v4613_v19 = vmul.f32 %v7048_v58, %v10952_v7  ;;  %7049 = vrcp.f32 %v4566_v10 }
0x205e   :  { %7051 = vrcp.f32 %v4595_v15  ;;  %4636 = vmatmul.f32.vlgmr.msra.gmra.mxu2 %v4612_v18 }
0x205f   :  { %4665 = vmatmul.f32.vlgmr.msrb.gmra.mxu0 %v4613_v19 }
0x2063   :  { %v7050_v21 = vpop.eup %7049 }
0x2064   :  { %v7052_v57 = vpop.eup %7051  ;;  %v4569_v35 = vpop.f32.mrf.mxu0  ;;  %v4614_v45 = vmul.f32 %v7050_v21, %v10958_v37 }
0x2065   :  { %v4598_v42 = vpop.f32.mrf.mxu1  ;;  %7053 = vrcp.f32 %v4569_v35  ;;  %v4615_v43 = vmul.f32 %v7052_v57, %v10960_v29 }
0x2066   :  { %7055 = vrcp.f32 %v4598_v42  ;;  %4639 = vmatmul.f32.gmra.mxu2 %v4614_v45 }
0x2067   :  { %4668 = vmatmul.f32.gmra.mxu0 %v4615_v43 }
0x206b   :  { %v7054_v4 = vpop.eup %7053 }
0x206c   :  { %v7056_v26 = vpop.eup %7055  ;;  %v4572_v6 = vpop.f32.mrf.mxu0  ;;  %v4616_v24 = vmul.f32 %v7054_v4, %v10966_v11  ;;  %v6600_v11 = vld [vmem:[%s12082_s18 + $0x70] sm:$0xff] }
0x206d   :  { %v4601_v7 = vpop.f32.mrf.mxu1  ;;  %7057 = vrcp.f32 %v4572_v6  ;;  %v4617_v41 = vmul.f32 %v7056_v26, %v10968_v30  ;;  %4713 = vmatpush.msrb.mxu1 %v6600_v11  ;;  %v6599_v30 = vld [vmem:[%s12082_s18 + $0x68] sm:$0xff] }
0x206e   :  { %7059 = vrcp.f32 %v4601_v7  ;;  %4642 = vmatmul.f32.gmra.mxu2 %v4616_v24 }
0x206f   :  { %4671 = vmatmul.f32.gmra.mxu0 %v4617_v41  ;;  %4714 = vmatpush.msrb.mxu1 %v6599_v30 }
0x2073   :  { %v7058_v31 = vpop.eup %7057 }
0x2074   :  { %v7060_v37 = vpop.eup %7059  ;;  %v4618_v40 = vmul.f32 %v7058_v31, %v10972_v36  ;;  %v6598_v36 = vld [vmem:[%s12082_s18 + $0x60] sm:$0xff] }
0x2075   :  { %v4619_v29 = vmul.f32 %v7060_v37, %v10974_v1  ;;  %4715 = vmatpush.msrb.mxu1 %v6598_v36 }
0x2076   :  { %4645 = vmatmul.f32.gmra.mxu2 %v4618_v40 }
0x2077   :  { %4674 = vmatmul.f32.gmra.mxu0 %v4619_v29 }
0x20dc   :  { %v4666_v1 = vpop.f32.mrf.mxu0 }
0x20e1   :  { %v4637_v50 = vpop.f32.mrf.mxu2 }
0x20e2   :  { %v4667_v28 = vadd.f32 %v4666_v1, %v4637_v50 }
0x20e4   :  { %6603 = vmatmul.msk.f32.vlgmr.msrb.gmra.mxu1 %vm522_vm6, %v4667_v28  ;;  %v4669_v39 = vpop.f32.mrf.mxu0  ;;  %v6612_v28 = vld [vmem:[%s12086_s22 + $0x78] sm:$0xff] }
0x20e5   :  { %4877 = vmatpush.msrb.mxu2 %v6612_v28 }
0x20e9   :  { %v4640_v27 = vpop.f32.mrf.mxu2 }
0x20ea   :  { %v4670_v3 = vadd.f32 %v4669_v39, %v4640_v27  ;;  %v6611_v39 = vld [vmem:[%s12086_s22 + $0x70] sm:$0xff]  ;;  %v6610_v27 = vld [vmem:[%s12086_s22 + $0x68] sm:$0xff] }
0x20eb   :  { %4878 = vmatpush.msrb.mxu2 %v6611_v39 }
0x20ec   :  { %6604 = vmatmul.msk.f32.gmra.mxu1 %vm522_vm6, %v4670_v3  ;;  %v4672_v44 = vpop.f32.mrf.mxu0  ;;  %v6609_v3 = vld [vmem:[%s12086_s22 + $0x60] sm:$0xff] }
0x20ed   :  { %4879 = vmatpush.msrb.mxu2 %v6610_v27 }
0x20ef   :  { %4880 = vmatpush.msrb.mxu2 %v6609_v3 }
0x20f1   :  { %v4643_v56 = vpop.f32.mrf.mxu2 }
0x20f2   :  { %v4673_v9 = vadd.f32 %v4672_v44, %v4643_v56  ;;  %v7474_v44 = vld [vmem:[%s12118_s29 + $0x30] sm:$0xff] }
0x20f3   :  { %5214 = vmatpush.msra.mxu2 %v7474_v44 }
0x20f4   :  { %6605 = vmatmul.msk.f32.gmra.mxu1 %vm522_vm6, %v4673_v9  ;;  %v4675_v61 = vpop.f32.mrf.mxu0  ;;  %v7475_v9 = vld [vmem:[%s12118_s29 + $0x20] sm:$0xff] }
0x20f5   :  { %5215 = vmatpush.msra.mxu2 %v7475_v9 }
0x20f9   :  { %v4646_v12 = vpop.f32.mrf.mxu2 }
0x20fa   :  { %v4676_v13 = vadd.f32 %v4675_v61, %v4646_v12  ;;  %v7476_v12 = vld [vmem:[%s12118_s29 + $0x10] sm:$0xff] }
0x20fb   :  { %5216 = vmatpush.msra.mxu2 %v7476_v12 }
0x20fc   :  { %6606 = vmatmul.msk.f32.gmra.mxu1 %vm522_vm6, %v4676_v13 }
0x2161   :  { %v4717_v55 = vpop.f32.mrf.mxu1 }
0x2162   :  { %v4718_v20 = vadd.f32 %v6838_v17, %v4717_v55 }
0x2164   :  { %v4729_v60 = vadd.f32 %v4718_v20, %v10454_v53 }
0x2166   :  { %v11071_v59 = vadd.f32 %v4729_v60, %v8757_v48 }
0x2168   :  { %v4741_v54 = vsel %vm522_vm6, %v11071_v59, 0.0 }
0x2169   :  { %v4720_v22 = vpop.f32.mrf.mxu1  ;;  %4742 = vadd.xlane.f32.xlu2 %v4741_v54 }
0x216a   :  { %v4721_v8 = vadd.f32 %v6838_v17, %v4720_v22 }
0x216c   :  { %v4730_v2 = vadd.f32 %v4721_v8, %v10459_v14 }
0x216e   :  { %v11077_v0 = vadd.f32 %v4730_v2, %v8768_v25 }
0x2170   :  { %v4744_v58 = vsel %vm522_vm6, %v11077_v0, 0.0 }
0x2171   :  { %v4723_v18 = vpop.f32.mrf.mxu1  ;;  %4745 = vadd.xlane.f32.xlu2 %v4744_v58 }
0x2172   :  { %v4724_v53 = vadd.f32 %v6838_v17, %v4723_v18 }
0x2174   :  { %v4731_v10 = vadd.f32 %v4724_v53, %v10464_v32 }
0x2176   :  { %v11083_v15 = vadd.f32 %v4731_v10, %v8779_v23 }
0x2178   :  { %v4747_v19 = vsel %vm522_vm6, %v11083_v15, 0.0 }
0x2179   :  { %4748 = vadd.xlane.f32.xlu0 %v4747_v19  ;;  %v4726_v21 = vpop.f32.mrf.mxu1 }
0x217a   :  { %v4727_v14 = vadd.f32 %v6838_v17, %v4726_v21  ;;  %v7477_v17 = vld [vmem:[%s12118_s29] sm:$0xff] }
0x217b   :  { %5217 = vmatpush.msra.mxu2 %v7477_v17  ;;  %v6839_v21 = vld [vmem:[%s12083_s20 + $0x3] ss:$0 sm:$0xff] }
0x217c   :  { %v4732_v57 = vadd.f32 %v4727_v14, %v10469_v62 }
0x217e   :  { %v11089_v35 = vadd.f32 %v4732_v57, %v8790_v16 }
0x2180   :  { %v4750_v42 = vsel %vm522_vm6, %v11089_v35, 0.0 }
0x2181   :  { %4751 = vadd.xlane.f32.xlu2 %v4750_v42  ;;  %v6633_v42 = vld [vmem:[%s12087_s24 + $0x1f8] sm:$0xff] }
0x2182   :  { %4952 = vmatpush.msra.mxu0 %v6633_v42  ;;  %v6622_v42 = vld [vmem:[%s12087_s24 + $0x1a0] sm:$0xff] }
0x21dc   :  { %v4743_v45 = vpop.xlane.xlu2 %4742 }
0x21dd   :  { %v4753_v32 = vmul.f32 %v4743_v45, %v7802_v38  ;;  %v6632_v45 = vld [vmem:[%s12087_s24 + $0x1f0] sm:$0xff] }
0x21de   :  { %4953 = vmatpush.msra.mxu0 %v6632_v45  ;;  %v6621_v45 = vld [vmem:[%s12087_s24 + $0x198] sm:$0xff] }
0x21df   :  { %v11095_v43 = vsub.f32 %v11071_v59, %v4753_v32 }
0x21e1   :  { %v4761_v4 = vmul.f32 %v11095_v43, %v11095_v43 }
0x21e3   :  { %v4765_v26 = vsel %vm522_vm6, %v4761_v4, 0.0 }
0x21e4   :  { %4766 = vadd.xlane.f32.xlu0 %v4765_v26  ;;  %v4746_v62 = vpop.xlane.xlu2 %4745  ;;  %v6840_v26 = vld [vmem:[%s12084_s21 + $0x3] ss:$0 sm:$0xff] }
0x21e5   :  { %v4754_v6 = vmul.f32 %v4746_v62, %v7802_v38 }
0x21e7   :  { %v11102_v7 = vsub.f32 %v11077_v0, %v4754_v6  ;;  %v6631_v6 = vld [vmem:[%s12087_s24 + $0x1e8] sm:$0xff] }
0x21e8   :  { %4954 = vmatpush.msra.mxu0 %v6631_v6  ;;  %v7479_v6 = vld [vmem:[%s12118_s29 + $0x28] sm:$0xff] }
0x21e9   :  { %v4762_v24 = vmul.f32 %v11102_v7, %v11102_v7 }
0x21eb   :  { %v4768_v41 = vsel %vm522_vm6, %v4762_v24, 0.0 }
0x21ec   :  { %v4749_v31 = vpop.xlane.xlu0 %4748  ;;  %4769 = vadd.xlane.f32.xlu1 %v4768_v41 }
0x21ed   :  { %v4755_v37 = vmul.f32 %v4749_v31, %v7802_v38 }
0x21ef   :  { %v11109_v40 = vsub.f32 %v11083_v15, %v4755_v37 }
0x21f1   :  { %v4763_v29 = vmul.f32 %v11109_v40, %v11109_v40 }
0x21f3   :  { %v4771_v46 = vsel %vm522_vm6, %v4763_v29, 0.0  ;;  %v6630_v29 = vld [vmem:[%s12087_s24 + $0x1e0] sm:$0xff] }
0x21f4   :  { %4772 = vadd.xlane.f32.xlu2 %v4771_v46  ;;  %v4752_v11 = vpop.xlane.xlu2 %4751  ;;  %4955 = vmatpush.msra.mxu0 %v6630_v29 }
0x21f5   :  { %v4756_v30 = vmul.f32 %v4752_v11, %v7802_v38 }
0x21f7   :  { %v11116_v36 = vsub.f32 %v11089_v35, %v4756_v30 }
0x21f9   :  { %v4764_v1 = vmul.f32 %v11116_v36, %v11116_v36 }
0x21fb   :  { %v4774_v50 = vsel %vm522_vm6, %v4764_v1, 0.0 }
0x21fc   :  { %4775 = vadd.xlane.f32.xlu0 %v4774_v50 }
0x2257   :  { %v4767_v56 = vpop.xlane.xlu0 %4766 }
0x2258   :  { %v4777_v61 = vmul.f32 %v4767_v56, %v7802_v38 }
0x225a   :  { %v4781_v13 = vadd.f32 1e-06, %v4777_v61 }
0x225c   :  { %7061 = vrsqrt.f32 %v4781_v13  ;;  %vm4791_vm14 = vweird.f32 %v4781_v13 }
0x225f   :  { %v4770_v55 = vpop.xlane.xlu1 %4769 }
0x2260   :  { %v4778_v20 = vmul.f32 %v4770_v55, %v7802_v38 }
0x2262   :  { %v7062_v60 = vpop.eup %7061  ;;  %v4782_v54 = vadd.f32 1e-06, %v4778_v20 }
0x2263   :  { %v4786_v22 = vmul.f32 %v7062_v60, %v4781_v13  ;;  %vm4792_vm13 = vweird.f32 %v7062_v60 }
0x2264   :  { %7063 = vrsqrt.f32 %v4782_v54  ;;  %vm4793_vm1 = vmor %vm4791_vm14, %vm4792_vm13  ;;  %vm4801_vm3 = vweird.f32 %v4782_v54 }
0x2265   :  { %v4787_v8 = vmul.f32 %v7062_v60, %v4786_v22 }
0x2267   :  { %v4788_v2 = vmul.f32 0.5, %v4787_v8  ;;  %v4773_v58 = vpop.xlane.xlu2 %4772 }
0x2268   :  { %v4779_v18 = vmul.f32 %v4773_v58, %v7802_v38 }
0x2269   :  { %v4789_v53 = vsub.f32 1.5, %v4788_v2 }
0x226a   :  { %v7064_v10 = vpop.eup %7063  ;;  %v4783_v19 = vadd.f32 1e-06, %v4779_v18 }
0x226b   :  { %v4790_v14 = vmul.f32 %v7062_v60, %v4789_v53  ;;  %v4796_v57 = vmul.f32 %v7064_v10, %v4782_v54  ;;  %vm4802_vm2 = vweird.f32 %v7064_v10 }
0x226c   :  { %7065 = vrsqrt.f32 %v4783_v19  ;;  %vm4803_vm4 = vmor %vm4801_vm3, %vm4802_vm2  ;;  %vm4811_vm7 = vweird.f32 %v4783_v19 }
0x226d   :  { %v4794_v32 = vsel %vm4793_vm1, %v7062_v60, %v4790_v14  ;;  %v4797_v4 = vmul.f32 %v7064_v10, %v4796_v57  ;;  %v6624_v14 = vld [vmem:[%s12087_s24 + $0x1b0] sm:$0xff]  ;;  %v6623_v57 = vld [vmem:[%s12087_s24 + $0x1a8] sm:$0xff] }
0x226e   :  { %v4825_v62 = vmul.f32 %v4794_v32, %v11095_v43  ;;  %v6620_v32 = vld [vmem:[%s12087_s24 + $0x190] sm:$0xff] }
0x226f   :  { %v4798_v24 = vmul.f32 0.5, %v4797_v4  ;;  %v4776_v41 = vpop.xlane.xlu0 %4775  ;;  %v6619_v4 = vld [vmem:[%s12087_s24 + $0x188] sm:$0xff] }
0x2270   :  { %v4832_v31 = vmul.f32 %v6839_v21, %v4825_v62  ;;  %v4780_v37 = vmul.f32 %v4776_v41, %v7802_v38  ;;  %v7478_v62 = vld [vmem:[%s12118_s29 + $0x38] sm:$0xff] }
0x2271   :  { %v4799_v46 = vsub.f32 1.5, %v4798_v24  ;;  %v6841_v24 = vld [vmem:[%s12085_s23 + $0x3] ss:$0 sm:$0xff]  ;;  %v7480_v41 = vld [vmem:[%s12118_s29 + $0x18] sm:$0xff] }
0x2272   :  { %v7066_v11 = vpop.eup %7065  ;;  %v4839_v30 = vadd.f32 %v6840_v26, %v4832_v31  ;;  %v4784_v43 = vadd.f32 1e-06, %v4780_v37  ;;  %v7481_v31 = vld [vmem:[%s12118_s29 + $0x8] sm:$0xff] }
0x2273   :  { %v4800_v1 = vmul.f32 %v7064_v10, %v4799_v46  ;;  %v4806_v50 = vmul.f32 %v7066_v11, %v4783_v19  ;;  %vm4812_vm5 = vweird.f32 %v7066_v11  ;;  %v6627_v19 = vld [vmem:[%s12087_s24 + $0x1c8] sm:$0xff] }
0x2274   :  { %7067 = vrsqrt.f32 %v4784_v43  ;;  %6614 = vmatmul.msk.f32.vlgmr.msrb.gmra.mxu2 %vm522_vm6, %v4839_v30  ;;  %vm4813_vm9 = vmor %vm4811_vm7, %vm4812_vm5  ;;  %vm4821_vm11 = vweird.f32 %v4784_v43 }
0x2275   :  { %v4804_v28 = vsel %vm4803_vm4, %v7064_v10, %v4800_v1  ;;  %v4807_v39 = vmul.f32 %v7066_v11, %v4806_v50  ;;  %v6628_v10 = vld [vmem:[%s12087_s24 + $0x1d0] sm:$0xff] }
0x2276   :  { %v4826_v27 = vmul.f32 %v4804_v28, %v11102_v7 }
0x2277   :  { %v4808_v3 = vmul.f32 0.5, %v4807_v39 }
0x2278   :  { %v4833_v44 = vmul.f32 %v6839_v21, %v4826_v27 }
0x2279   :  { %v4809_v56 = vsub.f32 1.5, %v4808_v3 }
0x227a   :  { %v7068_v9 = vpop.eup %7067  ;;  %v4840_v61 = vadd.f32 %v6840_v26, %v4833_v44 }
0x227b   :  { %v4810_v12 = vmul.f32 %v7066_v11, %v4809_v56  ;;  %v4816_v13 = vmul.f32 %v7068_v9, %v4784_v43  ;;  %vm4822_vm10 = vweird.f32 %v7068_v9 }
0x227c   :  { %6615 = vmatmul.msk.f32.gmra.mxu2 %vm522_vm6, %v4840_v61  ;;  %vm4823_vm12 = vmor %vm4821_vm11, %vm4822_vm10 }
0x227d   :  { %v4814_v17 = vsel %vm4813_vm9, %v7066_v11, %v4810_v12  ;;  %v4817_v55 = vmul.f32 %v7068_v9, %v4816_v13 }
0x227e   :  { %v4827_v20 = vmul.f32 %v4814_v17, %v11109_v40  ;;  %v6629_v40 = vld [vmem:[%s12087_s24 + $0x1d8] sm:$0xff] }
0x227f   :  { %v4818_v60 = vmul.f32 0.5, %v4817_v55  ;;  %4956 = vmatpush.msra.mxu0 %v6629_v40 }
0x2280   :  { %v4834_v54 = vmul.f32 %v6839_v21, %v4827_v20 }
0x2281   :  { %v4819_v22 = vsub.f32 1.5, %v4818_v60  ;;  %4957 = vmatpush.msra.mxu0 %v6628_v10 }
0x2282   :  { %v4841_v7 = vadd.f32 %v6840_v26, %v4834_v54 }
0x2283   :  { %v4820_v8 = vmul.f32 %v7068_v9, %v4819_v22  ;;  %4958 = vmatpush.msra.mxu0 %v6627_v19 }
0x2284   :  { %6616 = vmatmul.msk.f32.gmra.mxu2 %vm522_vm6, %v4841_v7 }
0x2285   :  { %v4824_v2 = vsel %vm4823_vm12, %v7068_v9, %v4820_v8 }
0x2286   :  { %v4828_v58 = vmul.f32 %v4824_v2, %v11116_v36  ;;  %v6626_v36 = vld [vmem:[%s12087_s24 + $0x1c0] sm:$0xff] }
0x2287   :  { %4959 = vmatpush.msra.mxu0 %v6626_v36 }
0x2288   :  { %v4835_v18 = vmul.f32 %v6839_v21, %v4828_v58  ;;  %v6625_v21 = vld [vmem:[%s12087_s24 + $0x1b8] sm:$0xff] }
0x2289   :  { %4960 = vmatpush.msra.mxu0 %v6625_v21 }
0x228a   :  { %v4842_v53 = vadd.f32 %v6840_v26, %v4835_v18  ;;  %v6618_v26 = vld [vmem:[%s12087_s24 + $0x180] sm:$0xff] }
0x228b   :  { %4961 = vmatpush.msra.mxu0 %v6624_v14 }
0x228c   :  { %6617 = vmatmul.msk.f32.gmra.mxu2 %vm522_vm6, %v4842_v53 }
0x228d   :  { %4962 = vmatpush.msra.mxu0 %v6623_v57 }
0x228f   :  { %4963 = vmatpush.msra.mxu0 %v6622_v42 }
0x2291   :  { %4964 = vmatpush.msra.mxu0 %v6621_v45 }
0x2293   :  { %4965 = vmatpush.msra.mxu0 %v6620_v32 }
0x2295   :  { %4966 = vmatpush.msra.mxu0 %v6619_v4 }
0x2297   :  { %4967 = vmatpush.msra.mxu0 %v6618_v26 }
0x2299   :  { %5243 = vmatpush.msrb.mxu0 %v7478_v62 }
0x229b   :  { %5244 = vmatpush.msrb.mxu0 %v7479_v6 }
0x229d   :  { %5245 = vmatpush.msrb.mxu0 %v7480_v41 }
0x229f   :  { %5246 = vmatpush.msrb.mxu0 %v7481_v31 }
0x22f7   :  { %v4882_v37 = vpop.f32.mrf.mxu2 }
0x22f8   :  { %v4883_v29 = vadd.f32 %v6841_v24, %v4882_v37 }
0x22fa   :  { %v4898_v46 = vmul.f32 0.044715, %v4883_v29  ;;  %v4894_v17 = vmul.f32 0.5, %v4883_v29 }
0x22fc   :  { %v4902_v11 = vmul.f32 %v4898_v46, %v4883_v29 }
0x22fe   :  { %v4906_v30 = vmul.f32 %v4902_v11, %v4883_v29 }
0x22ff   :  { %v4885_v43 = vpop.f32.mrf.mxu2 }
0x2300   :  { %v4910_v1 = vadd.f32 %v4906_v30, %v4883_v29  ;;  %v4886_v50 = vadd.f32 %v6841_v24, %v4885_v43 }
0x2302   :  { %v4914_v28 = vmul.f32 0.7978846, %v4910_v1  ;;  %v4899_v39 = vmul.f32 0.044715, %v4886_v50  ;;  %v4895_v53 = vmul.f32 0.5, %v4886_v50 }
0x2304   :  { %7069 = vtanh.f32 %v4914_v28  ;;  %v4903_v27 = vmul.f32 %v4899_v39, %v4886_v50 }
0x2306   :  { %v4907_v3 = vmul.f32 %v4903_v27, %v4886_v50 }
0x2307   :  { %v4888_v44 = vpop.f32.mrf.mxu2 }
0x2308   :  { %v4889_v56 = vadd.f32 %v6841_v24, %v4888_v44  ;;  %v4911_v9 = vadd.f32 %v4907_v3, %v4886_v50 }
0x230a   :  { %v7070_v61 = vpop.eup %7069  ;;  %v4900_v12 = vmul.f32 0.044715, %v4889_v56  ;;  %v4915_v13 = vmul.f32 0.7978846, %v4911_v9  ;;  %v4896_v42 = vmul.f32 0.5, %v4889_v56 }
0x230b   :  { %v4922_v55 = vadd.f32 1.0, %v7070_v61 }
0x230c   :  { %7071 = vtanh.f32 %v4915_v13  ;;  %v4904_v20 = vmul.f32 %v4900_v12, %v4889_v56 }
0x230d   :  { %v4926_v60 = vmul.f32 %v4922_v55, %v4894_v17 }
0x230e   :  { %v4908_v54 = vmul.f32 %v4904_v20, %v4889_v56 }
0x230f   :  { %v4891_v22 = vpop.f32.mrf.mxu2  ;;  %4968 = vmatmul.f32.vlgmr.msra.gmra.mxu0 %v4926_v60 }
0x2310   :  { %v4892_v7 = vadd.f32 %v6841_v24, %v4891_v22  ;;  %v4912_v8 = vadd.f32 %v4908_v54, %v4889_v56  ;;  %v6842_v24 = vld [vmem:[%s12088_s25 + $0x3] ss:$0 sm:$0xff] }
0x2312   :  { %v7072_v2 = vpop.eup %7071  ;;  %v4901_v58 = vmul.f32 0.044715, %v4892_v7  ;;  %v4916_v18 = vmul.f32 0.7978846, %v4912_v8  ;;  %v4897_v26 = vmul.f32 0.5, %v4892_v7 }
0x2313   :  { %v4923_v40 = vadd.f32 1.0, %v7072_v2 }
0x2314   :  { %7073 = vtanh.f32 %v4916_v18  ;;  %v4905_v10 = vmul.f32 %v4901_v58, %v4892_v7 }
0x2315   :  { %v4927_v19 = vmul.f32 %v4923_v40, %v4895_v53  ;;  %v6640_v40 = vld [vmem:[%s12119_s28 + $0x98] sm:$0xff] }
0x2316   :  { %v4909_v36 = vmul.f32 %v4905_v10, %v4892_v7  ;;  %5125 = vmatpush.msra.mxu1 %v6640_v40  ;;  %v6639_v10 = vld [vmem:[%s12119_s28 + $0x90] sm:$0xff] }
0x2317   :  { %4971 = vmatmul.f32.gmra.mxu0 %v4927_v19  ;;  %v6638_v19 = vld [vmem:[%s12119_s28 + $0x88] sm:$0xff] }
0x2318   :  { %v4913_v21 = vadd.f32 %v4909_v36, %v4892_v7  ;;  %5126 = vmatpush.msra.mxu1 %v6639_v10  ;;  %v6637_v36 = vld [vmem:[%s12119_s28 + $0x80] sm:$0xff] }
0x231a   :  { %v7074_v14 = vpop.eup %7073  ;;  %v4917_v57 = vmul.f32 0.7978846, %v4913_v21  ;;  %5127 = vmatpush.msra.mxu1 %v6638_v19 }
0x231b   :  { %v4924_v45 = vadd.f32 1.0, %v7074_v14 }
0x231c   :  { %7075 = vtanh.f32 %v4917_v57  ;;  %5128 = vmatpush.msra.mxu1 %v6637_v36 }
0x231d   :  { %v4928_v32 = vmul.f32 %v4924_v45, %v4896_v42 }
0x231f   :  { %4974 = vmatmul.f32.gmra.mxu0 %v4928_v32 }
0x2322   :  { %v7076_v4 = vpop.eup %7075 }
0x2323   :  { %v4925_v62 = vadd.f32 1.0, %v7076_v4 }
0x2325   :  { %v4929_v6 = vmul.f32 %v4925_v62, %v4897_v26 }
0x2327   :  { %4977 = vmatmul.f32.gmra.mxu0 %v4929_v6 }
0x238c   :  { %v4969_v41 = vpop.f32.mrf.mxu0 }
0x238d   :  { %v4970_v31 = vadd.f32 %v6842_v24, %v4969_v41 }
0x238f   :  { %v11230_v37 = vadd.f32 %v4970_v31, %v11071_v59 }
0x2391   :  { %v4989_v29 = vsel %vm522_vm6, %v11230_v37, 0.0 }
0x2392   :  { %4990 = vadd.xlane.f32.xlu2 %v4989_v29 }
0x2394   :  { %v4972_v46 = vpop.f32.mrf.mxu0 }
0x2395   :  { %v4973_v11 = vadd.f32 %v6842_v24, %v4972_v46 }
0x2397   :  { %v11235_v30 = vadd.f32 %v4973_v11, %v11077_v0 }
0x2399   :  { %v4992_v43 = vsel %vm522_vm6, %v11235_v30, 0.0 }
0x239a   :  { %4993 = vadd.xlane.f32.xlu0 %v4992_v43 }
0x239c   :  { %v4975_v1 = vpop.f32.mrf.mxu0 }
0x239d   :  { %v4976_v50 = vadd.f32 %v6842_v24, %v4975_v1  ;;  %v6843_v1 = vld [vmem:[%s12120_s0 + $0x4] ss:$0 sm:$0xff] }
0x239f   :  { %v11240_v28 = vadd.f32 %v4976_v50, %v11083_v15 }
0x23a1   :  { %v4995_v59 = vsel %vm522_vm6, %v11240_v28, 0.0 }
0x23a2   :  { %4996 = vadd.xlane.f32.xlu2 %v4995_v59 }
0x23a4   :  { %v4978_v39 = vpop.f32.mrf.mxu0 }
0x23a5   :  { %v4979_v27 = vadd.f32 %v6842_v24, %v4978_v39  ;;  %v6844_v39 = vld [vmem:[%s12121_s27 + $0x4] ss:$0 sm:$0xff] }
0x23a7   :  { %v11245_v3 = vadd.f32 %v4979_v27, %v11089_v35 }
0x23a9   :  { %v4998_v0 = vsel %vm522_vm6, %v11245_v3, 0.0 }
0x23aa   :  { %4999 = vadd.xlane.f32.xlu0 %v4998_v0 }
0x2405   :  { %v4991_v44 = vpop.xlane.xlu2 %4990 }
0x2406   :  { %v5001_v56 = vmul.f32 %v4991_v44, %v7802_v38 }
0x2408   :  { %v5005_v9 = vsub.f32 %v11230_v37, %v5001_v56 }
0x240a   :  { %v5009_v15 = vmul.f32 %v5005_v9, %v5005_v9 }
0x240c   :  { %v5013_v61 = vsel %vm522_vm6, %v5009_v15, 0.0 }
0x240d   :  { %v4994_v12 = vpop.xlane.xlu0 %4993  ;;  %5014 = vadd.xlane.f32.xlu2 %v5013_v61 }
0x240e   :  { %v5002_v13 = vmul.f32 %v4994_v12, %v7802_v38 }
0x2410   :  { %v11254_v17 = vsub.f32 %v11235_v30, %v5002_v13 }
0x2412   :  { %v5010_v35 = vmul.f32 %v11254_v17, %v11254_v17 }
0x2414   :  { %v5016_v55 = vsel %vm522_vm6, %v5010_v35, 0.0 }
0x2415   :  { %5017 = vadd.xlane.f32.xlu0 %v5016_v55  ;;  %v4997_v20 = vpop.xlane.xlu2 %4996 }
0x2416   :  { %v5003_v60 = vmul.f32 %v4997_v20, %v7802_v38 }
0x2418   :  { %v11261_v54 = vsub.f32 %v11240_v28, %v5003_v60 }
0x241a   :  { %v5011_v22 = vmul.f32 %v11261_v54, %v11261_v54 }
0x241c   :  { %v5019_v7 = vsel %vm522_vm6, %v5011_v22, 0.0 }
0x241d   :  { %v5000_v8 = vpop.xlane.xlu0 %4999  ;;  %5020 = vadd.xlane.f32.xlu2 %v5019_v7 }
0x241e   :  { %v5004_v2 = vmul.f32 %v5000_v8, %v7802_v38 }
0x2420   :  { %v11268_v58 = vsub.f32 %v11245_v3, %v5004_v2 }
0x2422   :  { %v5012_v18 = vmul.f32 %v11268_v58, %v11268_v58 }
0x2424   :  { %v5022_v53 = vsel %vm522_vm6, %v5012_v18, 0.0 }
0x2425   :  { %5023 = vadd.xlane.f32.xlu0 %v5022_v53 }
0x2480   :  { %v5015_v21 = vpop.xlane.xlu2 %5014 }
0x2481   :  { %v5025_v14 = vmul.f32 %v5015_v21, %v7802_v38 }
0x2483   :  { %v5029_v57 = vadd.f32 1e-06, %v5025_v14 }
0x2485   :  { %7077 = vrsqrt.f32 %v5029_v57  ;;  %vm5039_vm14 = vweird.f32 %v5029_v57 }
0x2488   :  { %v5018_v42 = vpop.xlane.xlu0 %5017 }
0x2489   :  { %v5026_v45 = vmul.f32 %v5018_v42, %v7802_v38 }
0x248b   :  { %v7078_v32 = vpop.eup %7077  ;;  %v5030_v4 = vadd.f32 1e-06, %v5026_v45 }
0x248c   :  { %v5034_v26 = vmul.f32 %v7078_v32, %v5029_v57  ;;  %vm5040_vm13 = vweird.f32 %v7078_v32 }
0x248d   :  { %7079 = vrsqrt.f32 %v5030_v4  ;;  %vm5041_vm1 = vmor %vm5039_vm14, %vm5040_vm13  ;;  %vm5049_vm3 = vweird.f32 %v5030_v4 }
0x248e   :  { %v5035_v62 = vmul.f32 %v7078_v32, %v5034_v26 }
0x2490   :  { %v5036_v6 = vmul.f32 0.5, %v5035_v62  ;;  %v5021_v24 = vpop.xlane.xlu2 %5020 }
0x2491   :  { %v5027_v41 = vmul.f32 %v5021_v24, %v7802_v38 }
0x2492   :  { %v5037_v31 = vsub.f32 1.5, %v5036_v6 }
0x2493   :  { %v7080_v29 = vpop.eup %7079  ;;  %v5031_v46 = vadd.f32 1e-06, %v5027_v41 }
0x2494   :  { %v5038_v11 = vmul.f32 %v7078_v32, %v5037_v31  ;;  %v5044_v43 = vmul.f32 %v7080_v29, %v5030_v4  ;;  %vm5050_vm2 = vweird.f32 %v7080_v29 }
0x2495   :  { %7081 = vrsqrt.f32 %v5031_v46  ;;  %vm5051_vm4 = vmor %vm5049_vm3, %vm5050_vm2  ;;  %vm5059_vm7 = vweird.f32 %v5031_v46 }
0x2496   :  { %v5042_v50 = vsel %vm5041_vm1, %v7078_v32, %v5038_v11  ;;  %v5045_v59 = vmul.f32 %v7080_v29, %v5044_v43 }
0x2497   :  { %v5073_v27 = vmul.f32 %v5042_v50, %v5005_v9 }
0x2498   :  { %v5046_v0 = vmul.f32 0.5, %v5045_v59  ;;  %v5024_v44 = vpop.xlane.xlu0 %5023 }
0x2499   :  { %v5080_v56 = vmul.f32 %v6843_v1, %v5073_v27  ;;  %v5028_v15 = vmul.f32 %v5024_v44, %v7802_v38 }
0x249a   :  { %v5047_v61 = vsub.f32 1.5, %v5046_v0 }
0x249b   :  { %v7082_v12 = vpop.eup %7081  ;;  %v5087_v13 = vadd.f32 %v6844_v39, %v5080_v56  ;;  %v5032_v35 = vadd.f32 1e-06, %v5028_v15 }
0x249c   :  { %v5048_v55 = vmul.f32 %v7080_v29, %v5047_v61  ;;  %v5054_v20 = vmul.f32 %v7082_v12, %v5031_v46  ;;  %vm5060_vm5 = vweird.f32 %v7082_v12 }
0x249d   :  { %7083 = vrsqrt.f32 %v5032_v35  ;;  %6642 = vmatmul.msk.f32.vlgmr.msra.gmra.mxu1 %vm522_vm6, %v5087_v13  ;;  %vm5061_vm9 = vmor %vm5059_vm7, %vm5060_vm5  ;;  %vm5069_vm11 = vweird.f32 %v5032_v35  ;;  %v7482_v13 = vld [vmem:[%s12075_s8] sm:$0xff] }
0x249e   :  { %v5052_v60 = vsel %vm5051_vm4, %v7080_v29, %v5048_v55  ;;  %v5055_v22 = vmul.f32 %v7082_v12, %v5054_v20  ;;  %v7484_v55 = vld [vmem:[%s12075_s8 + $0x10] sm:$0xff]  ;;  %v7485_v20 = vld [vmem:[%s12075_s8 + $0x18] sm:$0xff] }
0x249f   :  { %v5074_v9 = vmul.f32 %v5052_v60, %v11254_v17  ;;  %v7486_v60 = vld [vmem:[%s12075_s8 + $0x20] sm:$0xff] }
0x24a0   :  { %v5056_v7 = vmul.f32 0.5, %v5055_v22  ;;  %v7487_v22 = vld [vmem:[%s12075_s8 + $0x28] sm:$0xff] }
0x24a1   :  { %v5081_v8 = vmul.f32 %v6843_v1, %v5074_v9  ;;  %v7488_v9 = vld [vmem:[%s12075_s8 + $0x30] sm:$0xff] }
0x24a2   :  { %v5057_v2 = vsub.f32 1.5, %v5056_v7  ;;  %v7489_v7 = vld [vmem:[%s12075_s8 + $0x38] sm:$0xff] }
0x24a3   :  { %v7084_v18 = vpop.eup %7083  ;;  %v5088_v53 = vadd.f32 %v6844_v39, %v5081_v8  ;;  %v7490_v8 = vld [vmem:[%s12075_s8 + $0x40] sm:$0xff] }
0x24a4   :  { %v5058_v40 = vmul.f32 %v7082_v12, %v5057_v2  ;;  %v5064_v10 = vmul.f32 %v7084_v18, %v5032_v35  ;;  %vm5070_vm10 = vweird.f32 %v7084_v18  ;;  %v7483_v35 = vld [vmem:[%s12075_s8 + $0x8] sm:$0xff] }
0x24a5   :  { %6643 = vmatmul.msk.f32.gmra.mxu1 %vm522_vm6, %v5088_v53  ;;  %vm5071_vm12 = vmor %vm5069_vm11, %vm5070_vm10  ;;  %v7491_v2 = vld [vmem:[%s12075_s8 + $0x48] sm:$0xff]  ;;  %v7493_v53 = vld [vmem:[%s12075_s8 + $0x58] sm:$0xff] }
0x24a6   :  { %v5062_v19 = vsel %vm5061_vm9, %v7082_v12, %v5058_v40  ;;  %v5065_v36 = vmul.f32 %v7084_v18, %v5064_v10  ;;  %v7494_v40 = vld [vmem:[%s12075_s8 + $0x60] sm:$0xff]  ;;  %v7495_v10 = vld [vmem:[%s12075_s8 + $0x68] sm:$0xff] }
0x24a7   :  { %v5075_v21 = vmul.f32 %v5062_v19, %v11261_v54  ;;  %v6845_v54 = vld [vmem:[%s12074_s17 + $0x4] ss:$0 sm:$0xff]  ;;  %v7496_v19 = vld [vmem:[%s12075_s8 + $0x70] sm:$0xff] }
0x24a8   :  { %v5066_v14 = vmul.f32 0.5, %v5065_v36  ;;  %v7497_v36 = vld [vmem:[%s12075_s8 + $0x78] sm:$0xff] }
0x24a9   :  { %v5082_v57 = vmul.f32 %v6843_v1, %v5075_v21  ;;  %v7498_v21 = vld [vmem:[%s12075_s8 + $0x80] sm:$0xff] }
0x24aa   :  { %v5067_v42 = vsub.f32 1.5, %v5066_v14  ;;  %v7499_v14 = vld [vmem:[%s12075_s8 + $0x88] sm:$0xff] }
0x24ab   :  { %v5089_v17 = vadd.f32 %v6844_v39, %v5082_v57 }
0x24ac   :  { %v5068_v45 = vmul.f32 %v7084_v18, %v5067_v42  ;;  %v7500_v42 = vld [vmem:[%s12075_s8 + $0x90] sm:$0xff] }
0x24ad   :  { %6644 = vmatmul.msk.f32.gmra.mxu1 %vm522_vm6, %v5089_v17 }
0x24ae   :  { %v5072_v32 = vsel %vm5071_vm12, %v7084_v18, %v5068_v45  ;;  %v7492_v18 = vld [vmem:[%s12075_s8 + $0x50] sm:$0xff]  ;;  %v7501_v45 = vld [vmem:[%s12075_s8 + $0x98] sm:$0xff]  ;;  %vm6092_vm12 = vcmask 785408  }
0x24af   :  { %v5076_v4 = vmul.f32 %v5072_v32, %v11268_v58 }
0x24b1   :  { %v5083_v26 = vmul.f32 %v6843_v1, %v5076_v4  ;;  %v7502_v4 = vld [vmem:[%s12075_s8 + $0xa0] sm:$0xff] }
0x24b3   :  { %v5090_v62 = vadd.f32 %v6844_v39, %v5083_v26 }
0x24b5   :  { %6645 = vmatmul.msk.f32.gmra.mxu1 %vm522_vm6, %v5090_v62  ;;  %v7503_v62 = vld [vmem:[%s12075_s8 + $0xa8] sm:$0xff] }
0x251a   :  { %v5130_v6 = vpop.f32.mrf.mxu1 }
0x251b   :  { %v11305_v24 = vadd.f32 %v6845_v54, %v5130_v6  ;;  %v7505_v6 = vld [vmem:[%s12075_s8 + $0xb8] sm:$0xff] }
0x251d   :  { %5146 = vrot.lane.b32.xlu2 %v11305_v24, %s7591_s1 }
0x2522   :  { %v5133_v41 = vpop.f32.mrf.mxu1 }
0x2523   :  { %v11309_v31 = vadd.f32 %v6845_v54, %v5133_v41 }
0x2525   :  { %5148 = vrot.lane.b32.xlu0 %v11309_v31, %s7591_s1  ;;  %v6805_v1 = vpack.i.bf16 %v11305_v24, %v11309_v31 }
0x252a   :  { %v5136_v58 = vpop.f32.mrf.mxu1 }
0x252b   :  { %v11313_v29 = vadd.f32 %v6845_v54, %v5136_v58 }
0x252d   :  { %5150 = vrot.lane.b32.xlu0 %v11313_v29, %s7591_s1 }
0x2532   :  { %v5139_v46 = vpop.f32.mrf.mxu1 }
0x2533   :  { %v11317_v11 = vadd.f32 %v6845_v54, %v5139_v46  ;;  %v7504_v54 = vld [vmem:[%s12075_s8 + $0xb0] sm:$0xff] }
0x2535   :  { %5152 = vrot.lane.b32.xlu2 %v11317_v11, %s7591_s1  ;;  %v6800_v43 = vpack.i.bf16 %v11313_v29, %v11317_v11 }
0x253d   :  { %6801 = vrot.lane.b32.xlu2 %v6800_v43, %s12123_s5 }
0x2545   :  { %6806 = vrot.lane.b32.xlu2 %v6805_v1, %s12123_s5 }
0x2577   :  { %v5147_v50 = vpop.permute.xlu2 %5146 }
0x2578   :  { %5158 = vxpose.xlu0.b32.start [1/4] (short) (narrow) %v5147_v50, 32 }
0x258f   :  { %v5153_v59 = vpop.permute.xlu2 %5152 }
0x2597   :  { %v5149_v39 = vpop.permute.xlu0 %5148  ;;  %v6802_v27 = vpop.permute.xlu2 %6801 }
0x2598   :  { %v6803_v0 = vunpack.i.l.bf16 %v6802_v27  ;;  %5159 = vxpose.xlu0.b32.cont [2/4] (short) (narrow) %v5149_v39, 32  ;;  %v6804_v44 = vunpack.i.h.bf16 %v6802_v27  ;;  %v7506_v39 = vld [vmem:[%s12076_s9 + $0x38] sm:$0xff] }
0x259a   :  { %5292 = vmatpush.msrb.mxu1 %v6803_v0  ;;  %v7507_v0 = vld [vmem:[%s12076_s9 + $0x28] sm:$0xff] }
0x259c   :  { %5293 = vmatpush.msrb.mxu1 %v6804_v44 }
0x259f   :  { %v5151_v56 = vpop.permute.xlu0 %5150  ;;  %v6807_v15 = vpop.permute.xlu2 %6806 }
0x25a0   :  { %v6808_v61 = vunpack.i.l.bf16 %v6807_v15  ;;  %5160 = vxpose.xlu0.b32.cont [3/4] (short) (narrow) %v5151_v56, 32  ;;  %v6809_v12 = vunpack.i.h.bf16 %v6807_v15  ;;  %v7508_v56 = vld [vmem:[%s12076_s9 + $0x18] sm:$0xff] }
0x25a2   :  { %5294 = vmatpush.msrb.mxu1 %v6808_v61 }
0x25a4   :  { %5295 = vmatpush.msrb.mxu1 %v6809_v12  ;;  %v7509_v12 = vld [vmem:[%s12076_s9 + $0x8] sm:$0xff] }
0x25a5   :  { %6654 = vmatmul.msk.f32.vlgmr.msrb.gmra.mxu1 %vm522_vm6, %v7482_v13 }
0x25a8   :  { %5161 = vxpose.xlu0.b32.end [4/4] (short) (narrow) %v5153_v59, 32 }
0x25ad   :  { %6655 = vmatmul.msk.f32.gmra.mxu1 %vm522_vm6, %v7483_v35  ;;  %v7510_v35 = vld [vmem:[%s12076_s9 + $0x30] sm:$0xff] }
0x25b5   :  { %6656 = vmatmul.msk.f32.gmra.mxu1 %vm522_vm6, %v7484_v55 }
0x25bd   :  { %6657 = vmatmul.msk.f32.gmra.mxu1 %vm522_vm6, %v7485_v20  ;;  %v7511_v20 = vld [vmem:[%s12076_s9 + $0x20] sm:$0xff] }
0x25c5   :  { %6658 = vmatmul.msk.f32.gmra.mxu1 %vm522_vm6, %v7486_v60 }
0x25cd   :  { %6659 = vmatmul.msk.f32.gmra.mxu1 %vm522_vm6, %v7487_v22  ;;  %v7512_v22 = vld [vmem:[%s12076_s9 + $0x10] sm:$0xff] }
0x25d5   :  { %6660 = vmatmul.msk.f32.gmra.mxu1 %vm522_vm6, %v7488_v9 }
0x25dd   :  { %6661 = vmatmul.msk.f32.gmra.mxu1 %vm522_vm6, %v7489_v7  ;;  %v7513_v7 = vld [vmem:[%s12078_s12 + $0xf8] sm:$0xff] }
0x25e5   :  { %6662 = vmatmul.msk.f32.gmra.mxu1 %vm522_vm6, %v7490_v8  ;;  %v7514_v8 = vld [vmem:[%s12076_s9] sm:$0xff] }
0x25ed   :  { %6663 = vmatmul.msk.f32.gmra.mxu1 %vm522_vm6, %v7491_v2 }
0x25f5   :  { %6664 = vmatmul.msk.f32.gmra.mxu1 %vm522_vm6, %v7492_v18  ;;  %v7515_v18 = vld [vmem:[%s12078_s12 + $0xf0] sm:$0xff] }
0x25fd   :  { %6665 = vmatmul.msk.f32.gmra.mxu1 %vm522_vm6, %v7493_v53  ;;  %v7516_v53 = vld [vmem:[%s12078_s12 + $0xe8] sm:$0xff] }
0x2605   :  { %6666 = vmatmul.msk.f32.gmra.mxu1 %vm522_vm6, %v7494_v40  ;;  %v7517_v40 = vld [vmem:[%s12078_s12 + $0x78] sm:$0xff] }
0x260d   :  { %6667 = vmatmul.msk.f32.gmra.mxu1 %vm522_vm6, %v7495_v10  ;;  %v7518_v10 = vld [vmem:[%s12078_s12 + $0xe0] sm:$0xff] }
0x2615   :  { %6668 = vmatmul.msk.f32.gmra.mxu1 %vm522_vm6, %v7496_v19  ;;  %v7519_v19 = vld [vmem:[%s12078_s12 + $0x70] sm:$0xff] }
0x261d   :  { %6669 = vmatmul.msk.f32.gmra.mxu1 %vm522_vm6, %v7497_v36  ;;  %v7521_v36 = vld [vmem:[%s12078_s12 + $0x68] sm:$0xff] }
0x2625   :  { %6670 = vmatmul.msk.f32.gmra.mxu1 %vm522_vm6, %v7498_v21  ;;  %v7522_v21 = vld [vmem:[%s12078_s12 + $0xd0] sm:$0xff] }
0x262d   :  { %6671 = vmatmul.msk.f32.gmra.mxu1 %vm522_vm6, %v7499_v14  ;;  %v7523_v14 = vld [vmem:[%s12078_s12 + $0x60] sm:$0xff] }
0x2634   :  { %v5174_v57 = vpop.trf.xlu0 }
0x2635   :  { %6646 = vmatmul.msk.f32.vlgmr.msra.gmra.mxu2 %vm522_vm6, %v5174_v57  ;;  %6650 = vmatmul.msk.f32.vlgmr.msrb.gmra.mxu0 %vm522_vm6, %v5174_v57  ;;  %v7524_v57 = vld [vmem:[%s12078_s12 + $0xc8] sm:$0xff] }
0x2636   :  { %6672 = vmatmul.msk.f32.gmra.mxu1 %vm522_vm6, %v7500_v42  ;;  %v7525_v42 = vld [vmem:[%s12078_s12 + $0x58] sm:$0xff] }
0x263c   :  { %v5175_v17 = vpop.trf.xlu0 }
0x263d   :  { %6647 = vmatmul.msk.f32.gmra.mxu2 %vm522_vm6, %v5175_v17  ;;  %6651 = vmatmul.msk.f32.gmra.mxu0 %vm522_vm6, %v5175_v17  ;;  %v7526_v17 = vld [vmem:[%s12078_s12 + $0xc0] sm:$0xff] }
0x263e   :  { %6673 = vmatmul.msk.f32.gmra.mxu1 %vm522_vm6, %v7501_v45  ;;  %v7527_v45 = vld [vmem:[%s12078_s12 + $0x50] sm:$0xff] }
0x2644   :  { %v5176_v32 = vpop.trf.xlu0 }
0x2645   :  { %6648 = vmatmul.msk.f32.gmra.mxu2 %vm522_vm6, %v5176_v32  ;;  %6652 = vmatmul.msk.f32.gmra.mxu0 %vm522_vm6, %v5176_v32  ;;  %v7529_v32 = vld [vmem:[%s12078_s12 + $0x48] sm:$0xff] }
0x2646   :  { %6674 = vmatmul.msk.f32.gmra.mxu1 %vm522_vm6, %v7502_v4  ;;  %v7530_v4 = vld [vmem:[%s12078_s12 + $0xb0] sm:$0xff] }
0x264c   :  { %v5177_v26 = vpop.trf.xlu0 }
0x264d   :  { %6649 = vmatmul.msk.f32.gmra.mxu2 %vm522_vm6, %v5177_v26  ;;  %6653 = vmatmul.msk.f32.gmra.mxu0 %vm522_vm6, %v5177_v26  ;;  %v7531_v26 = vld [vmem:[%s12078_s12 + $0x40] sm:$0xff] }
0x264e   :  { %6675 = vmatmul.msk.f32.gmra.mxu1 %vm522_vm6, %v7503_v62  ;;  %v7532_v62 = vld [vmem:[%s12078_s12 + $0xa8] sm:$0xff] }
0x2656   :  { %6676 = vmatmul.msk.f32.gmra.mxu1 %vm522_vm6, %v7504_v54  ;;  %v7533_v54 = vld [vmem:[%s12078_s12 + $0x38] sm:$0xff] }
0x265e   :  { %6677 = vmatmul.msk.f32.gmra.mxu1 %vm522_vm6, %v7505_v6  ;;  %v7534_v6 = vld [vmem:[%s12078_s12 + $0xa0] sm:$0xff] }
0x26b2   :  { %v5248_v41 = vpop.f32.mrf.mxu0 }
0x26b3   :  { %v5261_v13 = vmul.f32 %v7509_v12, %v5248_v41  ;;  %v7535_v41 = vld [vmem:[%s12078_s12 + $0x30] sm:$0xff] }
0x26b8   :  { %v5219_v58 = vpop.f32.mrf.mxu2 }
0x26b9   :  { %v5260_v2 = vmul.f32 %v7514_v8, %v5219_v58  ;;  %v7537_v58 = vld [vmem:[%s12078_s12 + $0x28] sm:$0xff] }
0x26ba   :  { %v5251_v46 = vpop.f32.mrf.mxu0 }
0x26bb   :  { %v5263_v15 = vmul.f32 %v7508_v56, %v5251_v46  ;;  %v7538_v46 = vld [vmem:[%s12078_s12 + $0x90] sm:$0xff]  ;;  %v7547_v56 = vld [vmem:[%s12075_s8 + $0xc0] sm:$0xff] }
0x26c0   :  { %v5222_v43 = vpop.f32.mrf.mxu2 }
0x26c1   :  { %v5262_v9 = vmul.f32 %v7512_v22, %v5222_v43  ;;  %v7539_v43 = vld [vmem:[%s12078_s12 + $0x20] sm:$0xff] }
0x26c2   :  { %v5254_v1 = vpop.f32.mrf.mxu0 }
0x26c3   :  { %v5265_v44 = vmul.f32 %v7507_v0, %v5254_v1  ;;  %v7540_v1 = vld [vmem:[%s12078_s12 + $0x88] sm:$0xff]  ;;  %v7546_v0 = vld [vmem:[%s12080_s13] sm:$0xff] }
0x26c8   :  { %v5225_v50 = vpop.f32.mrf.mxu2 }
0x26c9   :  { %v5264_v60 = vmul.f32 %v7511_v20, %v5225_v50  ;;  %v7541_v50 = vld [vmem:[%s12078_s12 + $0x18] sm:$0xff] }
0x26ca   :  { %v5257_v59 = vpop.f32.mrf.mxu0 }
0x26cb   :  { %v5267_v27 = vmul.f32 %v7506_v39, %v5257_v59  ;;  %v7542_v59 = vld [vmem:[%s12078_s12 + $0x80] sm:$0xff]  ;;  %v7543_v39 = vld [vmem:[%s12078_s12 + $0x10] sm:$0xff] }
0x26cd   :  { %5474 = vmatpush.msra.mxu0 %v5267_v27  ;;  %v7544_v27 = vld [vmem:[%s12078_s12 + $0x8] sm:$0xff] }
0x26cf   :  { %5475 = vmatpush.msra.mxu0 %v5265_v44  ;;  %v11570_v44 = vpop.f32.mrf.mxu1  ;;  %6678 = vmatmul.msk.f32.gmra.mxu1 %vm522_vm6, %v7547_v56  ;;  %v7560_v56 = vld [vmem:[%s12079_s10 + $0x48] sm:$0xff] }
0x26d0   :  { %v5228_v61 = vpop.f32.mrf.mxu2 }
0x26d1   :  { %v5266_v55 = vmul.f32 %v7510_v35, %v5228_v61  ;;  %5476 = vmatpush.msra.mxu0 %v5263_v15  ;;  %v7548_v61 = vld [vmem:[%s12075_s8 + $0xc8] sm:$0xff] }
0x26d3   :  { %5445 = vmatpush.msrb.mxu2 %v5266_v55  ;;  %5477 = vmatpush.msra.mxu0 %v5261_v13  ;;  %v7549_v13 = vld [vmem:[%s12075_s8 + $0xd0] sm:$0xff]  ;;  %v7550_v55 = vld [vmem:[%s12075_s8 + $0xd8] sm:$0xff] }
0x26d4   :  { %6690 = vmatmul.msk.f32.vlgmr.msra.gmra.mxu0 %vm522_vm6, %v11305_v24 }
0x26d5   :  { %5446 = vmatpush.msrb.mxu2 %v5264_v60  ;;  %5556 = vmatpush.msrb.mxu0 %v7513_v7  ;;  %v7551_v60 = vld [vmem:[%s12075_s8 + $0xe0] sm:$0xff] }
0x26d7   :  { %5447 = vmatpush.msrb.mxu2 %v5262_v9  ;;  %5557 = vmatpush.msrb.mxu0 %v7515_v18  ;;  %v11576_v15 = vpop.f32.mrf.mxu1  ;;  %v7552_v9 = vld [vmem:[%s12075_s8 + $0xe8] sm:$0xff] }
0x26d8   :  { %6679 = vmatmul.msk.f32.gmra.mxu1 %vm522_vm6, %v7548_v61 }
0x26d9   :  { %5448 = vmatpush.msrb.mxu2 %v5260_v2  ;;  %5558 = vmatpush.msrb.mxu0 %v7516_v53  ;;  %v7553_v2 = vld [vmem:[%s12075_s8 + $0xf0] sm:$0xff] }
0x26da   :  { %6686 = vmatmul.msk.f32.vlgmr.msrb.gmra.mxu2 %vm522_vm6, %v11305_v24  ;;  %v7520_v24 = vld [vmem:[%s12078_s12 + $0xd8] sm:$0xff] }
0x26db   :  { %5527 = vmatpush.msra.mxu2 %v7517_v40  ;;  %5559 = vmatpush.msrb.mxu0 %v7518_v10  ;;  %v7554_v40 = vld [vmem:[%s12075_s8 + $0xf8] sm:$0xff] }
0x26dc   :  { %6691 = vmatmul.msk.f32.gmra.mxu0 %vm522_vm6, %v11309_v31 }
0x26dd   :  { %5528 = vmatpush.msra.mxu2 %v7519_v19  ;;  %5560 = vmatpush.msrb.mxu0 %v7520_v24 }
0x26df   :  { %5529 = vmatpush.msra.mxu2 %v7521_v36  ;;  %5561 = vmatpush.msrb.mxu0 %v7522_v21  ;;  %v11582_v12 = vpop.f32.mrf.mxu1 }
0x26e0   :  { %6680 = vmatmul.msk.f32.gmra.mxu1 %vm522_vm6, %v7549_v13  ;;  %v7561_v13 = vld [vmem:[%s12079_s10 + $0x50] sm:$0xff] }
0x26e1   :  { %5530 = vmatpush.msra.mxu2 %v7523_v14  ;;  %5562 = vmatpush.msrb.mxu0 %v7524_v57 }
0x26e2   :  { %6687 = vmatmul.msk.f32.gmra.mxu2 %vm522_vm6, %v11309_v31  ;;  %v7528_v31 = vld [vmem:[%s12078_s12 + $0xb8] sm:$0xff] }
0x26e3   :  { %5531 = vmatpush.msra.mxu2 %v7525_v42  ;;  %5563 = vmatpush.msrb.mxu0 %v7526_v17 }
0x26e4   :  { %6692 = vmatmul.msk.f32.gmra.mxu0 %vm522_vm6, %v11313_v29 }
0x26e5   :  { %5532 = vmatpush.msra.mxu2 %v7527_v45  ;;  %5564 = vmatpush.msrb.mxu0 %v7528_v31 }
0x26e7   :  { %5533 = vmatpush.msra.mxu2 %v7529_v32  ;;  %5565 = vmatpush.msrb.mxu0 %v7530_v4  ;;  %v11588_v35 = vpop.f32.mrf.mxu1 }
0x26e8   :  { %6681 = vmatmul.msk.f32.gmra.mxu1 %vm522_vm6, %v7550_v55 }
0x26e9   :  { %5534 = vmatpush.msra.mxu2 %v7531_v26  ;;  %5566 = vmatpush.msrb.mxu0 %v7532_v62 }
0x26ea   :  { %6688 = vmatmul.msk.f32.gmra.mxu2 %vm522_vm6, %v11313_v29  ;;  %v7536_v29 = vld [vmem:[%s12078_s12 + $0x98] sm:$0xff] }
0x26eb   :  { %5535 = vmatpush.msra.mxu2 %v7533_v54  ;;  %5567 = vmatpush.msrb.mxu0 %v7534_v6 }
0x26ec   :  { %6693 = vmatmul.msk.f32.gmra.mxu0 %vm522_vm6, %v11317_v11 }
0x26ed   :  { %5536 = vmatpush.msra.mxu2 %v7535_v41  ;;  %5568 = vmatpush.msrb.mxu0 %v7536_v29 }
0x26ef   :  { %5537 = vmatpush.msra.mxu2 %v7537_v58  ;;  %5569 = vmatpush.msrb.mxu0 %v7538_v46  ;;  %v11594_v20 = vpop.f32.mrf.mxu1  ;;  %v7555_v46 = vld [vmem:[%s12079_s10 + $0x78] sm:$0xff] }
0x26f0   :  { %6682 = vmatmul.msk.f32.gmra.mxu1 %vm522_vm6, %v7551_v60  ;;  %v7562_v60 = vld [vmem:[%s12079_s10 + $0x40] sm:$0xff] }
0x26f1   :  { %5538 = vmatpush.msra.mxu2 %v7539_v43  ;;  %5570 = vmatpush.msrb.mxu0 %v7540_v1  ;;  %v7557_v1 = vld [vmem:[%s12079_s10 + $0x68] sm:$0xff] }
0x26f2   :  { %6689 = vmatmul.msk.f32.gmra.mxu2 %vm522_vm6, %v11317_v11  ;;  %v7545_v11 = vld [vmem:[%s12078_s12] sm:$0xff] }
0x26f3   :  { %5539 = vmatpush.msra.mxu2 %v7541_v50  ;;  %5571 = vmatpush.msrb.mxu0 %v7542_v59  ;;  %v7558_v59 = vld [vmem:[%s12079_s10 + $0x60] sm:$0xff] }
0x26f5   :  { %5540 = vmatpush.msra.mxu2 %v7543_v39 }
0x26f7   :  { %5541 = vmatpush.msra.mxu2 %v7544_v27  ;;  %v11600_v22 = vpop.f32.mrf.mxu1 }
0x26f8   :  { %6683 = vmatmul.msk.f32.gmra.mxu1 %vm522_vm6, %v7552_v9 }
0x26f9   :  { %5542 = vmatpush.msra.mxu2 %v7545_v11  ;;  %v7559_v11 = vld [vmem:[%s12079_s10 + $0x58] sm:$0xff] }
0x26fb   :  { %5612 = vmatpush.msrb.mxu2 %v7546_v0 }
0x26ff   :  { %v11606_v8 = vpop.f32.mrf.mxu1 }
0x2700   :  { %6684 = vmatmul.msk.f32.gmra.mxu1 %vm522_vm6, %v7553_v2 }
0x2707   :  { %v5318_v53 = vpop.f32.mrf.mxu1 }
0x2708   :  { %6685 = vmatmul.msk.f32.gmra.mxu1 %vm522_vm6, %v7554_v40  ;;  %v7564_v40 = vld [vmem:[%s12079_s10 + $0x30] sm:$0xff] }
0x270f   :  { %v5321_v14 = vpop.f32.mrf.mxu1 }
0x2710   :  { %v5401_v9 = vmul.f32 %v7562_v60, %v5321_v14 }
0x2717   :  { %v5324_v45 = vpop.f32.mrf.mxu1 }
0x2718   :  { %v5402_v61 = vmul.f32 %v7560_v56, %v5324_v45 }
0x271f   :  { %v5327_v26 = vpop.f32.mrf.mxu1 }
0x2720   :  { %v5403_v55 = vmul.f32 %v7561_v13, %v5327_v26 }
0x2727   :  { %v5330_v6 = vpop.f32.mrf.mxu1 }
0x2728   :  { %v5404_v0 = vmul.f32 %v7559_v11, %v5330_v6 }
0x2751   :  { %v5479_v7 = vpop.f32.mrf.mxu0 }
0x2752   :  { %v11617_v10 = vadd.f32 %v5479_v7, %v8338_v33  ;;  %v7563_v7 = vld [vmem:[%s12079_s10 + $0x38] sm:$0xff] }
0x2753   :  { %v5400_v2 = vmul.f32 %v7563_v7, %v5318_v53  ;;  %v7566_v53 = vld [vmem:[%s12079_s10 + $0x20] sm:$0xff] }
0x2754   :  { %v5397_v14 = vmul.f32 %v7566_v53, %v11594_v20  ;;  %v7569_v20 = vld [vmem:[%s12079_s10 + $0x8] sm:$0xff] }
0x2755   :  { %v5394_v45 = vmul.f32 %v7569_v20, %v11576_v15 }
0x2759   :  { %v5482_v24 = vpop.f32.mrf.mxu0 }
0x275a   :  { %v11625_v57 = vadd.f32 %v5482_v24, %v8370_v51  ;;  %v5399_v24 = vmul.f32 %v7564_v40, %v11606_v8 }
0x275d   :  { %v5450_v18 = vpop.f32.mrf.mxu2 }
0x275e   :  { %v11620_v19 = vadd.f32 %v5450_v18, %v8341_v34 }
0x2760   :  { %v5491_v36 = vmax.f32 %v11620_v19, %v11617_v10 }
0x2761   :  { %v5485_v17 = vpop.f32.mrf.mxu0 }
0x2762   :  { %5492 = vmax.xlane.f32.xlu2 %v5491_v36  ;;  %v11633_v31 = vadd.f32 %v5485_v17, %v8408_v63  ;;  %v7565_v36 = vld [vmem:[%s12079_s10 + $0x28] sm:$0xff] }
0x2765   :  { %v5453_v21 = vpop.f32.mrf.mxu2 }
0x2766   :  { %v11628_v42 = vadd.f32 %v5453_v21, %v8373_v52  ;;  %v5398_v21 = vmul.f32 %v7565_v36, %v11600_v22  ;;  %v7568_v22 = vld [vmem:[%s12079_s10 + $0x10] sm:$0xff] }
0x2768   :  { %v5494_v33 = vmax.f32 %v11628_v42, %v11625_v57 }
0x2769   :  { %v5488_v4 = vpop.f32.mrf.mxu0 }
0x276a   :  { %5495 = vmax.xlane.f32.xlu1 %v5494_v33  ;;  %v11641_v62 = vadd.f32 %v5488_v4, %v8446_v47  ;;  %v7556_v47 = vld [vmem:[%s12079_s10 + $0x70] sm:$0xff]  ;;  %v7567_v33 = vld [vmem:[%s12079_s10 + $0x18] sm:$0xff] }
0x276b   :  { %v5396_v8 = vmul.f32 %v7567_v33, %v11588_v35  ;;  %v7570_v35 = vld [vmem:[%s12079_s10] sm:$0xff] }
0x276d   :  { %v5456_v34 = vpop.f32.mrf.mxu2 }
0x276e   :  { %v11636_v32 = vadd.f32 %v5456_v34, %v8411_v5  ;;  %v5333_v5 = vpop.f32.mrf.mxu1  ;;  %v5395_v34 = vmul.f32 %v7568_v22, %v11582_v12 }
0x276f   :  { %v5405_v39 = vmul.f32 %v7558_v59, %v5333_v5 }
0x2770   :  { %v5497_v51 = vmax.f32 %v11636_v32, %v11633_v31 }
0x2772   :  { %5498 = vmax.xlane.f32.xlu1 %v5497_v51  ;;  %v5393_v51 = vmul.f32 %v7570_v35, %v11570_v44 }
0x2775   :  { %v5459_v52 = vpop.f32.mrf.mxu2 }
0x2776   :  { %v11644_v54 = vadd.f32 %v5459_v52, %v8449_v49  ;;  %v5336_v41 = vpop.f32.mrf.mxu1 }
0x2777   :  { %v5406_v50 = vmul.f32 %v7557_v1, %v5336_v41 }
0x2778   :  { %v5500_v63 = vmax.f32 %v11644_v54, %v11641_v62 }
0x277a   :  { %5501 = vmax.xlane.f32.xlu1 %v5500_v63 }
0x277e   :  { %v5339_v29 = vpop.f32.mrf.mxu1 }
0x277f   :  { %v5407_v49 = vmul.f32 %v7556_v47, %v5339_v29 }
0x2786   :  { %v5342_v58 = vpop.f32.mrf.mxu1 }
0x2787   :  { %v5408_v43 = vmul.f32 %v7555_v46, %v5342_v58 }
0x2789   :  { %5671 = vmatpush.msra.mxu0 %v5408_v43 }
0x278b   :  { %5672 = vmatpush.msra.mxu0 %v5407_v49 }
0x278d   :  { %5673 = vmatpush.msra.mxu0 %v5406_v50 }
0x278e   :  { %v11660_v27 = vpop.f32.mrf.mxu1 }
0x278f   :  { %5674 = vmatpush.msra.mxu0 %v5405_v39 }
0x2791   :  { %5675 = vmatpush.msra.mxu0 %v5404_v0 }
0x2793   :  { %5676 = vmatpush.msra.mxu0 %v5403_v55 }
0x2795   :  { %5677 = vmatpush.msra.mxu0 %v5402_v61 }
0x2796   :  { %v11677_v18 = vpop.f32.mrf.mxu1 }
0x2797   :  { %5678 = vmatpush.msra.mxu0 %v5401_v9 }
0x2799   :  { %5679 = vmatpush.msra.mxu0 %v5400_v2 }
0x279b   :  { %5680 = vmatpush.msra.mxu0 %v5399_v24 }
0x279d   :  { %5681 = vmatpush.msra.mxu0 %v5398_v21  ;;  %v7571_v21 = vld [vmem:[%s12079_s10 + $0xf8] sm:$0xff] }
0x279e   :  { %v11695_v17 = vpop.f32.mrf.mxu1 }
0x279f   :  { %5682 = vmatpush.msra.mxu0 %v5397_v14  ;;  %v7572_v14 = vld [vmem:[%s12079_s10 + $0xf0] sm:$0xff] }
0x27a1   :  { %5683 = vmatpush.msra.mxu0 %v5396_v8  ;;  %v7573_v8 = vld [vmem:[%s12079_s10 + $0xe8] sm:$0xff] }
0x27a3   :  { %5684 = vmatpush.msra.mxu0 %v5395_v34  ;;  %v7574_v34 = vld [vmem:[%s12079_s10 + $0xe0] sm:$0xff] }
0x27a5   :  { %5685 = vmatpush.msra.mxu0 %v5394_v45  ;;  %v7575_v45 = vld [vmem:[%s12079_s10 + $0xd0] sm:$0xff] }
0x27a6   :  { %v11709_v4 = vpop.f32.mrf.mxu1 }
0x27a7   :  { %5686 = vmatpush.msra.mxu0 %v5393_v51  ;;  %v7576_v51 = vld [vmem:[%s12079_s10 + $0xd8] sm:$0xff] }
0x27ae   :  { %v11711_v12 = vpop.f32.mrf.mxu1 }
0x27b6   :  { %v11713_v52 = vpop.f32.mrf.mxu1 }
0x27be   :  { %v11715_v63 = vpop.f32.mrf.mxu1 }
0x27c6   :  { %v11719_v29 = vpop.f32.mrf.mxu1 }
0x27d5   :  { %v5493_v26 = vpop.xlane.xlu2 %5492 }
0x27d6   :  { %v5503_v15 = vsub.f32 %v11620_v19, %v5493_v26  ;;  %v5504_v6 = vsub.f32 %v11617_v10, %v5493_v26  ;;  %v5369_v19 = vpop.f32.mrf.mxu1 }
0x27d8   :  { %v5511_v5 = vmul.f32 1.442695, %v5503_v15  ;;  %v5513_v41 = vmul.f32 1.442695, %v5504_v6  ;;  %v7577_v15 = vld [vmem:[%s12079_s10 + $0xc8] sm:$0xff] }
0x27da   :  { %7085 = vpow2.f32 %v5511_v5  ;;  %v7578_v5 = vld [vmem:[%s12079_s10 + $0xc0] sm:$0xff] }
0x27db   :  { %7087 = vpow2.f32 %v5513_v41  ;;  %v5417_v41 = vmul.f32 %v7578_v5, %v5369_v19  ;;  %v7582_v19 = vld [vmem:[%s12079_s10 + $0xa0] sm:$0xff] }
0x27dd   :  { %v5496_v44 = vpop.xlane.xlu1 %5495 }
0x27de   :  { %v5505_v58 = vsub.f32 %v11628_v42, %v5496_v44  ;;  %v5506_v46 = vsub.f32 %v11625_v57, %v5496_v44  ;;  %v5372_v56 = vpop.f32.mrf.mxu1  ;;  %v7579_v44 = vld [vmem:[%s12079_s10 + $0xb8] sm:$0xff] }
0x27df   :  { %v5418_v6 = vmul.f32 %v7577_v15, %v5372_v56 }
0x27e0   :  { %v11723_v43 = vpop.eup %7085  ;;  %v5515_v47 = vmul.f32 1.442695, %v5505_v58  ;;  %v5517_v49 = vmul.f32 1.442695, %v5506_v46  ;;  %v5416_v58 = vmul.f32 %v7579_v44, %v11719_v29  ;;  %v7580_v46 = vld [vmem:[%s12079_s10 + $0xb0] sm:$0xff]  ;;  %v5413_v29 = vmul.f32 %v7582_v19, %v11711_v12 }
0x27e1   :  { %v11725_v1 = vpop.eup %7087  ;;  %5543 = vmatmul.f32.vlgmr.msra.gmra.mxu2 %v11723_v43 }
0x27e2   :  { %7089 = vpow2.f32 %v5515_v47  ;;  %5572 = vmatmul.f32.vlgmr.msrb.gmra.mxu0 %v11725_v1  ;;  %v5415_v47 = vmul.f32 %v7580_v46, %v11715_v63 }
0x27e3   :  { %7091 = vpow2.f32 %v5517_v49  ;;  %v7581_v49 = vld [vmem:[%s12079_s10 + $0xa8] sm:$0xff] }
0x27e5   :  { %v5499_v10 = vpop.xlane.xlu1 %5498 }
0x27e6   :  { %v5507_v50 = vsub.f32 %v11636_v32, %v5499_v10  ;;  %v5508_v42 = vsub.f32 %v11633_v31, %v5499_v10  ;;  %v5375_v9 = vpop.f32.mrf.mxu1  ;;  %v5414_v10 = vmul.f32 %v7581_v49, %v11713_v52 }
0x27e7   :  { %v5419_v35 = vmul.f32 %v7575_v45, %v5375_v9 }
0x27e8   :  { %v11731_v59 = vpop.eup %7089  ;;  %v5519_v57 = vmul.f32 1.442695, %v5507_v50  ;;  %v5521_v39 = vmul.f32 1.442695, %v5508_v42  ;;  %v7583_v50 = vld [vmem:[%s12079_s10 + $0x98] sm:$0xff]  ;;  %v7584_v42 = vld [vmem:[%s12079_s10 + $0x90] sm:$0xff] }
0x27e9   :  { %v11733_v11 = vpop.eup %7091  ;;  %5546 = vmatmul.f32.gmra.mxu2 %v11731_v59  ;;  %v5412_v63 = vmul.f32 %v7583_v50, %v11709_v4  ;;  %v5411_v52 = vmul.f32 %v7584_v42, %v11695_v17 }
0x27ea   :  { %7093 = vpow2.f32 %v5519_v57  ;;  %5575 = vmatmul.f32.gmra.mxu0 %v11733_v11  ;;  %v7585_v57 = vld [vmem:[%s12079_s10 + $0x88] sm:$0xff] }
0x27eb   :  { %7095 = vpow2.f32 %v5521_v39  ;;  %v5410_v12 = vmul.f32 %v7585_v57, %v11677_v18  ;;  %v7586_v39 = vld [vmem:[%s12079_s10 + $0x80] sm:$0xff] }
0x27ec   :  { %v5409_v4 = vmul.f32 %v7586_v39, %v11660_v27 }
0x27ed   :  { %v5502_v0 = vpop.xlane.xlu1 %5501 }
0x27ee   :  { %v5509_v61 = vsub.f32 %v11644_v54, %v5502_v0  ;;  %v5510_v32 = vsub.f32 %v11641_v62, %v5502_v0  ;;  %v5378_v62 = vpop.f32.mrf.mxu1 }
0x27ef   :  { %v5420_v26 = vmul.f32 %v7576_v51, %v5378_v62 }
0x27f0   :  { %v11739_v13 = vpop.eup %7093  ;;  %v5523_v31 = vmul.f32 1.442695, %v5509_v61  ;;  %v5525_v55 = vmul.f32 1.442695, %v5510_v32 }
0x27f1   :  { %v11741_v60 = vpop.eup %7095  ;;  %5549 = vmatmul.f32.gmra.mxu2 %v11739_v13 }
0x27f2   :  { %7097 = vpow2.f32 %v5523_v31  ;;  %5578 = vmatmul.f32.gmra.mxu0 %v11741_v60 }
0x27f3   :  { %7099 = vpow2.f32 %v5525_v55 }
0x27f6   :  { %v5381_v54 = vpop.f32.mrf.mxu1 }
0x27f7   :  { %v5421_v20 = vmul.f32 %v7574_v34, %v5381_v54 }
0x27f8   :  { %v11745_v7 = vpop.eup %7097 }
0x27f9   :  { %v11747_v2 = vpop.eup %7099  ;;  %5552 = vmatmul.f32.gmra.mxu2 %v11745_v7 }
0x27fa   :  { %5581 = vmatmul.f32.gmra.mxu0 %v11747_v2 }
0x27fe   :  { %v5384_v40 = vpop.f32.mrf.mxu1 }
0x27ff   :  { %v5422_v22 = vmul.f32 %v7573_v8, %v5384_v40 }
0x2806   :  { %v5387_v24 = vpop.f32.mrf.mxu1 }
0x2807   :  { %v5423_v33 = vmul.f32 %v7572_v14, %v5387_v24 }
0x280e   :  { %v5390_v36 = vpop.f32.mrf.mxu1 }
0x280f   :  { %v5424_v53 = vmul.f32 %v7571_v21, %v5390_v36 }
0x2811   :  { %5700 = vmatpush.msra.mxu2 %v5424_v53 }
0x2813   :  { %5701 = vmatpush.msra.mxu2 %v5423_v33 }
0x2815   :  { %5702 = vmatpush.msra.mxu2 %v5422_v22 }
0x2817   :  { %5703 = vmatpush.msra.mxu2 %v5421_v20 }
0x2819   :  { %5704 = vmatpush.msra.mxu2 %v5420_v26 }
0x281b   :  { %5705 = vmatpush.msra.mxu2 %v5419_v35 }
0x281d   :  { %5706 = vmatpush.msra.mxu2 %v5418_v6 }
0x281f   :  { %5707 = vmatpush.msra.mxu2 %v5417_v41 }
0x2821   :  { %5708 = vmatpush.msra.mxu2 %v5416_v58  ;;  %v6705_v58 = vld [vmem:[%s12082_s18 + $0x98] sm:$0xff] }
0x2822   :  { %5763 = vmatpush.msrb.mxu3 %v6705_v58 }
0x2823   :  { %5709 = vmatpush.msra.mxu2 %v5415_v47 }
0x2825   :  { %5710 = vmatpush.msra.mxu2 %v5414_v10 }
0x2827   :  { %5711 = vmatpush.msra.mxu2 %v5413_v29 }
0x2829   :  { %5712 = vmatpush.msra.mxu2 %v5412_v63 }
0x282b   :  { %5713 = vmatpush.msra.mxu2 %v5411_v52 }
0x282d   :  { %5714 = vmatpush.msra.mxu2 %v5410_v12  ;;  %v6846_v12 = vld [vmem:[%s12081_s19 + $0x4] ss:$0 sm:$0xff] }
0x282f   :  { %5715 = vmatpush.msra.mxu2 %v5409_v4 }
0x285f   :  { %v5573_v0 = vpop.f32.mrf.mxu0 }
0x2864   :  { %v5544_v56 = vpop.f32.mrf.mxu2 }
0x2865   :  { %v5574_v17 = vadd.f32 %v5573_v0, %v5544_v56 }
0x2867   :  { %6694 = vmatmul.msk.f32.vlgmr.msrb.gmra.mxu2 %vm178_vm8, %v5574_v17  ;;  %6698 = vmatmul.msk.f32.vlgmr.msra.gmra.mxu3 %vm178_vm8, %v5574_v17  ;;  %v5576_v61 = vpop.f32.mrf.mxu0 }
0x286c   :  { %v5547_v32 = vpop.f32.mrf.mxu2 }
0x286d   :  { %v5577_v18 = vadd.f32 %v5576_v61, %v5547_v32 }
0x286f   :  { %6695 = vmatmul.msk.f32.gmra.mxu2 %vm178_vm8, %v5577_v18  ;;  %6699 = vmatmul.msk.f32.gmra.mxu3 %vm178_vm8, %v5577_v18  ;;  %v5579_v31 = vpop.f32.mrf.mxu0 }
0x2874   :  { %v5550_v55 = vpop.f32.mrf.mxu2 }
0x2875   :  { %v5580_v27 = vadd.f32 %v5579_v31, %v5550_v55 }
0x2877   :  { %6696 = vmatmul.msk.f32.gmra.mxu2 %vm178_vm8, %v5580_v27  ;;  %6700 = vmatmul.msk.f32.gmra.mxu3 %vm178_vm8, %v5580_v27  ;;  %v5582_v9 = vpop.f32.mrf.mxu0 }
0x287c   :  { %v5553_v62 = vpop.f32.mrf.mxu2 }
0x287d   :  { %v5583_v54 = vadd.f32 %v5582_v9, %v5553_v62 }
0x287f   :  { %6697 = vmatmul.msk.f32.gmra.mxu2 %vm178_vm8, %v5583_v54  ;;  %6701 = vmatmul.msk.f32.gmra.mxu3 %vm178_vm8, %v5583_v54 }
0x28ea   :  { %v5614_v40 = vpop.f32.mrf.mxu2  ;;  %v5643_v24 = vpop.f32.mrf.mxu3 }
0x28eb   :  { %7101 = vrcp.f32 %v5614_v40 }
0x28ec   :  { %7103 = vrcp.f32 %v5643_v24 }
0x28f1   :  { %v7102_v36 = vpop.eup %7101 }
0x28f2   :  { %v7104_v21 = vpop.eup %7103  ;;  %v5663_v53 = vmul.f32 %v7102_v36, %v11723_v43  ;;  %v5617_v14 = vpop.f32.mrf.mxu2 }
0x28f3   :  { %v5646_v33 = vpop.f32.mrf.mxu3  ;;  %v5664_v8 = vmul.f32 %v7104_v21, %v11725_v1  ;;  %7105 = vrcp.f32 %v5617_v14 }
0x28f4   :  { %7107 = vrcp.f32 %v5646_v33  ;;  %5687 = vmatmul.f32.vlgmr.msra.gmra.mxu0 %v5663_v53 }
0x28f5   :  { %5716 = vmatmul.f32.vlgmr.msra.gmra.mxu2 %v5664_v8 }
0x28f9   :  { %v7106_v22 = vpop.eup %7105 }
0x28fa   :  { %v7108_v34 = vpop.eup %7107  ;;  %v5620_v20 = vpop.f32.mrf.mxu2  ;;  %v5665_v35 = vmul.f32 %v7106_v22, %v11731_v59 }
0x28fb   :  { %v5649_v45 = vpop.f32.mrf.mxu3  ;;  %7109 = vrcp.f32 %v5620_v20  ;;  %v5666_v51 = vmul.f32 %v7108_v34, %v11733_v11 }
0x28fc   :  { %7111 = vrcp.f32 %v5649_v45  ;;  %5690 = vmatmul.f32.gmra.mxu0 %v5665_v35 }
0x28fd   :  { %5719 = vmatmul.f32.gmra.mxu2 %v5666_v51 }
0x2901   :  { %v7110_v43 = vpop.eup %7109 }
0x2902   :  { %v7112_v26 = vpop.eup %7111  ;;  %v5623_v15 = vpop.f32.mrf.mxu2  ;;  %v5667_v6 = vmul.f32 %v7110_v43, %v11739_v13  ;;  %v6704_v13 = vld [vmem:[%s12082_s18 + $0x90] sm:$0xff] }
0x2903   :  { %v5652_v1 = vpop.f32.mrf.mxu3  ;;  %7113 = vrcp.f32 %v5623_v15  ;;  %v5668_v5 = vmul.f32 %v7112_v26, %v11741_v60  ;;  %5764 = vmatpush.msrb.mxu3 %v6704_v13  ;;  %v6703_v60 = vld [vmem:[%s12082_s18 + $0x88] sm:$0xff] }
0x2904   :  { %7115 = vrcp.f32 %v5652_v1  ;;  %5693 = vmatmul.f32.gmra.mxu0 %v5667_v6  ;;  %v6716_v6 = vld [vmem:[%s12086_s22 + $0x98] sm:$0xff] }
0x2905   :  { %5722 = vmatmul.f32.gmra.mxu2 %v5668_v5  ;;  %5765 = vmatpush.msrb.mxu3 %v6703_v60  ;;  %v6715_v5 = vld [vmem:[%s12086_s22 + $0x90] sm:$0xff] }
0x2906   :  { %5928 = vmatpush.msrb.mxu0 %v6716_v6 }
0x2908   :  { %5929 = vmatpush.msrb.mxu0 %v6715_v5 }
0x2909   :  { %v7114_v41 = vpop.eup %7113 }
0x290a   :  { %v7116_v59 = vpop.eup %7115  ;;  %v5669_v44 = vmul.f32 %v7114_v41, %v11745_v7  ;;  %v6702_v7 = vld [vmem:[%s12082_s18 + $0x80] sm:$0xff]  ;;  %v6714_v41 = vld [vmem:[%s12086_s22 + $0x88] sm:$0xff] }
0x290b   :  { %v5670_v11 = vmul.f32 %v7116_v59, %v11747_v2  ;;  %5766 = vmatpush.msrb.mxu3 %v6702_v7  ;;  %5930 = vmatpush.msrb.mxu0 %v6714_v41  ;;  %v6713_v59 = vld [vmem:[%s12086_s22 + $0x80] sm:$0xff] }
0x290c   :  { %5696 = vmatmul.f32.gmra.mxu0 %v5669_v44 }
0x290d   :  { %5725 = vmatmul.f32.gmra.mxu2 %v5670_v11  ;;  %5931 = vmatpush.msrb.mxu0 %v6713_v59 }
0x2971   :  { %v5688_v2 = vpop.f32.mrf.mxu0 }
0x2978   :  { %v5717_v46 = vpop.f32.mrf.mxu2 }
0x2979   :  { %v5718_v47 = vadd.f32 %v5717_v46, %v5688_v2  ;;  %v5691_v49 = vpop.f32.mrf.mxu0 }
0x297b   :  { %6707 = vmatmul.msk.f32.vlgmr.msrb.gmra.mxu3 %vm522_vm6, %v5718_v47 }
0x2980   :  { %v5720_v10 = vpop.f32.mrf.mxu2 }
0x2981   :  { %v5721_v19 = vadd.f32 %v5720_v10, %v5691_v49  ;;  %v5694_v29 = vpop.f32.mrf.mxu0 }
0x2983   :  { %6708 = vmatmul.msk.f32.gmra.mxu3 %vm522_vm6, %v5721_v19 }
0x2988   :  { %v5723_v50 = vpop.f32.mrf.mxu2 }
0x2989   :  { %v5724_v63 = vadd.f32 %v5723_v50, %v5694_v29  ;;  %v5697_v42 = vpop.f32.mrf.mxu0 }
0x298b   :  { %6709 = vmatmul.msk.f32.gmra.mxu3 %vm522_vm6, %v5724_v63 }
0x2990   :  { %v5726_v52 = vpop.f32.mrf.mxu2 }
0x2991   :  { %v5727_v57 = vadd.f32 %v5726_v52, %v5697_v42  ;;  %v6847_v42 = vld [vmem:[%s12083_s20 + $0x4] ss:$0 sm:$0xff] }
0x2993   :  { %6710 = vmatmul.msk.f32.gmra.mxu3 %vm522_vm6, %v5727_v57 }
0x29fe   :  { %v5768_v39 = vpop.f32.mrf.mxu3 }
0x29ff   :  { %v5769_v4 = vadd.f32 %v6846_v12, %v5768_v39  ;;  %v6736_v39 = vld [vmem:[%s12087_s24 + $0x270] sm:$0xff] }
0x2a01   :  { %v5780_v0 = vadd.f32 %v5769_v4, %v11230_v37 }
0x2a03   :  { %v11844_v56 = vadd.f32 %v5780_v0, %v8757_v48 }
0x2a05   :  { %v5792_v17 = vsel %vm522_vm6, %v11844_v56, 0.0 }
0x2a06   :  { %v5771_v61 = vpop.f32.mrf.mxu3  ;;  %5793 = vadd.xlane.f32.xlu1 %v5792_v17  ;;  %v6848_v17 = vld [vmem:[%s12084_s21 + $0x4] ss:$0 sm:$0xff] }
0x2a07   :  { %v5772_v32 = vadd.f32 %v6846_v12, %v5771_v61 }
0x2a09   :  { %v5781_v18 = vadd.f32 %v5772_v32, %v11235_v30  ;;  %v6735_v32 = vld [vmem:[%s12087_s24 + $0x268] sm:$0xff] }
0x2a0b   :  { %v11850_v31 = vadd.f32 %v5781_v18, %v8768_v25 }
0x2a0d   :  { %v5795_v55 = vsel %vm522_vm6, %v11850_v31, 0.0 }
0x2a0e   :  { %v5774_v27 = vpop.f32.mrf.mxu3  ;;  %5796 = vadd.xlane.f32.xlu0 %v5795_v55 }
0x2a0f   :  { %v5775_v37 = vadd.f32 %v6846_v12, %v5774_v27 }
0x2a11   :  { %v5782_v48 = vadd.f32 %v5775_v37, %v11240_v28 }
0x2a13   :  { %v11856_v9 = vadd.f32 %v5782_v48, %v8779_v23  ;;  %v6734_v48 = vld [vmem:[%s12087_s24 + $0x260] sm:$0xff] }
0x2a15   :  { %v5798_v62 = vsel %vm522_vm6, %v11856_v9, 0.0 }
0x2a16   :  { %5799 = vadd.xlane.f32.xlu1 %v5798_v62  ;;  %v5777_v54 = vpop.f32.mrf.mxu3 }
0x2a17   :  { %v5778_v30 = vadd.f32 %v6846_v12, %v5777_v54  ;;  %v6737_v12 = vld [vmem:[%s12087_s24 + $0x278] sm:$0xff] }
0x2a18   :  { %6003 = vmatpush.msrb.mxu2 %v6737_v12 }
0x2a19   :  { %v5783_v25 = vadd.f32 %v5778_v30, %v11245_v3 }
0x2a1a   :  { %6004 = vmatpush.msrb.mxu2 %v6736_v39 }
0x2a1b   :  { %v11862_v40 = vadd.f32 %v5783_v25, %v8790_v16 }
0x2a1c   :  { %6005 = vmatpush.msrb.mxu2 %v6735_v32 }
0x2a1d   :  { %v5801_v24 = vsel %vm522_vm6, %v11862_v40, 0.0 }
0x2a1e   :  { %5802 = vadd.xlane.f32.xlu2 %v5801_v24  ;;  %6006 = vmatpush.msrb.mxu2 %v6734_v48 }
0x2a79   :  { %v5794_v36 = vpop.xlane.xlu1 %5793 }
0x2a7a   :  { %v5804_v28 = vmul.f32 %v5794_v36, %v7802_v38 }
0x2a7c   :  { %v5808_v23 = vsub.f32 %v11844_v56, %v5804_v28 }
0x2a7e   :  { %v5812_v21 = vmul.f32 %v5808_v23, %v5808_v23 }
0x2a80   :  { %v5816_v53 = vsel %vm522_vm6, %v5812_v21, 0.0 }
0x2a81   :  { %v5797_v14 = vpop.xlane.xlu0 %5796  ;;  %5817 = vadd.xlane.f32.xlu1 %v5816_v53 }
0x2a82   :  { %v5805_v33 = vmul.f32 %v5797_v14, %v7802_v38 }
0x2a84   :  { %v11871_v3 = vsub.f32 %v11850_v31, %v5805_v33 }
0x2a86   :  { %v5813_v16 = vmul.f32 %v11871_v3, %v11871_v3 }
0x2a88   :  { %v5819_v8 = vsel %vm522_vm6, %v5813_v16, 0.0 }
0x2a89   :  { %v5800_v22 = vpop.xlane.xlu1 %5799  ;;  %5820 = vadd.xlane.f32.xlu2 %v5819_v8 }
0x2a8a   :  { %v5806_v34 = vmul.f32 %v5800_v22, %v7802_v38 }
0x2a8c   :  { %v11878_v20 = vsub.f32 %v11856_v9, %v5806_v34 }
0x2a8e   :  { %v5814_v45 = vmul.f32 %v11878_v20, %v11878_v20 }
0x2a90   :  { %v5822_v35 = vsel %vm522_vm6, %v5814_v45, 0.0 }
0x2a91   :  { %5823 = vadd.xlane.f32.xlu1 %v5822_v35  ;;  %v5803_v51 = vpop.xlane.xlu2 %5802 }
0x2a92   :  { %v5807_v43 = vmul.f32 %v5803_v51, %v7802_v38 }
0x2a94   :  { %v11885_v26 = vsub.f32 %v11862_v40, %v5807_v43 }
0x2a96   :  { %v5815_v15 = vmul.f32 %v11885_v26, %v11885_v26 }
0x2a98   :  { %v5825_v1 = vsel %vm522_vm6, %v5815_v15, 0.0 }
0x2a99   :  { %5826 = vadd.xlane.f32.xlu2 %v5825_v1 }
0x2af4   :  { %v5818_v44 = vpop.xlane.xlu1 %5817 }
0x2af5   :  { %v5828_v11 = vmul.f32 %v5818_v44, %v7802_v38  ;;  %v6732_v44 = vld [vmem:[%s12087_s24 + $0x250] sm:$0xff] }
0x2af7   :  { %v5832_v58 = vadd.f32 1e-06, %v5828_v11  ;;  %v6731_v11 = vld [vmem:[%s12087_s24 + $0x248] sm:$0xff] }
0x2af9   :  { %7117 = vrsqrt.f32 %v5832_v58  ;;  %vm5842_vm13 = vweird.f32 %v5832_v58 }
0x2afc   :  { %v5821_v13 = vpop.xlane.xlu2 %5820 }
0x2afd   :  { %v5829_v60 = vmul.f32 %v5821_v13, %v7802_v38  ;;  %v6728_v13 = vld [vmem:[%s12087_s24 + $0x230] sm:$0xff] }
0x2aff   :  { %v7118_v7 = vpop.eup %7117  ;;  %v5833_v2 = vadd.f32 1e-06, %v5829_v60  ;;  %v6727_v60 = vld [vmem:[%s12087_s24 + $0x228] sm:$0xff] }
0x2b00   :  { %v5837_v46 = vmul.f32 %v7118_v7, %v5832_v58  ;;  %vm5843_vm8 = vweird.f32 %v7118_v7  ;;  %v6729_v58 = vld [vmem:[%s12087_s24 + $0x238] sm:$0xff] }
0x2b01   :  { %7119 = vrsqrt.f32 %v5833_v2  ;;  %vm5844_vm14 = vmor %vm5842_vm13, %vm5843_vm8  ;;  %vm5852_vm2 = vweird.f32 %v5833_v2  ;;  %vm6181_vm8 = vcmask 1040384   ;;  %vm6195_vm13 = vcmask 1045508  }
0x2b02   :  { %v5838_v47 = vmul.f32 %v7118_v7, %v5837_v46  ;;  %v6724_v46 = vld [vmem:[%s12087_s24 + $0x210] sm:$0xff] }
0x2b04   :  { %v5839_v49 = vmul.f32 0.5, %v5838_v47  ;;  %v5824_v10 = vpop.xlane.xlu1 %5823  ;;  %v6723_v47 = vld [vmem:[%s12087_s24 + $0x208] sm:$0xff] }
0x2b05   :  { %v5830_v19 = vmul.f32 %v5824_v10, %v7802_v38  ;;  %v6849_v10 = vld [vmem:[%s12085_s23 + $0x4] ss:$0 sm:$0xff] }
0x2b06   :  { %v5840_v29 = vsub.f32 1.5, %v5839_v49  ;;  %v6722_v49 = vld [vmem:[%s12087_s24 + $0x200] sm:$0xff] }
0x2b07   :  { %v7120_v50 = vpop.eup %7119  ;;  %v5834_v63 = vadd.f32 1e-06, %v5830_v19 }
0x2b08   :  { %v5841_v52 = vmul.f32 %v7118_v7, %v5840_v29  ;;  %v5847_v57 = vmul.f32 %v7120_v50, %v5833_v2  ;;  %vm5853_vm1 = vweird.f32 %v7120_v50  ;;  %v6725_v2 = vld [vmem:[%s12087_s24 + $0x218] sm:$0xff] }
0x2b09   :  { %7121 = vrsqrt.f32 %v5834_v63  ;;  %vm5854_vm3 = vmor %vm5852_vm2, %vm5853_vm1  ;;  %vm5862_vm5 = vweird.f32 %v5834_v63 }
0x2b0a   :  { %v5845_v4 = vsel %vm5844_vm14, %v7118_v7, %v5841_v52  ;;  %v5848_v0 = vmul.f32 %v7120_v50, %v5847_v57  ;;  %v6726_v7 = vld [vmem:[%s12087_s24 + $0x220] sm:$0xff]  ;;  %vm6193_vm14 = vcmask 1041408  }
0x2b0b   :  { %v5876_v61 = vmul.f32 %v5845_v4, %v5808_v23 }
0x2b0c   :  { %v5849_v18 = vmul.f32 0.5, %v5848_v0  ;;  %v5827_v55 = vpop.xlane.xlu2 %5826 }
0x2b0d   :  { %v5883_v27 = vmul.f32 %v6847_v42, %v5876_v61  ;;  %v5831_v37 = vmul.f32 %v5827_v55, %v7802_v38 }
0x2b0e   :  { %v5850_v62 = vsub.f32 1.5, %v5849_v18 }
0x2b0f   :  { %v7122_v54 = vpop.eup %7121  ;;  %v5890_v30 = vadd.f32 %v6848_v17, %v5883_v27  ;;  %v5835_v25 = vadd.f32 1e-06, %v5831_v37 }
0x2b10   :  { %v5851_v24 = vmul.f32 %v7120_v50, %v5850_v62  ;;  %v5857_v36 = vmul.f32 %v7122_v54, %v5834_v63  ;;  %vm5863_vm4 = vweird.f32 %v7122_v54 }
0x2b11   :  { %7123 = vrsqrt.f32 %v5835_v25  ;;  %6718 = vmatmul.msk.f32.vlgmr.msrb.gmra.mxu0 %vm522_vm6, %v5890_v30  ;;  %vm5864_vm7 = vmor %vm5862_vm5, %vm5863_vm4  ;;  %vm5872_vm10 = vweird.f32 %v5835_v25 }
0x2b12   :  { %v5855_v28 = vsel %vm5854_vm3, %v7120_v50, %v5851_v24  ;;  %v5858_v38 = vmul.f32 %v7122_v54, %v5857_v36 }
0x2b13   :  { %v5877_v23 = vmul.f32 %v5855_v28, %v11871_v3 }
0x2b14   :  { %v5859_v21 = vmul.f32 0.5, %v5858_v38 }
0x2b15   :  { %v5884_v53 = vmul.f32 %v6847_v42, %v5877_v23 }
0x2b16   :  { %v5860_v14 = vsub.f32 1.5, %v5859_v21 }
0x2b17   :  { %v7124_v33 = vpop.eup %7123  ;;  %v5891_v16 = vadd.f32 %v6848_v17, %v5884_v53 }
0x2b18   :  { %v5861_v8 = vmul.f32 %v7122_v54, %v5860_v14  ;;  %v5867_v22 = vmul.f32 %v7124_v33, %v5835_v25  ;;  %vm5873_vm9 = vweird.f32 %v7124_v33 }
0x2b19   :  { %6719 = vmatmul.msk.f32.gmra.mxu0 %vm522_vm6, %v5891_v16  ;;  %vm5874_vm11 = vmor %vm5872_vm10, %vm5873_vm9 }
0x2b1a   :  { %v5865_v34 = vsel %vm5864_vm7, %v7122_v54, %v5861_v8  ;;  %v5868_v45 = vmul.f32 %v7124_v33, %v5867_v22 }
0x2b1b   :  { %v5878_v35 = vmul.f32 %v5865_v34, %v11878_v20  ;;  %v6733_v20 = vld [vmem:[%s12087_s24 + $0x258] sm:$0xff] }
0x2b1c   :  { %v5869_v51 = vmul.f32 0.5, %v5868_v45  ;;  %6007 = vmatpush.msrb.mxu2 %v6733_v20 }
0x2b1d   :  { %v5885_v43 = vmul.f32 %v6847_v42, %v5878_v35 }
0x2b1e   :  { %v5870_v15 = vsub.f32 1.5, %v5869_v51  ;;  %6008 = vmatpush.msrb.mxu2 %v6732_v44 }
0x2b1f   :  { %v5892_v3 = vadd.f32 %v6848_v17, %v5885_v43 }
0x2b20   :  { %v5871_v1 = vmul.f32 %v7124_v33, %v5870_v15  ;;  %6009 = vmatpush.msrb.mxu2 %v6731_v11 }
0x2b21   :  { %6720 = vmatmul.msk.f32.gmra.mxu0 %vm522_vm6, %v5892_v3 }
0x2b22   :  { %v5875_v6 = vsel %vm5874_vm11, %v7124_v33, %v5871_v1 }
0x2b23   :  { %v5879_v5 = vmul.f32 %v5875_v6, %v11885_v26  ;;  %v6730_v26 = vld [vmem:[%s12087_s24 + $0x240] sm:$0xff] }
0x2b24   :  { %6010 = vmatpush.msrb.mxu2 %v6730_v26 }
0x2b25   :  { %v5886_v41 = vmul.f32 %v6847_v42, %v5879_v5  ;;  %v6850_v5 = vld [vmem:[%s12088_s25 + $0x4] ss:$0 sm:$0xff] }
0x2b26   :  { %6011 = vmatpush.msrb.mxu2 %v6729_v58 }
0x2b27   :  { %v5893_v59 = vadd.f32 %v6848_v17, %v5886_v41 }
0x2b28   :  { %6012 = vmatpush.msrb.mxu2 %v6728_v13 }
0x2b29   :  { %6721 = vmatmul.msk.f32.gmra.mxu0 %vm522_vm6, %v5893_v59 }
0x2b2a   :  { %6013 = vmatpush.msrb.mxu2 %v6727_v60 }
0x2b2c   :  { %6014 = vmatpush.msrb.mxu2 %v6726_v7 }
0x2b2e   :  { %6015 = vmatpush.msrb.mxu2 %v6725_v2 }
0x2b30   :  { %6016 = vmatpush.msrb.mxu2 %v6724_v46 }
0x2b32   :  { %6017 = vmatpush.msrb.mxu2 %v6723_v47 }
0x2b34   :  { %6018 = vmatpush.msrb.mxu2 %v6722_v49 }
0x2b8e   :  { %v5933_v19 = vpop.f32.mrf.mxu0 }
0x2b8f   :  { %v5934_v29 = vadd.f32 %v6849_v10, %v5933_v19 }
0x2b91   :  { %v5949_v50 = vmul.f32 0.044715, %v5934_v29  ;;  %v5945_v48 = vmul.f32 0.5, %v5934_v29 }
0x2b93   :  { %v5953_v63 = vmul.f32 %v5949_v50, %v5934_v29 }
0x2b95   :  { %v5957_v42 = vmul.f32 %v5953_v63, %v5934_v29 }
0x2b96   :  { %v5936_v52 = vpop.f32.mrf.mxu0 }
0x2b97   :  { %v5961_v57 = vadd.f32 %v5957_v42, %v5934_v29  ;;  %v5937_v12 = vadd.f32 %v6849_v10, %v5936_v52 }
0x2b99   :  { %v5965_v39 = vmul.f32 0.7978846, %v5961_v57  ;;  %v5950_v4 = vmul.f32 0.044715, %v5937_v12  ;;  %v5946_v53 = vmul.f32 0.5, %v5937_v12 }
0x2b9b   :  { %7125 = vtanh.f32 %v5965_v39  ;;  %v5954_v0 = vmul.f32 %v5950_v4, %v5937_v12 }
0x2b9d   :  { %v5958_v17 = vmul.f32 %v5954_v0, %v5937_v12 }
0x2b9e   :  { %v5939_v61 = vpop.f32.mrf.mxu0 }
0x2b9f   :  { %v5940_v32 = vadd.f32 %v6849_v10, %v5939_v61  ;;  %v5962_v18 = vadd.f32 %v5958_v17, %v5937_v12 }
0x2ba1   :  { %v7126_v55 = vpop.eup %7125  ;;  %v5951_v27 = vmul.f32 0.044715, %v5940_v32  ;;  %v5966_v37 = vmul.f32 0.7978846, %v5962_v18  ;;  %v5947_v35 = vmul.f32 0.5, %v5940_v32 }
0x2ba2   :  { %v5973_v62 = vadd.f32 1.0, %v7126_v55 }
0x2ba3   :  { %7127 = vtanh.f32 %v5966_v37  ;;  %v5955_v54 = vmul.f32 %v5951_v27, %v5940_v32 }
0x2ba4   :  { %v5977_v30 = vmul.f32 %v5973_v62, %v5945_v48 }
0x2ba5   :  { %v5959_v25 = vmul.f32 %v5955_v54, %v5940_v32 }
0x2ba6   :  { %v5942_v24 = vpop.f32.mrf.mxu0  ;;  %6019 = vmatmul.f32.vlgmr.msrb.gmra.mxu2 %v5977_v30 }
0x2ba7   :  { %v5943_v36 = vadd.f32 %v6849_v10, %v5942_v24  ;;  %v5963_v28 = vadd.f32 %v5959_v25, %v5940_v32 }
0x2ba9   :  { %v7128_v38 = vpop.eup %7127  ;;  %v5952_v23 = vmul.f32 0.044715, %v5943_v36  ;;  %v5967_v21 = vmul.f32 0.7978846, %v5963_v28  ;;  %v5948_v3 = vmul.f32 0.5, %v5943_v36 }
0x2baa   :  { %v5974_v14 = vadd.f32 1.0, %v7128_v38 }
0x2bab   :  { %7129 = vtanh.f32 %v5967_v21  ;;  %v5956_v33 = vmul.f32 %v5952_v23, %v5943_v36 }
0x2bac   :  { %v5978_v16 = vmul.f32 %v5974_v14, %v5946_v53 }
0x2bad   :  { %v5960_v8 = vmul.f32 %v5956_v33, %v5943_v36 }
0x2bae   :  { %6022 = vmatmul.f32.gmra.mxu2 %v5978_v16 }
0x2baf   :  { %v5964_v22 = vadd.f32 %v5960_v8, %v5943_v36 }
0x2bb1   :  { %v7130_v34 = vpop.eup %7129  ;;  %v5968_v45 = vmul.f32 0.7978846, %v5964_v22 }
0x2bb2   :  { %v5975_v51 = vadd.f32 1.0, %v7130_v34 }
0x2bb3   :  { %7131 = vtanh.f32 %v5968_v45 }
0x2bb4   :  { %v5979_v43 = vmul.f32 %v5975_v51, %v5947_v35 }
0x2bb6   :  { %6025 = vmatmul.f32.gmra.mxu2 %v5979_v43 }
0x2bb9   :  { %v7132_v15 = vpop.eup %7131 }
0x2bba   :  { %v5976_v1 = vadd.f32 1.0, %v7132_v15 }
0x2bbc   :  { %v5980_v6 = vmul.f32 %v5976_v1, %v5948_v3 }
0x2bbe   :  { %6028 = vmatmul.f32.gmra.mxu2 %v5980_v6 }
0x2c29   :  { %v6020_v41 = vpop.f32.mrf.mxu2 }
0x2c2a   :  { %v6021_v59 = vadd.f32 %v6850_v5, %v6020_v41 }
0x2c2c   :  { %v11974_v20 = vadd.f32 %v6021_v59, %v11844_v56 }
0x2c2e   :  { %v6037_v44 = vrot.slane %v11974_v20, 1  ;;  %v6041_v11 = vrot.slane %v11974_v20, 2  ;;  %v6045_v60 = vrot.slane %v11974_v20, 3  ;;  %v6051_v7 = vrot.slane %v11974_v20, 5 }
0x2c2f   :  { %v6055_v2 = vrot.slane %v11974_v20, 6  ;;  %v6059_v29 = vrot.slane %v11974_v20, 7  ;;  %v6049_v38 = vrot.slane %v11974_v20, 4 }
0x2c30   :  { %6038 = vrot.lane.b32.xlu1 %v6037_v44, %s7593_s4  ;;  %6042 = vrot.lane.b32.xlu2 %v6041_v11, %s12123_s5 }
0x2c31   :  { %v6023_v26 = vpop.f32.mrf.mxu2 }
0x2c32   :  { %v6024_v58 = vadd.f32 %v6850_v5, %v6023_v26 }
0x2c34   :  { %v11981_v13 = vadd.f32 %v6024_v58, %v11850_v31 }
0x2c36   :  { %v6082_v56 = vrot.slane %v11981_v13, 6  ;;  %v6064_v46 = vrot.slane %v11981_v13, 1  ;;  %v6078_v31 = vrot.slane %v11981_v13, 5  ;;  %v6068_v47 = vrot.slane %v11981_v13, 2 }
0x2c37   :  { %v6072_v19 = vrot.slane %v11981_v13, 3  ;;  %v6076_v44 = vrot.slane %v11981_v13, 4 }
0x2c38   :  { %6046 = vrot.lane.b32.xlu1 %v6045_v60, %s7591_s1  ;;  %6052 = vrot.lane.b32.xlu2 %v6051_v7, %s7593_s4 }
0x2c39   :  { %6083 = vrot.lane.b32.xlu0 %v6082_v56, %s12123_s5  ;;  %v6026_v49 = vpop.f32.mrf.mxu2 }
0x2c3a   :  { %v6027_v10 = vadd.f32 %v6850_v5, %v6026_v49 }
0x2c3c   :  { %v12002_v50 = vadd.f32 %v6027_v10, %v11856_v9 }
0x2c3e   :  { %v6122_v63 = vrot.slane %v12002_v50, 6  ;;  %v6118_v42 = vrot.slane %v12002_v50, 5  ;;  %v6126_v12 = vrot.slane %v12002_v50, 7  ;;  %v6104_v39 = vrot.slane %v12002_v50, 1 }
0x2c3f   :  { %v6108_v4 = vrot.slane %v12002_v50, 2  ;;  %v6112_v27 = vrot.slane %v12002_v50, 3 }
0x2c40   :  { %6056 = vrot.lane.b32.xlu1 %v6055_v2, %s12123_s5  ;;  %6065 = vrot.lane.b32.xlu2 %v6064_v46, %s7593_s4 }
0x2c41   :  { %v6029_v52 = vpop.f32.mrf.mxu2 }
0x2c42   :  { %v6030_v57 = vadd.f32 %v6850_v5, %v6029_v52  ;;  %v6116_v5 = vrot.slane %v12002_v50, 4 }
0x2c44   :  { %v6035_v9 = vadd.f32 %v6030_v57, %v11862_v40  ;;  %v6086_v40 = vrot.slane %v11981_v13, 7 }
0x2c46   :  { %v6145_v0 = vrot.slane %v6035_v9, 5  ;;  %v6135_v17 = vrot.slane %v6035_v9, 2  ;;  %v6131_v61 = vrot.slane %v6035_v9, 1  ;;  %v6139_v32 = vrot.slane %v6035_v9, 3 }
0x2c47   :  { %v6149_v18 = vrot.slane %v6035_v9, 6  ;;  %v6153_v55 = vrot.slane %v6035_v9, 7  ;;  %v6143_v41 = vrot.slane %v6035_v9, 4 }
0x2c48   :  { %6079 = vrot.lane.b32.xlu1 %v6078_v31, %s7593_s4  ;;  %6069 = vrot.lane.b32.xlu2 %v6068_v47, %s12123_s5 }
0x2c50   :  { %6073 = vrot.lane.b32.xlu1 %v6072_v19, %s7591_s1  ;;  %6060 = vrot.lane.b32.xlu2 %v6059_v29, %s7591_s1 }
0x2c58   :  { %6123 = vrot.lane.b32.xlu1 %v6122_v63, %s12123_s5  ;;  %6119 = vrot.lane.b32.xlu2 %v6118_v42, %s7593_s4 }
0x2c60   :  { %6127 = vrot.lane.b32.xlu1 %v6126_v12, %s7591_s1  ;;  %6105 = vrot.lane.b32.xlu2 %v6104_v39, %s7593_s4 }
0x2c68   :  { %6109 = vrot.lane.b32.xlu1 %v6108_v4, %s12123_s5  ;;  %6146 = vrot.lane.b32.xlu2 %v6145_v0, %s7593_s4 }
0x2c70   :  { %6136 = vrot.lane.b32.xlu2 %v6135_v17, %s12123_s5  ;;  %6132 = vrot.lane.b32.xlu1 %v6131_v61, %s7593_s4 }
0x2c78   :  { %6140 = vrot.lane.b32.xlu2 %v6139_v32, %s7591_s1  ;;  %6150 = vrot.lane.b32.xlu1 %v6149_v18, %s12123_s5 }
0x2c80   :  { %6087 = vrot.lane.b32.xlu2 %v6086_v40, %s7591_s1  ;;  %6154 = vrot.lane.b32.xlu1 %v6153_v55, %s7591_s1 }
0x2c88   :  { %6113 = vrot.lane.b32.xlu1 %v6112_v27, %s7591_s1 }
0x2c8a   :  { %v6043_v37 = vpop.permute.xlu2 %6042 }
0x2c92   :  { %v6053_v48 = vpop.permute.xlu2 %6052 }
0x2c93   :  { %v6094_v23 = vsel %vm522_vm6, %v6049_v38, %v6053_v48 }
0x2c9a   :  { %v6066_v30 = vpop.permute.xlu2 %6065 }
0x2c9b   :  { %v6097_v63 = vsel %vm522_vm6, %v11981_v13, %v6066_v30 }
0x2ca2   :  { %v6039_v62 = vpop.permute.xlu1 %6038  ;;  %v6070_v28 = vpop.permute.xlu2 %6069 }
0x2ca3   :  { %v6090_v54 = vsel %vm522_vm6, %v11974_v20, %v6039_v62  ;;  %v6098_v52 = vsel %vm366_vm15, %v6097_v63, %v6070_v28 }
0x2ca4   :  { %v6091_v25 = vsel %vm366_vm15, %v6090_v54, %v6043_v37 }
0x2caa   :  { %v6047_v24 = vpop.permute.xlu1 %6046  ;;  %v6061_v14 = vpop.permute.xlu2 %6060 }
0x2cab   :  { %v6093_v36 = vsel %vm6092_vm12, %v6091_v25, %v6047_v24  ;;  %v6084_v49 = vpop.permute.xlu0 %6083 }
0x2cb2   :  { %v6057_v21 = vpop.permute.xlu1 %6056  ;;  %v6120_v16 = vpop.permute.xlu2 %6119 }
0x2cb3   :  { %v6095_v53 = vsel %vm366_vm15, %v6094_v23, %v6057_v21  ;;  %v6160_v20 = vsel %vm522_vm6, %v6116_v5, %v6120_v16 }
0x2cb4   :  { %v6096_v12 = vsel %vm6092_vm12, %v6095_v53, %v6061_v14 }
0x2cba   :  { %v6080_v33 = vpop.permute.xlu1 %6079  ;;  %v6106_v34 = vpop.permute.xlu2 %6105 }
0x2cbb   :  { %v6100_v7 = vsel %vm522_vm6, %v6076_v44, %v6080_v33  ;;  %v6157_v39 = vsel %vm522_vm6, %v12002_v50, %v6106_v34 }
0x2cbc   :  { %v6101_v19 = vsel %vm366_vm15, %v6100_v7, %v6084_v49 }
0x2cc2   :  { %v6074_v8 = vpop.permute.xlu1 %6073  ;;  %v6147_v35 = vpop.permute.xlu2 %6146 }
0x2cc3   :  { %v6166_v11 = vsel %vm522_vm6, %v6143_v41, %v6147_v35 }
0x2cca   :  { %v6124_v22 = vpop.permute.xlu1 %6123  ;;  %v6137_v43 = vpop.permute.xlu2 %6136 }
0x2ccb   :  { %v6161_v26 = vsel %vm366_vm15, %v6160_v20, %v6124_v22 }
0x2cd2   :  { %v6128_v45 = vpop.permute.xlu1 %6127  ;;  %v6141_v3 = vpop.permute.xlu2 %6140 }
0x2cd3   :  { %v6162_v56 = vsel %vm6092_vm12, %v6161_v26, %v6128_v45 }
0x2cd4   :  { %v6174_v10 = vrot.slane %v6162_v56, 7 }
0x2cd6   :  { %v6183_v4 = vsel %vm6181_vm8, %v6096_v12, %v6174_v10 }
0x2cd7   :  { %v6190_v40 = vrot.slane %v6183_v4, 6 }
0x2cda   :  { %v6110_v51 = vpop.permute.xlu1 %6109  ;;  %v6088_v31 = vpop.permute.xlu2 %6087 }
0x2cdb   :  { %v6102_v42 = vsel %vm6092_vm12, %v6101_v19, %v6088_v31  ;;  %v6158_v0 = vsel %vm366_vm15, %v6157_v39, %v6110_v51 }
0x2ce2   :  { %v6133_v15 = vpop.permute.xlu1 %6132 }
0x2ce3   :  { %v6163_v6 = vsel %vm522_vm6, %v6035_v9, %v6133_v15  ;;  %v6099_v9 = vsel %vm6092_vm12, %v6098_v52, %v6074_v8 }
0x2ce4   :  { %v6164_v59 = vsel %vm366_vm15, %v6163_v6, %v6137_v43 }
0x2ce5   :  { %v6165_v2 = vsel %vm6092_vm12, %v6164_v59, %v6141_v3 }
0x2ce6   :  { %v6175_v29 = vrot.slane %v6165_v2, 7 }
0x2ce8   :  { %v6184_v13 = vsel %vm6181_vm8, %v6099_v9, %v6175_v29 }
0x2ce9   :  { %v6191_v55 = vrot.slane %v6184_v13, 4 }
0x2cea   :  { %v6151_v1 = vpop.permute.xlu1 %6150 }
0x2ceb   :  { %v6167_v58 = vsel %vm366_vm15, %v6166_v11, %v6151_v1 }
0x2cf2   :  { %v6155_v60 = vpop.permute.xlu1 %6154 }
0x2cf3   :  { %v6168_v46 = vsel %vm6092_vm12, %v6167_v58, %v6155_v60 }
0x2cf4   :  { %v6176_v47 = vrot.slane %v6168_v46, 7 }
0x2cf6   :  { %v6185_v57 = vsel %vm6181_vm8, %v6102_v42, %v6176_v47 }
0x2cf7   :  { %v6192_v61 = vrot.slane %v6185_v57, 2 }
0x2cf9   :  { %v6196_v50 = vsel %vm6195_vm13, %v6191_v55, %v6192_v61 }
0x2cfa   :  { %v6114_v17 = vpop.permute.xlu1 %6113 }
0x2cfb   :  { %v6159_v32 = vsel %vm6092_vm12, %v6158_v0, %v6114_v17 }
0x2cfc   :  { %v6173_v18 = vrot.slane %v6159_v32, 7 }
0x2cfe   :  { %v6182_v27 = vsel %vm6181_vm8, %v6093_v36, %v6173_v18 }
0x2cff   :  { %v6194_v37 = vsel %vm6193_vm14, %v6182_v27, %v6190_v40 }
0x2d00   :  { %v6197_v48 = vsel %vm134_vm0, %v6194_v37, %v6196_v50 }
0x2d01   :  { %6199 = vst [vmem:[%s12089_s26] sm:$0xff] %v6197_v48 }

</bundles_post_ra>
